<compile_context>
chip_gen: v5e
topology: v5e:2x2
jax: 0.10.0
libtpu: 0.0.40
codegen_flags: <defaults>
</compile_context>

<pallas_src>
import functools

import numpy as np
import jax
import jax.numpy as jnp
from jax.experimental import pallas as pl
from jax.experimental.pallas import tpu as pltpu


def _round_up(a, b):
    return ((a + b - 1) // b) * b


# ---------------------------------------------------------------------------
# Tiny JAX glue: adaptive average pooling + per-scale 1x1 conv.  The bilinear
# upsample itself is fused into the Pallas kernel via precomputed interpolation
# matrices (U below).
# ---------------------------------------------------------------------------
def adaptive_avg_pool_nhwc(x, size):
    """AdaptiveAvgPool2d((size,size)) on NHWC, matching PyTorch bin boundaries."""
    n, h, w, c = x.shape
    hs = [int(np.floor(i * h / size)) for i in range(size)]
    he = [int(np.ceil((i + 1) * h / size)) for i in range(size)]
    ws = [int(np.floor(j * w / size)) for j in range(size)]
    we = [int(np.ceil((j + 1) * w / size)) for j in range(size)]
    rows = []
    for i in range(size):
        cols = []
        for j in range(size):
            cols.append(jnp.mean(x[:, hs[i]:he[i], ws[j]:we[j], :], axis=(1, 2)))
        rows.append(jnp.stack(cols, axis=1))          # (N, size, C)
    return jnp.stack(rows, axis=1)                    # (N, size, size, C)


def _bilinear_weights_1d(out_size, in_size):
    """(out_size, in_size) interpolation matrix, align_corners=False (PyTorch)."""
    scale = in_size / out_size
    src = (np.arange(out_size, dtype=np.float64) + 0.5) * scale - 0.5
    src = np.maximum(src, 0.0)
    i0 = np.minimum(np.floor(src).astype(np.int64), in_size - 1)
    i1 = np.minimum(i0 + 1, in_size - 1)
    lam = src - i0
    m = np.zeros((out_size, in_size), np.float64)
    m[np.arange(out_size), i0] += 1.0 - lam
    m[np.arange(out_size), i1] += lam                 # i0==i1 -> weights sum to 1
    return m


def _build_interp_matrices(h, w, sizes, kp, hw_pad):
    """U[i] is (hw_pad, kp): row p holds the bilinear weights mapping the s_i*s_i
    pooled grid to output pixel p = y*W + x.  Zero-padded rows/cols are inert."""
    n_scales = len(sizes)
    u = np.zeros((n_scales, hw_pad, kp), np.float32)
    for i, s in enumerate(sizes):
        mh = _bilinear_weights_1d(h, s)               # (H, s)
        mw = _bilinear_weights_1d(w, s)               # (W, s)
        ui = np.einsum("ya,xb->yxab", mh, mw).reshape(h * w, s * s)
        u[i, :h * w, :s * s] = ui.astype(np.float32)
    return u


def bilinear_upsample_nhwc(x, out_h, out_w):
    """Reference-only: F.interpolate(mode='bilinear', align_corners=False)."""
    n, in_h, in_w, c = x.shape

    def src_index(out_size, in_size):
        scale = in_size / out_size
        src = (jnp.arange(out_size, dtype=jnp.float32) + 0.5) * scale - 0.5
        src = jnp.maximum(src, 0.0)
        i0 = jnp.minimum(jnp.floor(src).astype(jnp.int32), in_size - 1)
        i1 = jnp.minimum(i0 + 1, in_size - 1)
        lam = src - i0.astype(jnp.float32)
        return i0, i1, lam

    h0, h1, lh = src_index(out_h, in_h)
    w0, w1, lw = src_index(out_w, in_w)
    xh = (x[:, h0, :, :] * (1.0 - lh)[None, :, None, None]
          + x[:, h1, :, :] * lh[None, :, None, None])
    return (xh[:, :, w0, :] * (1.0 - lw)[None, None, :, None]
            + xh[:, :, w1, :] * lw[None, None, :, None])


# ---------------------------------------------------------------------------
# Pallas kernel: in-VMEM bilinear reconstruction + sigmoid gating + weighted
# fusion + bottleneck 1x1 conv + ReLU, with per-scale streaming.
# ---------------------------------------------------------------------------
def _contextual_kernel(feats_ref, u_ref, p_ref, pww_ref, ww_ref, bw_ref,
                       wbf_ref, wbx_ref, bb_ref, out_ref):
    feats_bf = feats_ref[0]                              # (TM, C) bf16 (MXU operand)
    n_scales = u_ref.shape[0]
    tm, c = feats_bf.shape

    # feats @ Ww^T + bw — computed ONCE per tile (bf16 x bf16 -> f32 acc).
    fw = (jnp.dot(feats_bf, ww_ref[...], preferred_element_type=jnp.float32)
          + bw_ref[...])                                 # (TM, C) f32

    # Per-scale streaming accumulation (static unroll; ms_i / g discarded each
    # iteration -> small live set, no (S*TM, C) concat, no 4x gate matmul).
    num = jnp.zeros((tm, c), jnp.float32)
    den = jnp.zeros((tm, c), jnp.float32)
    for i in range(n_scales):
        u_i = u_ref[i]                                   # (TM, KP) bf16
        # ms_i   = U_i @ P_i          (bilinear upsample reconstructed in VMEM)
        # mswi   = U_i @ (P_i @ Ww^T) (weight_net applied to ms_i, via algebra)
        ms_i = jnp.dot(u_i, p_ref[0, i], preferred_element_type=jnp.float32)
        msw_i = jnp.dot(u_i, pww_ref[0, i], preferred_element_type=jnp.float32)
        g = jax.nn.sigmoid(fw - msw_i)                   # f32 elementwise (VPU/EUP)
        num = num + ms_i * g
        den = den + g

    # EUP reciprocal (separate VLIW slot — essentially free).
    fused = num * pl.reciprocal(den, approx=True)        # (TM, C) f32

    # Split bottleneck (no lane-axis concat):
    #   out = fused @ Wb[:C] + feats @ Wb[C:] + bb
    out = (jnp.dot(fused.astype(jnp.bfloat16), wbf_ref[...],
                   preferred_element_type=jnp.float32)
           + jnp.dot(feats_bf, wbx_ref[...], preferred_element_type=jnp.float32)
           + bb_ref[...])
    out_ref[0] = jnp.maximum(out, 0.0).astype(out_ref.dtype)


def contextual_fuse_pallas(feats_q, u, p, pww, ww, bw, wbf, wbx, bb, *,
                           tile_m, out_dtype):
    """feats_q: (N, HW_pad, C) bf16; u: (S, HW_pad, KP) bf16;
    p / pww: (N, S, KP, C) bf16; ww: (C, C) bf16; wbf/wbx: (C, OUT) bf16;
    bw/bb f32.  Returns (N, HW_pad, OUT) out_dtype."""
    n, hw_pad, c = feats_q.shape
    n_scales, _, kp = u.shape
    out_c = wbf.shape[1]
    num_tiles = hw_pad // tile_m
    grid = (n, num_tiles)

    # NOTE: the constant-index weight blocks (ww/bw/wbf/wbx/bb) could be marked
    # pipeline_mode=pl.Buffered(1) to avoid double-buffering; they are already
    # bf16 so the saving is small — kept default for lowering safety.
    return pl.pallas_call(
        _contextual_kernel,
        out_shape=jax.ShapeDtypeStruct((n, hw_pad, out_c), out_dtype),
        grid_spec=pltpu.PrefetchScalarGridSpec(
            num_scalar_prefetch=0,
            grid=grid,
            in_specs=[
                pl.BlockSpec((1, tile_m, c), lambda b, t: (b, t, 0)),            # feats (bf16)
                pl.BlockSpec((n_scales, tile_m, kp), lambda b, t: (0, t, 0)),    # U (bf16)
                pl.BlockSpec((1, n_scales, kp, c), lambda b, t: (b, 0, 0, 0)),   # P (bf16)
                pl.BlockSpec((1, n_scales, kp, c), lambda b, t: (b, 0, 0, 0)),   # P@Ww^T (bf16)
                pl.BlockSpec((c, c), lambda b, t: (0, 0)),                       # Ww^T (bf16)
                pl.BlockSpec((1, c), lambda b, t: (0, 0)),                       # bw (f32)
                pl.BlockSpec((c, out_c), lambda b, t: (0, 0)),                   # Wb fused half
                pl.BlockSpec((c, out_c), lambda b, t: (0, 0)),                   # Wb feats half
                pl.BlockSpec((1, out_c), lambda b, t: (0, 0)),                   # bb (f32)
            ],
            out_specs=pl.BlockSpec((1, tile_m, out_c), lambda b, t: (b, t, 0)),
        ),
        compiler_params=pltpu.CompilerParams(
            dimension_semantics=("parallel", "parallel"),
            # Headroom above the 32 MiB default scoped limit, safely below
            # v7x's 64 MiB physical VMEM.  Sweep upward on v5e/v6e.
            vmem_limit_bytes=48 * 1024 * 1024),
    )(feats_q, u, p, pww, ww, bw, wbf, wbx, bb)


# ---------------------------------------------------------------------------
# Full module forward (NHWC primary; NCHW wrapper for PyTorch API parity)
# ---------------------------------------------------------------------------
def contextual_module_forward_nhwc(x, params, sizes=(1, 2, 3, 6), tile_m=512,
                                   out_dtype=jnp.bfloat16):
    """x: (N, H, W, C) float32. Returns (N, H, W, OUT) out_dtype."""
    n, h, w, c = x.shape
    n_scales = len(sizes)
    out_c = params["bottleneck_w"].shape[0]

    # Tiny pooled maps + per-scale 1x1 conv (no bias): stays in plain JAX.
    # KP rounded to a multiple of 16 for clean bf16 sublane packing.
    kp = _round_up(max(s * s for s in sizes), 16)
    p = jnp.zeros((n, n_scales, kp, c), jnp.float32)
    for i, s in enumerate(sizes):
        pooled = adaptive_avg_pool_nhwc(x, s)                       # (N, s, s, C)
        conv = jnp.einsum("nabc,dc->nabd", pooled, params["scale_w"][i])
        p = p.at[:, i, :s * s, :].set(conv.reshape(n, s * s, c))

    ww_t = params["weight_net_w"].T.astype(jnp.float32)             # (C, C)
    # Algebraic refactor of the gate logits: precompute P @ Ww^T once (tiny).
    pww = jnp.einsum("nskc,cd->nskd", p, ww_t)                       # (N, S, KP, C)

    # Row tiling over the spatial dimension (channels stay on the lane axis).
    hw = h * w
    tile_m = max(16, (min(int(tile_m), _round_up(hw, 16)) // 16) * 16)
    hw_pad = _round_up(hw, tile_m)

    u = jnp.asarray(_build_interp_matrices(h, w, sizes, kp, hw_pad)
                    ).astype(jnp.bfloat16)

    feats_flat = x.reshape(n, hw, c)
    if hw_pad != hw:
        feats_flat = jnp.pad(feats_flat, ((0, 0), (0, hw_pad - hw), (0, 0)))
    feats_q = feats_flat.astype(jnp.bfloat16)        # halve HBM bytes, native MXU rate

    bw = params["weight_net_b"].reshape(1, c).astype(jnp.float32)
    wb_t = params["bottleneck_w"].T.astype(jnp.float32)              # (2C, OUT)
    wbf = wb_t[:c].astype(jnp.bfloat16)                              # fused half
    wbx = wb_t[c:].astype(jnp.bfloat16)                              # feats half
    bb = params["bottleneck_b"].reshape(1, out_c).astype(jnp.float32)

    out_flat = contextual_fuse_pallas(
        feats_q, u, p.astype(jnp.bfloat16), pww.astype(jnp.bfloat16),
        ww_t.astype(jnp.bfloat16), bw, wbf, wbx, bb,
        tile_m=tile_m, out_dtype=out_dtype)
    return out_flat[:, :hw, :].reshape(n, h, w, out_c)


def contextual_module_forward(feats_nchw, params, sizes=(1, 2, 3, 6),
                              tile_m=512, out_dtype=jnp.bfloat16):
    """NCHW wrapper for parity with the PyTorch module (adds two transposes)."""
    x = jnp.transpose(feats_nchw, (0, 2, 3, 1))
    out = contextual_module_forward_nhwc(x, params, sizes, tile_m, out_dtype)
    return jnp.transpose(out, (0, 3, 1, 2))


# ---------------------------------------------------------------------------
# Pure-JAX reference (mirrors the kernel's intentional bf16 quantization of the
# dominant operands: feats, weight_net / bottleneck weights).
# ---------------------------------------------------------------------------
def _reference_forward_nhwc(x, params, sizes=(1, 2, 3, 6)):
    n, h, w, c = x.shape
    multi_scales = []
    for k, s in enumerate(sizes):
        pooled = adaptive_avg_pool_nhwc(x, s)
        conv = jnp.einsum("nabc,dc->nabd", pooled, params["scale_w"][k])
        multi_scales.append(bilinear_upsample_nhwc(conv, h, w))
    xq = x.astype(jnp.bfloat16).astype(jnp.float32)
    ww = params["weight_net_w"].astype(jnp.bfloat16).astype(jnp.float32)
    wb = params["bottleneck_w"].astype(jnp.bfloat16).astype(jnp.float32)
    bw, bb = params["weight_net_b"], params["bottleneck_b"]
    gates = [jax.nn.sigmoid(jnp.einsum("nhwc,dc->nhwd", xq - m, ww) + bw)
             for m in multi_scales]
    num = sum(m * g for m, g in zip(multi_scales, gates))
    den = sum(gates)
    fused = num / den
    cat = jnp.concatenate([fused, xq], axis=-1)
    out = jnp.einsum("nhwc,dc->nhwd", cat, wb) + bb
    return jnp.maximum(out, 0.0)


def init_params(key, features, out_features, sizes):
    keys = jax.random.split(key, len(sizes) + 4)
    return {
        "scale_w": [0.1 * jax.random.normal(keys[i], (features, features),
                                            dtype=jnp.float32)
                    for i in range(len(sizes))],
        "weight_net_w": 0.1 * jax.random.normal(keys[-4], (features, features),
                                                dtype=jnp.float32),
        "weight_net_b": 0.1 * jax.random.normal(keys[-3], (features,),
                                                dtype=jnp.float32),
        "bottleneck_w": 0.1 * jax.random.normal(
            keys[-2], (out_features, 2 * features), dtype=jnp.float32),
        "bottleneck_b": 0.1 * jax.random.normal(keys[-1], (out_features,),
                                                dtype=jnp.float32),
    }


if __name__ == "__main__":
    # Small but lane-dense demo shapes (C and OUT multiples of 128 so vregs and
    # output stores are fully utilized; the real module uses features=512).
    N, C, H, W = 2, 128, 16, 16
    OUT = 128
    SIZES = (1, 2, 3, 6)

    key = jax.random.PRNGKey(0)
    k_x, k_p = jax.random.split(key)
    x_nhwc = jax.random.normal(k_x, (N, H, W, C), dtype=jnp.float32)
    params = init_params(k_p, C, OUT, SIZES)

    fwd = jax.jit(functools.partial(contextual_module_forward_nhwc,
                                    sizes=SIZES, tile_m=512))
    out = jax.block_until_ready(fwd(x_nhwc, params))
    assert out.shape == (N, H, W, OUT)

    # Silent sanity check (tolerance accounts for bf16 operands/output + the
    # EUP approx reciprocal).
    ref = jax.block_until_ready(_reference_forward_nhwc(x_nhwc, params, SIZES))
    np.testing.assert_allclose(np.asarray(out.astype(jnp.float32)),
                               np.asarray(ref), rtol=3e-2, atol=3e-2)

    print("KERNEL_OK")
</pallas_src>

<mosaic_0001>
module attributes {stable_mosaic.version = 11 : i64} {
  func.func @_contextual_kernel(%arg0: i32, %arg1: i32, %arg2: memref<1x256x128xbf16, #tpu.memory_space<vmem>>, %arg3: memref<4x256x48xbf16, #tpu.memory_space<vmem>>, %arg4: memref<1x4x48x128xbf16, #tpu.memory_space<vmem>>, %arg5: memref<1x4x48x128xbf16, #tpu.memory_space<vmem>>, %arg6: memref<128x128xbf16, #tpu.memory_space<vmem>>, %arg7: memref<1x128xf32, #tpu.memory_space<vmem>>, %arg8: memref<128x128xbf16, #tpu.memory_space<vmem>>, %arg9: memref<128x128xbf16, #tpu.memory_space<vmem>>, %arg10: memref<1x128xf32, #tpu.memory_space<vmem>>, %arg11: memref<1x256x128xbf16, #tpu.memory_space<vmem>>) attributes {dimension_semantics = [#tpu.dimension_semantics<parallel>, #tpu.dimension_semantics<parallel>], iteration_bounds = array<i64: 2, 1>, scalar_prefetch = 0 : i64, scratch_operands = 0 : i64, tpu.core_type = #tpu.core_type<tc>, window_params = [{transform_indices = @transform_0, window_bounds = array<i64: 1, 256, 128>}, {transform_indices = @transform_1, window_bounds = array<i64: 4, 256, 48>}, {transform_indices = @transform_2, window_bounds = array<i64: 1, 4, 48, 128>}, {transform_indices = @transform_3, window_bounds = array<i64: 1, 4, 48, 128>}, {pipeline_mode = #tpu.pipeline_mode<synchronous>, transform_indices = @transform_4, window_bounds = array<i64: 128, 128>}, {pipeline_mode = #tpu.pipeline_mode<synchronous>, transform_indices = @transform_5, window_bounds = array<i64: 1, 128>}, {pipeline_mode = #tpu.pipeline_mode<synchronous>, transform_indices = @transform_6, window_bounds = array<i64: 128, 128>}, {pipeline_mode = #tpu.pipeline_mode<synchronous>, transform_indices = @transform_7, window_bounds = array<i64: 128, 128>}, {pipeline_mode = #tpu.pipeline_mode<synchronous>, transform_indices = @transform_8, window_bounds = array<i64: 1, 128>}, {transform_indices = @transform_9, window_bounds = array<i64: 1, 256, 128>}]} {
    %c0 = arith.constant 0 : index
    %c0_0 = arith.constant 0 : index
    %c0_1 = arith.constant 0 : index
    %0 = vector.load %arg2[%c0, %c0_0, %c0_1] : memref<1x256x128xbf16, #tpu.memory_space<vmem>>, vector<1x256x128xbf16>
    %1 = vector.shape_cast %0 : vector<1x256x128xbf16> to vector<256x128xbf16>
    %c0_2 = arith.constant 0 : index
    %c0_3 = arith.constant 0 : index
    %2 = vector.load %arg6[%c0_2, %c0_3] : memref<128x128xbf16, #tpu.memory_space<vmem>>, vector<128x128xbf16>
    %cst = arith.constant dense<0.000000e+00> : vector<256x128xf32>
    %3 = tpu.matmul %1, %2, %cst {dimension_numbers = #tpu.dot_dimension_numbers<[1], [0], [0], [1], [0, 0, 1, 1], [], []>} : vector<256x128xbf16>, vector<128x128xbf16>, vector<256x128xf32> -> vector<256x128xf32>
    %c0_4 = arith.constant 0 : index
    %c0_5 = arith.constant 0 : index
    %4 = vector.load %arg7[%c0_4, %c0_5] : memref<1x128xf32, #tpu.memory_space<vmem>>, vector<1x128xf32>
    %5 = vector.broadcast %4 : vector<1x128xf32> to vector<256x128xf32>
    %6 = arith.addf %3, %5 : vector<256x128xf32>
    %cst_6 = arith.constant 0.000000e+00 : f32
    %7 = vector.broadcast %cst_6 : f32 to vector<256x128xf32>
    %cst_7 = arith.constant 0.000000e+00 : f32
    %8 = vector.broadcast %cst_7 : f32 to vector<256x128xf32>
    %c0_8 = arith.constant 0 : index
    %c0_9 = arith.constant 0 : index
    %c0_10 = arith.constant 0 : index
    %9 = vector.load %arg3[%c0_8, %c0_9, %c0_10] : memref<4x256x48xbf16, #tpu.memory_space<vmem>>, vector<1x256x48xbf16>
    %10 = vector.shape_cast %9 : vector<1x256x48xbf16> to vector<256x48xbf16>
    %c0_11 = arith.constant 0 : index
    %c0_12 = arith.constant 0 : index
    %c0_13 = arith.constant 0 : index
    %c0_14 = arith.constant 0 : index
    %11 = vector.load %arg4[%c0_11, %c0_12, %c0_13, %c0_14] : memref<1x4x48x128xbf16, #tpu.memory_space<vmem>>, vector<1x1x48x128xbf16>
    %12 = vector.shape_cast %11 : vector<1x1x48x128xbf16> to vector<48x128xbf16>
    %cst_15 = arith.constant dense<0.000000e+00> : vector<256x128xf32>
    %13 = tpu.matmul %10, %12, %cst_15 {dimension_numbers = #tpu.dot_dimension_numbers<[1], [0], [0], [1], [0, 0, 1, 1], [], []>} : vector<256x48xbf16>, vector<48x128xbf16>, vector<256x128xf32> -> vector<256x128xf32>
    %c0_16 = arith.constant 0 : index
    %c0_17 = arith.constant 0 : index
    %c0_18 = arith.constant 0 : index
    %c0_19 = arith.constant 0 : index
    %14 = vector.load %arg5[%c0_16, %c0_17, %c0_18, %c0_19] : memref<1x4x48x128xbf16, #tpu.memory_space<vmem>>, vector<1x1x48x128xbf16>
    %15 = vector.shape_cast %14 : vector<1x1x48x128xbf16> to vector<48x128xbf16>
    %cst_20 = arith.constant dense<0.000000e+00> : vector<256x128xf32>
    %16 = tpu.matmul %10, %15, %cst_20 {dimension_numbers = #tpu.dot_dimension_numbers<[1], [0], [0], [1], [0, 0, 1, 1], [], []>} : vector<256x48xbf16>, vector<48x128xbf16>, vector<256x128xf32> -> vector<256x128xf32>
    %17 = arith.subf %6, %16 : vector<256x128xf32>
    %18 = arith.negf %17 : vector<256x128xf32>
    %19 = math.exp %18 : vector<256x128xf32>
    %cst_21 = arith.constant 1.000000e+00 : f32
    %20 = vector.broadcast %cst_21 : f32 to vector<256x128xf32>
    %21 = arith.addf %20, %19 : vector<256x128xf32>
    %22 = arith.divf %20, %21 : vector<256x128xf32>
    %23 = arith.mulf %13, %22 : vector<256x128xf32>
    %24 = arith.addf %7, %23 : vector<256x128xf32>
    %25 = arith.addf %8, %22 : vector<256x128xf32>
    %c1 = arith.constant 1 : index
    %c0_22 = arith.constant 0 : index
    %c0_23 = arith.constant 0 : index
    %26 = vector.load %arg3[%c1, %c0_22, %c0_23] : memref<4x256x48xbf16, #tpu.memory_space<vmem>>, vector<1x256x48xbf16>
    %27 = vector.shape_cast %26 : vector<1x256x48xbf16> to vector<256x48xbf16>
    %c0_24 = arith.constant 0 : index
    %c1_25 = arith.constant 1 : index
    %c0_26 = arith.constant 0 : index
    %c0_27 = arith.constant 0 : index
    %28 = vector.load %arg4[%c0_24, %c1_25, %c0_26, %c0_27] : memref<1x4x48x128xbf16, #tpu.memory_space<vmem>>, vector<1x1x48x128xbf16>
    %29 = vector.shape_cast %28 : vector<1x1x48x128xbf16> to vector<48x128xbf16>
    %cst_28 = arith.constant dense<0.000000e+00> : vector<256x128xf32>
    %30 = tpu.matmul %27, %29, %cst_28 {dimension_numbers = #tpu.dot_dimension_numbers<[1], [0], [0], [1], [0, 0, 1, 1], [], []>} : vector<256x48xbf16>, vector<48x128xbf16>, vector<256x128xf32> -> vector<256x128xf32>
    %c0_29 = arith.constant 0 : index
    %c1_30 = arith.constant 1 : index
    %c0_31 = arith.constant 0 : index
    %c0_32 = arith.constant 0 : index
    %31 = vector.load %arg5[%c0_29, %c1_30, %c0_31, %c0_32] : memref<1x4x48x128xbf16, #tpu.memory_space<vmem>>, vector<1x1x48x128xbf16>
    %32 = vector.shape_cast %31 : vector<1x1x48x128xbf16> to vector<48x128xbf16>
    %cst_33 = arith.constant dense<0.000000e+00> : vector<256x128xf32>
    %33 = tpu.matmul %27, %32, %cst_33 {dimension_numbers = #tpu.dot_dimension_numbers<[1], [0], [0], [1], [0, 0, 1, 1], [], []>} : vector<256x48xbf16>, vector<48x128xbf16>, vector<256x128xf32> -> vector<256x128xf32>
    %34 = arith.subf %6, %33 : vector<256x128xf32>
    %35 = arith.negf %34 : vector<256x128xf32>
    %36 = math.exp %35 : vector<256x128xf32>
    %cst_34 = arith.constant 1.000000e+00 : f32
    %37 = vector.broadcast %cst_34 : f32 to vector<256x128xf32>
    %38 = arith.addf %37, %36 : vector<256x128xf32>
    %39 = arith.divf %37, %38 : vector<256x128xf32>
    %40 = arith.mulf %30, %39 : vector<256x128xf32>
    %41 = arith.addf %24, %40 : vector<256x128xf32>
    %42 = arith.addf %25, %39 : vector<256x128xf32>
    %c2 = arith.constant 2 : index
    %c0_35 = arith.constant 0 : index
    %c0_36 = arith.constant 0 : index
    %43 = vector.load %arg3[%c2, %c0_35, %c0_36] : memref<4x256x48xbf16, #tpu.memory_space<vmem>>, vector<1x256x48xbf16>
    %44 = vector.shape_cast %43 : vector<1x256x48xbf16> to vector<256x48xbf16>
    %c0_37 = arith.constant 0 : index
    %c2_38 = arith.constant 2 : index
    %c0_39 = arith.constant 0 : index
    %c0_40 = arith.constant 0 : index
    %45 = vector.load %arg4[%c0_37, %c2_38, %c0_39, %c0_40] : memref<1x4x48x128xbf16, #tpu.memory_space<vmem>>, vector<1x1x48x128xbf16>
    %46 = vector.shape_cast %45 : vector<1x1x48x128xbf16> to vector<48x128xbf16>
    %cst_41 = arith.constant dense<0.000000e+00> : vector<256x128xf32>
    %47 = tpu.matmul %44, %46, %cst_41 {dimension_numbers = #tpu.dot_dimension_numbers<[1], [0], [0], [1], [0, 0, 1, 1], [], []>} : vector<256x48xbf16>, vector<48x128xbf16>, vector<256x128xf32> -> vector<256x128xf32>
    %c0_42 = arith.constant 0 : index
    %c2_43 = arith.constant 2 : index
    %c0_44 = arith.constant 0 : index
    %c0_45 = arith.constant 0 : index
    %48 = vector.load %arg5[%c0_42, %c2_43, %c0_44, %c0_45] : memref<1x4x48x128xbf16, #tpu.memory_space<vmem>>, vector<1x1x48x128xbf16>
    %49 = vector.shape_cast %48 : vector<1x1x48x128xbf16> to vector<48x128xbf16>
    %cst_46 = arith.constant dense<0.000000e+00> : vector<256x128xf32>
    %50 = tpu.matmul %44, %49, %cst_46 {dimension_numbers = #tpu.dot_dimension_numbers<[1], [0], [0], [1], [0, 0, 1, 1], [], []>} : vector<256x48xbf16>, vector<48x128xbf16>, vector<256x128xf32> -> vector<256x128xf32>
    %51 = arith.subf %6, %50 : vector<256x128xf32>
    %52 = arith.negf %51 : vector<256x128xf32>
    %53 = math.exp %52 : vector<256x128xf32>
    %cst_47 = arith.constant 1.000000e+00 : f32
    %54 = vector.broadcast %cst_47 : f32 to vector<256x128xf32>
    %55 = arith.addf %54, %53 : vector<256x128xf32>
    %56 = arith.divf %54, %55 : vector<256x128xf32>
    %57 = arith.mulf %47, %56 : vector<256x128xf32>
    %58 = arith.addf %41, %57 : vector<256x128xf32>
    %59 = arith.addf %42, %56 : vector<256x128xf32>
    %c3 = arith.constant 3 : index
    %c0_48 = arith.constant 0 : index
    %c0_49 = arith.constant 0 : index
    %60 = vector.load %arg3[%c3, %c0_48, %c0_49] : memref<4x256x48xbf16, #tpu.memory_space<vmem>>, vector<1x256x48xbf16>
    %61 = vector.shape_cast %60 : vector<1x256x48xbf16> to vector<256x48xbf16>
    %c0_50 = arith.constant 0 : index
    %c3_51 = arith.constant 3 : index
    %c0_52 = arith.constant 0 : index
    %c0_53 = arith.constant 0 : index
    %62 = vector.load %arg4[%c0_50, %c3_51, %c0_52, %c0_53] : memref<1x4x48x128xbf16, #tpu.memory_space<vmem>>, vector<1x1x48x128xbf16>
    %63 = vector.shape_cast %62 : vector<1x1x48x128xbf16> to vector<48x128xbf16>
    %cst_54 = arith.constant dense<0.000000e+00> : vector<256x128xf32>
    %64 = tpu.matmul %61, %63, %cst_54 {dimension_numbers = #tpu.dot_dimension_numbers<[1], [0], [0], [1], [0, 0, 1, 1], [], []>} : vector<256x48xbf16>, vector<48x128xbf16>, vector<256x128xf32> -> vector<256x128xf32>
    %c0_55 = arith.constant 0 : index
    %c3_56 = arith.constant 3 : index
    %c0_57 = arith.constant 0 : index
    %c0_58 = arith.constant 0 : index
    %65 = vector.load %arg5[%c0_55, %c3_56, %c0_57, %c0_58] : memref<1x4x48x128xbf16, #tpu.memory_space<vmem>>, vector<1x1x48x128xbf16>
    %66 = vector.shape_cast %65 : vector<1x1x48x128xbf16> to vector<48x128xbf16>
    %cst_59 = arith.constant dense<0.000000e+00> : vector<256x128xf32>
    %67 = tpu.matmul %61, %66, %cst_59 {dimension_numbers = #tpu.dot_dimension_numbers<[1], [0], [0], [1], [0, 0, 1, 1], [], []>} : vector<256x48xbf16>, vector<48x128xbf16>, vector<256x128xf32> -> vector<256x128xf32>
    %68 = arith.subf %6, %67 : vector<256x128xf32>
    %69 = arith.negf %68 : vector<256x128xf32>
    %70 = math.exp %69 : vector<256x128xf32>
    %cst_60 = arith.constant 1.000000e+00 : f32
    %71 = vector.broadcast %cst_60 : f32 to vector<256x128xf32>
    %72 = arith.addf %71, %70 : vector<256x128xf32>
    %73 = arith.divf %71, %72 : vector<256x128xf32>
    %74 = arith.mulf %64, %73 : vector<256x128xf32>
    %75 = arith.addf %58, %74 : vector<256x128xf32>
    %76 = arith.addf %59, %73 : vector<256x128xf32>
    %77 = tpu.reciprocal %76 {approx = true} : vector<256x128xf32> -> vector<256x128xf32>
    %78 = arith.mulf %75, %77 : vector<256x128xf32>
    %79 = arith.truncf %78 : vector<256x128xf32> to vector<256x128xbf16>
    %c0_61 = arith.constant 0 : index
    %c0_62 = arith.constant 0 : index
    %80 = vector.load %arg8[%c0_61, %c0_62] : memref<128x128xbf16, #tpu.memory_space<vmem>>, vector<128x128xbf16>
    %cst_63 = arith.constant dense<0.000000e+00> : vector<256x128xf32>
    %81 = tpu.matmul %79, %80, %cst_63 {dimension_numbers = #tpu.dot_dimension_numbers<[1], [0], [0], [1], [0, 0, 1, 1], [], []>} : vector<256x128xbf16>, vector<128x128xbf16>, vector<256x128xf32> -> vector<256x128xf32>
    %c0_64 = arith.constant 0 : index
    %c0_65 = arith.constant 0 : index
    %82 = vector.load %arg9[%c0_64, %c0_65] : memref<128x128xbf16, #tpu.memory_space<vmem>>, vector<128x128xbf16>
    %cst_66 = arith.constant dense<0.000000e+00> : vector<256x128xf32>
    %83 = tpu.matmul %1, %82, %cst_66 {dimension_numbers = #tpu.dot_dimension_numbers<[1], [0], [0], [1], [0, 0, 1, 1], [], []>} : vector<256x128xbf16>, vector<128x128xbf16>, vector<256x128xf32> -> vector<256x128xf32>
    %84 = arith.addf %81, %83 : vector<256x128xf32>
    %c0_67 = arith.constant 0 : index
    %c0_68 = arith.constant 0 : index
    %85 = vector.load %arg10[%c0_67, %c0_68] : memref<1x128xf32, #tpu.memory_space<vmem>>, vector<1x128xf32>
    %86 = vector.broadcast %85 : vector<1x128xf32> to vector<256x128xf32>
    %87 = arith.addf %84, %86 : vector<256x128xf32>
    %cst_69 = arith.constant 0.000000e+00 : f32
    %88 = vector.broadcast %cst_69 : f32 to vector<256x128xf32>
    %89 = arith.maximumf %87, %88 : vector<256x128xf32>
    %90 = arith.truncf %89 : vector<256x128xf32> to vector<256x128xbf16>
    %c0_70 = arith.constant 0 : index
    %c0_71 = arith.constant 0 : index
    %c0_72 = arith.constant 0 : index
    %91 = vector.load %arg11[%c0_70, %c0_71, %c0_72] : memref<1x256x128xbf16, #tpu.memory_space<vmem>>, vector<1x256x128xbf16>
    %92 = vector.shape_cast %91 : vector<1x256x128xbf16> to vector<256x128xbf16>
    %93 = vector.shape_cast %90 : vector<256x128xbf16> to vector<1x256x128xbf16>
    tpu.vector_store %arg11[%c0_70, %c0_71, %c0_72], %93 {strides = array<i32>} : memref<1x256x128xbf16, #tpu.memory_space<vmem>>, vector<1x256x128xbf16>,
    return
  }
  func.func @transform_0(%arg0: i32, %arg1: i32) -> (i32, i32, i32) {
    %c0_i32 = arith.constant 0 : i32
    %c0_i32_0 = arith.constant 0 : i32
    return %arg0, %arg1, %c0_i32 : i32, i32, i32
  }
  func.func @transform_1(%arg0: i32, %arg1: i32) -> (i32, i32, i32) {
    %c0_i32 = arith.constant 0 : i32
    %c0_i32_0 = arith.constant 0 : i32
    %c0_i32_1 = arith.constant 0 : i32
    return %c0_i32, %arg1, %c0_i32_0 : i32, i32, i32
  }
  func.func @transform_2(%arg0: i32, %arg1: i32) -> (i32, i32, i32, i32) {
    %c0_i32 = arith.constant 0 : i32
    %c0_i32_0 = arith.constant 0 : i32
    %c0_i32_1 = arith.constant 0 : i32
    %c0_i32_2 = arith.constant 0 : i32
    return %arg0, %c0_i32, %c0_i32_0, %c0_i32_1 : i32, i32, i32, i32
  }
  func.func @transform_3(%arg0: i32, %arg1: i32) -> (i32, i32, i32, i32) {
    %c0_i32 = arith.constant 0 : i32
    %c0_i32_0 = arith.constant 0 : i32
    %c0_i32_1 = arith.constant 0 : i32
    %c0_i32_2 = arith.constant 0 : i32
    return %arg0, %c0_i32, %c0_i32_0, %c0_i32_1 : i32, i32, i32, i32
  }
  func.func @transform_4(%arg0: i32, %arg1: i32) -> (i32, i32) {
    %c0_i32 = arith.constant 0 : i32
    %c0_i32_0 = arith.constant 0 : i32
    %c0_i32_1 = arith.constant 0 : i32
    return %c0_i32, %c0_i32_0 : i32, i32
  }
  func.func @transform_5(%arg0: i32, %arg1: i32) -> (i32, i32) {
    %c0_i32 = arith.constant 0 : i32
    %c0_i32_0 = arith.constant 0 : i32
    %c0_i32_1 = arith.constant 0 : i32
    return %c0_i32, %c0_i32_0 : i32, i32
  }
  func.func @transform_6(%arg0: i32, %arg1: i32) -> (i32, i32) {
    %c0_i32 = arith.constant 0 : i32
    %c0_i32_0 = arith.constant 0 : i32
    %c0_i32_1 = arith.constant 0 : i32
    return %c0_i32, %c0_i32_0 : i32, i32
  }
  func.func @transform_7(%arg0: i32, %arg1: i32) -> (i32, i32) {
    %c0_i32 = arith.constant 0 : i32
    %c0_i32_0 = arith.constant 0 : i32
    %c0_i32_1 = arith.constant 0 : i32
    return %c0_i32, %c0_i32_0 : i32, i32
  }
  func.func @transform_8(%arg0: i32, %arg1: i32) -> (i32, i32) {
    %c0_i32 = arith.constant 0 : i32
    %c0_i32_0 = arith.constant 0 : i32
    %c0_i32_1 = arith.constant 0 : i32
    return %c0_i32, %c0_i32_0 : i32, i32
  }
  func.func @transform_9(%arg0: i32, %arg1: i32) -> (i32, i32, i32) {
    %c0_i32 = arith.constant 0 : i32
    %c0_i32_0 = arith.constant 0 : i32
    return %arg0, %arg1, %c0_i32 : i32, i32, i32
  }
}

</mosaic_0001>

<bundles_post_ra>
// kernel: contextual_module_forward_nhwc.1
= control target key start
LH: loop header
LB: loop body
LE: loop exit
PB: predicated region body
PF: predicated region fallthrough
CT: control target
= control target key end

     0   :  { %s12164_s0 = inlined_call_operand.vmem [shape: bf16[2,256,128], index: 0, kind: input, shape index: {}]   ;;  %s12165_s1 = inlined_call_operand.vmem [shape: bf16[4,256,48], index: 1, kind: input, shape index: {}]   ;;  %s12166_s2 = inlined_call_operand.vmem [shape: bf16[2,4,48,128], index: 2, kind: input, shape index: {}]   ;;  %s12167_s3 = inlined_call_operand.vmem [shape: bf16[2,4,48,128], index: 3, kind: input, shape index: {}]   ;;  %s12168_s4 = inlined_call_operand.vmem [shape: bf16[128,128], index: 4, kind: input, shape index: {}]   ;;  %s12169_s5 = inlined_call_operand.vmem [shape: f32[1,128], index: 5, kind: input, shape index: {}]   ;;  %s12170_s6 = inlined_call_operand.vmem [shape: bf16[128,128], index: 6, kind: input, shape index: {}]   ;;  %s12171_s7 = inlined_call_operand.vmem [shape: bf16[128,128], index: 7, kind: input, shape index: {}]   ;;  %s12172_s8 = inlined_call_operand.vmem [shape: f32[1,128], index: 8, kind: input, shape index: {}]   ;;  %s12173_s9 = inlined_call_operand.hbm [shape: bf16[2,256,128], index: 9, kind: output, shape index: {}]  }
   0x1   :  { %12317 = sst [smem:[#allocation137_spill]] %s12166_s2 }
   0x2   :  { %14 = vsyncpa [#allocation3], 0 }
   0x3   :  { %16 = vsyncpa [#allocation3 + $0x1], 0  ;;  %s7806_s30 = smov 0   ;;  %s7808_s10 = smov 0  }
   0x4   :  { %s7810_s11 = smov 0   ;;  %s7812_s12 = smov 0  }
   0x5   :  { %s7814_s13 = smov 0   ;;  %s7816_s14 = smov 0  }
   0x6 LB: > { %s5862_s15 = sadd.s32 4294967295, %s7752_s14   ;;  %s5863_s16 = sadd.s32 4294967294, %s7752_s14   ;;  %s7752_s14 = sphi %s7816_s14, %s22_s14   ;;  %s7748_s13 = sphi %s7814_s13, %s12929_s13   ;;  %s7744_s12 = sphi %s7812_s12, %s12928_s12   ;;  %s7740_s11 = sphi %s7810_s11, %s12927_s11   ;;  %s7736_s10 = sphi %s7808_s10, %s12926_s10   ;;  %s7732_s30 = sphi %s7806_s30, %s12925_s30  }
   0x7   : > { %s34_s17 = sadd.s32 1, %s7748_s13  ;;  %s254_s18 = sadd.s32 1, %s7740_s11 }
   0x8   : > { %p36_p0 = scmp.ge.s32.totalorder %s34_s17, 2  ;;  %p264_p1 = scmp.ne.s32.totalorder %s7740_s11, %s7736_s10 }
   0x9   : > { %p265_p2 = scmp.eq.s32.totalorder %s5862_s15, 1  ;;  %p270_p3 = scmp.ne.s32.totalorder %s7736_s10, %s7732_s30 }
   0xa   : > { %s12931_s17 = smov (%p36_p0, %s34_s17), 0  ;;  %p271_p5 = scmp.eq.s32.totalorder %s5863_s16, 1 }
   0xb   : > { %p7846_p4 = por %p265_p2, %p264_p1  ;;  %s249_s20 = ssub.s32 %s7748_s13, %s12931_s17 }
   0xc   : > { %p5867_p6 = scmp.ge.s32.totalorder %s7752_s14, 1  ;;  %p252_p7 = scmp.eq.s32.totalorder %s249_s20, 0 }
   0xd   : > { %p7853_p8 = por %p271_p5, %p270_p3  ;;  %p342_p9 = scmp.lt.s32.totalorder %s7752_s14, 3 }
   0xe   : > { %s7859_s22 = scalar_select %p252_p7, %s7740_s11, %s254_s18  }
   0xf   : > { %p343_p10 = pnand %p5867_p6, %p342_p9 }
  0x11   : > { %346 = sbr.rel (%p343_p10) target bundleno = 1224 (0x4c8), region = 56 }
  0x16   : > { %v6802_v0 = vld [vmem:[%s12168_s4 + $0x38] sm:$0xff]  ;;  %p398_p11 = scmp.lt.s32.totalorder %s7744_s12, 1  ;;  %v6801_v1 = vld [vmem:[%s12168_s4 + $0x30] sm:$0xff]  ;;  %s12320_s2 = sld [smem:[#allocation137_spill]]  ;;  %v6800_v2 = vld [vmem:[%s12168_s4 + $0x28] sm:$0xff]  ;;  %vm846_vm0 = vcmask 392192  }
  0x17   : > { %621 = vmatpush.bf16.msra.mxu0 %v6802_v0  ;;  %v6799_v8 = vld [vmem:[%s12168_s4 + $0x20] sm:$0xff]  ;;  %v6798_v12 = vld [vmem:[%s12168_s4 + $0x18] sm:$0xff]  ;;  %v6797_v17 = vld [vmem:[%s12168_s4 + $0x10] sm:$0xff] }
  0x18   : > { %s7869_s27 = scalar_select %p398_p11, %s7744_s12, 1  ;;  %v6806_v15 = vld [vmem:[%s12165_s1 + $0x18] sm:$0xff]  ;;  %v6796_v18 = vld [vmem:[%s12168_s4 + $0x8] sm:$0xff]  ;;  %v6795_v19 = vld [vmem:[%s12168_s4] sm:$0xff] }
  0x19   : > { %v7915_v16 = vld [vmem:[%s12165_s1 + $0x98] sm:$0xff]  ;;  %v6807_v21 = vld [vmem:[%s12165_s1 + $0x20] sm:$0xff]  ;;  %v6808_v24 = vld [vmem:[%s12165_s1 + $0x28] sm:$0xff] }
  0x1a   : > { %s7012_s28 = smul.u32 96, %s7869_s27  ;;  %s6778_s18 = sshll.u32 %s7869_s27, 7  ;;  %v7944_v22 = vld [vmem:[%s12165_s1 + $0xa0] sm:$0xff]  ;;  %v7957_v25 = vld [vmem:[%s12165_s1 + $0xa8] sm:$0xff]  ;;  %v6809_v28 = vld [vmem:[%s12165_s1 + $0x30] sm:$0xff] }
  0x1b   : > { %622 = vmatpush.bf16.msra.mxu0 %v6801_v1  ;;  %s7932_s24 = scalar_lea.vmem %s12164_s0, %s6778_s18  ;;  %v7971_v29 = vld [vmem:[%s12165_s1 + $0xb0] sm:$0xff]  ;;  %v6810_v31 = vld [vmem:[%s12165_s1 + $0x38] sm:$0xff]  ;;  %v6811_v34 = vld [vmem:[%s12165_s1 + $0x40] sm:$0xff]  ;;  %s394_s18 = sand.u32 1, %s7736_s10  }
  0x1c   : > { %s7875_s16 = scalar_lea.vmem %s12320_s2, %s7012_s28  ;;  %s7883_s25 = scalar_lea.vmem %s12167_s3, %s7012_s28  ;;  %v6779_v20 = vld [vmem:[%s7932_s24] sm:$0xff]  ;;  %v6780_v23 = vld [vmem:[%s7932_s24 + $0x8] sm:$0xff]  ;;  %v6781_v27 = vld [vmem:[%s7932_s24 + $0x10] sm:$0xff] }
  0x1d   : > { %v6821_v3 = vld [vmem:[%s7875_s16 + $0x10] sm:$0xff]  ;;  %v7887_v4 = vld [vmem:[%s7875_s16 + $0x28] sm:$0xff]  ;;  %v7892_v6 = vld [vmem:[%s7875_s16 + $0x20] sm:$0xff]  ;;  %s5868_s20 = sshll.u32 %s394_s18, 7 }
  0x1e   : > { %7003 = vmatpush.bf16.msra.mxu1 %v6821_v3  ;;  %7009 = vmatpush.bf16.msra.mxu3 %v7887_v4  ;;  %v6820_v5 = vld [vmem:[%s7875_s16 + $0x8] sm:$0xff]  ;;  %v6824_v7 = vld [vmem:[%s7883_s25 + $0x10] sm:$0xff]  ;;  %v6819_v10 = vld [vmem:[%s7875_s16] sm:$0xff]  ;;  %s11953_s2 = scalar_lea.vmem [#allocation2], %s5868_s20 }
  0x1f   : > { %623 = vmatpush.bf16.msra.mxu0 %v6800_v2  ;;  %7006 = vmatpush.bf16.msra.mxu2 %v6824_v7  ;;  %v6823_v9 = vld [vmem:[%s7883_s25 + $0x8] sm:$0xff]  ;;  %v7902_v11 = vld [vmem:[%s7875_s16 + $0x18] sm:$0xff]  ;;  %v6822_v14 = vld [vmem:[%s7883_s25] sm:$0xff]  ;;  %s5741_s29 = sshll.u32 %s11953_s2, 4  ;;  %s5742_s29 = int_to_ptr.vmem [resolvable:$true] %s5741_s29 }
  0x20   : > { %v6846_v13 = vld [vmem:[%s7883_s25 + $0x28] sm:$0xff]  ;;  %v6845_v26 = vld [vmem:[%s7883_s25 + $0x20] sm:$0xff]  ;;  %v6782_v30 = vld [vmem:[%s7932_s24 + $0x18] sm:$0xff] }
  0x21   : > { %v7984_v32 = vld [vmem:[%s12165_s1 + $0xb8] sm:$0xff]  ;;  %v6783_v33 = vld [vmem:[%s7932_s24 + $0x20] sm:$0xff]  ;;  %v6784_v36 = vld [vmem:[%s7932_s24 + $0x28] sm:$0xff] }
  0x22   : > { %7004 = vmatpush.bf16.msra.mxu1 %v6820_v5  ;;  %7010 = vmatpush.bf16.msra.mxu3 %v7892_v6  ;;  %v7997_v35 = vld [vmem:[%s12165_s1 + $0xc0] sm:$0xff]  ;;  %v6812_v37 = vld [vmem:[%s12165_s1 + $0x48] sm:$0xff]  ;;  %v6785_v39 = vld [vmem:[%s7932_s24 + $0x30] sm:$0xff] }
  0x23   : > { %624 = vmatpush.bf16.msra.mxu0 %v6799_v8  ;;  %7007 = vmatpush.bf16.msra.mxu2 %v6823_v9  ;;  %v6834_v38 = vld [vmem:[%s12165_s1 + $0xc8] sm:$0xff]  ;;  %v6844_v40 = vld [vmem:[%s7883_s25 + $0x18] sm:$0xff]  ;;  %v6813_v41 = vld [vmem:[%s12165_s1 + $0x50] sm:$0xff] }
  0x24   : > { %v6835_v42 = vld [vmem:[%s12165_s1 + $0xd0] sm:$0xff]  ;;  %v6786_v43 = vld [vmem:[%s7932_s24 + $0x38] sm:$0xff]  ;;  %v6787_v50 = vld [vmem:[%s7932_s24 + $0x40] sm:$0xff] }
  0x25   : > { %v6814_v44 = vld [vmem:[%s12165_s1 + $0x58] sm:$0xff]  ;;  %v6815_v53 = vld [vmem:[%s12165_s1 + $0x60] sm:$0xff]  ;;  %v6788_v63 = vld [vmem:[%s7932_s24 + $0x48] sm:$0xff] }
  0x26   : > { %7005 = vmatpush.bf16.msra.mxu1 %v6819_v10  ;;  %7011 = vmatpush.bf16.msra.mxu3 %v7902_v11  ;;  %v6836_v45 = vld [vmem:[%s12165_s1 + $0xd8] sm:$0xff]  ;;  %v6837_v54 = vld [vmem:[%s12165_s1 + $0xe0] sm:$0xff]  ;;  %v6816_v2 = vld [vmem:[%s12165_s1 + $0x68] sm:$0xff] }
  0x27   : > { %625 = vmatpush.bf16.msra.mxu0 %v6798_v12  ;;  %7008 = vmatpush.bf16.msra.mxu2 %v6822_v14  ;;  %v6865_v57 = vld [vmem:[%s7875_s16 + $0x40] sm:$0xff] }
  0x28   : > { %v6868_v58 = vld [vmem:[%s7883_s25 + $0x40] sm:$0xff] }
  0x29   : > { %6048 = vmatmul.msk.bf16.vlgmr.msra.gmra.mxu1 %vm846_vm0, %v6806_v15  ;;  %6238 = vmatmul.msk.bf16.vlgmr.msra.gmra.mxu3 %vm846_vm0, %v7915_v16 }
  0x2a   : > { %2138 = vmatpush.bf16.msrb.mxu1 %v6846_v13  ;;  %6076 = vmatmul.msk.bf16.vlgmr.msra.gmra.mxu2 %vm846_vm0, %v6806_v15  ;;  %v6867_v13 = vld [vmem:[%s7883_s25 + $0x38] sm:$0xff] }
  0x2b   : > { %626 = vmatpush.bf16.msra.mxu0 %v6797_v17  ;;  %3263 = vmatpush.bf16.msrb.mxu3 %v6868_v58  ;;  %v6791_v58 = vld [vmem:[%s7932_s24 + $0x60] sm:$0xff] }
  0x2c   : > { %3149 = vmatpush.bf16.msrb.mxu2 %v6865_v57  ;;  %v6864_v57 = vld [vmem:[%s7875_s16 + $0x38] sm:$0xff] }
  0x2e   : > { %2139 = vmatpush.bf16.msrb.mxu1 %v6845_v26 }
  0x2f   : > { %627 = vmatpush.bf16.msra.mxu0 %v6796_v18  ;;  %3264 = vmatpush.bf16.msrb.mxu3 %v6867_v13  ;;  %v6866_v18 = vld [vmem:[%s7883_s25 + $0x30] sm:$0xff] }
  0x30   : > { %3150 = vmatpush.bf16.msrb.mxu2 %v6864_v57 }
  0x32   : > { %2140 = vmatpush.bf16.msrb.mxu1 %v6844_v40 }
  0x33   : > { %628 = vmatpush.bf16.msra.mxu0 %v6795_v19  ;;  %v6817_v19 = vld [vmem:[%s12165_s1 + $0x70] sm:$0xff]  ;;  %3265 = vmatpush.bf16.msrb.mxu3 %v6866_v18  ;;  %v6847_v18 = vld [vmem:[%s12165_s1 + $0x100] sm:$0xff] }
  0x36   : > { %629 = vmatmul.bf16.vlgmr.msra.gmra.mxu0 %v6779_v20  ;;  %v6839_v20 = vld [vmem:[%s12165_s1 + $0xf0] sm:$0xff] }
  0x37   : > { %900 = vmatpush.bf16.msrb.mxu0 %v6821_v3  ;;  %v6838_v3 = vld [vmem:[%s12165_s1 + $0xe8] sm:$0xff] }
  0x39   : > { %6049 = vmatmul.msk.bf16.gmra.mxu1 %vm846_vm0, %v6807_v21  ;;  %6239 = vmatmul.msk.bf16.gmra.mxu3 %vm846_vm0, %v7944_v22 }
  0x3a   : > { %6077 = vmatmul.msk.bf16.gmra.mxu2 %vm846_vm0, %v6807_v21 }
  0x3b   : > { %901 = vmatpush.bf16.msrb.mxu0 %v6820_v5 }
  0x3f   : > { %902 = vmatpush.bf16.msrb.mxu0 %v6819_v10 }
  0x43   : > { %1013 = vmatpush.bf16.msra.mxu0 %v6824_v7 }
  0x46   : > { %634 = vmatmul.bf16.gmra.mxu0 %v6780_v23 }
  0x47   : > { %1014 = vmatpush.bf16.msra.mxu0 %v6823_v9 }
  0x49   : > { %6050 = vmatmul.msk.bf16.gmra.mxu1 %vm846_vm0, %v6808_v24  ;;  %6240 = vmatmul.msk.bf16.gmra.mxu3 %vm846_vm0, %v7957_v25 }
  0x4a   : > { %6078 = vmatmul.msk.bf16.gmra.mxu2 %vm846_vm0, %v6808_v24 }
  0x4b   : > { %1015 = vmatpush.bf16.msra.mxu0 %v6822_v14  ;;  %v6789_v14 = vld [vmem:[%s7932_s24 + $0x50] sm:$0xff] }
  0x56   : > { %639 = vmatmul.bf16.gmra.mxu0 %v6781_v27 }
  0x59   : > { %6051 = vmatmul.msk.bf16.gmra.mxu1 %vm846_vm0, %v6809_v28  ;;  %6241 = vmatmul.msk.bf16.gmra.mxu3 %vm846_vm0, %v7971_v29 }
  0x5a   : > { %6079 = vmatmul.msk.bf16.gmra.mxu2 %vm846_vm0, %v6809_v28 }
  0x66   : > { %644 = vmatmul.bf16.gmra.mxu0 %v6782_v30  ;;  %v8127_v30 = vld [vmem:[%s12169_s5] ss:$0 sm:$0xff] }
  0x69   : > { %6052 = vmatmul.msk.bf16.gmra.mxu1 %vm846_vm0, %v6810_v31  ;;  %6242 = vmatmul.msk.bf16.gmra.mxu3 %vm846_vm0, %v7984_v32 }
  0x6a   : > { %6080 = vmatmul.msk.bf16.gmra.mxu2 %vm846_vm0, %v6810_v31  ;;  %v6790_v31 = vld [vmem:[%s7932_s24 + $0x58] sm:$0xff] }
  0x76   : > { %649 = vmatmul.bf16.gmra.mxu0 %v6783_v33 }
  0x79   : > { %6053 = vmatmul.msk.bf16.gmra.mxu1 %vm846_vm0, %v6811_v34  ;;  %6243 = vmatmul.msk.bf16.gmra.mxu3 %vm846_vm0, %v7997_v35 }
  0x7a   : > { %6081 = vmatmul.msk.bf16.gmra.mxu2 %vm846_vm0, %v6811_v34  ;;  %v6890_v34 = vld [vmem:[%s7883_s25 + $0x58] sm:$0xff] }
  0x7b   : > { %4388 = vmatpush.bf16.msra.mxu1 %v6890_v34 }
  0x86   : > { %654 = vmatmul.bf16.gmra.mxu0 %v6784_v36 }
  0x89   : > { %6054 = vmatmul.msk.bf16.gmra.mxu1 %vm846_vm0, %v6812_v37  ;;  %6244 = vmatmul.msk.bf16.gmra.mxu3 %vm846_vm0, %v6834_v38  ;;  %v6818_v38 = vld [vmem:[%s12165_s1 + $0x78] sm:$0xff] }
  0x8a   : > { %6082 = vmatmul.msk.bf16.gmra.mxu2 %vm846_vm0, %v6812_v37 }
  0x96   : > { %659 = vmatmul.bf16.gmra.mxu0 %v6785_v39  ;;  %v6840_v39 = vld [vmem:[%s12165_s1 + $0xf8] sm:$0xff] }
  0x99   : > { %6055 = vmatmul.msk.bf16.gmra.mxu1 %vm846_vm0, %v6813_v41  ;;  %6245 = vmatmul.msk.bf16.gmra.mxu3 %vm846_vm0, %v6835_v42 }
  0x9a   : > { %6083 = vmatmul.msk.bf16.gmra.mxu2 %vm846_vm0, %v6813_v41 }
  0xa6   : > { %664 = vmatmul.bf16.gmra.mxu0 %v6786_v43  ;;  %v8031_v46 = vpop.f32.mrf.mxu1 }
  0xa9   : > { %6056 = vmatmul.msk.bf16.gmra.mxu1 %vm846_vm0, %v6814_v44  ;;  %6246 = vmatmul.msk.bf16.gmra.mxu3 %vm846_vm0, %v6836_v45 }
  0xaa   : > { %6084 = vmatmul.msk.bf16.gmra.mxu2 %vm846_vm0, %v6814_v44 }
  0xac   : > { %v8036_v47 = vpop.f32.mrf.mxu3 }
  0xad   : > { %12321 = vst [vmem:[#allocation5_spill] sm:$0xff] %v8036_v47  ;;  %v8040_v49 = vpop.f32.mrf.mxu2 }
  0xae   : > { %v8038_v48 = vpop.f32.mrf.mxu1 }
  0xb3   : > { %v8043_v51 = vpop.f32.mrf.mxu0 }
  0xb4   : > { %v8045_v52 = vpop.f32.mrf.mxu3 }
  0xb5   : > { %12322 = vst [vmem:[#allocation6_spill] sm:$0xff] %v8045_v52  ;;  %v8055_v56 = vpop.f32.mrf.mxu2 }
  0xb6   : > { %669 = vmatmul.bf16.gmra.mxu0 %v6787_v50  ;;  %v8053_v55 = vpop.f32.mrf.mxu1 }
  0xb9   : > { %6057 = vmatmul.msk.bf16.gmra.mxu1 %vm846_vm0, %v6815_v53  ;;  %6247 = vmatmul.msk.bf16.gmra.mxu3 %vm846_vm0, %v6837_v54 }
  0xba   : > { %6085 = vmatmul.msk.bf16.gmra.mxu2 %vm846_vm0, %v6815_v53 }
  0xbb   : > { %v8061_v59 = vpop.f32.mrf.mxu0 }
  0xbc   : > { %v8064_v60 = vpop.f32.mrf.mxu3 }
  0xbd   : > { %12323 = vst [vmem:[#allocation7_spill] sm:$0xff] %v8064_v60  ;;  %v8068_v62 = vpop.f32.mrf.mxu2 }
  0xbe   : > { %v8066_v61 = vpop.f32.mrf.mxu1 }
  0xc3   : > { %v8071_v0 = vpop.f32.mrf.mxu0 }
  0xc4   : > { %v8073_v1 = vpop.f32.mrf.mxu3 }
  0xc5   : > { %12324 = vst [vmem:[#allocation8_spill] sm:$0xff] %v8073_v1  ;;  %v8083_v7 = vpop.f32.mrf.mxu2 }
  0xc6   : > { %674 = vmatmul.bf16.gmra.mxu0 %v6788_v63  ;;  %v8081_v5 = vpop.f32.mrf.mxu1  ;;  %v6863_v63 = vld [vmem:[%s7875_s16 + $0x30] sm:$0xff] }
  0xc7   : > { %3151 = vmatpush.bf16.msrb.mxu2 %v6863_v63 }
  0xc9   : > { %6058 = vmatmul.msk.bf16.gmra.mxu1 %vm846_vm0, %v6816_v2  ;;  %6248 = vmatmul.msk.bf16.gmra.mxu3 %vm846_vm0, %v6838_v3 }
  0xca   : > { %6086 = vmatmul.msk.bf16.gmra.mxu2 %vm846_vm0, %v6816_v2 }
  0xcb   : > { %v8087_v8 = vpop.f32.mrf.mxu0 }
  0xcc   : > { %v8090_v9 = vpop.f32.mrf.mxu3 }
  0xcd   : > { %12325 = vst [vmem:[#allocation9_spill] sm:$0xff] %v8090_v9  ;;  %v8094_v12 = vpop.f32.mrf.mxu2 }
  0xce   : > { %v8092_v10 = vpop.f32.mrf.mxu1 }
  0xd3   : > { %v8098_v15 = vpop.f32.mrf.mxu0 }
  0xd4   : > { %v8100_v17 = vpop.f32.mrf.mxu3 }
  0xd5   : > { %12326 = vst [vmem:[#allocation10_spill] sm:$0xff] %v8100_v17  ;;  %v8111_v23 = vpop.f32.mrf.mxu2 }
  0xd6   : > { %679 = vmatmul.bf16.gmra.mxu0 %v6789_v14  ;;  %v8109_v21 = vpop.f32.mrf.mxu1  ;;  %v8173_v14 = vld [vmem:[%s12165_s1 + $0x80] sm:$0xff] }
  0xd7   : > { %12337 = vst [vmem:[#allocation21_spill] sm:$0xff] %v8173_v14 }
  0xd9   : > { %6059 = vmatmul.msk.bf16.gmra.mxu1 %vm846_vm0, %v6817_v19  ;;  %6249 = vmatmul.msk.bf16.gmra.mxu3 %vm846_vm0, %v6839_v20 }
  0xda   : > { %6087 = vmatmul.msk.bf16.gmra.mxu2 %vm846_vm0, %v6817_v19 }
  0xdb   : > { %v8115_v24 = vpop.f32.mrf.mxu0 }
  0xdc   : > { %v8118_v26 = vpop.f32.mrf.mxu3 }
  0xdd   : > { %12327 = vst [vmem:[#allocation11_spill] sm:$0xff] %v8118_v26  ;;  %v8122_v28 = vpop.f32.mrf.mxu2 }
  0xde   : > { %v8120_v27 = vpop.f32.mrf.mxu1 }
  0xdf   : > { %12328 = vst [vmem:[#allocation12_spill] sm:$0xff] %v8120_v27 }
  0xe3   : > { %v645_v33 = vpop.f32.mrf.mxu0 }
  0xe4   : > { %v8132_v36 = vadd.f32 %v8127_v30, %v645_v33  ;;  %v8134_v37 = vpop.f32.mrf.mxu3 }
  0xe5   : > { %12330 = vst [vmem:[#allocation14_spill] sm:$0xff] %v8134_v37  ;;  %v8146_v42 = vpop.f32.mrf.mxu2  ;;  %v6794_v37 = vld [vmem:[%s7932_s24 + $0x78] sm:$0xff] }
  0xe6   : > { %12329 = vst [vmem:[#allocation13_spill] sm:$0xff] %v8132_v36  ;;  %684 = vmatmul.bf16.gmra.mxu0 %v6790_v31  ;;  %v8144_v41 = vpop.f32.mrf.mxu1 }
  0xe7   : > { %12331 = vst [vmem:[#allocation15_spill] sm:$0xff] %v8144_v41 }
  0xe9   : > { %6060 = vmatmul.msk.bf16.gmra.mxu1 %vm846_vm0, %v6818_v38  ;;  %6250 = vmatmul.msk.bf16.gmra.mxu3 %vm846_vm0, %v6840_v39 }
  0xea   : > { %6088 = vmatmul.msk.bf16.gmra.mxu2 %vm846_vm0, %v6818_v38 }
  0xeb   : > { %v647_v43 = vpop.f32.mrf.mxu0 }
  0xec   : > { %v8152_v44 = vadd.f32 %v8127_v30, %v647_v43  ;;  %v8154_v45 = vpop.f32.mrf.mxu3 }
  0xed   : > { %12333 = vst [vmem:[#allocation17_spill] sm:$0xff] %v8154_v45  ;;  %v8160_v54 = vpop.f32.mrf.mxu2 }
  0xee   : > { %12332 = vst [vmem:[#allocation16_spill] sm:$0xff] %v8152_v44  ;;  %v8158_v53 = vpop.f32.mrf.mxu1 }
  0xef   : > { %12334 = vst [vmem:[#allocation18_spill] sm:$0xff] %v8158_v53 }
  0xf3   : > { %v650_v2 = vpop.f32.mrf.mxu0 }
  0xf4   : > { %v8166_v3 = vadd.f32 %v8127_v30, %v650_v2  ;;  %v8168_v13 = vpop.f32.mrf.mxu3 }
  0xf5   : > { %12336 = vst [vmem:[#allocation20_spill] sm:$0xff] %v8168_v13  ;;  %v8182_v31 = vpop.f32.mrf.mxu2 }
  0xf6   : > { %12335 = vst [vmem:[#allocation19_spill] sm:$0xff] %v8166_v3  ;;  %689 = vmatmul.bf16.gmra.mxu0 %v6791_v58  ;;  %v8180_v20 = vpop.f32.mrf.mxu1  ;;  %v6792_v58 = vld [vmem:[%s7932_s24 + $0x68] sm:$0xff] }
  0xf7   : > { %12338 = vst [vmem:[#allocation22_spill] sm:$0xff] %v8180_v20 }
  0xf9   : > { %6269 = vmatmul.msk.bf16.vlgmr.msrb.gmra.mxu1 %vm846_vm0, %v8173_v14  ;;  %6465 = vmatmul.msk.bf16.vlgmr.msrb.gmra.mxu3 %vm846_vm0, %v6847_v18 }
  0xfa   : > { %6431 = vmatmul.msk.bf16.vlgmr.msrb.gmra.mxu2 %vm846_vm0, %v6847_v18  ;;  %v6826_v18 = vld [vmem:[%s12165_s1 + $0x88] sm:$0xff] }
  0xfb   : > { %v652_v33 = vpop.f32.mrf.mxu0 }
  0xfc   : > { %v8189_v34 = vadd.f32 %v8127_v30, %v652_v33  ;;  %v8191_v38 = vpop.f32.mrf.mxu3  ;;  %v6848_v33 = vld [vmem:[%s12165_s1 + $0x108] sm:$0xff] }
  0xfd   : > { %12340 = vst [vmem:[#allocation24_spill] sm:$0xff] %v8191_v38  ;;  %v8197_v57 = vpop.f32.mrf.mxu2  ;;  %v6793_v38 = vld [vmem:[%s7932_s24 + $0x70] sm:$0xff] }
  0xfe   : > { %12339 = vst [vmem:[#allocation23_spill] sm:$0xff] %v8189_v34  ;;  %v8195_v43 = vpop.f32.mrf.mxu1 }
  0xff   : > { %12341 = vst [vmem:[#allocation25_spill] sm:$0xff] %v8195_v43 }
 0x103   : > { %v655_v63 = vpop.f32.mrf.mxu0 }
 0x104   : > { %v8201_v2 = vadd.f32 %v8127_v30, %v655_v63  ;;  %v8203_v19 = vpop.f32.mrf.mxu3 }
 0x105   : > { %12343 = vst [vmem:[#allocation27_spill] sm:$0xff] %v8203_v19  ;;  %v8215_v40 = vpop.f32.mrf.mxu2 }
 0x106   : > { %12342 = vst [vmem:[#allocation26_spill] sm:$0xff] %v8201_v2  ;;  %694 = vmatmul.bf16.gmra.mxu0 %v6792_v58  ;;  %v8213_v50 = vpop.f32.mrf.mxu1 }
 0x107   : > { %12344 = vst [vmem:[#allocation28_spill] sm:$0xff] %v8213_v50 }
 0x109   : > { %6270 = vmatmul.msk.bf16.gmra.mxu1 %vm846_vm0, %v6826_v18  ;;  %6466 = vmatmul.msk.bf16.gmra.mxu3 %vm846_vm0, %v6848_v33 }
 0x10a   : > { %6432 = vmatmul.msk.bf16.gmra.mxu2 %vm846_vm0, %v6848_v33  ;;  %v6827_v33 = vld [vmem:[%s12165_s1 + $0x90] sm:$0xff] }
 0x10b   : > { %v657_v63 = vpop.f32.mrf.mxu0 }
 0x10c   : > { %v8221_v19 = vadd.f32 %v8127_v30, %v657_v63  ;;  %v8223_v43 = vpop.f32.mrf.mxu3  ;;  %v6849_v63 = vld [vmem:[%s12165_s1 + $0x110] sm:$0xff] }
 0x10d   : > { %12346 = vst [vmem:[#allocation30_spill] sm:$0xff] %v8223_v43  ;;  %v8229_v50 = vpop.f32.mrf.mxu2 }
 0x10e   : > { %12345 = vst [vmem:[#allocation29_spill] sm:$0xff] %v8221_v19  ;;  %v8227_v58 = vpop.f32.mrf.mxu1 }
 0x10f   : > { %12347 = vst [vmem:[#allocation31_spill] sm:$0xff] %v8227_v58 }
 0x113   : > { %v660_v20 = vpop.f32.mrf.mxu0 }
 0x114   : > { %v8233_v18 = vadd.f32 %v8127_v30, %v660_v20  ;;  %v8235_v13 = vpop.f32.mrf.mxu3 }
 0x115   : > { %12349 = vst [vmem:[#allocation33_spill] sm:$0xff] %v8235_v13  ;;  %v8247_v43 = vpop.f32.mrf.mxu2 }
 0x116   : > { %12348 = vst [vmem:[#allocation32_spill] sm:$0xff] %v8233_v18  ;;  %699 = vmatmul.bf16.gmra.mxu0 %v6793_v38  ;;  %v8245_v58 = vpop.f32.mrf.mxu1 }
 0x117   : > { %12350 = vst [vmem:[#allocation34_spill] sm:$0xff] %v8245_v58 }
 0x119   : > { %6271 = vmatmul.msk.bf16.gmra.mxu1 %vm846_vm0, %v6827_v33  ;;  %6467 = vmatmul.msk.bf16.gmra.mxu3 %vm846_vm0, %v6849_v63 }
 0x11a   : > { %6433 = vmatmul.msk.bf16.gmra.mxu2 %vm846_vm0, %v6849_v63  ;;  %v6850_v63 = vld [vmem:[%s12165_s1 + $0x118] sm:$0xff] }
 0x11b   : > { %v662_v20 = vpop.f32.mrf.mxu0 }
 0x11c   : > { %v8253_v13 = vadd.f32 %v8127_v30, %v662_v20  ;;  %v8255_v45 = vpop.f32.mrf.mxu3 }
 0x11d   : > { %12352 = vst [vmem:[#allocation36_spill] sm:$0xff] %v8255_v45  ;;  %v8261_v58 = vpop.f32.mrf.mxu2 }
 0x11e   : > { %12351 = vst [vmem:[#allocation35_spill] sm:$0xff] %v8253_v13  ;;  %v8259_v38 = vpop.f32.mrf.mxu1 }
 0x11f   : > { %12353 = vst [vmem:[#allocation37_spill] sm:$0xff] %v8259_v38 }
 0x123   : > { %v665_v26 = vpop.f32.mrf.mxu0 }
 0x124   : > { %v8265_v33 = vadd.f32 %v8127_v30, %v665_v26  ;;  %v8267_v17 = vpop.f32.mrf.mxu3 }
 0x125   : > { %12355 = vst [vmem:[#allocation39_spill] sm:$0xff] %v8267_v17  ;;  %v8276_v38 = vpop.f32.mrf.mxu2 }
 0x126   : > { %12354 = vst [vmem:[#allocation38_spill] sm:$0xff] %v8265_v33  ;;  %704 = vmatmul.bf16.gmra.mxu0 %v6794_v37  ;;  %v8274_v39 = vpop.f32.mrf.mxu1  ;;  %v6851_v37 = vld [vmem:[%s12165_s1 + $0x120] sm:$0xff] }
 0x127   : > { %12356 = vst [vmem:[#allocation40_spill] sm:$0xff] %v8274_v39 }
 0x129   : > { %6272 = vmatmul.msk.bf16.gmra.mxu1 %vm846_vm0, %v7915_v16  ;;  %6468 = vmatmul.msk.bf16.gmra.mxu3 %vm846_vm0, %v6850_v63  ;;  %v8296_v16 = vld [vmem:[%s12165_s1] sm:$0xff] }
 0x12a   : > { %6434 = vmatmul.msk.bf16.gmra.mxu2 %vm846_vm0, %v6850_v63 }
 0x12b   : > { %v667_v26 = vpop.f32.mrf.mxu0 }
 0x12c   : > { %v8283_v17 = vadd.f32 %v8127_v30, %v667_v26  ;;  %v8285_v45 = vpop.f32.mrf.mxu3 }
 0x12d   : > { %12358 = vst [vmem:[#allocation42_spill] sm:$0xff] %v8285_v45  ;;  %v8291_v39 = vpop.f32.mrf.mxu2 }
 0x12e   : > { %12357 = vst [vmem:[#allocation41_spill] sm:$0xff] %v8283_v17  ;;  %v8289_v20 = vpop.f32.mrf.mxu1 }
 0x12f   : > { %12359 = vst [vmem:[#allocation43_spill] sm:$0xff] %v8289_v20  ;;  %v12362_v20 = vsub.f32 %v8132_v36, %v8040_v49  ;;  %v12364_v49 = vsub.f32 %v8152_v44, %v8055_v56 }
 0x131   : > { %v6095_v45 = vmul.f32 -1.442695, %v12362_v20  ;;  %v6096_v20 = vmul.f32 -1.442695, %v12364_v49 }
 0x133   : > { %v670_v9 = vpop.f32.mrf.mxu0  ;;  %7072 = vpow2.f32 %v6095_v45 }
 0x134   : > { %v8299_v63 = vadd.f32 %v8127_v30, %v670_v9  ;;  %v8301_v26 = vpop.f32.mrf.mxu3  ;;  %7074 = vpow2.f32 %v6096_v20  ;;  %v12369_v20 = vsub.f32 %v8189_v34, %v8083_v7 }
 0x135   : > { %12361 = vst [vmem:[#allocation45_spill] sm:$0xff] %v8301_v26  ;;  %v8315_v9 = vpop.f32.mrf.mxu2  ;;  %v6889_v26 = vld [vmem:[%s7883_s25 + $0x50] sm:$0xff] }
 0x136   : > { %12360 = vst [vmem:[#allocation44_spill] sm:$0xff] %v8299_v63  ;;  %6045 = vmatmul.msk.bf16.vlgmr.msrb.gmra.mxu0 %vm846_vm0, %v8296_v16  ;;  %v8313_v60 = vpop.f32.mrf.mxu1  ;;  %4389 = vmatpush.bf16.msra.mxu1 %v6889_v26 }
 0x137   : > { %12363 = vst [vmem:[#allocation46_spill] sm:$0xff] %v8313_v60  ;;  %2024 = vmatpush.bf16.msrb.mxu0 %v7887_v4 }
 0x139   : > { %6273 = vmatmul.msk.bf16.gmra.mxu1 %vm846_vm0, %v7944_v22  ;;  %6469 = vmatmul.msk.bf16.gmra.mxu3 %vm846_vm0, %v6851_v37  ;;  %v12367_v22 = vsub.f32 %v8166_v3, %v8068_v62  ;;  %v12377_v3 = vsub.f32 %v8233_v18, %v8122_v28  ;;  %v8410_v28 = vld [vmem:[%s12165_s1 + $0x10] sm:$0xff] }
 0x13a   : > { %6435 = vmatmul.msk.bf16.gmra.mxu2 %vm846_vm0, %v6851_v37  ;;  %12379 = vst [vmem:[#allocation56_spill] sm:$0xff] %v8410_v28 }
 0x13b   : > { %v672_v1 = vpop.f32.mrf.mxu0  ;;  %2025 = vmatpush.bf16.msrb.mxu0 %v7892_v6  ;;  %v6097_v45 = vmul.f32 -1.442695, %v12367_v22  ;;  %v7073_v6 = vpop.eup %7072  ;;  %v6098_v22 = vmul.f32 -1.442695, %v12369_v20 }
 0x13c   : > { %v8328_v60 = vadd.f32 %v8127_v30, %v672_v1  ;;  %v8330_v4 = vpop.f32.mrf.mxu3  ;;  %v8345_v1 = vld [vmem:[%s12165_s1 + $0x8] sm:$0xff]  ;;  %v8347_v37 = vadd.f32 1.0, %v7073_v6  ;;  %v7075_v26 = vpop.eup %7074 }
 0x13d   : > { %12366 = vst [vmem:[#allocation48_spill] sm:$0xff] %v8330_v4  ;;  %v8339_v52 = vpop.f32.mrf.mxu2  ;;  %7076 = vpow2.f32 %v6097_v45  ;;  %v8369_v7 = vadd.f32 1.0, %v7075_v26 }
 0x13e   : > { %12365 = vst [vmem:[#allocation47_spill] sm:$0xff] %v8328_v60  ;;  %v8337_v49 = vpop.f32.mrf.mxu1  ;;  %7078 = vrcp.f32 %v8347_v37  ;;  %vm1352_vm1 = vweird.f32 %v8347_v37 }
 0x13f   : > { %12368 = vst [vmem:[#allocation49_spill] sm:$0xff] %v8337_v49  ;;  %2026 = vmatpush.bf16.msrb.mxu0 %v7902_v11  ;;  %v6852_v11 = vld [vmem:[%s12165_s1 + $0x128] sm:$0xff]  ;;  %7080 = vpow2.f32 %v6098_v22  ;;  %vm1367_vm3 = vweird.f32 %v8369_v7 }
 0x140   : > { %7082 = vrcp.f32 %v8369_v7 }
 0x143   : > { %v675_v62 = vpop.f32.mrf.mxu0 }
 0x144   : > { %v8353_v56 = vadd.f32 %v8127_v30, %v675_v62  ;;  %v8355_v49 = vpop.f32.mrf.mxu3  ;;  %v7077_v62 = vpop.eup %7076 }
 0x145   : > { %12371 = vst [vmem:[#allocation51_spill] sm:$0xff] %v8355_v49  ;;  %v8366_v4 = vpop.f32.mrf.mxu2  ;;  %v8375_v20 = vadd.f32 1.0, %v7077_v62  ;;  %v8386_v47 = vpop.eup %7078 }
 0x146   : > { %12370 = vst [vmem:[#allocation50_spill] sm:$0xff] %v8353_v56  ;;  %6046 = vmatmul.msk.bf16.gmra.mxu0 %vm846_vm0, %v8345_v1  ;;  %v8364_v6 = vpop.f32.mrf.mxu1  ;;  %v7081_v62 = vpop.eup %7080  ;;  %vm1353_vm2 = vweird.f32 %v8386_v47 }
 0x147   : > { %12372 = vst [vmem:[#allocation52_spill] sm:$0xff] %v8364_v6  ;;  %v12373_v6 = vsub.f32 %v8201_v2, %v8094_v12  ;;  %7084 = vrcp.f32 %v8375_v20  ;;  %v8403_v2 = vadd.f32 1.0, %v7081_v62  ;;  %vm8478_vm5 = vmor %vm1352_vm1, %vm1353_vm2  ;;  %vm1382_vm9 = vweird.f32 %v8375_v20 }
 0x149   : > { %6274 = vmatmul.msk.bf16.gmra.mxu1 %vm846_vm0, %v7957_v25  ;;  %6470 = vmatmul.msk.bf16.gmra.mxu3 %vm846_vm0, %v6852_v11  ;;  %v6099_v49 = vmul.f32 -1.442695, %v12373_v6  ;;  %v12376_v25 = vsub.f32 %v8221_v19, %v8111_v23  ;;  %v1348_v23 = vmul.f32 %v8386_v47, %v8347_v37  ;;  %v12383_v19 = vsub.f32 %v8253_v13, %v8146_v42 }
 0x14a   : > { %6436 = vmatmul.msk.bf16.gmra.mxu2 %vm846_vm0, %v6852_v11  ;;  %v6101_v11 = vmul.f32 -1.442695, %v12377_v3  ;;  %vm1397_vm12 = vweird.f32 %v8403_v2 }
 0x14b   : > { %v677_v45 = vpop.f32.mrf.mxu0  ;;  %v6100_v34 = vmul.f32 -1.442695, %v12376_v25  ;;  %7086 = vpow2.f32 %v6099_v49  ;;  %v6102_v44 = vmul.f32 -1.442695, %v12383_v19 }
 0x14c   : > { %v8382_v26 = vadd.f32 %v8127_v30, %v677_v45  ;;  %v8384_v22 = vpop.f32.mrf.mxu3 }
 0x14d   : > { %12375 = vst [vmem:[#allocation54_spill] sm:$0xff] %v8384_v22  ;;  %v8398_v45 = vpop.f32.mrf.mxu2  ;;  %v8401_v22 = vpop.eup %7082  ;;  %7088 = vpow2.f32 %v6100_v34  ;;  %v6853_v34 = vld [vmem:[%s12165_s1 + $0x130] sm:$0xff] }
 0x14e   : > { %12374 = vst [vmem:[#allocation53_spill] sm:$0xff] %v8382_v26  ;;  %v8396_v6 = vpop.f32.mrf.mxu1  ;;  %7090 = vpow2.f32 %v6101_v11  ;;  %v1363_v49 = vmul.f32 %v8401_v22, %v8369_v7  ;;  %v8419_v62 = vpop.eup %7084  ;;  %v1349_v11 = vsub.f32 1.0, %v1348_v23  ;;  %vm1368_vm4 = vweird.f32 %v8401_v22 }
 0x14f   : > { %12378 = vst [vmem:[#allocation55_spill] sm:$0xff] %v8396_v6  ;;  %7092 = vrcp.f32 %v8403_v2  ;;  %v1378_v18 = vmul.f32 %v8419_v62, %v8375_v20  ;;  %vm8513_vm7 = vmor %vm1367_vm3, %vm1368_vm4  ;;  %vm1383_vm10 = vweird.f32 %v8419_v62 }
 0x150   : > { %v1364_v41 = vsub.f32 1.0, %v1363_v49  ;;  %v1350_v23 = vmul.f32 %v8386_v47, %v1349_v11  ;;  %7094 = vpow2.f32 %v6102_v44  ;;  %v1358_v49 = vand.u32 2147483648, %v8347_v37  ;;  %vm8579_vm11 = vmor %vm1382_vm9, %vm1383_vm10 }
 0x151   : > { %v7087_v6 = vpop.eup %7086  ;;  %v1379_v44 = vsub.f32 1.0, %v1378_v18  ;;  %v8550_v18 = vadd.f32 %v8127_v30, %v8115_v24 }
 0x152   : > { %v8436_v14 = vadd.f32 1.0, %v7087_v6 }
 0x153   : > { %v680_v3 = vpop.f32.mrf.mxu0 }
 0x154   : > { %v8413_v25 = vadd.f32 %v8127_v30, %v680_v3  ;;  %v8415_v12 = vpop.f32.mrf.mxu3  ;;  %7096 = vrcp.f32 %v8436_v14  ;;  %vm1412_vm2 = vweird.f32 %v8436_v14 }
 0x155   : > { %12381 = vst [vmem:[#allocation58_spill] sm:$0xff] %v8415_v12  ;;  %v7089_v12 = vpop.eup %7088  ;;  %v8434_v53 = vpop.f32.mrf.mxu2 }
 0x156   : > { %12380 = vst [vmem:[#allocation57_spill] sm:$0xff] %v8413_v25  ;;  %6047 = vmatmul.msk.bf16.gmra.mxu0 %vm846_vm0, %v8410_v28  ;;  %v8429_v3 = vpop.f32.mrf.mxu1  ;;  %v7091_v36 = vpop.eup %7090  ;;  %v8503_v28 = vadd.f32 %v8127_v30, %v8098_v15 }
 0x157   : > { %12382 = vst [vmem:[#allocation59_spill] sm:$0xff] %v8429_v3  ;;  %v8444_v3 = vadd.f32 1.0, %v7089_v12  ;;  %v8447_v42 = vpop.eup %7092  ;;  %v8449_v19 = vadd.f32 1.0, %v7091_v36  ;;  %v1365_v12 = vmul.f32 %v8401_v22, %v1364_v41  ;;  %v1351_v36 = vadd.f32 %v8386_v47, %v1350_v23 }
 0x158   : > { %12384 = vst [vmem:[#allocation60_spill] sm:$0xff] %v8434_v53  ;;  %v1393_v41 = vmul.f32 %v8447_v42, %v8403_v2  ;;  %v1371_v23 = vand.u32 2147483647, %v8369_v7  ;;  %v8499_v53 = vadd.f32 %v8127_v30, %v8087_v8  ;;  %vm1398_vm13 = vweird.f32 %v8447_v42 }
 0x159   : > { %6275 = vmatmul.msk.bf16.gmra.mxu1 %vm846_vm0, %v7971_v29  ;;  %6471 = vmatmul.msk.bf16.gmra.mxu3 %vm846_vm0, %v6853_v34  ;;  %v1356_v29 = vand.u32 2147483647, %v8347_v37  ;;  %7098 = vrcp.f32 %v8444_v3  ;;  %v1366_v37 = vadd.f32 %v8401_v22, %v1365_v12  ;;  %12393 = vst [vmem:[#allocation66_spill] sm:$0xff] %v8503_v28  ;;  %v1355_v15 = vsel %vm8478_vm5, %v8386_v47, %v1351_v36  ;;  %vm8619_vm15 = vmor %vm1397_vm12, %vm1398_vm13 }
 0x15a   : > { %6437 = vmatmul.msk.bf16.gmra.mxu2 %vm846_vm0, %v6853_v34  ;;  %v12387_v34 = vsub.f32 %v8265_v33, %v8160_v54  ;;  %7100 = vrcp.f32 %v8449_v19  ;;  %v1373_v54 = vand.u32 2147483648, %v8369_v7  ;;  %v7095_v33 = vpop.eup %7094  ;;  %12392 = vst [vmem:[#allocation65_spill] sm:$0xff] %v8499_v53  ;;  %v1394_v12 = vsub.f32 1.0, %v1393_v41 }
 0x15b   : > { %v682_v6 = vpop.f32.mrf.mxu0  ;;  %vm8505_vm6 = vcmp.eq.f32.partialorder %v1356_v29, 8.507059e+37  ;;  %v1380_v29 = vmul.f32 %v8419_v62, %v1379_v44  ;;  %v8523_v28 = vpop.eup %7096  ;;  %vm8528_vm8 = vcmp.eq.f32.partialorder %v1371_v23, 8.507059e+37  ;;  %v8535_v47 = vadd.f32 1.0, %v7095_v33  ;;  %v6854_v33 = vld [vmem:[%s12165_s1 + $0x138] sm:$0xff] }
 0x15c   : > { %v8455_v11 = vadd.f32 %v8127_v30, %v682_v6  ;;  %v8457_v13 = vpop.f32.mrf.mxu3  ;;  %v6103_v6 = vmul.f32 -1.442695, %v12387_v34  ;;  %v8486_v34 = vadd.f32 %v8127_v30, %v8043_v51  ;;  %v1386_v23 = vand.u32 2147483647, %v8375_v20 }
 0x15d   : > { %12386 = vst [vmem:[#allocation62_spill] sm:$0xff] %v8457_v13  ;;  %v8490_v13 = vadd.f32 %v8127_v30, %v8061_v59  ;;  %v1359_v59 = vor.u32 1.1754944e-38, %v1358_v49  ;;  %v8517_v8 = vpop.f32.mrf.mxu2  ;;  %v12399_v49 = vsub.f32 %v8283_v17, %v8182_v31  ;;  %v1370_v31 = vsel %vm8513_vm7, %v8401_v22, %v1366_v37 }
 0x15e   : > { %12385 = vst [vmem:[#allocation61_spill] sm:$0xff] %v8455_v11  ;;  %v8471_v27 = vpop.f32.mrf.mxu1  ;;  %7102 = vpow2.f32 %v6103_v6  ;;  %v1374_v6 = vor.u32 1.1754944e-38, %v1373_v54  ;;  %v1388_v22 = vand.u32 2147483648, %v8375_v20  ;;  %v1381_v24 = vadd.f32 %v8419_v62, %v1380_v29 }
 0x15f   : > { %12388 = vst [vmem:[#allocation63_spill] sm:$0xff] %v8471_v27  ;;  %v8494_v27 = vadd.f32 %v8127_v30, %v8071_v0  ;;  %v6104_v7 = vmul.f32 -1.442695, %v12399_v49  ;;  %v1395_v0 = vmul.f32 %v8447_v42, %v1394_v12  ;;  %v1408_v51 = vmul.f32 %v8523_v28, %v8436_v14 }
 0x160   : > { %12398 = vst [vmem:[#allocation67_spill] sm:$0xff] %v8517_v8  ;;  %v8533_v8 = vpop.eup %7098  ;;  %vm8598_vm14 = vcmp.eq.f32.partialorder %v1386_v23, 8.507059e+37  ;;  %vm1413_vm3 = vweird.f32 %v8523_v28  ;;  %vm1427_vm5 = vweird.f32 %v8444_v3  ;;  %vm1442_vm7 = vweird.f32 %v8449_v19 }
 0x161   : > { %12391 = vst [vmem:[#allocation64_spill] sm:$0xff] %v8494_v27  ;;  %v8546_v41 = vpop.eup %7100  ;;  %7104 = vpow2.f32 %v6104_v7  ;;  %v1401_v27 = vand.u32 2147483647, %v8403_v2  ;;  %v1389_v7 = vor.u32 1.1754944e-38, %v1388_v22  ;;  %v1396_v54 = vadd.f32 %v8447_v42, %v1395_v0  ;;  %vm8687_vm9 = vmor %vm1412_vm2, %vm1413_vm3 }
 0x162   : > { %7106 = vrcp.f32 %v8535_v47  ;;  %v1438_v12 = vmul.f32 %v8546_v41, %v8449_v19  ;;  %v1416_v22 = vand.u32 2147483647, %v8436_v14  ;;  %v12412_v0 = vsub.f32 %v8299_v63, %v8197_v57 }
 0x163   : > { %v685_v53 = vpop.f32.mrf.mxu0  ;;  %vm8634_vm1 = vcmp.eq.f32.partialorder %v1401_v27, 8.507059e+37 }
 0x164   : > { %v8538_v36 = vadd.f32 %v8127_v30, %v685_v53  ;;  %v8540_v44 = vpop.f32.mrf.mxu3  ;;  %v8557_v53 = vsel %vm8505_vm6, %v1359_v59, %v1355_v15  ;;  %v8573_v59 = vsel %vm8528_vm8, %v1374_v6, %v1370_v31  ;;  %v7103_v29 = vpop.eup %7102  ;;  %v1403_v6 = vand.u32 2147483648, %v8403_v2 }
 0x165   : > { %12403 = vst [vmem:[#allocation69_spill] sm:$0xff] %v8540_v44  ;;  %v8596_v20 = vmul.f32 %v8557_v53, %v8031_v46  ;;  %v1385_v31 = vsel %vm8579_vm11, %v8419_v62, %v1381_v24  ;;  %v8608_v44 = vadd.f32 1.0, %v7103_v29  ;;  %v8613_v23 = vmul.f32 %v8573_v59, %v8038_v48  ;;  %v8632_v15 = vpop.f32.mrf.mxu2 }
 0x166   : > { %12402 = vst [vmem:[#allocation68_spill] sm:$0xff] %v8538_v36  ;;  %v8563_v37 = vpop.f32.mrf.mxu1  ;;  %6073 = vmatmul.msk.bf16.vlgmr.msra.gmra.mxu0 %vm846_vm0, %v8296_v16  ;;  %v1423_v16 = vmul.f32 %v8533_v8, %v8444_v3  ;;  %v1439_v29 = vsub.f32 1.0, %v1438_v12  ;;  %v8643_v57 = vsel %vm8598_vm14, %v1389_v7, %v1385_v31  ;;  %v1400_v12 = vsel %vm8619_vm15, %v8447_v42, %v1396_v54 }
 0x167   : > { %12404 = vst [vmem:[#allocation70_spill] sm:$0xff] %v8563_v37  ;;  %v1418_v37 = vand.u32 2147483648, %v8436_v14  ;;  %v7105_v17 = vpop.eup %7104  ;;  %7108 = vrcp.f32 %v8608_v44  ;;  %vm8660_vm4 = vcmp.eq.f32.partialorder %v1416_v22, 8.507059e+37  ;;  %v12421_v54 = vsub.f32 %v8353_v56, %v8229_v50 }
 0x168   : > { %12409 = vst [vmem:[#allocation71_spill] sm:$0xff] %v8613_v23  ;;  %v1424_v24 = vsub.f32 1.0, %v1423_v16  ;;  %v12417_v16 = vsub.f32 %v8328_v60, %v8215_v40  ;;  %v8666_v31 = vadd.f32 1.0, %v7105_v17  ;;  %v1440_v42 = vmul.f32 %v8546_v41, %v1439_v29 }
 0x169   : > { %6276 = vmatmul.msk.bf16.gmra.mxu1 %vm846_vm0, %v7984_v32  ;;  %6472 = vmatmul.msk.bf16.gmra.mxu3 %vm846_vm0, %v6854_v33  ;;  %v1409_v32 = vsub.f32 1.0, %v1408_v51  ;;  %v6105_v51 = vmul.f32 -1.442695, %v12412_v0  ;;  %v8646_v0 = vpop.eup %7106  ;;  %vm1428_vm6 = vweird.f32 %v8533_v8  ;;  %v1431_v17 = vand.u32 2147483647, %v8444_v3 }
 0x16a   : > { %6438 = vmatmul.msk.bf16.gmra.mxu2 %vm846_vm0, %v6854_v33  ;;  %v6106_v23 = vmul.f32 -1.442695, %v12417_v16  ;;  %v8656_v16 = vor.u32 1.1754944e-38, %v1418_v37  ;;  %v1425_v7 = vmul.f32 %v8533_v8, %v1424_v24  ;;  %v6107_v37 = vmul.f32 -1.442695, %v12421_v54  ;;  %vm8707_vm10 = vmor %vm1427_vm5, %vm1428_vm6 }
 0x16b   : > { %v687_v46 = vpop.f32.mrf.mxu0  ;;  %v1410_v40 = vmul.f32 %v8523_v28, %v1409_v32  ;;  %7110 = vpow2.f32 %v6105_v51  ;;  %v1453_v32 = vmul.f32 %v8646_v0, %v8535_v47  ;;  %vm1443_vm8 = vweird.f32 %v8546_v41 }
 0x16c   : > { %v8628_v33 = vadd.f32 %v8127_v30, %v687_v46  ;;  %v8630_v48 = vpop.f32.mrf.mxu3  ;;  %v1404_v46 = vor.u32 1.1754944e-38, %v1403_v6  ;;  %v1433_v6 = vand.u32 2147483648, %v8444_v3  ;;  %7112 = vpow2.f32 %v6106_v23  ;;  %vm8728_vm11 = vmor %vm1442_vm7, %vm1443_vm8 }
 0x16d   : > { %12414 = vst [vmem:[#allocation73_spill] sm:$0xff] %v8630_v48  ;;  %v1411_v62 = vadd.f32 %v8523_v28, %v1410_v40  ;;  %v12422_v23 = vsub.f32 %v8382_v26, %v8247_v43  ;;  %v1426_v51 = vadd.f32 %v8533_v8, %v1425_v7  ;;  %v1446_v29 = vand.u32 2147483647, %v8449_v19  ;;  %v8738_v2 = vpop.f32.mrf.mxu2 }
 0x16e   : > { %12413 = vst [vmem:[#allocation72_spill] sm:$0xff] %v8628_v33  ;;  %v8650_v48 = vpop.f32.mrf.mxu1  ;;  %v1448_v40 = vand.u32 2147483648, %v8449_v19  ;;  %7114 = vrcp.f32 %v8666_v31  ;;  %v12425_v43 = vsub.f32 %v8413_v25, %v8261_v58  ;;  %v1441_v27 = vadd.f32 %v8546_v41, %v1440_v42 }
 0x16f   : > { %12418 = vst [vmem:[#allocation74_spill] sm:$0xff] %v8650_v48  ;;  %v6108_v22 = vmul.f32 -1.442695, %v12422_v23  ;;  %v8712_v48 = vpop.eup %7108  ;;  %7116 = vpow2.f32 %v6107_v37  ;;  %v12430_v58 = vsub.f32 %v8455_v11, %v8276_v38  ;;  %v8722_v3 = vsel %vm8634_vm1, %v1404_v46, %v1400_v12 }
 0x170   : > { %v6109_v54 = vmul.f32 -1.442695, %v12425_v43  ;;  %v6855_v43 = vld [vmem:[%s12165_s1 + $0x140] sm:$0xff]  ;;  %v1454_v37 = vsub.f32 1.0, %v1453_v32  ;;  %v1415_v19 = vsel %vm8687_vm9, %v8523_v28, %v1411_v62  ;;  %vm8743_vm12 = vcmp.eq.f32.partialorder %v1431_v17, 8.507059e+37 }
 0x171   : > { %v1434_v12 = vor.u32 1.1754944e-38, %v1433_v6  ;;  %7118 = vpow2.f32 %v6108_v22  ;;  %v8754_v50 = vmul.f32 %v8643_v57, %v8053_v55  ;;  %v1445_v28 = vsel %vm8728_vm11, %v8546_v41, %v1441_v27 }
 0x172   : > { %7120 = vpow2.f32 %v6109_v54  ;;  %vm8759_vm13 = vcmp.eq.f32.partialorder %v1446_v29, 8.507059e+37  ;;  %v1468_v55 = vmul.f32 %v8712_v48, %v8608_v44  ;;  %v8777_v27 = vmul.f32 %v8722_v3, %v8066_v61 }
 0x173   : > { %v690_v24 = vpop.f32.mrf.mxu0  ;;  %v8782_v22 = vsel %vm8660_vm4, %v8656_v16, %v1415_v19  ;;  %v12439_v29 = vsub.f32 %v8538_v36, %v8291_v39  ;;  %vm1457_vm14 = vweird.f32 %v8535_v47  ;;  %v1463_v16 = vand.u32 2147483648, %v8535_v47 }
 0x174   : > { %v8699_v23 = vadd.f32 %v8127_v30, %v690_v24  ;;  %v8701_v14 = vpop.f32.mrf.mxu3  ;;  %v6110_v24 = vmul.f32 -1.442695, %v12430_v58  ;;  %v12440_v49 = vsub.f32 %v8628_v33, %v8315_v9  ;;  %vm1458_vm15 = vweird.f32 %v8646_v0 }
 0x175   : > { %12427 = vst [vmem:[#allocation76_spill] sm:$0xff] %v8701_v14  ;;  %v7111_v14 = vpop.eup %7110  ;;  %vm8835_vm1 = vmor %vm1457_vm14, %vm1458_vm15  ;;  %vm1472_vm3 = vweird.f32 %v8608_v44  ;;  %vm1473_vm4 = vweird.f32 %v8712_v48  ;;  %vm1487_vm5 = vweird.f32 %v8666_v31 }
 0x176   : > { %12426 = vst [vmem:[#allocation75_spill] sm:$0xff] %v8699_v23  ;;  %v1121_v38 = vsub.f32 %v8699_v23, %v8339_v52  ;;  %6074 = vmatmul.msk.bf16.gmra.mxu0 %vm846_vm0, %v8345_v1  ;;  %v8736_v58 = vpop.f32.mrf.mxu1  ;;  %v7113_v32 = vpop.eup %7112  ;;  %v1430_v1 = vsel %vm8707_vm10, %v8533_v8, %v1426_v51  ;;  %v1449_v23 = vor.u32 1.1754944e-38, %v1448_v40  ;;  %v8763_v62 = vadd.f32 1.0, %v7111_v14  ;;  %vm8906_vm7 = vmor %vm1472_vm3, %vm1473_vm4 }
 0x177   : > { %v2222_v52 = vsub.f32 %v8486_v34, %v8736_v58  ;;  %7122 = vpow2.f32 %v6110_v24  ;;  %v1455_v8 = vmul.f32 %v8646_v0, %v1454_v37  ;;  %v8771_v17 = vpop.eup %7114  ;;  %v8773_v41 = vadd.f32 1.0, %v7113_v32 }
 0x178   : > { %12437 = vst [vmem:[#allocation77_spill] sm:$0xff] %v8763_v62  ;;  %v7117_v51 = vpop.eup %7116  ;;  %v6111_v40 = vmul.f32 -1.442695, %v12439_v29  ;;  %v8794_v61 = vsel %vm8759_vm13, %v1449_v23, %v1445_v28  ;;  %v6112_v14 = vmul.f32 -1.442695, %v12440_v49  ;;  %7124 = vrcp.f32 %v8763_v62 }
 0x179   : > { %6277 = vmatmul.msk.bf16.gmra.mxu1 %vm846_vm0, %v7997_v35  ;;  %6473 = vmatmul.msk.bf16.gmra.mxu3 %vm846_vm0, %v6855_v43  ;;  %12438 = vst [vmem:[#allocation78_spill] sm:$0xff] %v8773_v41  ;;  %v8786_v35 = vsel %vm8743_vm12, %v1434_v12, %v1430_v1  ;;  %v1461_v24 = vand.u32 2147483647, %v8535_v47  ;;  %v8809_v42 = vadd.f32 %v8646_v0, %v1455_v8  ;;  %v1469_v37 = vsub.f32 1.0, %v1468_v55  ;;  %v8821_v55 = vpop.f32.mrf.mxu2 }
 0x17a   : > { %6439 = vmatmul.msk.bf16.gmra.mxu2 %vm846_vm0, %v6855_v43  ;;  %v7119_v43 = vpop.eup %7118  ;;  %7126 = vrcp.f32 %v8773_v41  ;;  %v8812_v9 = vadd.f32 1.0, %v7117_v51  ;;  %v1483_v12 = vmul.f32 %v8771_v17, %v8666_v31  ;;  %v6113_v1 = vmul.f32 -1.442695, %v1121_v38 }
 0x17b   : > { %v692_v54 = vpop.f32.mrf.mxu0  ;;  %v7121_v58 = vpop.eup %7120  ;;  %7128 = vpow2.f32 %v6111_v40  ;;  %v8819_v8 = vadd.f32 1.0, %v7119_v43  ;;  %v8825_v51 = vmul.f32 %v8782_v22, %v8081_v5  ;;  %v8843_v40 = vmul.f32 %v8794_v61, %v8109_v21 }
 0x17c   : > { %v8802_v7 = vadd.f32 %v8127_v30, %v692_v54  ;;  %v3267_v39 = vpop.f32.mrf.mxu3  ;;  %12442 = vst [vmem:[#allocation80_spill] sm:$0xff] %v8812_v9  ;;  %7130 = vpow2.f32 %v6112_v14  ;;  %v8839_v29 = vadd.f32 1.0, %v7121_v58  ;;  %v1464_v5 = vor.u32 1.1754944e-38, %v1463_v16 }
 0x17d   : > { %v3347_v23 = vsub.f32 %v8486_v34, %v3267_v39  ;;  %v7123_v32 = vpop.eup %7122  ;;  %12443 = vst [vmem:[#allocation81_spill] sm:$0xff] %v8819_v8  ;;  %vm8848_vm2 = vcmp.eq.f32.partialorder %v1461_v24, 8.507059e+37  ;;  %v1484_v47 = vsub.f32 1.0, %v1483_v12  ;;  %v6285_v14 = vmul.f32 -1.442695, %v2222_v52 }
 0x17e   : > { %12441 = vst [vmem:[#allocation79_spill] sm:$0xff] %v8802_v7  ;;  %v1122_v19 = vsub.f32 %v8802_v7, %v8366_v4  ;;  %v2144_v46 = vpop.f32.mrf.mxu1  ;;  %v8829_v4 = vmul.f32 %v8786_v35, %v8092_v10  ;;  %v8846_v10 = vadd.f32 1.0, %v7123_v32  ;;  %v8852_v49 = vpop.eup %7124  ;;  %v1460_v21 = vsel %vm8835_vm1, %v8646_v0, %v8809_v42  ;;  %v6856_v0 = vld [vmem:[%s12165_s1 + $0x148] sm:$0xff] }
 0x17f   : > { %v6481_v28 = vmul.f32 -1.442695, %v3347_v23  ;;  %v2223_v6 = vsub.f32 %v8490_v13, %v2144_v46  ;;  %12446 = vst [vmem:[#allocation82_spill] sm:$0xff] %v8839_v29  ;;  %v1470_v16 = vmul.f32 %v8712_v48, %v1469_v37  ;;  %v1478_v46 = vand.u32 2147483648, %v8608_v44 }
 0x180   : > { %12447 = vst [vmem:[#allocation83_spill] sm:$0xff] %v8846_v10  ;;  %v8859_v43 = vpop.eup %7126  ;;  %v6114_v24 = vmul.f32 -1.442695, %v1122_v19  ;;  %v12453_v19 = vld [vmem:[#allocation56_spill] sm:$0xff]  ;;  %vm1488_vm6 = vweird.f32 %v8771_v17 }
 0x181   : > { %7132 = vpow2.f32 %v6481_v28  ;;  %12450 = vst [vmem:[#allocation84_spill] sm:$0xff] %v8852_v49  ;;  %v7129_v52 = vpop.eup %7128  ;;  %v6286_v38 = vmul.f32 -1.442695, %v2223_v6  ;;  %v7648_v6 = vld [vmem:[%s12165_s1 + $0xc8] sm:$0xff]  ;;  %vm8923_vm8 = vmor %vm1487_vm5, %vm1488_vm6 }
 0x182   : > { %7134 = vrcp.f32 %v8812_v9  ;;  %12451 = vst [vmem:[#allocation85_spill] sm:$0xff] %v8859_v43  ;;  %v7131_v42 = vpop.eup %7130 }
 0x183   : > { %7136 = vpow2.f32 %v6113_v1  ;;  %v695_v39 = vpop.f32.mrf.mxu0  ;;  %v1485_v1 = vmul.f32 %v8771_v17, %v1484_v47  ;;  %v1471_v47 = vadd.f32 %v8712_v48, %v1470_v16  ;;  %v1493_v16 = vand.u32 2147483648, %v8666_v31 }
 0x184   : > { %7138 = vrcp.f32 %v8819_v8  ;;  %v8863_v23 = vadd.f32 %v8127_v30, %v695_v39  ;;  %v3269_v58 = vpop.f32.mrf.mxu3  ;;  %v12481_v8 = vld [vmem:[#allocation21_spill] sm:$0xff] }
 0x185   : > { %7140 = vrcp.f32 %v8839_v29  ;;  %v3348_v12 = vsub.f32 %v8490_v13, %v3269_v58  ;;  %v12454_v58 = vld [vmem:[#allocation64_spill] sm:$0xff] }
 0x186   : > { %12452 = vst [vmem:[#allocation86_spill] sm:$0xff] %v8863_v23  ;;  %7142 = vrcp.f32 %v8846_v10  ;;  %v1123_v37 = vsub.f32 %v8863_v23, %v8398_v45  ;;  %6075 = vmatmul.msk.bf16.gmra.mxu0 %vm846_vm0, %v12453_v19  ;;  %v2147_v32 = vpop.f32.mrf.mxu1  ;;  %v8883_v10 = vadd.f32 1.0, %v7129_v52  ;;  %v8888_v23 = vadd.f32 1.0, %v7131_v42  ;;  %v12470_v42 = vld [vmem:[#allocation65_spill] sm:$0xff] }
 0x187   : > { %v7133_v28 = vpop.eup %7132  ;;  %7144 = vpow2.f32 %v6285_v14  ;;  %v6482_v39 = vmul.f32 -1.442695, %v3348_v12  ;;  %v2224_v7 = vsub.f32 %v12454_v58, %v2147_v32  ;;  %v1476_v14 = vand.u32 2147483647, %v8608_v44  ;;  %v8900_v12 = vpop.f32.mrf.mxu2 }
 0x188   : > { %v8881_v29 = vpop.eup %7134  ;;  %12456 = vst [vmem:[#allocation64_spill] sm:$0xff] %v8883_v10  ;;  %7146 = vpow2.f32 %v6114_v24  ;;  %v8885_v45 = vadd.f32 1.0, %v7133_v28  ;;  %v6115_v52 = vmul.f32 -1.442695, %v1123_v37  ;;  %v1486_v32 = vadd.f32 %v8771_v17, %v1485_v1 }
 0x189   : > { %12455 = vst [vmem:[#allocation56_spill] sm:$0xff] %v8881_v29  ;;  %v7137_v19 = vpop.eup %7136  ;;  %7148 = vpow2.f32 %v6482_v39  ;;  %6278 = vmatmul.msk.bf16.gmra.mxu1 %vm846_vm0, %v7648_v6  ;;  %6474 = vmatmul.msk.bf16.gmra.mxu3 %vm846_vm0, %v6856_v0  ;;  %v6287_v39 = vmul.f32 -1.442695, %v2224_v7  ;;  %v8917_v37 = vsel %vm8848_vm2, %v1464_v5, %v1460_v21  ;;  %v1491_v1 = vand.u32 2147483647, %v8666_v31 }
 0x18a   : > { %12457 = vst [vmem:[#allocation87_spill] sm:$0xff] %v8888_v23  ;;  %v8897_v24 = vpop.eup %7138  ;;  %7150 = vrcp.f32 %v8885_v45  ;;  %6440 = vmatmul.msk.bf16.gmra.mxu2 %vm846_vm0, %v6856_v0  ;;  %v8931_v7 = vadd.f32 1.0, %v7137_v19  ;;  %v1479_v21 = vor.u32 1.1754944e-38, %v1478_v46  ;;  %v1475_v31 = vsel %vm8906_vm7, %v8712_v48, %v1471_v47  ;;  %v6857_v47 = vld [vmem:[%s12165_s1 + $0x150] sm:$0xff] }
 0x18b   : > { %12458 = vst [vmem:[#allocation88_spill] sm:$0xff] %v8897_v24  ;;  %v8912_v28 = vpop.eup %7140  ;;  %7152 = vpow2.f32 %v6286_v38  ;;  %v697_v6 = vpop.f32.mrf.mxu0  ;;  %vm8941_vm9 = vcmp.eq.f32.partialorder %v1476_v14, 8.507059e+37  ;;  %v1490_v46 = vsel %vm8923_vm8, %v8771_v17, %v1486_v32  ;;  %vm8951_vm10 = vcmp.eq.f32.partialorder %v1491_v1, 8.507059e+37 }
 0x18c   : > { %12461 = vst [vmem:[#allocation89_spill] sm:$0xff] %v8912_v28  ;;  %v8928_v28 = vpop.eup %7142  ;;  %7154 = vrcp.f32 %v8883_v10  ;;  %v8934_v54 = vadd.f32 %v8127_v30, %v697_v6  ;;  %v3272_v5 = vpop.f32.mrf.mxu3  ;;  %v12469_v10 = vld [vmem:[#allocation60_spill] sm:$0xff]  ;;  %vm3512_vm11 = vweird.f32 %v8885_v45 }
 0x18d   : > { %12464 = vst [vmem:[#allocation90_spill] sm:$0xff] %v8928_v28  ;;  %v7145_v0 = vpop.eup %7144  ;;  %7156 = vrcp.f32 %v8888_v23  ;;  %v3349_v38 = vsub.f32 %v12454_v58, %v3272_v5  ;;  %v1494_v23 = vor.u32 1.1754944e-38, %v1493_v16 }
 0x18e   : > { %12465 = vst [vmem:[#allocation91_spill] sm:$0xff] %v8931_v7  ;;  %v7147_v19 = vpop.eup %7146  ;;  %7158 = vpow2.f32 %v6115_v52  ;;  %v1124_v30 = vsub.f32 %v8934_v54, %v12469_v10  ;;  %v2149_v6 = vpop.f32.mrf.mxu1  ;;  %v8958_v10 = vadd.f32 1.0, %v7145_v0  ;;  %v3516_v0 = vand.u32 2147483647, %v8885_v45 }
 0x18f   : > { %12466 = vst [vmem:[#allocation92_spill] sm:$0xff] %v8934_v54  ;;  %v7149_v5 = vpop.eup %7148  ;;  %7160 = vpow2.f32 %v6287_v39  ;;  %v6483_v24 = vmul.f32 -1.442695, %v3349_v38  ;;  %v2225_v48 = vsub.f32 %v12470_v42, %v2149_v6  ;;  %v12473_v39 = vld [vmem:[#allocation12_spill] sm:$0xff]  ;;  %v8970_v6 = vadd.f32 1.0, %v7147_v19 }
 0x190   : > { %v8955_v14 = vpop.eup %7150  ;;  %7162 = vrcp.f32 %v8931_v7  ;;  %v8960_v52 = vadd.f32 1.0, %v7149_v5  ;;  %v6116_v44 = vmul.f32 -1.442695, %v1124_v30  ;;  %v8966_v1 = vmul.f32 %v8917_v37, %v12473_v39 }
 0x191   : > { %v7153_v17 = vpop.eup %7152  ;;  %7164 = vpow2.f32 %v6483_v24  ;;  %v6288_v32 = vmul.f32 -1.442695, %v2225_v48  ;;  %v3508_v16 = vmul.f32 %v8955_v14, %v8885_v45  ;;  %12475 = vst [vmem:[#allocation65_spill] sm:$0xff] %v8970_v6  ;;  %v3518_v30 = vand.u32 2147483648, %v8885_v45 }
 0x192   : > { %v8968_v38 = vpop.eup %7154  ;;  %7166 = vrcp.f32 %v8960_v52  ;;  %v8979_v39 = vsel %vm8941_vm9, %v1479_v21, %v1475_v31  ;;  %v8983_v19 = vsel %vm8951_vm10, %v1494_v23, %v1490_v46  ;;  %v8986_v54 = vadd.f32 1.0, %v7153_v17  ;;  %v8997_v21 = vpop.f32.mrf.mxu2  ;;  %v6888_v23 = vld [vmem:[%s7883_s25 + $0x48] sm:$0xff] }
 0x193   : > { %12474 = vst [vmem:[#allocation60_spill] sm:$0xff] %v8968_v38  ;;  %v8975_v24 = vpop.eup %7156  ;;  %7168 = vpow2.f32 %v6116_v44  ;;  %v700_v5 = vpop.f32.mrf.mxu0  ;;  %v3509_v48 = vsub.f32 1.0, %v3508_v16  ;;  %vm3513_vm12 = vweird.f32 %v8955_v14  ;;  %vm9013_vm13 = vcmp.eq.f32.partialorder %v3516_v0, 8.507059e+37  ;;  %4390 = vmatpush.bf16.msra.mxu1 %v6888_v23 }
 0x194   : > { %12476 = vst [vmem:[#allocation12_spill] sm:$0xff] %v8975_v24  ;;  %v7159_v7 = vpop.eup %7158  ;;  %7170 = vrcp.f32 %v8958_v10  ;;  %v8991_v24 = vld [vmem:[%s12169_s5] ss:$0 sm:$0xff]  ;;  %v3274_v28 = vpop.f32.mrf.mxu3  ;;  %v3519_v33 = vor.u32 1.1754944e-38, %v3518_v30  ;;  %vm3514_vm14 = vmor %vm3512_vm11, %vm3513_vm12  ;;  %vm3527_vm15 = vweird.f32 %v8960_v52  ;;  %vm2387_vm11 = vweird.f32 %v8958_v10 }
 0x195   : > { %12477 = vst [vmem:[#allocation93_spill] sm:$0xff] %v8986_v54  ;;  %v8994_v44 = vadd.f32 %v8991_v24, %v700_v5  ;;  %v7161_v31 = vpop.eup %7160  ;;  %7172 = vpow2.f32 %v6288_v32  ;;  %v3350_v46 = vsub.f32 %v12470_v42, %v3274_v28  ;;  %v3510_v17 = vmul.f32 %v8955_v14, %v3509_v48  ;;  %v12480_v5 = vld [vmem:[#allocation67_spill] sm:$0xff] }
 0x196   : > { %v9006_v16 = vpop.eup %7162  ;;  %7174 = vrcp.f32 %v8970_v6  ;;  %6235 = vmatmul.msk.bf16.vlgmr.msrb.gmra.mxu0 %vm846_vm0, %v12481_v8  ;;  %v2152_v32 = vpop.f32.mrf.mxu1  ;;  %v9017_v29 = vadd.f32 1.0, %v7159_v7  ;;  %v9024_v8 = vadd.f32 1.0, %v7161_v31  ;;  %v3531_v7 = vand.u32 2147483647, %v8960_v52 }
 0x197   : > { %12478 = vst [vmem:[#allocation94_spill] sm:$0xff] %v8994_v44  ;;  %v1125_v38 = vsub.f32 %v8994_v44, %v12480_v5  ;;  %v7165_v48 = vpop.eup %7164  ;;  %v6484_v9 = vmul.f32 -1.442695, %v3350_v46  ;;  %v3511_v6 = vadd.f32 %v8955_v14, %v3510_v17  ;;  %7176 = vrcp.f32 %v8986_v54  ;;  %v7650_v46 = vld [vmem:[%s12165_s1 + $0xd0] sm:$0xff] }
 0x198   : > { %12479 = vst [vmem:[#allocation95_spill] sm:$0xff] %v9006_v16  ;;  %v12485_v16 = vld [vmem:[#allocation66_spill] sm:$0xff]  ;;  %v9021_v43 = vpop.eup %7166  ;;  %v9026_v0 = vadd.f32 1.0, %v7165_v48  ;;  %vm9064_vm1 = vcmp.eq.f32.partialorder %v3531_v7, 8.507059e+37 }
 0x199   : > { %12484 = vst [vmem:[#allocation67_spill] sm:$0xff] %v9017_v29  ;;  %v2226_v36 = vsub.f32 %v12485_v16, %v2152_v32  ;;  %v7169_v30 = vpop.eup %7168  ;;  %v6117_v23 = vmul.f32 -1.442695, %v1125_v38  ;;  %7178 = vpow2.f32 %v6484_v9  ;;  %6279 = vmatmul.msk.bf16.gmra.mxu1 %vm846_vm0, %v7650_v46  ;;  %6475 = vmatmul.msk.bf16.gmra.mxu3 %vm846_vm0, %v6857_v47  ;;  %v3515_v31 = vsel %vm3514_vm14, %v8955_v14, %v3511_v6 }
 0x19a   : > { %12486 = vst [vmem:[#allocation21_spill] sm:$0xff] %v9024_v8  ;;  %v3523_v17 = vmul.f32 %v9021_v43, %v8960_v52  ;;  %v9041_v45 = vpop.eup %7170  ;;  %v9043_v5 = vadd.f32 1.0, %v7169_v30  ;;  %7180 = vrcp.f32 %v9026_v0  ;;  %v9048_v9 = vsel %vm9013_vm13, %v3519_v33, %v3515_v31  ;;  %6441 = vmatmul.msk.bf16.gmra.mxu2 %vm846_vm0, %v6857_v47  ;;  %v6906_v47 = vld [vmem:[%s12171_s7 + $0x38] sm:$0xff] }
 0x19b   : > { %12488 = vst [vmem:[#allocation96_spill] sm:$0xff] %v9048_v9  ;;  %v3533_v38 = vand.u32 2147483648, %v8960_v52  ;;  %v7173_v32 = vpop.eup %7172  ;;  %7182 = vrcp.f32 %v9017_v29  ;;  %v9054_v14 = vmul.f32 %v9048_v9, %v8900_v12  ;;  %v702_v6 = vpop.f32.mrf.mxu0  ;;  %v6289_v33 = vmul.f32 -1.442695, %v2226_v36  ;;  %v6898_v36 = vld [vmem:[%s12170_s6 + $0x38] sm:$0xff]  ;;  %5368 = vmatpush.bf16.msra.mxu2 %v6906_v47  ;;  %v12499_v52 = vld [vmem:[#allocation15_spill] sm:$0xff] }
 0x19c   : > { %12487 = vst [vmem:[#allocation66_spill] sm:$0xff] %v9043_v5  ;;  %v3524_v48 = vsub.f32 1.0, %v3523_v17  ;;  %v9058_v30 = vpop.eup %7174  ;;  %7184 = vrcp.f32 %v9024_v8  ;;  %v9062_v28 = vadd.f32 %v8991_v24, %v702_v6  ;;  %v3277_v46 = vpop.f32.mrf.mxu3  ;;  %vm3528_vm2 = vweird.f32 %v9021_v43  ;;  %5505 = vmatpush.bf16.msra.mxu3 %v6898_v36 }
 0x19d   : > { %12489 = vst [vmem:[#allocation97_spill] sm:$0xff] %v9054_v14  ;;  %7186 = vpow2.f32 %v6117_v23  ;;  %v3351_v12 = vsub.f32 %v12485_v16, %v3277_v46  ;;  %v9077_v6 = vpop.eup %7176  ;;  %v9080_v7 = vadd.f32 1.0, %v7173_v32  ;;  %v3534_v46 = vor.u32 1.1754944e-38, %v3533_v38  ;;  %v9084_v9 = vpop.f32.mrf.mxu2  ;;  %vm3529_vm3 = vmor %vm3527_vm15, %vm3528_vm2 }
 0x19e   : > { %12490 = vst [vmem:[#allocation98_spill] sm:$0xff] %v9058_v30  ;;  %v3525_v17 = vmul.f32 %v9021_v43, %v3524_v48  ;;  %7188 = vrcp.f32 %v9043_v5  ;;  %v1126_v23 = vsub.f32 %v9062_v28, %v8632_v15  ;;  %v2154_v48 = vpop.f32.mrf.mxu1  ;;  %v3546_v8 = vand.u32 2147483647, %v9026_v0 }
 0x19f   : > { %12491 = vst [vmem:[#allocation99_spill] sm:$0xff] %v9062_v28  ;;  %v7179_v14 = vpop.eup %7178  ;;  %v6485_v29 = vmul.f32 -1.442695, %v3351_v12  ;;  %v2227_v30 = vsub.f32 %v8550_v18, %v2154_v48  ;;  %7190 = vpow2.f32 %v6289_v33  ;;  %v3548_v38 = vand.u32 2147483648, %v9026_v0  ;;  %v12500_v48 = vld [vmem:[#allocation18_spill] sm:$0xff]  ;;  %v12507_v28 = vld [vmem:[#allocation13_spill] sm:$0xff] }
 0x1a0   : > { %12494 = vst [vmem:[#allocation100_spill] sm:$0xff] %v9077_v6  ;;  %v3526_v44 = vadd.f32 %v9021_v43, %v3525_v17  ;;  %v9089_v5 = vpop.eup %7180  ;;  %v9091_v32 = vadd.f32 1.0, %v7179_v14  ;;  %v6118_v15 = vmul.f32 -1.442695, %v1126_v23  ;;  %v9112_v23 = vmul.f32 %v8979_v39, %v12499_v52 }
 0x1a1   : > { %12495 = vst [vmem:[#allocation101_spill] sm:$0xff] %v9080_v7  ;;  %v9098_v12 = vpop.eup %7182  ;;  %7192 = vpow2.f32 %v6485_v29  ;;  %v6290_v17 = vmul.f32 -1.442695, %v2227_v30  ;;  %v3538_v36 = vmul.f32 %v9089_v5, %v9026_v0  ;;  %v9116_v29 = vmul.f32 %v8983_v19, %v12500_v48 }
 0x1a2   : > { %12496 = vst [vmem:[#allocation102_spill] sm:$0xff] %v9098_v12  ;;  %v3530_v47 = vsel %vm3529_vm3, %v9021_v43, %v3526_v44  ;;  %v9103_v14 = vpop.eup %7184  ;;  %7194 = vrcp.f32 %v9091_v32  ;;  %vm3542_vm4 = vweird.f32 %v9026_v0  ;;  %vm9129_vm5 = vcmp.eq.f32.partialorder %v3546_v8, 8.507059e+37 }
 0x1a3   : > { %12497 = vst [vmem:[#allocation103_spill] sm:$0xff] %v9103_v14  ;;  %v9108_v33 = vsel %vm9064_vm1, %v3534_v46, %v3530_v47  ;;  %v7187_v43 = vpop.eup %7186  ;;  %7196 = vpow2.f32 %v6118_v15  ;;  %v705_v30 = vpop.f32.mrf.mxu0  ;;  %v3539_v12 = vsub.f32 1.0, %v3538_v36  ;;  %v3549_v15 = vor.u32 1.1754944e-38, %v3548_v38  ;;  %v6858_v36 = vld [vmem:[%s12165_s1 + $0x158] sm:$0xff]  ;;  %v7651_v38 = vld [vmem:[%s12165_s1 + $0x88] sm:$0xff] }
 0x1a4   : > { %12498 = vst [vmem:[#allocation104_spill] sm:$0xff] %v9108_v33  ;;  %v9120_v44 = vmul.f32 %v9108_v33, %v8997_v21  ;;  %v9123_v31 = vpop.eup %7188  ;;  %7198 = vrcp.f32 %v9080_v7  ;;  %v9127_v46 = vadd.f32 %v8991_v24, %v705_v30  ;;  %v3279_v47 = vpop.f32.mrf.mxu3  ;;  %vm3543_vm6 = vweird.f32 %v9089_v5 }
 0x1a5   : > { %12502 = vst [vmem:[#allocation18_spill] sm:$0xff] %v9123_v31  ;;  %7200 = vpow2.f32 %v6290_v17  ;;  %v3352_v21 = vsub.f32 %v8550_v18, %v3279_v47  ;;  %v3540_v48 = vmul.f32 %v9089_v5, %v3539_v12  ;;  %v7191_v33 = vpop.eup %7190  ;;  %v9139_v30 = vadd.f32 1.0, %v7187_v43  ;;  %vm9158_vm8 = vmor %vm3542_vm4, %vm3543_vm6  ;;  %v3160_v47 = vpop.f32.mrf.mxu2 }
 0x1a6   : > { %12501 = vst [vmem:[#allocation15_spill] sm:$0xff] %v9120_v44  ;;  %v1127_v8 = vsub.f32 %v9127_v46, %v8738_v2  ;;  %6236 = vmatmul.msk.bf16.gmra.mxu0 %vm846_vm0, %v7651_v38  ;;  %v2157_v17 = vpop.f32.mrf.mxu1  ;;  %vm3557_vm7 = vweird.f32 %v9091_v32  ;;  %v9176_v11 = vadd.f32 1.0, %v7191_v33  ;;  %vm2388_vm13 = vweird.f32 %v9041_v45 }
 0x1a7   : > { %12503 = vst [vmem:[#allocation105_spill] sm:$0xff] %v9127_v46  ;;  %v7193_v12 = vpop.eup %7192  ;;  %v6486_v31 = vmul.f32 -1.442695, %v3352_v21  ;;  %v2228_v7 = vsub.f32 %v12507_v28, %v2157_v17  ;;  %v3541_v43 = vadd.f32 %v9089_v5, %v3540_v48  ;;  %v3561_v21 = vand.u32 2147483647, %v9091_v32  ;;  %vm9271_vm2 = vmor %vm2387_vm11, %vm2388_vm13 }
 0x1a8   : > { %12506 = vst [vmem:[#allocation106_spill] sm:$0xff] %v9139_v30  ;;  %v7195_v2 = vpop.eup %7194  ;;  %v9152_v46 = vadd.f32 1.0, %v7193_v12  ;;  %v6119_v14 = vmul.f32 -1.442695, %v1127_v8  ;;  %v2383_v48 = vmul.f32 %v9041_v45, %v8958_v10  ;;  %v7652_v8 = vld [vmem:[%s12165_s1 + $0xd8] sm:$0xff] }
 0x1a9   : > { %v7197_v17 = vpop.eup %7196  ;;  %7202 = vpow2.f32 %v6486_v31  ;;  %v6291_v44 = vmul.f32 -1.442695, %v2228_v7  ;;  %6280 = vmatmul.msk.bf16.gmra.mxu1 %vm846_vm0, %v7652_v8  ;;  %6476 = vmatmul.msk.bf16.gmra.mxu3 %vm846_vm0, %v6858_v36  ;;  %v3545_v0 = vsel %vm9158_vm8, %v9089_v5, %v3541_v43  ;;  %v3553_v12 = vmul.f32 %v7195_v2, %v9091_v32  ;;  %12511 = vst [vmem:[#allocation108_spill] sm:$0xff] %v9176_v11 }
 0x1aa   : > { %v9174_v41 = vpop.eup %7198  ;;  %7204 = vrcp.f32 %v9152_v46  ;;  %v9181_v7 = vsel %vm9129_vm5, %v3549_v15, %v3545_v0  ;;  %v3563_v31 = vand.u32 2147483648, %v9091_v32  ;;  %v9184_v6 = vadd.f32 1.0, %v7197_v17  ;;  %6442 = vmatmul.msk.bf16.gmra.mxu2 %vm846_vm0, %v6858_v36 }
 0x1ab   : > { %12510 = vst [vmem:[#allocation107_spill] sm:$0xff] %v9174_v41  ;;  %v7201_v8 = vpop.eup %7200  ;;  %7206 = vpow2.f32 %v6119_v14  ;;  %v9188_v5 = vmul.f32 %v9181_v7, %v9084_v9  ;;  %v707_v43 = vpop.f32.mrf.mxu0  ;;  %v3554_v38 = vsub.f32 1.0, %v3553_v12  ;;  %v2384_v0 = vsub.f32 1.0, %v2383_v48  ;;  %v12519_v48 = vld [vmem:[#allocation16_spill] sm:$0xff] }
 0x1ac   : > { %12512 = vst [vmem:[#allocation109_spill] sm:$0xff] %v9181_v7  ;;  %7208 = vrcp.f32 %v9139_v30  ;;  %v9192_v33 = vadd.f32 1.0, %v7201_v8  ;;  %v9195_v52 = vadd.f32 %v8991_v24, %v707_v43  ;;  %v3282_v15 = vpop.f32.mrf.mxu3  ;;  %vm3558_vm9 = vweird.f32 %v7195_v2 }
 0x1ad   : > { %12513 = vst [vmem:[#allocation110_spill] sm:$0xff] %v9184_v6  ;;  %7210 = vpow2.f32 %v6291_v44  ;;  %v3353_v14 = vsub.f32 %v12507_v28, %v3282_v15  ;;  %v3555_v17 = vmul.f32 %v7195_v2, %v3554_v38  ;;  %vm9201_vm10 = vcmp.eq.f32.partialorder %v3561_v21, 8.507059e+37  ;;  %vm3559_vm12 = vmor %vm3557_vm7, %vm3558_vm9 }
 0x1ae   : > { %12514 = vst [vmem:[#allocation111_spill] sm:$0xff] %v9188_v5  ;;  %7212 = vrcp.f32 %v9176_v11  ;;  %v1128_v9 = vsub.f32 %v9195_v52, %v8821_v55  ;;  %v2159_v36 = vpop.f32.mrf.mxu1  ;;  %v3564_v8 = vor.u32 1.1754944e-38, %v3563_v31  ;;  %v2385_v31 = vmul.f32 %v9041_v45, %v2384_v0 }
 0x1af   : > { %12515 = vst [vmem:[#allocation112_spill] sm:$0xff] %v9192_v33  ;;  %v7203_v24 = vpop.eup %7202  ;;  %7214 = vrcp.f32 %v9184_v6  ;;  %v6487_v44 = vmul.f32 -1.442695, %v3353_v14  ;;  %v2229_v43 = vsub.f32 %v12519_v48, %v2159_v36  ;;  %v3556_v38 = vadd.f32 %v7195_v2, %v3555_v17 }
 0x1b0   : > { %12516 = vst [vmem:[#allocation113_spill] sm:$0xff] %v9195_v52  ;;  %v9208_v15 = vpop.eup %7204  ;;  %7216 = vrcp.f32 %v9192_v33  ;;  %v9211_v55 = vadd.f32 1.0, %v7203_v24  ;;  %v6120_v21 = vmul.f32 -1.442695, %v1128_v9  ;;  %v3163_v24 = vpop.f32.mrf.mxu2  ;;  %v3576_v32 = vand.u32 2147483647, %v9152_v46 }
 0x1b1   : > { %v7207_v28 = vpop.eup %7206  ;;  %7218 = vpow2.f32 %v6487_v44  ;;  %v6292_v7 = vmul.f32 -1.442695, %v2229_v43  ;;  %v3560_v14 = vsel %vm3559_vm12, %v7195_v2, %v3556_v38  ;;  %v3568_v17 = vmul.f32 %v9208_v15, %v9152_v46 }
 0x1b2   : > { %v9219_v36 = vpop.eup %7208  ;;  %7220 = vrcp.f32 %v9211_v55  ;;  %v9224_v9 = vsel %vm9201_vm10, %v3564_v8, %v3560_v14  ;;  %v3578_v0 = vand.u32 2147483648, %v9152_v46  ;;  %v9236_v12 = vadd.f32 1.0, %v7207_v28 }
 0x1b3   : > { %12520 = vst [vmem:[#allocation114_spill] sm:$0xff] %v9219_v36  ;;  %v7211_v5 = vpop.eup %7210  ;;  %7222 = vpow2.f32 %v6120_v21  ;;  %v9229_v2 = vmul.f32 %v9224_v9, %v3160_v47  ;;  %v9231_v44 = vpop.f32.mrf.mxu0  ;;  %v3569_v43 = vsub.f32 1.0, %v3568_v17  ;;  %vm3573_vm14 = vweird.f32 %v9208_v15  ;;  %v6859_v17 = vld [vmem:[%s12165_s1 + $0x160] sm:$0xff] }
 0x1b4   : > { %12521 = vst [vmem:[#allocation115_spill] sm:$0xff] %v9224_v9  ;;  %v9234_v38 = vpop.eup %7212  ;;  %v9238_v8 = vadd.f32 1.0, %v7211_v5  ;;  %v3284_v14 = vpop.f32.mrf.mxu3  ;;  %v9242_v6 = vadd.f32 %v9041_v45, %v2385_v31  ;;  %7224 = vpow2.f32 %v6292_v7  ;;  %v3591_v5 = vand.u32 2147483647, %v9211_v55  ;;  %v7653_v31 = vld [vmem:[%s12165_s1 + $0x90] sm:$0xff] }
 0x1b5   : > { %12522 = vst [vmem:[#allocation116_spill] sm:$0xff] %v9229_v2  ;;  %v9244_v21 = vpop.eup %7214  ;;  %v3354_v47 = vsub.f32 %v12519_v48, %v3284_v14  ;;  %v3570_v28 = vmul.f32 %v9208_v15, %v3569_v43  ;;  %vm3572_vm15 = vweird.f32 %v9152_v46  ;;  %vm9260_vm1 = vcmp.eq.f32.partialorder %v3576_v32, 8.507059e+37  ;;  %v6897_v14 = vld [vmem:[%s12170_s6 + $0x30] sm:$0xff] }
 0x1b6   : > { %12523 = vst [vmem:[#allocation117_spill] sm:$0xff] %v9231_v44  ;;  %v9252_v9 = vpop.eup %7216  ;;  %7226 = vrcp.f32 %v9238_v8  ;;  %6237 = vmatmul.msk.bf16.gmra.mxu0 %vm846_vm0, %v7653_v31  ;;  %v2162_v7 = vpop.f32.mrf.mxu1  ;;  %v3579_v43 = vor.u32 1.1754944e-38, %v3578_v0  ;;  %v3593_v52 = vand.u32 2147483648, %v9211_v55  ;;  %vm3574_vm3 = vmor %vm3572_vm15, %vm3573_vm14  ;;  %vm3587_vm4 = vweird.f32 %v9211_v55  ;;  %5506 = vmatpush.bf16.msra.mxu3 %v6897_v14 }
 0x1b7   : > { %12524 = vst [vmem:[#allocation118_spill] sm:$0xff] %v9234_v38  ;;  %v7219_v48 = vpop.eup %7218  ;;  %v6488_v2 = vmul.f32 -1.442695, %v3354_v47  ;;  %v3571_v30 = vadd.f32 %v9208_v15, %v3570_v28  ;;  %7228 = vrcp.f32 %v9236_v12  ;;  %vm9295_vm5 = vcmp.eq.f32.partialorder %v3591_v5, 8.507059e+37  ;;  %v6905_v38 = vld [vmem:[%s12171_s7 + $0x30] sm:$0xff] }
 0x1b8   : > { %12525 = vst [vmem:[#allocation119_spill] sm:$0xff] %v9236_v12  ;;  %v9275_v46 = vpop.eup %7220  ;;  %v9278_v32 = vadd.f32 1.0, %v7219_v48  ;;  %v3594_v33 = vor.u32 1.1754944e-38, %v3593_v52  ;;  %vm2477_vm6 = vweird.f32 %v9238_v8  ;;  %v12539_v52 = vand.u32 2147483648, %v8958_v10  ;;  %5369 = vmatpush.bf16.msra.mxu2 %v6905_v38 }
 0x1b9   : > { %12526 = vst [vmem:[#allocation120_spill] sm:$0xff] %v9244_v21  ;;  %v12530_v21 = vld [vmem:[#allocation19_spill] sm:$0xff]  ;;  %v7223_v47 = vpop.eup %7222  ;;  %7230 = vpow2.f32 %v6488_v2  ;;  %6477 = vmatmul.msk.bf16.gmra.mxu3 %vm846_vm0, %v6859_v17  ;;  %v3575_v48 = vsel %vm3574_vm3, %v9208_v15, %v3571_v30  ;;  %v3583_v12 = vmul.f32 %v9275_v46, %v9211_v55  ;;  %v2481_v2 = vand.u32 2147483647, %v9238_v8 }
 0x1ba   : > { %12527 = vst [vmem:[#allocation121_spill] sm:$0xff] %v9252_v9  ;;  %v2230_v36 = vsub.f32 %v12530_v21, %v2162_v7  ;;  %v7654_v7 = vld [vmem:[%s12165_s1 + $0xe0] sm:$0xff]  ;;  %7232 = vrcp.f32 %v9278_v32  ;;  %v7225_v0 = vpop.eup %7224  ;;  %6443 = vmatmul.msk.bf16.gmra.mxu2 %vm846_vm0, %v6859_v17  ;;  %vm3588_vm7 = vweird.f32 %v9275_v46  ;;  %vm3602_vm11 = vweird.f32 %v9278_v32 }
 0x1bb   : > { %6281 = vmatmul.msk.bf16.gmra.mxu1 %vm846_vm0, %v7654_v7  ;;  %v2483_v7 = vand.u32 2147483648, %v9238_v8  ;;  %v9309_v15 = vpop.f32.mrf.mxu0  ;;  %v3584_v5 = vsub.f32 1.0, %v3583_v12  ;;  %v9325_v12 = vor.u32 1.1754944e-38, %v12539_v52  ;;  %vm9334_vm8 = vcmp.eq.f32.partialorder %v2481_v2, 8.507059e+37  ;;  %vm3589_vm9 = vmor %vm3587_vm4, %vm3588_vm7 }
 0x1bc   : > { %v6293_v28 = vmul.f32 -1.442695, %v2230_v36  ;;  %v9302_v36 = vsel %vm9260_vm1, %v3579_v43, %v3575_v48  ;;  %12537 = vst [vmem:[#allocation124_spill] sm:$0xff] %v9309_v15  ;;  %v7227_v43 = vpop.eup %7226  ;;  %v9318_v48 = vadd.f32 1.0, %v7223_v47  ;;  %v3606_v15 = vand.u32 2147483647, %v9278_v32 }
 0x1bd   : > { %12535 = vst [vmem:[#allocation122_spill] sm:$0xff] %v9302_v36  ;;  %v9307_v30 = vmul.f32 %v9302_v36, %v3163_v24  ;;  %v3287_v24 = vpop.f32.mrf.mxu3  ;;  %v3165_v36 = vpop.f32.mrf.mxu2  ;;  %v3585_v41 = vmul.f32 %v9275_v46, %v3584_v5  ;;  %v2484_v52 = vor.u32 1.1754944e-38, %v2483_v7  ;;  %vm2478_vm10 = vweird.f32 %v7227_v43 }
 0x1be   : > { %7234 = vpow2.f32 %v6293_v28  ;;  %12538 = vst [vmem:[#allocation125_spill] sm:$0xff] %v9318_v48  ;;  %v9320_v28 = vadd.f32 1.0, %v7225_v0  ;;  %v3355_v11 = vsub.f32 %v12530_v21, %v3287_v24  ;;  %v9331_v17 = vpop.eup %7228  ;;  %v2164_v0 = vpop.f32.mrf.mxu1  ;;  %v12544_v21 = vld [vmem:[#allocation23_spill] sm:$0xff]  ;;  %v3608_v2 = vand.u32 2147483648, %v9278_v32  ;;  %vm2479_vm13 = vmor %vm2477_vm6, %vm2478_vm10 }
 0x1bf   : > { %12536 = vst [vmem:[#allocation123_spill] sm:$0xff] %v9307_v30  ;;  %v2473_v30 = vmul.f32 %v7227_v43, %v9238_v8  ;;  %v7231_v54 = vpop.eup %7230  ;;  %v2231_v5 = vsub.f32 %v12544_v21, %v2164_v0  ;;  %v3586_v44 = vadd.f32 %v9275_v46, %v3585_v41  ;;  %vm9367_vm12 = vcmp.eq.f32.partialorder %v3606_v15, 8.507059e+37 }
 0x1c0   : > { %12540 = vst [vmem:[#allocation126_spill] sm:$0xff] %v9325_v12  ;;  %7236 = vrcp.f32 %v9320_v28  ;;  %v6489_v24 = vmul.f32 -1.442695, %v3355_v11  ;;  %v9341_v14 = vpop.eup %7232  ;;  %v2496_v11 = vand.u32 2147483647, %v9320_v28  ;;  %vm2492_vm14 = vweird.f32 %v9320_v28 }
 0x1c1   : > { %12541 = vst [vmem:[#allocation127_spill] sm:$0xff] %v9331_v17  ;;  %v2474_v38 = vsub.f32 1.0, %v2473_v30  ;;  %v9343_v17 = vadd.f32 1.0, %v7231_v54  ;;  %v6294_v41 = vmul.f32 -1.442695, %v2231_v5  ;;  %v3590_v30 = vsel %vm3589_vm9, %v9275_v46, %v3586_v44 }
 0x1c2   : > { %7238 = vpow2.f32 %v6489_v24  ;;  %v9358_v55 = vsel %vm9295_vm5, %v3594_v33, %v3590_v30  ;;  %v3598_v49 = vmul.f32 %v9341_v14, %v9278_v32  ;;  %vm3603_vm15 = vweird.f32 %v9341_v14 }
 0x1c3   : > { %v2475_v0 = vmul.f32 %v7227_v43, %v2474_v38  ;;  %7240 = vrcp.f32 %v9343_v17  ;;  %12545 = vst [vmem:[#allocation128_spill] sm:$0xff] %v9358_v55  ;;  %v9363_v62 = vmul.f32 %v9358_v55, %v3165_v36  ;;  %v9365_v24 = vpop.f32.mrf.mxu0  ;;  %v3609_v38 = vor.u32 1.1754944e-38, %v3608_v2  ;;  %vm3604_vm5 = vmor %vm3602_vm11, %vm3603_vm15 }
 0x1c4   : > { %v7235_v7 = vpop.eup %7234  ;;  %7242 = vpow2.f32 %v6294_v41  ;;  %12547 = vst [vmem:[#allocation130_spill] sm:$0xff] %v9365_v24  ;;  %v3599_v9 = vsub.f32 1.0, %v3598_v49  ;;  %v2498_v36 = vand.u32 2147483648, %v9320_v28  ;;  %v6860_v41 = vld [vmem:[%s12165_s1 + $0x168] sm:$0xff]  ;;  %vm9390_vm3 = vcmp.eq.f32.partialorder %v2496_v11, 8.507059e+37 }
 0x1c5   : > { %v9354_v54 = vadd.f32 1.0, %v7235_v7  ;;  %12546 = vst [vmem:[#allocation129_spill] sm:$0xff] %v9363_v62  ;;  %v2476_v5 = vadd.f32 %v7227_v43, %v2475_v0  ;;  %v3289_v33 = vpop.f32.mrf.mxu3  ;;  %v3168_v2 = vpop.f32.mrf.mxu2  ;;  %v12552_v24 = vld [vmem:[#allocation26_spill] sm:$0xff]  ;;  %vm3617_vm4 = vweird.f32 %v9343_v17 }
 0x1c6   : > { %v9371_v46 = vpop.eup %7236  ;;  %v3356_v7 = vsub.f32 %v12544_v21, %v3289_v33  ;;  %v2167_v8 = vpop.f32.mrf.mxu1  ;;  %v3600_v0 = vmul.f32 %v9341_v14, %v3599_v9  ;;  %v2499_v33 = vor.u32 1.1754944e-38, %v2498_v36 }
 0x1c7   : > { %7244 = vrcp.f32 %v9354_v54  ;;  %v2488_v15 = vmul.f32 %v9371_v46, %v9320_v28  ;;  %v2480_v30 = vsel %vm2479_vm13, %v7227_v43, %v2476_v5  ;;  %vm2493_vm1 = vweird.f32 %v9371_v46  ;;  %v12553_v5 = vld [vmem:[#allocation5_spill] sm:$0xff] }
 0x1c8   : > { %v2485_v49 = vsel %vm9334_vm8, %v2484_v52, %v2480_v30  ;;  %v7239_v21 = vpop.eup %7238  ;;  %v6490_v62 = vmul.f32 -1.442695, %v3356_v7  ;;  %v2232_v43 = vsub.f32 %v12552_v24, %v2167_v8  ;;  %v3601_v11 = vadd.f32 %v9341_v14, %v3600_v0  ;;  %v7655_v8 = vld [vmem:[%s12165_s1 + $0xe8] sm:$0xff]  ;;  %vm2494_vm6 = vmor %vm2492_vm14, %vm2493_vm1  ;;  %v12558_v28 = vld [vmem:[#allocation29_spill] sm:$0xff] }
 0x1c9   : > { %v2868_v25 = vmul.f32 %v2485_v49, %v12553_v5  ;;  %v2932_v12 = vadd.f32 %v2485_v49, %v8557_v53  ;;  %v9398_v47 = vpop.eup %7240  ;;  %v9400_v52 = vadd.f32 1.0, %v7239_v21  ;;  %v2489_v9 = vsub.f32 1.0, %v2488_v15  ;;  %6478 = vmatmul.msk.bf16.gmra.mxu3 %vm846_vm0, %v6860_v41 }
 0x1ca   : > { %v3621_v30 = vand.u32 2147483647, %v9343_v17  ;;  %v7243_v36 = vpop.eup %7242  ;;  %7246 = vpow2.f32 %v6490_v62  ;;  %v6295_v7 = vmul.f32 -1.442695, %v2232_v43  ;;  %v3613_v21 = vmul.f32 %v9398_v47, %v9343_v17  ;;  %6444 = vmatmul.msk.bf16.gmra.mxu2 %vm846_vm0, %v6860_v41 }
 0x1cb   : > { %6282 = vmatmul.msk.bf16.gmra.mxu1 %vm846_vm0, %v7655_v8  ;;  %v2900_v53 = vadd.f32 %v2868_v25, %v8596_v20  ;;  %7248 = vrcp.f32 %v9400_v52  ;;  %v9419_v15 = vadd.f32 1.0, %v7243_v36  ;;  %v3605_v49 = vsel %vm3604_vm5, %v9341_v14, %v3601_v11  ;;  %v9427_v32 = vpop.f32.mrf.mxu0 }
 0x1cc   : > { %v2490_v0 = vmul.f32 %v9371_v46, %v2489_v9  ;;  %7250 = vpow2.f32 %v6295_v7  ;;  %v3610_v20 = vsel %vm9367_vm12, %v3609_v38, %v3605_v49  ;;  %v3614_v43 = vsub.f32 1.0, %v3613_v21 }
 0x1cd   : > { %v9416_v62 = vpop.eup %7244  ;;  %7252 = vrcp.f32 %v9419_v15  ;;  %v3993_v5 = vmul.f32 %v3610_v20, %v3168_v2  ;;  %v9431_v36 = vadd.f32 %v3610_v20, %v2932_v12  ;;  %v3292_v14 = vpop.f32.mrf.mxu3  ;;  %vm3618_vm7 = vweird.f32 %v9398_v47 }
 0x1ce   : > { %v2503_v25 = vmul.f32 %v9416_v62, %v9354_v54  ;;  %v2491_v11 = vadd.f32 %v9371_v46, %v2490_v0  ;;  %v3357_v9 = vsub.f32 %v12552_v24, %v3292_v14  ;;  %v3615_v44 = vmul.f32 %v9398_v47, %v3614_v43  ;;  %v2169_v41 = vpop.f32.mrf.mxu1  ;;  %vm3619_vm9 = vmor %vm3617_vm4, %vm3618_vm7 }
 0x1cf   : > { %12554 = vst [vmem:[#allocation5_spill] sm:$0xff] %v9431_v36  ;;  %vm9441_vm8 = vcmp.eq.f32.partialorder %v3621_v30, 8.507059e+37  ;;  %v9445_v12 = vadd.f32 %v3993_v5, %v2900_v53  ;;  %v3623_v7 = vand.u32 2147483648, %v9343_v17  ;;  %v2233_v0 = vsub.f32 %v12558_v28, %v2169_v41  ;;  %v12559_v53 = vld [vmem:[#allocation6_spill] sm:$0xff]  ;;  %v12573_v36 = vld [vmem:[#allocation35_spill] sm:$0xff] }
 0x1d0   : > { %v2495_v2 = vsel %vm2494_vm6, %v9371_v46, %v2491_v11  ;;  %v2504_v8 = vsub.f32 1.0, %v2503_v25  ;;  %v7247_v21 = vpop.eup %7246  ;;  %v6491_v49 = vmul.f32 -1.442695, %v3357_v9  ;;  %v3616_v30 = vadd.f32 %v9398_v47, %v3615_v44  ;;  %v3170_v11 = vpop.f32.mrf.mxu2 }
 0x1d1   : > { %12557 = vst [vmem:[#allocation131_spill] sm:$0xff] %v9445_v12  ;;  %v2500_v20 = vsel %vm9390_vm3, %v2499_v33, %v2495_v2  ;;  %v9453_v43 = vpop.eup %7248  ;;  %v9455_v14 = vadd.f32 1.0, %v7247_v21  ;;  %v3624_v25 = vor.u32 1.1754944e-38, %v3623_v7  ;;  %v6296_v55 = vmul.f32 -1.442695, %v2233_v0 }
 0x1d2   : > { %v2869_v5 = vmul.f32 %v2500_v20, %v12559_v53  ;;  %v2933_v46 = vadd.f32 %v2500_v20, %v8573_v59  ;;  %v7251_v9 = vpop.eup %7250  ;;  %7254 = vpow2.f32 %v6491_v49  ;;  %v3620_v33 = vsel %vm3619_vm9, %v9398_v47, %v3616_v30  ;;  %v12560_v59 = vld [vmem:[#allocation71_spill] sm:$0xff] }
 0x1d3   : > { %v2505_v44 = vmul.f32 %v9416_v62, %v2504_v8  ;;  %v9465_v41 = vpop.eup %7252  ;;  %7256 = vrcp.f32 %v9455_v14  ;;  %v9468_v2 = vadd.f32 1.0, %v7251_v9  ;;  %v3625_v17 = vsel %vm9441_vm8, %v3624_v25, %v3620_v33  ;;  %v9477_v47 = vpop.f32.mrf.mxu0  ;;  %v6861_v53 = vld [vmem:[%s12165_s1 + $0x170] sm:$0xff] }
 0x1d4   : > { %v2901_v21 = vadd.f32 %v2869_v5, %v12560_v59  ;;  %v2518_v7 = vmul.f32 %v9465_v41, %v9419_v15  ;;  %7258 = vpow2.f32 %v6296_v55  ;;  %v3994_v49 = vmul.f32 %v3625_v17, %v3170_v11  ;;  %v12565_v59 = vld [vmem:[#allocation32_spill] sm:$0xff] }
 0x1d5   : > { %v9475_v0 = vadd.f32 %v3625_v17, %v2933_v46  ;;  %7260 = vrcp.f32 %v9468_v2  ;;  %v3294_v8 = vpop.f32.mrf.mxu3  ;;  %v2506_v20 = vadd.f32 %v9416_v62, %v2505_v44  ;;  %vm2507_vm10 = vweird.f32 %v9354_v54 }
 0x1d6   : > { %vm2508_vm11 = vweird.f32 %v9416_v62  ;;  %v9483_v38 = vadd.f32 %v3994_v49, %v2901_v21  ;;  %v3358_v30 = vsub.f32 %v12558_v28, %v3294_v8  ;;  %v2511_v46 = vand.u32 2147483647, %v9354_v54  ;;  %v2172_v25 = vpop.f32.mrf.mxu1 }
 0x1d7   : > { %12561 = vst [vmem:[#allocation6_spill] sm:$0xff] %v9475_v0  ;;  %vm9489_vm12 = vmor %vm2507_vm10, %vm2508_vm11  ;;  %v2513_v11 = vand.u32 2147483648, %v9354_v54  ;;  %7262 = vrcp.f32 %v9318_v48  ;;  %v3628_v55 = vmul.f32 %v9453_v43, %v9400_v52  ;;  %vm3632_vm13 = vweird.f32 %v9400_v52 }
 0x1d8   : > { %12562 = vst [vmem:[#allocation71_spill] sm:$0xff] %v9483_v38  ;;  %v2510_v9 = vsel %vm9489_vm12, %v9416_v62, %v2506_v20  ;;  %v7255_v33 = vpop.eup %7254  ;;  %v6492_v44 = vmul.f32 -1.442695, %v3358_v30  ;;  %v2234_v21 = vsub.f32 %v12565_v59, %v2172_v25  ;;  %vm2512_vm14 = vcmp.eq.f32.partialorder %v2511_v46, 8.507059e+37  ;;  %v7656_v30 = vld [vmem:[%s12165_s1 + $0xf0] sm:$0xff] }
 0x1d9   : > { %v2514_v17 = vor.u32 1.1754944e-38, %v2513_v11  ;;  %v9503_v49 = vpop.eup %7256  ;;  %v9505_v54 = vadd.f32 1.0, %v7255_v33  ;;  %v3629_v8 = vsub.f32 1.0, %v3628_v55  ;;  %v3636_v38 = vand.u32 2147483647, %v9400_v52  ;;  %6479 = vmatmul.msk.bf16.gmra.mxu3 %vm846_vm0, %v6861_v53  ;;  %v12566_v33 = vld [vmem:[#allocation7_spill] sm:$0xff] }
 0x1da   : > { %v3638_v62 = vand.u32 2147483648, %v9400_v52  ;;  %v7259_v20 = vpop.eup %7258  ;;  %7264 = vpow2.f32 %v6492_v44  ;;  %v6297_v5 = vmul.f32 -1.442695, %v2234_v21  ;;  %v2519_v11 = vsub.f32 1.0, %v2518_v7  ;;  %6445 = vmatmul.msk.bf16.gmra.mxu2 %vm846_vm0, %v6861_v53  ;;  %v6904_v53 = vld [vmem:[%s12171_s7 + $0x28] sm:$0xff] }
 0x1db   : > { %6283 = vmatmul.msk.bf16.gmra.mxu1 %vm846_vm0, %v7656_v30  ;;  %v2515_v46 = vsel %vm2512_vm14, %v2514_v17, %v2510_v9  ;;  %v9514_v25 = vpop.eup %7260  ;;  %7266 = vrcp.f32 %v9505_v54  ;;  %v9517_v55 = vadd.f32 1.0, %v7259_v20  ;;  %v3630_v30 = vmul.f32 %v9453_v43, %v3629_v8  ;;  %v9527_v7 = vpop.f32.mrf.mxu0  ;;  %5370 = vmatpush.bf16.msra.mxu2 %v6904_v53 }
 0x1dc   : > { %v2870_v0 = vmul.f32 %v2515_v46, %v12566_v33  ;;  %v2934_v44 = vadd.f32 %v2515_v46, %v8643_v57  ;;  %v9523_v21 = vmul.f32 %v9514_v25, %v9468_v2  ;;  %7268 = vpow2.f32 %v6297_v5  ;;  %12567 = vst [vmem:[#allocation7_spill] sm:$0xff] %v9527_v7  ;;  %v3173_v8 = vpop.f32.mrf.mxu2 }
 0x1dd   : > { %vm3633_vm15 = vweird.f32 %v9453_v43  ;;  %v9530_v9 = vpop.eup %7262  ;;  %7270 = vrcp.f32 %v9517_v55  ;;  %vm9534_vm1 = vcmp.eq.f32.partialorder %v3636_v38, 8.507059e+37  ;;  %v3297_v20 = vpop.f32.mrf.mxu3  ;;  %v2520_v5 = vmul.f32 %v9465_v41, %v2519_v11 }
 0x1de   : > { %12568 = vst [vmem:[#allocation132_spill] sm:$0xff] %v9530_v9  ;;  %v2902_v17 = vadd.f32 %v2870_v0, %v8754_v50  ;;  %v3631_v46 = vadd.f32 %v9453_v43, %v3630_v30  ;;  %v3639_v33 = vor.u32 1.1754944e-38, %v3638_v62  ;;  %v3359_v12 = vsub.f32 %v12565_v59, %v3297_v20  ;;  %v6896_v50 = vld [vmem:[%s12170_s6 + $0x28] sm:$0xff]  ;;  %vm9552_vm4 = vmor %vm3632_vm13, %vm3633_vm15  ;;  %v2174_v38 = vpop.f32.mrf.mxu1 }
 0x1df   : > { %vm2523_vm3 = vweird.f32 %v9465_v41  ;;  %v2521_v62 = vadd.f32 %v9465_v41, %v2520_v5  ;;  %vm2522_vm5 = vweird.f32 %v9419_v15  ;;  %v2528_v11 = vand.u32 2147483648, %v9419_v15  ;;  %5507 = vmatpush.bf16.msra.mxu3 %v6896_v50 }
 0x1e0   : > { %v3643_v30 = vmul.f32 %v9503_v49, %v9455_v14  ;;  %v7265_v20 = vpop.eup %7264  ;;  %v3635_v52 = vsel %vm9552_vm4, %v9453_v43, %v3631_v46  ;;  %v6493_v59 = vmul.f32 -1.442695, %v3359_v12  ;;  %v2235_v28 = vsub.f32 %v12573_v36, %v2174_v38  ;;  %vm9565_vm6 = vmor %vm2522_vm5, %vm2523_vm3  ;;  %v6887_v43 = vld [vmem:[%s7875_s16 + $0x58] sm:$0xff] }
 0x1e1   : > { %v2526_v5 = vand.u32 2147483647, %v9419_v15  ;;  %v9570_v9 = vpop.eup %7266  ;;  %v9572_v48 = vadd.f32 1.0, %v7265_v20  ;;  %v3640_v7 = vsel %vm9534_vm1, %v3639_v33, %v3635_v52  ;;  %v2525_v12 = vsel %vm9565_vm6, %v9465_v41, %v2521_v62  ;;  %4274 = vmatpush.bf16.msra.mxu0 %v6887_v43  ;;  %v6862_v20 = vld [vmem:[%s12165_s1 + $0x178] sm:$0xff] }
 0x1e2   : > { %vm3647_vm7 = vweird.f32 %v9455_v14  ;;  %v7269_v46 = vpop.eup %7268  ;;  %v3995_v0 = vmul.f32 %v3640_v7, %v3173_v8  ;;  %v9581_v38 = vadd.f32 %v3640_v7, %v2934_v44  ;;  %7272 = vpow2.f32 %v6493_v59  ;;  %v12577_v8 = vld [vmem:[#allocation8_spill] sm:$0xff] }
 0x1e3   : > { %v6298_v15 = vmul.f32 -1.442695, %v2235_v28  ;;  %v9583_v53 = vpop.eup %7270  ;;  %7274 = vrcp.f32 %v9572_v48  ;;  %v9586_v50 = vadd.f32 1.0, %v7269_v46  ;;  %v2529_v57 = vor.u32 1.1754944e-38, %v2528_v11  ;;  %v1017_v41 = vpop.f32.mrf.mxu0 }
 0x1e4   : > { %v3644_v33 = vsub.f32 1.0, %v3643_v30  ;;  %v9588_v24 = vadd.f32 %v3995_v0, %v2902_v17  ;;  %vm2527_vm8 = vcmp.eq.f32.partialorder %v2526_v5, 8.507059e+37  ;;  %vm3648_vm9 = vweird.f32 %v9503_v49 }
 0x1e5   : > { %7276 = vpow2.f32 %v6298_v15  ;;  %v2530_v59 = vsel %vm2527_vm8, %v2529_v57, %v2525_v12  ;;  %v3651_v44 = vand.u32 2147483647, %v9455_v14  ;;  %v3299_v7 = vpop.f32.mrf.mxu3  ;;  %v3653_v17 = vand.u32 2147483648, %v9455_v14  ;;  %v3175_v15 = vpop.f32.mrf.mxu2  ;;  %vm3649_vm11 = vmor %vm3647_vm7, %vm3648_vm9 }
 0x1e6   : > { %12576 = vst [vmem:[#allocation133_spill] sm:$0xff] %v9588_v24  ;;  %7278 = vrcp.f32 %v9586_v50  ;;  %v3645_v28 = vmul.f32 %v9503_v49, %v3644_v33  ;;  %v2871_v62 = vmul.f32 %v2530_v59, %v12577_v8  ;;  %v2935_v11 = vadd.f32 %v2530_v59, %v8722_v3  ;;  %v2177_v43 = vpop.f32.mrf.mxu1 }
 0x1e7   : > { %v1097_v30 = vsub.f32 %v8486_v34, %v1017_v41  ;;  %vm9602_vm10 = vcmp.eq.f32.partialorder %v3651_v44, 8.507059e+37  ;;  %v3360_v12 = vsub.f32 %v12573_v36, %v3299_v7  ;;  %v2534_v46 = vsub.f32 1.0, %v9523_v21  ;;  %v12580_v41 = vld [vmem:[#allocation38_spill] sm:$0xff] }
 0x1e8   : > { %v3646_v52 = vadd.f32 %v9503_v49, %v3645_v28  ;;  %v7273_v3 = vpop.eup %7272  ;;  %v2903_v0 = vadd.f32 %v2871_v62, %v8777_v27  ;;  %v3654_v57 = vor.u32 1.1754944e-38, %v3653_v17  ;;  %v2236_v59 = vsub.f32 %v12580_v41, %v2177_v43 }
 0x1e9   : > { %v6089_v33 = vmul.f32 -1.442695, %v1097_v30  ;;  %v9614_v28 = vpop.eup %7274  ;;  %v9616_v44 = vadd.f32 1.0, %v7273_v3  ;;  %v6494_v21 = vmul.f32 -1.442695, %v3360_v12  ;;  %v2535_v8 = vmul.f32 %v9514_v25, %v2534_v46  ;;  %v7657_v30 = vld [vmem:[%s12165_s1 + $0xf8] sm:$0xff]  ;;  %6480 = vmatmul.msk.bf16.gmra.mxu3 %vm846_vm0, %v6862_v20 }
 0x1ea   : > { %v3650_v7 = vsel %vm3649_vm11, %v9503_v49, %v3646_v52  ;;  %v9622_v62 = vmul.f32 %v9583_v53, %v9517_v55  ;;  %v6299_v17 = vmul.f32 -1.442695, %v2236_v59  ;;  %vm2537_vm12 = vweird.f32 %v9468_v2  ;;  %6446 = vmatmul.msk.bf16.gmra.mxu2 %vm846_vm0, %v6862_v20  ;;  %v12585_v3 = vld [vmem:[#allocation41_spill] sm:$0xff] }
 0x1eb   : > { %v7277_v27 = vpop.eup %7276  ;;  %v3655_v14 = vsel %vm9602_vm10, %v3654_v57, %v3650_v7  ;;  %7280 = vpow2.f32 %v6089_v33  ;;  %6284 = vmatmul.msk.bf16.gmra.mxu1 %vm846_vm0, %v7657_v30  ;;  %v2536_v5 = vadd.f32 %v9514_v25, %v2535_v8  ;;  %vm2538_vm13 = vweird.f32 %v9514_v25  ;;  %v1019_v57 = vpop.f32.mrf.mxu0 }
 0x1ec   : > { %v9631_v49 = vpop.eup %7278  ;;  %7282 = vrcp.f32 %v9616_v44  ;;  %v9634_v52 = vadd.f32 1.0, %v7277_v27  ;;  %v3996_v12 = vmul.f32 %v3655_v14, %v3175_v15  ;;  %v9636_v43 = vadd.f32 %v3655_v14, %v2935_v11  ;;  %vm9645_vm14 = vmor %vm2537_vm12, %vm2538_vm13 }
 0x1ed   : > { %7284 = vpow2.f32 %v6494_v21  ;;  %v2541_v11 = vand.u32 2147483647, %v9468_v2  ;;  %v2543_v15 = vand.u32 2147483648, %v9468_v2  ;;  %v3302_v33 = vpop.f32.mrf.mxu3  ;;  %v9653_v59 = vmul.f32 %v9631_v49, %v9586_v50 }
 0x1ee   : > { %12581 = vst [vmem:[#allocation8_spill] sm:$0xff] %v9636_v43  ;;  %7286 = vrcp.f32 %v9634_v52  ;;  %v9643_v46 = vadd.f32 %v3996_v12, %v2903_v0  ;;  %v2540_v20 = vsel %vm9645_vm14, %v9514_v25, %v2536_v5  ;;  %v3658_v0 = vmul.f32 %v9570_v9, %v9505_v54  ;;  %v2179_v21 = vpop.f32.mrf.mxu1 }
 0x1ef   : > { %7288 = vpow2.f32 %v6299_v17  ;;  %vm2542_vm15 = vcmp.eq.f32.partialorder %v2541_v11, 8.507059e+37  ;;  %v2544_v7 = vor.u32 1.1754944e-38, %v2543_v15  ;;  %vm3662_vm1 = vweird.f32 %v9505_v54 }
 0x1f0   : > { %12582 = vst [vmem:[#allocation134_spill] sm:$0xff] %v9643_v46  ;;  %v3666_v2 = vand.u32 2147483647, %v9505_v54  ;;  %v3659_v27 = vsub.f32 1.0, %v3658_v0  ;;  %v3668_v14 = vand.u32 2147483648, %v9505_v54  ;;  %v1098_v17 = vsub.f32 %v8490_v13, %v1019_v57  ;;  %v12586_v46 = vld [vmem:[#allocation9_spill] sm:$0xff] }
 0x1f1   : > { %v7281_v8 = vpop.eup %7280  ;;  %v3361_v30 = vsub.f32 %v12580_v41, %v3302_v33  ;;  %v2545_v5 = vsel %vm2542_vm15, %v2544_v7, %v2540_v20  ;;  %vm3663_vm3 = vweird.f32 %v9570_v9  ;;  %v2237_v11 = vsub.f32 %v12585_v3, %v2179_v21  ;;  %v3178_v41 = vpop.f32.mrf.mxu2 }
 0x1f2   : > { %v9665_v12 = vpop.eup %7282  ;;  %v9667_v25 = vadd.f32 1.0, %v7281_v8  ;;  %v2872_v43 = vmul.f32 %v2545_v5, %v12586_v46  ;;  %v2936_v0 = vadd.f32 %v2545_v5, %v8782_v22  ;;  %v3660_v36 = vmul.f32 %v9570_v9, %v3659_v27  ;;  %vm3664_vm5 = vmor %vm3662_vm1, %vm3663_vm3 }
 0x1f3   : > { %v7285_v15 = vpop.eup %7284  ;;  %vm9674_vm4 = vcmp.eq.f32.partialorder %v3666_v2, 8.507059e+37  ;;  %v3669_v7 = vor.u32 1.1754944e-38, %v3668_v14  ;;  %v6090_v8 = vmul.f32 -1.442695, %v1098_v17  ;;  %v6495_v27 = vmul.f32 -1.442695, %v3361_v30 }
 0x1f4   : > { %v9678_v33 = vpop.eup %7286  ;;  %7290 = vrcp.f32 %v9667_v25  ;;  %v9681_v20 = vadd.f32 1.0, %v7285_v15  ;;  %v2904_v22 = vadd.f32 %v2872_v43, %v8825_v51  ;;  %v3661_v2 = vadd.f32 %v9570_v9, %v3660_v36  ;;  %v9703_v36 = vld [vmem:[%s12165_s1 + $0x180] sm:$0xff] }
 0x1f5   : > { %v7289_v21 = vpop.eup %7288  ;;  %v9685_v46 = vmul.f32 %v9678_v33, %v9634_v52  ;;  %v6300_v14 = vmul.f32 -1.442695, %v2237_v11  ;;  %v2549_v17 = vsub.f32 1.0, %v9622_v62  ;;  %vm2553_vm6 = vweird.f32 %v9583_v53 }
 0x1f6   : > { %7292 = vrcp.f32 %v9681_v20  ;;  %v9690_v5 = vadd.f32 1.0, %v7289_v21  ;;  %v3665_v15 = vsel %vm3664_vm5, %v9570_v9, %v3661_v2  ;;  %v2556_v51 = vand.u32 2147483647, %v9517_v55  ;;  %v6886_v9 = vld [vmem:[%s7875_s16 + $0x50] sm:$0xff] }
 0x1f7   : > { %7294 = vpow2.f32 %v6090_v8  ;;  %v3670_v54 = vsel %vm9674_vm4, %v3669_v7, %v3665_v15  ;;  %v2550_v43 = vmul.f32 %v9583_v53, %v2549_v17  ;;  %v2558_v62 = vand.u32 2147483648, %v9517_v55  ;;  %v1022_v8 = vpop.f32.mrf.mxu0  ;;  %v3304_v17 = vpop.f32.mrf.mxu3  ;;  %4275 = vmatpush.bf16.msra.mxu0 %v6886_v9 }
 0x1f8   : > { %7296 = vrcp.f32 %v9690_v5  ;;  %v3997_v30 = vmul.f32 %v3670_v54, %v3178_v41  ;;  %v9711_v11 = vadd.f32 %v3670_v54, %v2936_v0  ;;  %vm2552_vm7 = vweird.f32 %v9517_v55  ;;  %v2182_v41 = vpop.f32.mrf.mxu1 }
 0x1f9   : > { %7298 = vpow2.f32 %v6495_v27  ;;  %v2551_v2 = vadd.f32 %v9583_v53, %v2550_v43  ;;  %vm9717_vm8 = vcmp.eq.f32.partialorder %v2556_v51, 8.507059e+37  ;;  %v3673_v7 = vmul.f32 %v9614_v28, %v9572_v48  ;;  %vm2554_vm9 = vmor %vm2552_vm7, %vm2553_vm6 }
 0x1fa   : > { %12589 = vst [vmem:[#allocation9_spill] sm:$0xff] %v9711_v11  ;;  %v9714_v21 = vpop.eup %7290  ;;  %7300 = vpow2.f32 %v6300_v14  ;;  %v9723_v0 = vadd.f32 %v3997_v30, %v2904_v22  ;;  %v2559_v55 = vor.u32 1.1754944e-38, %v2558_v62  ;;  %vm3677_vm10 = vweird.f32 %v9572_v48 }
 0x1fb   : > { %v3681_v27 = vand.u32 2147483647, %v9572_v48  ;;  %6661 = vmatmul.msk.bf16.vlgmr.msra.gmra.mxu1 %vm846_vm0, %v9703_v36  ;;  %v2555_v15 = vsel %vm2554_vm9, %v9583_v53, %v2551_v2  ;;  %v3674_v51 = vsub.f32 1.0, %v3673_v7  ;;  %v3683_v54 = vand.u32 2147483648, %v9572_v48  ;;  %v12593_v53 = vld [vmem:[#allocation10_spill] sm:$0xff] }
 0x1fc   : > { %12592 = vst [vmem:[#allocation135_spill] sm:$0xff] %v9723_v0  ;;  %v9731_v14 = vpop.eup %7292  ;;  %v1099_v22 = vsub.f32 %v12454_v58, %v1022_v8  ;;  %v2560_v62 = vsel %vm9717_vm8, %v2559_v55, %v2555_v15  ;;  %vm3678_vm11 = vweird.f32 %v9614_v28  ;;  %v3362_v9 = vsub.f32 %v12585_v3, %v3304_v17 }
 0x1fd   : > { %v7295_v43 = vpop.eup %7294  ;;  %v2238_v30 = vsub.f32 %v8299_v63, %v2182_v41  ;;  %v2873_v2 = vmul.f32 %v2560_v62, %v12593_v53  ;;  %v2937_v7 = vadd.f32 %v2560_v62, %v8786_v35  ;;  %v3675_v8 = vmul.f32 %v9614_v28, %v3674_v51  ;;  %v3180_v51 = vpop.f32.mrf.mxu2  ;;  %vm3679_vm13 = vmor %vm3677_vm10, %vm3678_vm11 }
 0x1fe   : > { %v9741_v0 = vpop.eup %7296  ;;  %v9743_v11 = vadd.f32 1.0, %v7295_v43  ;;  %vm9748_vm12 = vcmp.eq.f32.partialorder %v3681_v27, 8.507059e+37  ;;  %v3684_v55 = vor.u32 1.1754944e-38, %v3683_v54  ;;  %v6091_v15 = vmul.f32 -1.442695, %v1099_v22 }
 0x1ff   : > { %v7299_v24 = vpop.eup %7298  ;;  %v6496_v17 = vmul.f32 -1.442695, %v3362_v9  ;;  %v2905_v43 = vadd.f32 %v2873_v2, %v8829_v4  ;;  %v3676_v53 = vadd.f32 %v9614_v28, %v3675_v8  ;;  %v6301_v27 = vmul.f32 -1.442695, %v2238_v30  ;;  %v1024_v2 = vpop.f32.mrf.mxu0 }
 0x200   : > { %v7301_v3 = vpop.eup %7300  ;;  %7302 = vrcp.f32 %v9743_v11  ;;  %v9753_v41 = vadd.f32 1.0, %v7299_v24  ;;  %v2564_v54 = vsub.f32 1.0, %v9653_v59  ;;  %v9766_v24 = vmul.f32 %v9741_v0, %v9690_v5  ;;  %v3307_v8 = vpop.f32.mrf.mxu3 }
 0x201   : > { %v9757_v35 = vadd.f32 1.0, %v7301_v3  ;;  %7304 = vpow2.f32 %v6091_v15  ;;  %v3680_v4 = vsel %vm3679_vm13, %v9614_v28, %v3676_v53  ;;  %vm2568_vm14 = vweird.f32 %v9631_v49 }
 0x202   : > { %7306 = vrcp.f32 %v9753_v41  ;;  %v3685_v48 = vsel %vm9748_vm12, %v3684_v55, %v3680_v4  ;;  %v2565_v3 = vmul.f32 %v9631_v49, %v2564_v54  ;;  %v2571_v22 = vand.u32 2147483647, %v9586_v50 }
 0x203   : > { %7308 = vrcp.f32 %v9757_v35  ;;  %v3998_v59 = vmul.f32 %v3685_v48, %v3180_v51  ;;  %v9776_v62 = vadd.f32 %v3685_v48, %v2937_v7  ;;  %v2573_v9 = vand.u32 2147483648, %v9586_v50 }
 0x204   : > { %7310 = vpow2.f32 %v6496_v17  ;;  %v2566_v28 = vadd.f32 %v9631_v49, %v2565_v3  ;;  %vm2567_vm15 = vweird.f32 %v9586_v50  ;;  %v3688_v30 = vmul.f32 %v9665_v12, %v9616_v44 }
 0x205   : > { %7312 = vpow2.f32 %v6301_v27  ;;  %v9785_v55 = vadd.f32 %v3998_v59, %v2905_v43  ;;  %vm2569_vm1 = vmor %vm2567_vm15, %vm2568_vm14  ;;  %vm2572_vm3 = vcmp.eq.f32.partialorder %v2571_v22, 8.507059e+37  ;;  %v2574_v7 = vor.u32 1.1754944e-38, %v2573_v9  ;;  %v2184_v27 = vpop.f32.mrf.mxu1  ;;  %v12597_v59 = vld [vmem:[#allocation11_spill] sm:$0xff] }
 0x206   : > { %v9783_v57 = vpop.eup %7302  ;;  %vm3692_vm4 = vweird.f32 %v9616_v44  ;;  %v2570_v17 = vsel %vm2569_vm1, %v9631_v49, %v2566_v28  ;;  %v3689_v50 = vsub.f32 1.0, %v3688_v30  ;;  %v3696_v53 = vand.u32 2147483647, %v9616_v44 }
 0x207   : > { %12596 = vst [vmem:[#allocation10_spill] sm:$0xff] %v9785_v55  ;;  %v7305_v15 = vpop.eup %7304  ;;  %v3698_v51 = vand.u32 2147483648, %v9616_v44  ;;  %v2575_v4 = vsel %vm2572_vm3, %v2574_v7, %v2570_v17  ;;  %v1100_v48 = vsub.f32 %v12470_v42, %v1024_v2  ;;  %v3363_v3 = vsub.f32 %v8299_v63, %v3307_v8  ;;  %v3183_v55 = vpop.f32.mrf.mxu2 }
 0x208   : > { %v9793_v54 = vpop.eup %7306  ;;  %v9795_v43 = vadd.f32 1.0, %v7305_v15  ;;  %v2874_v9 = vmul.f32 %v2575_v4, %v12597_v59  ;;  %v2938_v49 = vadd.f32 %v2575_v4, %v8794_v61  ;;  %v3690_v28 = vmul.f32 %v9665_v12, %v3689_v50  ;;  %v9819_v59 = vld [vmem:[%s12165_s1 + $0x188] sm:$0xff] }
 0x209   : > { %v9799_v22 = vpop.eup %7308  ;;  %vm3693_vm5 = vweird.f32 %v9665_v12  ;;  %vm9810_vm6 = vcmp.eq.f32.partialorder %v3696_v53, 8.507059e+37  ;;  %v6092_v8 = vmul.f32 -1.442695, %v1100_v48  ;;  %v3699_v50 = vor.u32 1.1754944e-38, %v3698_v51  ;;  %v6903_v51 = vld [vmem:[%s12171_s7 + $0x20] sm:$0xff] }
 0x20a   : > { %v7311_v30 = vpop.eup %7310  ;;  %v9807_v15 = vmul.f32 %v9799_v22, %v9757_v35  ;;  %7314 = vrcp.f32 %v9795_v43  ;;  %v2906_v17 = vadd.f32 %v2874_v9, %v8843_v40  ;;  %v3691_v61 = vadd.f32 %v9665_v12, %v3690_v28  ;;  %vm3694_vm7 = vmor %vm3692_vm4, %vm3693_vm5  ;;  %v6895_v48 = vld [vmem:[%s12170_s6 + $0x20] sm:$0xff]  ;;  %5371 = vmatpush.bf16.msra.mxu2 %v6903_v51 }
 0x20b   : > { %v7313_v7 = vpop.eup %7312  ;;  %v6497_v4 = vmul.f32 -1.442695, %v3363_v3  ;;  %7316 = vpow2.f32 %v6092_v8  ;;  %v2239_v53 = vsub.f32 %v8328_v60, %v2184_v27  ;;  %v2579_v40 = vsub.f32 1.0, %v9685_v46  ;;  %6662 = vmatmul.msk.bf16.gmra.mxu1 %vm846_vm0, %v9819_v59  ;;  %5508 = vmatpush.bf16.msra.mxu3 %v6895_v48 }
 0x20c   : > { %v9821_v63 = vadd.f32 1.0, %v7313_v7  ;;  %v9833_v3 = vadd.f32 1.0, %v7311_v30  ;;  %v3695_v9 = vsel %vm3694_vm7, %v9665_v12, %v3691_v61  ;;  %vm2582_vm8 = vweird.f32 %v9634_v52 }
 0x20d   : > { %vm2583_vm9 = vweird.f32 %v9678_v33  ;;  %v3700_v44 = vsel %vm9810_vm6, %v3699_v50, %v3695_v9  ;;  %v6302_v46 = vmul.f32 -1.442695, %v2239_v53  ;;  %v2580_v27 = vmul.f32 %v9678_v33, %v2579_v40  ;;  %v1027_v50 = vpop.f32.mrf.mxu0  ;;  %v3309_v53 = vpop.f32.mrf.mxu3  ;;  %v6885_v40 = vld [vmem:[%s7875_s16 + $0x48] sm:$0xff] }
 0x20e   : > { %7318 = vrcp.f32 %v9821_v63  ;;  %v3999_v28 = vmul.f32 %v3700_v44, %v3183_v55  ;;  %v9844_v12 = vadd.f32 %v3700_v44, %v2938_v49  ;;  %v2586_v30 = vand.u32 2147483647, %v9634_v52  ;;  %vm9861_vm10 = vmor %vm2582_vm8, %vm2583_vm9  ;;  %4276 = vmatpush.bf16.msra.mxu0 %v6885_v40 }
 0x20f   : > { %7320 = vpow2.f32 %v6497_v4  ;;  %v2581_v7 = vadd.f32 %v9678_v33, %v2580_v27  ;;  %v2588_v2 = vand.u32 2147483648, %v9634_v52  ;;  %v3703_v61 = vmul.f32 %v9731_v14, %v9681_v20  ;;  %v2187_v4 = vpop.f32.mrf.mxu1 }
 0x210   : > { %12600 = vst [vmem:[#allocation11_spill] sm:$0xff] %v9844_v12  ;;  %v9847_v8 = vpop.eup %7314  ;;  %7322 = vpow2.f32 %v6302_v46  ;;  %v9855_v55 = vadd.f32 %v3999_v28, %v2906_v17  ;;  %vm2587_vm11 = vcmp.eq.f32.partialorder %v2586_v30, 8.507059e+37  ;;  %vm3707_vm12 = vweird.f32 %v9681_v20 }
 0x211   : > { %7324 = vrcp.f32 %v9833_v3  ;;  %v7317_v51 = vpop.eup %7316  ;;  %v2585_v48 = vsel %vm9861_vm10, %v9678_v33, %v2581_v7  ;;  %v2589_v9 = vor.u32 1.1754944e-38, %v2588_v2  ;;  %v3704_v17 = vsub.f32 1.0, %v3703_v61  ;;  %v12604_v61 = vld [vmem:[#allocation14_spill] sm:$0xff]  ;;  %6627 = vmatmul.msk.bf16.vlgmr.msra.gmra.mxu0 %vm846_vm0, %v9703_v36 }
 0x212   : > { %12601 = vst [vmem:[#allocation136_spill] sm:$0xff] %v9855_v55  ;;  %v3711_v44 = vand.u32 2147483647, %v9681_v20  ;;  %v9870_v46 = vadd.f32 1.0, %v7317_v51  ;;  %v3713_v52 = vand.u32 2147483648, %v9681_v20  ;;  %v1101_v27 = vsub.f32 %v12485_v16, %v1027_v50 }
 0x213   : > { %v3364_v28 = vsub.f32 %v8328_v60, %v3309_v53  ;;  %v2590_v55 = vsel %vm2587_vm11, %v2589_v9, %v2585_v48  ;;  %v3705_v12 = vmul.f32 %v9731_v14, %v3704_v17  ;;  %vm3708_vm13 = vweird.f32 %v9731_v14 }
 0x214   : > { %v9875_v30 = vpop.eup %7318  ;;  %v2240_v33 = vsub.f32 %v8353_v56, %v2187_v4  ;;  %v2875_v40 = vmul.f32 %v2590_v55, %v12604_v61  ;;  %v2939_v50 = vadd.f32 %v2590_v55, %v8917_v37  ;;  %vm9886_vm14 = vcmp.eq.f32.partialorder %v3711_v44, 8.507059e+37  ;;  %v3185_v55 = vpop.f32.mrf.mxu2  ;;  %vm3709_vm15 = vmor %vm3707_vm12, %vm3708_vm13 }
 0x215   : > { %v7321_v7 = vpop.eup %7320  ;;  %v9882_v2 = vmul.f32 %v9875_v30, %v9821_v63  ;;  %7326 = vrcp.f32 %v9870_v46  ;;  %v3706_v51 = vadd.f32 %v9731_v14, %v3705_v12  ;;  %v6093_v48 = vmul.f32 -1.442695, %v1101_v27 }
 0x216   : > { %v7323_v49 = vpop.eup %7322  ;;  %v9893_v4 = vadd.f32 1.0, %v7321_v7  ;;  %v2907_v37 = vadd.f32 %v2875_v40, %v8966_v1  ;;  %v3714_v36 = vor.u32 1.1754944e-38, %v3713_v52  ;;  %v6498_v44 = vmul.f32 -1.442695, %v3364_v28  ;;  %v1029_v28 = vpop.f32.mrf.mxu0 }
 0x217   : > { %v9896_v9 = vpop.eup %7324  ;;  %v9898_v17 = vadd.f32 1.0, %v7323_v49  ;;  %v3710_v7 = vsel %vm3709_vm15, %v9731_v14, %v3706_v51  ;;  %v6303_v12 = vmul.f32 -1.442695, %v2240_v33  ;;  %v2594_v27 = vsub.f32 1.0, %v9766_v24  ;;  %v3312_v33 = vpop.f32.mrf.mxu3 }
 0x218   : > { %7328 = vrcp.f32 %v9893_v4  ;;  %v3715_v1 = vsel %vm9886_vm14, %v3714_v36, %v3710_v7  ;;  %vm2598_vm1 = vweird.f32 %v9741_v0  ;;  %v2601_v61 = vand.u32 2147483647, %v9690_v5  ;;  %v2189_v51 = vpop.f32.mrf.mxu1 }
 0x219   : > { %7330 = vrcp.f32 %v9898_v17  ;;  %v4000_v20 = vmul.f32 %v3715_v1, %v3185_v55  ;;  %v9913_v40 = vadd.f32 %v3715_v1, %v2939_v50  ;;  %v2595_v52 = vmul.f32 %v9741_v0, %v2594_v27 }
 0x21a   : > { %7332 = vpow2.f32 %v6093_v48  ;;  %vm2597_vm3 = vweird.f32 %v9690_v5  ;;  %v2603_v14 = vand.u32 2147483648, %v9690_v5  ;;  %v3718_v24 = vmul.f32 %v9793_v54, %v9753_v41 }
 0x21b   : > { %7334 = vpow2.f32 %v6498_v44  ;;  %v9920_v53 = vpop.eup %7326  ;;  %v9922_v49 = vadd.f32 %v4000_v20, %v2907_v37  ;;  %v2596_v50 = vadd.f32 %v9741_v0, %v2595_v52  ;;  %vm2602_vm4 = vcmp.eq.f32.partialorder %v2601_v61, 8.507059e+37  ;;  %vm2599_vm5 = vmor %vm2597_vm3, %vm2598_vm1 }
 0x21c   : > { %7336 = vpow2.f32 %v6303_v12  ;;  %v2604_v48 = vor.u32 1.1754944e-38, %v2603_v14  ;;  %v3719_v55 = vsub.f32 1.0, %v3718_v24  ;;  %vm3722_vm6 = vweird.f32 %v9753_v41  ;;  %v12608_v14 = vld [vmem:[#allocation17_spill] sm:$0xff] }
 0x21d   : > { %12607 = vst [vmem:[#allocation14_spill] sm:$0xff] %v9922_v49  ;;  %v3726_v5 = vand.u32 2147483647, %v9753_v41  ;;  %v2600_v44 = vsel %vm2599_vm5, %v9741_v0, %v2596_v50  ;;  %v3728_v37 = vand.u32 2147483648, %v9753_v41  ;;  %v1102_v7 = vsub.f32 %v8550_v18, %v1029_v28 }
 0x21e   : > { %v9929_v36 = vpop.eup %7328  ;;  %v3365_v12 = vsub.f32 %v8353_v56, %v3312_v33  ;;  %v2605_v1 = vsel %vm2602_vm4, %v2604_v48, %v2600_v44  ;;  %v3720_v61 = vmul.f32 %v9793_v54, %v3719_v55  ;;  %vm3723_vm7 = vweird.f32 %v9793_v54 }
 0x21f   : > { %v9935_v27 = vpop.eup %7330  ;;  %v2241_v20 = vsub.f32 %v8382_v26, %v2189_v51  ;;  %v2876_v24 = vmul.f32 %v2605_v1, %v12608_v14  ;;  %v2940_v0 = vadd.f32 %v2605_v1, %v8979_v39  ;;  %vm9942_vm8 = vcmp.eq.f32.partialorder %v3726_v5, 8.507059e+37  ;;  %v3188_v14 = vpop.f32.mrf.mxu2  ;;  %vm3724_vm9 = vmor %vm3722_vm6, %vm3723_vm7 }
 0x220   : > { %v7333_v52 = vpop.eup %7332  ;;  %v3729_v28 = vor.u32 1.1754944e-38, %v3728_v37  ;;  %v3721_v48 = vadd.f32 %v9793_v54, %v3720_v61  ;;  %v6094_v55 = vmul.f32 -1.442695, %v1102_v7  ;;  %v6499_v44 = vmul.f32 -1.442695, %v3365_v12  ;;  %v2192_v31 = vpop.f32.mrf.mxu1 }
 0x221   : > { %v7335_v33 = vpop.eup %7334  ;;  %v9946_v56 = vadd.f32 1.0, %v7333_v52  ;;  %v2908_v51 = vadd.f32 %v2876_v24, %v9112_v23  ;;  %v6304_v39 = vmul.f32 -1.442695, %v2241_v20  ;;  %v2609_v5 = vsub.f32 1.0, %v9807_v15  ;;  %6628 = vmatmul.msk.bf16.gmra.mxu0 %vm846_vm0, %v9819_v59  ;;  %v9986_v52 = vld [vmem:[%s12165_s1 + $0x190] sm:$0xff] }
 0x222   : > { %v7337_v49 = vpop.eup %7336  ;;  %v9949_v60 = vadd.f32 1.0, %v7335_v33  ;;  %v3725_v7 = vsel %vm3724_vm9, %v9793_v54, %v3721_v48  ;;  %vm2612_vm10 = vweird.f32 %v9757_v35  ;;  %vm2613_vm11 = vweird.f32 %v9799_v22  ;;  %6663 = vmatmul.msk.bf16.gmra.mxu1 %vm846_vm0, %v9986_v52 }
 0x223   : > { %7338 = vrcp.f32 %v9946_v56  ;;  %v9958_v37 = vadd.f32 1.0, %v7337_v49  ;;  %v3730_v23 = vsel %vm9942_vm8, %v3729_v28, %v3725_v7  ;;  %v2610_v12 = vmul.f32 %v9799_v22, %v2609_v5  ;;  %vm2614_vm13 = vmor %vm2612_vm10, %vm2613_vm11 }
 0x224   : > { %7340 = vrcp.f32 %v9949_v60  ;;  %v12611_v41 = vand.u32 2147483647, %v8958_v10  ;;  %v4001_v54 = vmul.f32 %v3730_v23, %v3188_v14  ;;  %v9974_v49 = vadd.f32 %v3730_v23, %v2940_v0  ;;  %v12623_v23 = vld [vmem:[#allocation57_spill] sm:$0xff] }
 0x225   : > { %7342 = vrcp.f32 %v9958_v37  ;;  %v2616_v1 = vand.u32 2147483647, %v9757_v35  ;;  %v2611_v61 = vadd.f32 %v9799_v22, %v2610_v12  ;;  %v2618_v20 = vand.u32 2147483648, %v9757_v35 }
 0x226   : > { %vm9969_vm12 = vcmp.eq.f32.partialorder %v12611_v41, 8.507059e+37  ;;  %7344 = vpow2.f32 %v6094_v55  ;;  %v3733_v10 = vmul.f32 %v9896_v9, %v9833_v3  ;;  %v9990_v24 = vmul.f32 %v9935_v27, %v9898_v17 }
 0x227   : > { %v9992_v0 = vadd.f32 %v4001_v54, %v2908_v51  ;;  %7346 = vpow2.f32 %v6499_v44  ;;  %vm2617_vm14 = vcmp.eq.f32.partialorder %v2616_v1, 8.507059e+37  ;;  %v2615_v59 = vsel %vm2614_vm13, %v9799_v22, %v2611_v61 }
 0x228   : > { %7348 = vpow2.f32 %v6304_v39  ;;  %v2619_v50 = vor.u32 1.1754944e-38, %v2618_v20  ;;  %v3734_v28 = vsub.f32 1.0, %v3733_v10  ;;  %vm3737_vm15 = vweird.f32 %v9833_v3  ;;  %v12615_v39 = vld [vmem:[#allocation20_spill] sm:$0xff] }
 0x229   : > { %12614 = vst [vmem:[#allocation17_spill] sm:$0xff] %v9992_v0  ;;  %v10001_v33 = vpop.eup %7338  ;;  %v3741_v48 = vand.u32 2147483647, %v9833_v3  ;;  %v3743_v55 = vand.u32 2147483648, %v9833_v3  ;;  %v1258_v35 = vmul.f32 %v9714_v21, %v9667_v25  ;;  %vm3738_vm1 = vweird.f32 %v9896_v9 }
 0x22a   : > { %v10008_v44 = vpop.eup %7340  ;;  %v2620_v51 = vsel %vm2617_vm14, %v2619_v50, %v2615_v59  ;;  %v3735_v22 = vmul.f32 %v9896_v9, %v3734_v28  ;;  %vm1262_vm3 = vweird.f32 %v9667_v25  ;;  %vm1263_vm5 = vweird.f32 %v9714_v21  ;;  %v3190_v50 = vpop.f32.mrf.mxu2  ;;  %vm3739_vm6 = vmor %vm3737_vm15, %vm3738_vm1 }
 0x22b   : > { %v10013_v14 = vpop.eup %7342  ;;  %v2877_v5 = vmul.f32 %v2620_v51, %v12615_v39  ;;  %v2941_v7 = vadd.f32 %v2620_v51, %v8983_v19  ;;  %vm10017_vm4 = vcmp.eq.f32.partialorder %v3741_v48, 8.507059e+37  ;;  %v3744_v54 = vor.u32 1.1754944e-38, %v3743_v55  ;;  %v2028_v28 = vpop.f32.mrf.mxu0  ;;  %v12619_v55 = vld [vmem:[#allocation126_spill] sm:$0xff] }
 0x22c   : > { %v7345_v12 = vpop.eup %7344  ;;  %v3736_v41 = vadd.f32 %v9896_v9, %v3735_v22  ;;  %v1259_v1 = vsub.f32 1.0, %v1258_v35  ;;  %v1266_v61 = vand.u32 2147483647, %v9667_v25  ;;  %v1268_v19 = vand.u32 2147483648, %v9667_v25 }
 0x22d   : > { %v7347_v20 = vpop.eup %7346  ;;  %v10024_v10 = vadd.f32 1.0, %v7345_v12  ;;  %v2909_v59 = vadd.f32 %v2877_v5, %v9116_v29  ;;  %v12618_v48 = vsel %vm9271_vm2, %v9041_v45, %v9242_v6  ;;  %v3314_v5 = vpop.f32.mrf.mxu3  ;;  %vm1264_vm2 = vmor %vm1262_vm3, %vm1263_vm5  ;;  %vm2627_vm10 = vweird.f32 %v9821_v63 }
 0x22e   : > { %v2395_v35 = vsel %vm9969_vm12, %v12619_v55, %v12618_v48  ;;  %v7349_v51 = vpop.eup %7348  ;;  %v10040_v29 = vadd.f32 1.0, %v7347_v20  ;;  %v3740_v22 = vsel %vm3739_vm6, %v9896_v9, %v3736_v41  ;;  %v1260_v3 = vmul.f32 %v9714_v21, %v1259_v1 }
 0x22f   : > { %vm10044_vm7 = vcmp.eq.f32.partialorder %v1266_v61, 8.507059e+37  ;;  %7350 = vrcp.f32 %v10024_v10  ;;  %v10049_v45 = vadd.f32 1.0, %v7349_v51  ;;  %v3745_v6 = vsel %vm10017_vm4, %v3744_v54, %v3740_v22 }
 0x230   : > { %v1269_v15 = vor.u32 1.1754944e-38, %v1268_v19  ;;  %7352 = vrcp.f32 %v10040_v29  ;;  %v4002_v12 = vmul.f32 %v3745_v6, %v3190_v50  ;;  %v10054_v9 = vadd.f32 %v3745_v6, %v2941_v7  ;;  %v12625_v7 = vld [vmem:[#allocation77_spill] sm:$0xff]  ;;  %v12626_v19 = vld [vmem:[#allocation84_spill] sm:$0xff] }
 0x231   : > { %v1261_v41 = vadd.f32 %v9714_v21, %v1260_v3  ;;  %7354 = vrcp.f32 %v10049_v45  ;;  %v2862_v1 = vmul.f32 %v2395_v35, %v2028_v28  ;;  %v3366_v61 = vsub.f32 %v8382_v26, %v3314_v5  ;;  %v12627_v28 = vld [vmem:[#allocation117_spill] sm:$0xff]  ;;  %6629 = vmatmul.msk.bf16.gmra.mxu0 %vm846_vm0, %v9986_v52 }
 0x232   : > { %12622 = vst [vmem:[#allocation20_spill] sm:$0xff] %v10054_v9  ;;  %v2242_v54 = vsub.f32 %v12623_v23, %v2192_v31  ;;  %v10064_v20 = vadd.f32 %v4002_v12, %v2909_v59  ;;  %v1498_v48 = vmul.f32 %v12626_v19, %v12625_v7  ;;  %vm1502_vm8 = vweird.f32 %v12625_v7 }
 0x233   : > { %v1265_v50 = vsel %vm1264_vm2, %v9714_v21, %v1261_v41  ;;  %v6500_v51 = vmul.f32 -1.442695, %v3366_v61  ;;  %vm1503_vm9 = vweird.f32 %v12626_v19  ;;  %v1506_v5 = vand.u32 2147483647, %v12625_v7 }
 0x234   : > { %12624 = vst [vmem:[#allocation126_spill] sm:$0xff] %v10064_v20  ;;  %v1270_v55 = vsel %vm10044_vm7, %v1269_v15, %v1265_v50  ;;  %v6305_v25 = vmul.f32 -1.442695, %v2242_v54  ;;  %v1499_v59 = vsub.f32 1.0, %v1498_v48  ;;  %v10081_v31 = vmul.f32 %v10013_v14, %v9958_v37  ;;  %vm10099_vm11 = vmor %vm1502_vm8, %vm1503_vm9 }
 0x235   : > { %v1737_v22 = vmul.f32 %v1270_v55, %v12627_v28  ;;  %v10074_v3 = vadd.f32 %v2395_v35, %v1270_v55  ;;  %v10077_v21 = vpop.eup %7350  ;;  %7356 = vpow2.f32 %v6500_v51  ;;  %v1508_v39 = vand.u32 2147483648, %v12625_v7 }
 0x236   : > { %v2624_v6 = vsub.f32 1.0, %v9882_v2  ;;  %v10087_v15 = vpop.eup %7352  ;;  %7358 = vpow2.f32 %v6305_v25  ;;  %v1500_v12 = vmul.f32 %v12626_v19, %v1499_v59  ;;  %vm2628_vm12 = vweird.f32 %v9875_v30 }
 0x237   : > { %v10089_v35 = vadd.f32 %v2862_v1, %v1737_v22  ;;  %v10093_v41 = vpop.eup %7354  ;;  %v1509_v52 = vor.u32 1.1754944e-38, %v1508_v39  ;;  %v2631_v1 = vand.u32 2147483647, %v9821_v63  ;;  %vm1507_vm13 = vcmp.eq.f32.partialorder %v1506_v5, 8.507059e+37  ;;  %vm2629_vm1 = vmor %vm2627_vm10, %vm2628_vm12 }
 0x238   : > { %v2625_v61 = vmul.f32 %v9875_v30, %v2624_v6  ;;  %v1501_v54 = vadd.f32 %v12626_v19, %v1500_v12  ;;  %v2633_v50 = vand.u32 2147483648, %v9821_v63  ;;  %v3748_v48 = vmul.f32 %v9929_v36, %v9893_v4 }
 0x239   : > { %v10112_v7 = vmul.f32 %v10093_v41, %v10049_v45  ;;  %vm2632_vm14 = vcmp.eq.f32.partialorder %v2631_v1, 8.507059e+37  ;;  %vm3752_vm15 = vweird.f32 %v9893_v4  ;;  %v3756_v22 = vand.u32 2147483647, %v9893_v4 }
 0x23a   : > { %v2626_v55 = vadd.f32 %v9875_v30, %v2625_v61  ;;  %v1505_v51 = vsel %vm10099_vm11, %v12626_v19, %v1501_v54  ;;  %v2634_v25 = vor.u32 1.1754944e-38, %v2633_v50  ;;  %v3749_v28 = vsub.f32 1.0, %v3748_v48  ;;  %v12630_v54 = vld [vmem:[#allocation22_spill] sm:$0xff] }
 0x23b   : > { %v7357_v59 = vpop.eup %7356  ;;  %v1510_v5 = vsel %vm1507_vm13, %v1509_v52, %v1505_v51  ;;  %v3758_v6 = vand.u32 2147483648, %v9893_v4  ;;  %v1273_v12 = vmul.f32 %v9783_v57, %v9743_v11  ;;  %vm3753_vm3 = vweird.f32 %v9929_v36  ;;  %v12631_v52 = vld [vmem:[#allocation24_spill] sm:$0xff]  ;;  %v3317_v4 = vpop.f32.mrf.mxu3 }
 0x23c   : > { %v2630_v39 = vsel %vm2629_vm1, %v9875_v30, %v2626_v55  ;;  %v7359_v61 = vpop.eup %7358  ;;  %v10126_v1 = vadd.f32 1.0, %v7357_v59  ;;  %v3750_v63 = vmul.f32 %v9929_v36, %v3749_v28  ;;  %v1753_v50 = vmul.f32 %v1510_v5, %v12630_v54  ;;  %v3193_v59 = vpop.f32.mrf.mxu2  ;;  %vm3754_vm5 = vmor %vm3752_vm15, %vm3753_vm3 }
 0x23d   : > { %v2635_v19 = vsel %vm2632_vm14, %v2634_v25, %v2630_v39  ;;  %v10130_v2 = vadd.f32 1.0, %v7359_v61  ;;  %vm3757_vm4 = vcmp.eq.f32.partialorder %v3756_v22, 8.507059e+37  ;;  %v1274_v51 = vsub.f32 1.0, %v1273_v12  ;;  %v12632_v12 = vld [vmem:[#allocation93_spill] sm:$0xff] }
 0x23e   : > { %v2878_v48 = vmul.f32 %v2635_v19, %v12631_v52  ;;  %v2942_v30 = vadd.f32 %v2635_v19, %v1510_v5  ;;  %7360 = vrcp.f32 %v10126_v1  ;;  %v3751_v55 = vadd.f32 %v9929_v36, %v3750_v63  ;;  %v12633_v63 = vld [vmem:[#allocation100_spill] sm:$0xff] }
 0x23f   : > { %7362 = vrcp.f32 %v10130_v2  ;;  %v3759_v28 = vor.u32 1.1754944e-38, %v3758_v6  ;;  %vm1278_vm6 = vweird.f32 %v9783_v57  ;;  %v1275_v5 = vmul.f32 %v9783_v57, %v1274_v51  ;;  %v2194_v6 = vpop.f32.mrf.mxu1 }
 0x240   : > { %v2910_v25 = vadd.f32 %v2878_v48, %v1753_v50  ;;  %v3755_v39 = vsel %vm3754_vm5, %v9929_v36, %v3751_v55  ;;  %v1281_v61 = vand.u32 2147483647, %v9743_v11  ;;  %v1283_v19 = vand.u32 2147483648, %v9743_v11 }
 0x241   : > { %v3760_v22 = vsel %vm3757_vm4, %v3759_v28, %v3755_v39  ;;  %vm1277_vm7 = vweird.f32 %v9743_v11  ;;  %v2398_v54 = vmul.f32 %v12633_v63, %v12632_v12  ;;  %vm2402_vm2 = vweird.f32 %v12632_v12 }
 0x242   : > { %v4003_v50 = vmul.f32 %v3760_v22, %v3193_v59  ;;  %v10148_v52 = vadd.f32 %v3760_v22, %v2942_v30  ;;  %v1276_v36 = vadd.f32 %v9783_v57, %v1275_v5  ;;  %vm1282_vm8 = vcmp.eq.f32.partialorder %v1281_v61, 8.507059e+37  ;;  %vm1279_vm9 = vmor %vm1277_vm7, %vm1278_vm6  ;;  %v12636_v22 = vld [vmem:[#allocation61_spill] sm:$0xff] }
 0x243   : > { %v1284_v48 = vor.u32 1.1754944e-38, %v1283_v19  ;;  %v2399_v55 = vsub.f32 1.0, %v2398_v54  ;;  %v2406_v11 = vand.u32 2147483647, %v12632_v12  ;;  %v2408_v51 = vand.u32 2147483648, %v12632_v12 }
 0x244   : > { %12634 = vst [vmem:[#allocation77_spill] sm:$0xff] %v10148_v52  ;;  %v10155_v28 = vpop.eup %7360  ;;  %v10157_v39 = vadd.f32 %v4003_v50, %v2910_v25  ;;  %v1280_v59 = vsel %vm1279_vm9, %v9783_v57, %v1276_v36  ;;  %v3367_v30 = vsub.f32 %v12623_v23, %v3317_v4  ;;  %v2243_v5 = vsub.f32 %v12636_v22, %v2194_v6  ;;  %v12639_v36 = vld [vmem:[#allocation124_spill] sm:$0xff] }
 0x245   : > { %v10162_v61 = vpop.eup %7362  ;;  %v1285_v52 = vsel %vm1282_vm8, %v1284_v48, %v1280_v59  ;;  %v2400_v19 = vmul.f32 %v12633_v63, %v2399_v55  ;;  %vm2403_vm10 = vweird.f32 %v12633_v63  ;;  %vm10166_vm11 = vcmp.eq.f32.partialorder %v2406_v11, 8.507059e+37  ;;  %v12640_v48 = vld [vmem:[#allocation78_spill] sm:$0xff]  ;;  %v12641_v59 = vld [vmem:[#allocation85_spill] sm:$0xff]  ;;  %v2030_v11 = vpop.f32.mrf.mxu0 }
 0x246   : > { %12635 = vst [vmem:[#allocation84_spill] sm:$0xff] %v10157_v39  ;;  %v10172_v25 = vmul.f32 %v10162_v61, %v10130_v2  ;;  %v2409_v57 = vor.u32 1.1754944e-38, %v2408_v51  ;;  %v6501_v50 = vmul.f32 -1.442695, %v3367_v30  ;;  %v6306_v4 = vmul.f32 -1.442695, %v2243_v5  ;;  %vm2404_vm13 = vmor %vm2402_vm2, %vm2403_vm10 }
 0x247   : > { %v1738_v6 = vmul.f32 %v1285_v52, %v12639_v36  ;;  %v2401_v23 = vadd.f32 %v12633_v63, %v2400_v19  ;;  %v1513_v55 = vmul.f32 %v12641_v59, %v12640_v48  ;;  %vm1517_vm12 = vweird.f32 %v12640_v48 }
 0x248   : > { %7364 = vpow2.f32 %v6501_v50  ;;  %vm1518_vm14 = vweird.f32 %v12641_v59  ;;  %v1523_v51 = vand.u32 2147483648, %v12640_v48  ;;  %v2639_v30 = vsub.f32 1.0, %v9990_v24 }
 0x249   : > { %v2405_v5 = vsel %vm2404_vm13, %v12633_v63, %v2401_v23  ;;  %7366 = vpow2.f32 %v6306_v4  ;;  %v1514_v19 = vsub.f32 1.0, %v1513_v55  ;;  %v1521_v36 = vand.u32 2147483647, %v12640_v48  ;;  %vm10195_vm1 = vmor %vm1517_vm12, %vm1518_vm14  ;;  %v6872_v55 = vld [vmem:[%s12165_s1 + $0x198] sm:$0xff]  ;;  %v3195_v48 = vpop.f32.mrf.mxu2 }
 0x24a   : > { %v2410_v39 = vsel %vm10166_vm11, %v2409_v57, %v2405_v5  ;;  %v1524_v26 = vor.u32 1.1754944e-38, %v1523_v51  ;;  %v2640_v12 = vmul.f32 %v9935_v27, %v2639_v30  ;;  %vm2642_vm15 = vweird.f32 %v9898_v17  ;;  %6664 = vmatmul.msk.bf16.gmra.mxu1 %vm846_vm0, %v6872_v55  ;;  %6630 = vmatmul.msk.bf16.gmra.mxu0 %vm846_vm0, %v6872_v55 }
 0x24b   : > { %v2863_v50 = vmul.f32 %v2410_v39, %v2030_v11  ;;  %v10190_v20 = vadd.f32 %v2410_v39, %v1285_v52  ;;  %v1515_v9 = vmul.f32 %v12641_v59, %v1514_v19  ;;  %vm2643_vm3 = vweird.f32 %v9935_v27 }
 0x24c   : > { %v2641_v23 = vadd.f32 %v9935_v27, %v2640_v12  ;;  %vm10201_vm4 = vmor %vm2642_vm15, %vm2643_vm3  ;;  %v2646_v54 = vand.u32 2147483647, %v9898_v17  ;;  %v2648_v52 = vand.u32 2147483648, %v9898_v17  ;;  %v3763_v39 = vmul.f32 %v10008_v44, %v9949_v60  ;;  %v6902_v17 = vld [vmem:[%s12171_s7 + $0x18] sm:$0xff] }
 0x24d   : > { %v10209_v57 = vadd.f32 %v2863_v50, %v1738_v6  ;;  %v1516_v4 = vadd.f32 %v12641_v59, %v1515_v9  ;;  %vm10212_vm5 = vcmp.eq.f32.partialorder %v1521_v36, 8.507059e+37  ;;  %vm3768_vm6 = vweird.f32 %v10008_v44  ;;  %v6894_v6 = vld [vmem:[%s12170_s6 + $0x18] sm:$0xff]  ;;  %5372 = vmatpush.bf16.msra.mxu2 %v6902_v17 }
 0x24e   : > { %v7365_v11 = vpop.eup %7364  ;;  %v2645_v9 = vsel %vm10201_vm4, %v9935_v27, %v2641_v23  ;;  %vm2647_vm7 = vcmp.eq.f32.partialorder %v2646_v54, 8.507059e+37  ;;  %v2649_v51 = vor.u32 1.1754944e-38, %v2648_v52  ;;  %v3764_v30 = vsub.f32 1.0, %v3763_v39  ;;  %5509 = vmatpush.bf16.msra.mxu3 %v6894_v6  ;;  %v12649_v54 = vld [vmem:[#allocation27_spill] sm:$0xff] }
 0x24f   : > { %v7367_v5 = vpop.eup %7366  ;;  %v10229_v19 = vadd.f32 1.0, %v7365_v11  ;;  %v1520_v36 = vsel %vm10195_vm1, %v12641_v59, %v1516_v4  ;;  %v3771_v12 = vand.u32 2147483647, %v9949_v60  ;;  %v3773_v50 = vand.u32 2147483648, %v9949_v60  ;;  %v12648_v59 = vld [vmem:[#allocation25_spill] sm:$0xff] }
 0x250   : > { %v10237_v0 = vadd.f32 1.0, %v7367_v5  ;;  %v1525_v27 = vsel %vm10212_vm5, %v1524_v26, %v1520_v36  ;;  %v2650_v23 = vsel %vm2647_vm7, %v2649_v51, %v2645_v9  ;;  %v3765_v63 = vmul.f32 %v10008_v44, %v3764_v30  ;;  %v12650_v51 = vld [vmem:[#allocation21_spill] sm:$0xff] }
 0x251   : > { %7368 = vrcp.f32 %v10229_v19  ;;  %v1754_v24 = vmul.f32 %v1525_v27, %v12648_v59  ;;  %v2879_v52 = vmul.f32 %v2650_v23, %v12649_v54  ;;  %v2943_v39 = vadd.f32 %v2650_v23, %v1525_v27 }
 0x252   : > { %7370 = vrcp.f32 %v10237_v0  ;;  %v3766_v4 = vadd.f32 %v10008_v44, %v3765_v63  ;;  %vm3767_vm2 = vweird.f32 %v9949_v60  ;;  %vm3772_vm8 = vcmp.eq.f32.partialorder %v3771_v12, 8.507059e+37  ;;  %v12651_v60 = vld [vmem:[#allocation103_spill] sm:$0xff]  ;;  %v3319_v12 = vpop.f32.mrf.mxu3 }
 0x253   : > { %v2911_v26 = vadd.f32 %v2879_v52, %v1754_v24  ;;  %vm3769_vm9 = vmor %vm3767_vm2, %vm3768_vm6  ;;  %v3774_v55 = vor.u32 1.1754944e-38, %v3773_v50  ;;  %v1288_v17 = vmul.f32 %v9847_v8, %v9795_v43  ;;  %vm1292_vm10 = vweird.f32 %v9795_v43  ;;  %v2197_v50 = vpop.f32.mrf.mxu1 }
 0x254   : > { %v3770_v6 = vsel %vm3769_vm9, %v10008_v44, %v3766_v4  ;;  %v1296_v11 = vand.u32 2147483647, %v9795_v43  ;;  %v1298_v9 = vand.u32 2147483648, %v9795_v43  ;;  %v2413_v30 = vmul.f32 %v12651_v60, %v12650_v51 }
 0x255   : > { %v3775_v5 = vsel %vm3772_vm8, %v3774_v55, %v3770_v6  ;;  %v1289_v36 = vsub.f32 1.0, %v1288_v17  ;;  %vm1293_vm11 = vweird.f32 %v9847_v8  ;;  %vm2417_vm12 = vweird.f32 %v12650_v51  ;;  %v12657_v6 = vld [vmem:[#allocation80_spill] sm:$0xff] }
 0x256   : > { %v4004_v27 = vmul.f32 %v3775_v5, %v3195_v48  ;;  %v10261_v23 = vadd.f32 %v3775_v5, %v2943_v39  ;;  %vm10263_vm13 = vcmp.eq.f32.partialorder %v1296_v11, 8.507059e+37  ;;  %vm2418_vm14 = vweird.f32 %v12651_v60  ;;  %v12656_v48 = vld [vmem:[#allocation68_spill] sm:$0xff]  ;;  %vm1294_vm15 = vmor %vm1292_vm10, %vm1293_vm11 }
 0x257   : > { %v10268_v63 = vpop.eup %7368  ;;  %v1290_v59 = vmul.f32 %v9847_v8, %v1289_v36  ;;  %v1299_v24 = vor.u32 1.1754944e-38, %v1298_v9  ;;  %v2414_v54 = vsub.f32 1.0, %v2413_v30  ;;  %v2423_v52 = vand.u32 2147483648, %v12650_v51  ;;  %v12658_v11 = vld [vmem:[#allocation56_spill] sm:$0xff]  ;;  %vm2419_vm4 = vmor %vm2417_vm12, %vm2418_vm14 }
 0x258   : > { %12652 = vst [vmem:[#allocation117_spill] sm:$0xff] %v10261_v23  ;;  %v10272_v4 = vpop.eup %7370  ;;  %v10274_v55 = vadd.f32 %v4004_v27, %v2911_v26  ;;  %v3368_v39 = vsub.f32 %v12636_v22, %v3319_v12  ;;  %v2244_v17 = vsub.f32 %v12656_v48, %v2197_v50  ;;  %v1528_v5 = vmul.f32 %v12658_v11, %v12657_v6 }
 0x259   : > { %v10282_v23 = vmul.f32 %v10272_v4, %v10237_v0  ;;  %v1291_v9 = vadd.f32 %v9847_v8, %v1290_v59  ;;  %v2415_v30 = vmul.f32 %v12651_v60, %v2414_v54  ;;  %v2421_v36 = vand.u32 2147483647, %v12650_v51  ;;  %v2033_v54 = vpop.f32.mrf.mxu0 }
 0x25a   : > { %12655 = vst [vmem:[#allocation22_spill] sm:$0xff] %v10274_v55  ;;  %v2424_v26 = vor.u32 1.1754944e-38, %v2423_v52  ;;  %v6502_v12 = vmul.f32 -1.442695, %v3368_v39  ;;  %v6307_v50 = vmul.f32 -1.442695, %v2244_v17  ;;  %vm1532_vm1 = vweird.f32 %v12657_v6 }
 0x25b   : > { %v1529_v27 = vsub.f32 1.0, %v1528_v5  ;;  %v1295_v22 = vsel %vm1294_vm15, %v9847_v8, %v1291_v9  ;;  %v2416_v55 = vadd.f32 %v12651_v60, %v2415_v30  ;;  %vm1533_vm3 = vweird.f32 %v12658_v11  ;;  %v12661_v17 = vld [vmem:[#allocation130_spill] sm:$0xff] }
 0x25c   : > { %v1300_v59 = vsel %vm10263_vm13, %v1299_v24, %v1295_v22  ;;  %7372 = vpow2.f32 %v6502_v12  ;;  %v1536_v8 = vand.u32 2147483647, %v12657_v6  ;;  %vm2422_vm5 = vcmp.eq.f32.partialorder %v2421_v36, 8.507059e+37  ;;  %vm10304_vm6 = vmor %vm1532_vm1, %vm1533_vm3 }
 0x25d   : > { %v1530_v43 = vmul.f32 %v12658_v11, %v1529_v27  ;;  %v2420_v52 = vsel %vm2419_vm4, %v12651_v60, %v2416_v55  ;;  %7374 = vpow2.f32 %v6307_v50  ;;  %v1538_v22 = vand.u32 2147483648, %v12657_v6 }
 0x25e   : > { %v2425_v44 = vsel %vm2422_vm5, %v2424_v26, %v2420_v52  ;;  %vm1537_vm7 = vcmp.eq.f32.partialorder %v1536_v8, 8.507059e+37  ;;  %v2654_v51 = vsub.f32 1.0, %v10081_v31  ;;  %v1739_v5 = vmul.f32 %v1300_v59, %v12661_v17 }
 0x25f   : > { %v1531_v24 = vadd.f32 %v12658_v11, %v1530_v43  ;;  %v2864_v9 = vmul.f32 %v2425_v44, %v2033_v54  ;;  %v10312_v30 = vadd.f32 %v2425_v44, %v1300_v59  ;;  %v1539_v60 = vor.u32 1.1754944e-38, %v1538_v22  ;;  %v12662_v59 = vld [vmem:[#allocation28_spill] sm:$0xff] }
 0x260   : > { %v2655_v36 = vmul.f32 %v10013_v14, %v2654_v51  ;;  %vm2658_vm2 = vweird.f32 %v10013_v14  ;;  %v2661_v6 = vand.u32 2147483647, %v9958_v37  ;;  %v2663_v31 = vand.u32 2147483648, %v9958_v37 }
 0x261   : > { %v1535_v55 = vsel %vm10304_vm6, %v12658_v11, %v1531_v24  ;;  %v10320_v26 = vadd.f32 %v2864_v9, %v1739_v5  ;;  %v3778_v50 = vmul.f32 %v10087_v15, %v10040_v29  ;;  %vm2657_vm8 = vweird.f32 %v9958_v37  ;;  %v12663_v9 = vld [vmem:[#allocation30_spill] sm:$0xff] }
 0x262   : > { %v1540_v12 = vsel %vm1537_vm7, %v1539_v60, %v1535_v55  ;;  %v7373_v27 = vpop.eup %7372  ;;  %v2656_v43 = vadd.f32 %v10013_v14, %v2655_v36  ;;  %vm2662_vm9 = vcmp.eq.f32.partialorder %v2661_v6, 8.507059e+37  ;;  %vm2659_vm10 = vmor %vm2657_vm8, %vm2658_vm2  ;;  %v2664_v52 = vor.u32 1.1754944e-38, %v2663_v31 }
 0x263   : > { %v1755_v54 = vmul.f32 %v1540_v12, %v12662_v59  ;;  %v7375_v11 = vpop.eup %7374  ;;  %v10328_v8 = vadd.f32 1.0, %v7373_v27  ;;  %v3779_v39 = vsub.f32 1.0, %v3778_v50  ;;  %vm3783_vm11 = vweird.f32 %v10087_v15  ;;  %v3198_v50 = vpop.f32.mrf.mxu2 }
 0x264   : > { %v10331_v22 = vadd.f32 1.0, %v7375_v11  ;;  %v2660_v44 = vsel %vm2659_vm10, %v10013_v14, %v2656_v43  ;;  %v3786_v24 = vand.u32 2147483647, %v10040_v29  ;;  %v3788_v51 = vand.u32 2147483648, %v10040_v29  ;;  %v12664_v43 = vld [vmem:[#allocation101_spill] sm:$0xff]  ;;  %v12665_v11 = vld [vmem:[#allocation107_spill] sm:$0xff] }
 0x265   : > { %7376 = vrcp.f32 %v10328_v8  ;;  %v2665_v37 = vsel %vm2662_vm9, %v2664_v52, %v2660_v44  ;;  %v3780_v17 = vmul.f32 %v10087_v15, %v3779_v39  ;;  %v1303_v5 = vmul.f32 %v9920_v53, %v9870_v46  ;;  %v2199_v39 = vpop.f32.mrf.mxu1 }
 0x266   : > { %7378 = vrcp.f32 %v10331_v22  ;;  %v2880_v60 = vmul.f32 %v2665_v37, %v12663_v9  ;;  %v2944_v55 = vadd.f32 %v2665_v37, %v1540_v12  ;;  %vm3782_vm12 = vweird.f32 %v10040_v29 }
 0x267   : > { %v3781_v14 = vadd.f32 %v10087_v15, %v3780_v17  ;;  %vm3787_vm13 = vcmp.eq.f32.partialorder %v3786_v24, 8.507059e+37  ;;  %v3789_v36 = vor.u32 1.1754944e-38, %v3788_v51  ;;  %v1304_v6 = vsub.f32 1.0, %v1303_v5  ;;  %vm3784_vm14 = vmor %vm3782_vm12, %vm3783_vm11 }
 0x268   : > { %v2912_v31 = vadd.f32 %v2880_v60, %v1755_v54  ;;  %vm1307_vm15 = vweird.f32 %v9870_v46  ;;  %v1311_v27 = vand.u32 2147483647, %v9870_v46  ;;  %v1313_v59 = vand.u32 2147483648, %v9870_v46  ;;  %v3322_v54 = vpop.f32.mrf.mxu3 }
 0x269   : > { %v3785_v12 = vsel %vm3784_vm14, %v10087_v15, %v3781_v14  ;;  %v1305_v29 = vmul.f32 %v9920_v53, %v1304_v6  ;;  %vm1308_vm1 = vweird.f32 %v9920_v53  ;;  %v2428_v52 = vmul.f32 %v12665_v11, %v12664_v43 }
 0x26a   : > { %v3790_v44 = vsel %vm3787_vm13, %v3789_v36, %v3785_v12  ;;  %vm10354_vm3 = vcmp.eq.f32.partialorder %v1311_v27, 8.507059e+37  ;;  %v1314_v51 = vor.u32 1.1754944e-38, %v1313_v59  ;;  %vm2432_vm4 = vweird.f32 %v12664_v43  ;;  %vm1309_vm5 = vmor %vm1307_vm15, %vm1308_vm1  ;;  %v12669_v27 = vld [vmem:[#allocation72_spill] sm:$0xff] }
 0x26b   : > { %v10359_v37 = vpop.eup %7376  ;;  %v4005_v15 = vmul.f32 %v3790_v44, %v3198_v50  ;;  %v10361_v17 = vadd.f32 %v3790_v44, %v2944_v55  ;;  %v1306_v5 = vadd.f32 %v9920_v53, %v1305_v29  ;;  %v2429_v9 = vsub.f32 1.0, %v2428_v52  ;;  %v12673_v44 = vld [vmem:[#allocation81_spill] sm:$0xff] }
 0x26c   : > { %v10364_v60 = vpop.eup %7378  ;;  %v2436_v14 = vand.u32 2147483647, %v12664_v43  ;;  %v2438_v36 = vand.u32 2147483648, %v12664_v43  ;;  %v3369_v6 = vsub.f32 %v12656_v48, %v3322_v54  ;;  %v2245_v59 = vsub.f32 %v12669_v27, %v2199_v39 }
 0x26d   : > { %12668 = vst [vmem:[#allocation24_spill] sm:$0xff] %v10361_v17  ;;  %v10372_v12 = vadd.f32 %v4005_v15, %v2912_v31  ;;  %v1310_v55 = vsel %vm1309_vm5, %v9920_v53, %v1306_v5  ;;  %v2430_v50 = vmul.f32 %v12665_v11, %v2429_v9  ;;  %vm2433_vm6 = vweird.f32 %v12665_v11  ;;  %v12674_v15 = vld [vmem:[#allocation88_spill] sm:$0xff]  ;;  %v2035_v9 = vpop.f32.mrf.mxu0 }
 0x26e   : > { %v10379_v46 = vmul.f32 %v10364_v60, %v10331_v22  ;;  %v1315_v29 = vsel %vm10354_vm3, %v1314_v51, %v1310_v55  ;;  %vm10383_vm7 = vcmp.eq.f32.partialorder %v2436_v14, 8.507059e+37  ;;  %v6503_v54 = vmul.f32 -1.442695, %v3369_v6  ;;  %vm2434_vm2 = vmor %vm2432_vm4, %vm2433_vm6 }
 0x26f   : > { %12670 = vst [vmem:[#allocation93_spill] sm:$0xff] %v10372_v12  ;;  %v2431_v31 = vadd.f32 %v12665_v11, %v2430_v50  ;;  %v2439_v39 = vor.u32 1.1754944e-38, %v2438_v36  ;;  %v6308_v53 = vmul.f32 -1.442695, %v2245_v59  ;;  %v1543_v5 = vmul.f32 %v12674_v15, %v12673_v44 }
 0x270   : > { %7380 = vpow2.f32 %v6503_v54  ;;  %vm1547_vm8 = vweird.f32 %v12673_v44  ;;  %vm1548_vm9 = vweird.f32 %v12674_v15  ;;  %v1551_v24 = vand.u32 2147483647, %v12673_v44 }
 0x271   : > { %v2435_v51 = vsel %vm2434_vm2, %v12665_v11, %v2431_v31  ;;  %7382 = vpow2.f32 %v6308_v53  ;;  %v1544_v14 = vsub.f32 1.0, %v1543_v5  ;;  %v1553_v36 = vand.u32 2147483648, %v12673_v44  ;;  %vm10410_vm11 = vmor %vm1547_vm8, %vm1548_vm9  ;;  %v6873_v5 = vld [vmem:[%s12165_s1 + $0x1a0] sm:$0xff] }
 0x272   : > { %v1740_v6 = vmul.f32 %v1315_v29, %v9427_v32  ;;  %v2440_v59 = vsel %vm10383_vm7, %v2439_v39, %v2435_v51  ;;  %vm10400_vm10 = vcmp.eq.f32.partialorder %v1551_v24, 8.507059e+37  ;;  %v2669_v55 = vsub.f32 1.0, %v10112_v7  ;;  %6665 = vmatmul.msk.bf16.gmra.mxu1 %vm846_vm0, %v6873_v5  ;;  %6631 = vmatmul.msk.bf16.gmra.mxu0 %vm846_vm0, %v6873_v5  ;;  %v3200_v51 = vpop.f32.mrf.mxu2 }
 0x273   : > { %v2865_v50 = vmul.f32 %v2440_v59, %v2035_v9  ;;  %v10405_v54 = vadd.f32 %v2440_v59, %v1315_v29  ;;  %v1545_v11 = vmul.f32 %v12674_v15, %v1544_v14  ;;  %v1554_v31 = vor.u32 1.1754944e-38, %v1553_v36 }
 0x274   : > { %v2670_v32 = vmul.f32 %v10093_v41, %v2669_v55  ;;  %vm2673_vm12 = vweird.f32 %v10093_v41  ;;  %v2676_v52 = vand.u32 2147483647, %v10049_v45  ;;  %v2678_v7 = vand.u32 2147483648, %v10049_v45 }
 0x275   : > { %v10418_v39 = vadd.f32 %v2865_v50, %v1740_v6  ;;  %v1546_v29 = vadd.f32 %v12674_v15, %v1545_v11  ;;  %vm2672_vm13 = vweird.f32 %v10049_v45  ;;  %v3793_v44 = vmul.f32 %v10155_v28, %v10126_v1 }
 0x276   : > { %v7381_v9 = vpop.eup %7380  ;;  %v2671_v24 = vadd.f32 %v10093_v41, %v2670_v32  ;;  %vm10428_vm14 = vcmp.eq.f32.partialorder %v2676_v52, 8.507059e+37  ;;  %v2679_v14 = vor.u32 1.1754944e-38, %v2678_v7  ;;  %vm3797_vm15 = vweird.f32 %v10126_v1  ;;  %vm2674_vm1 = vmor %vm2672_vm13, %vm2673_vm12  ;;  %v12681_v7 = vld [vmem:[#allocation31_spill] sm:$0xff] }
 0x277   : > { %v7383_v36 = vpop.eup %7382  ;;  %v10433_v6 = vadd.f32 1.0, %v7381_v9  ;;  %v1550_v45 = vsel %vm10410_vm11, %v12674_v15, %v1546_v29  ;;  %v3794_v59 = vsub.f32 1.0, %v3793_v44  ;;  %v3801_v55 = vand.u32 2147483647, %v10126_v1  ;;  %v12682_v44 = vld [vmem:[#allocation33_spill] sm:$0xff] }
 0x278   : > { %v10443_v50 = vadd.f32 1.0, %v7383_v36  ;;  %v1555_v11 = vsel %vm10400_vm10, %v1554_v31, %v1550_v45  ;;  %v2675_v32 = vsel %vm2674_vm1, %v10093_v41, %v2671_v24  ;;  %v3803_v53 = vand.u32 2147483648, %v10126_v1 }
 0x279   : > { %7384 = vrcp.f32 %v10433_v6  ;;  %v2680_v15 = vsel %vm10428_vm14, %v2679_v14, %v2675_v32  ;;  %v3795_v52 = vmul.f32 %v10155_v28, %v3794_v59  ;;  %vm3798_vm3 = vweird.f32 %v10155_v28 }
 0x27a   : > { %7386 = vrcp.f32 %v10443_v50  ;;  %v1756_v29 = vmul.f32 %v1555_v11, %v12681_v7  ;;  %v2881_v43 = vmul.f32 %v2680_v15, %v12682_v44  ;;  %v2945_v31 = vadd.f32 %v2680_v15, %v1555_v11  ;;  %vm3799_vm5 = vmor %vm3797_vm15, %vm3798_vm3  ;;  %v12684_v11 = vld [vmem:[#allocation118_spill] sm:$0xff]  ;;  %v2202_v15 = vpop.f32.mrf.mxu1 }
 0x27b   : > { %v3796_v41 = vadd.f32 %v10155_v28, %v3795_v52  ;;  %vm3802_vm4 = vcmp.eq.f32.partialorder %v3801_v55, 8.507059e+37  ;;  %v3804_v5 = vor.u32 1.1754944e-38, %v3803_v53  ;;  %v1318_v9 = vmul.f32 %v10001_v33, %v9946_v56  ;;  %v12683_v55 = vld [vmem:[#allocation108_spill] sm:$0xff]  ;;  %v3324_v53 = vpop.f32.mrf.mxu3 }
 0x27c   : > { %v2913_v24 = vadd.f32 %v2881_v43, %v1756_v29  ;;  %vm1322_vm6 = vweird.f32 %v9946_v56  ;;  %v1326_v14 = vand.u32 2147483647, %v9946_v56  ;;  %v1328_v36 = vand.u32 2147483648, %v9946_v56 }
 0x27d   : > { %v3800_v45 = vsel %vm3799_vm5, %v10155_v28, %v3796_v41  ;;  %v1319_v59 = vsub.f32 1.0, %v1318_v9  ;;  %vm1323_vm7 = vweird.f32 %v10001_v33  ;;  %v2443_v32 = vmul.f32 %v12684_v11, %v12683_v55 }
 0x27e   : > { %v3805_v52 = vsel %vm3802_vm4, %v3804_v5, %v3800_v45  ;;  %vm10469_vm2 = vcmp.eq.f32.partialorder %v1326_v14, 8.507059e+37  ;;  %v1329_v7 = vor.u32 1.1754944e-38, %v1328_v36  ;;  %vm2447_vm8 = vweird.f32 %v12683_v55  ;;  %v12687_v45 = vld [vmem:[#allocation75_spill] sm:$0xff]  ;;  %vm1324_vm10 = vmor %vm1322_vm6, %vm1323_vm7 }
 0x27f   : > { %v10474_v29 = vpop.eup %7384  ;;  %v4006_v44 = vmul.f32 %v3805_v52, %v3200_v51  ;;  %v10476_v28 = vadd.f32 %v3805_v52, %v2945_v31  ;;  %v1320_v43 = vmul.f32 %v10001_v33, %v1319_v59  ;;  %v2444_v41 = vsub.f32 1.0, %v2443_v32 }
 0x280   : > { %v10479_v9 = vpop.eup %7386  ;;  %v2451_v48 = vand.u32 2147483647, %v12683_v55  ;;  %v2453_v5 = vand.u32 2147483648, %v12683_v55  ;;  %v3370_v14 = vsub.f32 %v12669_v27, %v3324_v53  ;;  %v2246_v36 = vsub.f32 %v12687_v45, %v2202_v15 }
 0x281   : > { %v10485_v12 = vadd.f32 %v4006_v44, %v2913_v24  ;;  %v1321_v17 = vadd.f32 %v10001_v33, %v1320_v43  ;;  %v2445_v31 = vmul.f32 %v12684_v11, %v2444_v41  ;;  %vm2448_vm9 = vweird.f32 %v12684_v11  ;;  %v12691_v44 = vld [vmem:[#allocation82_spill] sm:$0xff]  ;;  %v12692_v43 = vld [vmem:[#allocation89_spill] sm:$0xff] }
 0x282   : > { %v10492_v51 = vmul.f32 %v10479_v9, %v10443_v50  ;;  %vm10498_vm11 = vcmp.eq.f32.partialorder %v2451_v48, 8.507059e+37  ;;  %v6504_v24 = vmul.f32 -1.442695, %v3370_v14  ;;  %v6309_v32 = vmul.f32 -1.442695, %v2246_v36  ;;  %vm2449_vm12 = vmor %vm2447_vm8, %vm2448_vm9 }
 0x283   : > { %12688 = vst [vmem:[#allocation100_spill] sm:$0xff] %v10485_v12  ;;  %v1325_v53 = vsel %vm1324_vm10, %v10001_v33, %v1321_v17  ;;  %v2446_v15 = vadd.f32 %v12684_v11, %v2445_v31  ;;  %v2454_v52 = vor.u32 1.1754944e-38, %v2453_v5  ;;  %v1558_v41 = vmul.f32 %v12692_v43, %v12691_v44  ;;  %v2038_v12 = vpop.f32.mrf.mxu0 }
 0x284   : > { %v1330_v27 = vsel %vm10469_vm2, %v1329_v7, %v1325_v53  ;;  %7388 = vpow2.f32 %v6504_v24  ;;  %vm1562_vm13 = vweird.f32 %v12691_v44  ;;  %v1566_v56 = vand.u32 2147483647, %v12691_v44 }
 0x285   : > { %v2450_v33 = vsel %vm2449_vm12, %v12684_v11, %v2446_v15  ;;  %7390 = vpow2.f32 %v6309_v32  ;;  %v1559_v48 = vsub.f32 1.0, %v1558_v41  ;;  %vm1563_vm14 = vweird.f32 %v12692_v43 }
 0x286   : > { %v1741_v17 = vmul.f32 %v1330_v27, %v9477_v47  ;;  %v2455_v1 = vsel %vm10498_vm11, %v2454_v52, %v2450_v33  ;;  %v1568_v7 = vand.u32 2147483648, %v12691_v44  ;;  %v2684_v55 = vsub.f32 1.0, %v10172_v25  ;;  %vm10526_vm1 = vmor %vm1562_vm13, %vm1563_vm14 }
 0x287   : > { %v2866_v5 = vmul.f32 %v2455_v1, %v2038_v12  ;;  %v10519_v14 = vadd.f32 %v2455_v1, %v1330_v27  ;;  %v1560_v36 = vmul.f32 %v12692_v43, %v1559_v48  ;;  %vm10522_vm15 = vcmp.eq.f32.partialorder %v1566_v56, 8.507059e+37 }
 0x288   : > { %v1569_v47 = vor.u32 1.1754944e-38, %v1568_v7  ;;  %v2685_v59 = vmul.f32 %v10162_v61, %v2684_v55  ;;  %vm2688_vm3 = vweird.f32 %v10162_v61  ;;  %v2691_v25 = vand.u32 2147483647, %v10130_v2 }
 0x289   : > { %v10533_v12 = vadd.f32 %v2866_v5, %v1741_v17  ;;  %v1561_v27 = vadd.f32 %v12692_v43, %v1560_v36  ;;  %v2693_v24 = vand.u32 2147483648, %v10130_v2  ;;  %v3808_v32 = vmul.f32 %v10268_v63, %v10229_v19  ;;  %v12698_v36 = vld [vmem:[#allocation36_spill] sm:$0xff] }
 0x28a   : > { %v7389_v53 = vpop.eup %7388  ;;  %v2686_v15 = vadd.f32 %v10162_v61, %v2685_v59  ;;  %vm2687_vm4 = vweird.f32 %v10130_v2  ;;  %vm2692_vm5 = vcmp.eq.f32.partialorder %v2691_v25, 8.507059e+37  ;;  %vm3812_vm6 = vweird.f32 %v10229_v19 }
 0x28b   : > { %v7391_v52 = vpop.eup %7390  ;;  %v10542_v44 = vadd.f32 1.0, %v7389_v53  ;;  %v1565_v41 = vsel %vm10526_vm1, %v12692_v43, %v1561_v27  ;;  %vm2689_vm7 = vmor %vm2687_vm4, %vm2688_vm3  ;;  %v2694_v56 = vor.u32 1.1754944e-38, %v2693_v24  ;;  %v3809_v33 = vsub.f32 1.0, %v3808_v32  ;;  %v12697_v43 = vld [vmem:[#allocation34_spill] sm:$0xff] }
 0x28c   : > { %v10547_v48 = vadd.f32 1.0, %v7391_v52  ;;  %v1570_v17 = vsel %vm10522_vm15, %v1569_v47, %v1565_v41  ;;  %v2690_v2 = vsel %vm2689_vm7, %v10162_v61, %v2686_v15  ;;  %v3816_v1 = vand.u32 2147483647, %v10229_v19  ;;  %v3203_v15 = vpop.f32.mrf.mxu2 }
 0x28d   : > { %7392 = vrcp.f32 %v10542_v44  ;;  %v2695_v7 = vsel %vm2692_vm5, %v2694_v56, %v2690_v2  ;;  %v3810_v55 = vmul.f32 %v10268_v63, %v3809_v33  ;;  %vm3813_vm2 = vweird.f32 %v10268_v63  ;;  %v12703_v33 = vld [vmem:[#allocation112_spill] sm:$0xff]  ;;  %v3327_v2 = vpop.f32.mrf.mxu3 }
 0x28e   : > { %7394 = vrcp.f32 %v10547_v48  ;;  %v1757_v5 = vmul.f32 %v1570_v17, %v12697_v43  ;;  %v2882_v31 = vmul.f32 %v2695_v7, %v12698_v36  ;;  %v2946_v59 = vadd.f32 %v2695_v7, %v1570_v17  ;;  %vm10569_vm9 = vmor %vm3812_vm6, %vm3813_vm2  ;;  %v12704_v17 = vld [vmem:[#allocation121_spill] sm:$0xff] }
 0x28f   : > { %v3811_v11 = vadd.f32 %v10268_v63, %v3810_v55  ;;  %vm10560_vm8 = vcmp.eq.f32.partialorder %v3816_v1, 8.507059e+37  ;;  %v3818_v47 = vand.u32 2147483648, %v10229_v19  ;;  %v1333_v25 = vmul.f32 %v10077_v21, %v10024_v10 }
 0x290   : > { %v2914_v27 = vadd.f32 %v2882_v31, %v1757_v5  ;;  %vm1337_vm10 = vweird.f32 %v10024_v10  ;;  %v1341_v32 = vand.u32 2147483647, %v10024_v10  ;;  %v1343_v53 = vand.u32 2147483648, %v10024_v10  ;;  %v2204_v31 = vpop.f32.mrf.mxu1 }
 0x291   : > { %v3815_v52 = vsel %vm10569_vm9, %v10268_v63, %v3811_v11  ;;  %v3819_v41 = vor.u32 1.1754944e-38, %v3818_v47  ;;  %v1334_v56 = vsub.f32 1.0, %v1333_v25  ;;  %v2458_v19 = vmul.f32 %v12704_v17, %v12703_v33 }
 0x292   : > { %vm1338_vm11 = vweird.f32 %v10077_v21  ;;  %vm10582_vm12 = vcmp.eq.f32.partialorder %v1341_v32, 8.507059e+37  ;;  %v1344_v7 = vor.u32 1.1754944e-38, %v1343_v53  ;;  %vm2463_vm13 = vweird.f32 %v12704_v17 }
 0x293   : > { %v10587_v55 = vpop.eup %7392  ;;  %v3820_v63 = vsel %vm10560_vm8, %v3819_v41, %v3815_v52  ;;  %v1335_v43 = vmul.f32 %v10077_v21, %v1334_v56  ;;  %v2459_v5 = vsub.f32 1.0, %v2458_v19  ;;  %v2466_v36 = vand.u32 2147483647, %v12703_v33  ;;  %vm1339_vm1 = vmor %vm1337_vm10, %vm1338_vm11  ;;  %v12709_v56 = vld [vmem:[#allocation79_spill] sm:$0xff] }
 0x294   : > { %v10593_v11 = vpop.eup %7394  ;;  %v4007_v47 = vmul.f32 %v3820_v63, %v3203_v15  ;;  %v10595_v25 = vadd.f32 %v3820_v63, %v2946_v59  ;;  %v2468_v24 = vand.u32 2147483648, %v12703_v33  ;;  %v3371_v32 = vsub.f32 %v12687_v45, %v3327_v2 }
 0x295   : > { %v1336_v53 = vadd.f32 %v10077_v21, %v1335_v43  ;;  %v2460_v61 = vmul.f32 %v12704_v17, %v2459_v5  ;;  %vm2462_vm14 = vweird.f32 %v12703_v33  ;;  %vm10602_vm15 = vcmp.eq.f32.partialorder %v2466_v36, 8.507059e+37  ;;  %v12713_v43 = vld [vmem:[#allocation90_spill] sm:$0xff]  ;;  %v2040_v36 = vpop.f32.mrf.mxu0 }
 0x296   : > { %v10606_v41 = vadd.f32 %v4007_v47, %v2914_v27  ;;  %v2469_v59 = vor.u32 1.1754944e-38, %v2468_v24  ;;  %v6505_v15 = vmul.f32 -1.442695, %v3371_v32  ;;  %v2247_v19 = vsub.f32 %v12709_v56, %v2204_v31  ;;  %vm10617_vm3 = vmor %vm2462_vm14, %vm2463_vm13  ;;  %v12712_v27 = vld [vmem:[#allocation83_spill] sm:$0xff] }
 0x297   : > { %v1340_v2 = vsel %vm1339_vm1, %v10077_v21, %v1336_v53  ;;  %v2461_v63 = vadd.f32 %v12704_v17, %v2460_v61  ;;  %v1573_v5 = vmul.f32 %v12713_v43, %v12712_v27  ;;  %vm1577_vm4 = vweird.f32 %v12712_v27  ;;  %v6874_v21 = vld [vmem:[%s12165_s1 + $0x1a8] sm:$0xff]  ;;  %v6901_v47 = vld [vmem:[%s12171_s7 + $0x10] sm:$0xff] }
 0x298   : > { %v1345_v10 = vsel %vm10582_vm12, %v1344_v7, %v1340_v2  ;;  %7396 = vpow2.f32 %v6505_v15  ;;  %v6310_v31 = vmul.f32 -1.442695, %v2247_v19  ;;  %vm1578_vm5 = vweird.f32 %v12713_v43  ;;  %v6893_v24 = vld [vmem:[%s12170_s6 + $0x10] sm:$0xff]  ;;  %6666 = vmatmul.msk.bf16.gmra.mxu1 %vm846_vm0, %v6874_v21  ;;  %5373 = vmatpush.bf16.msra.mxu2 %v6901_v47 }
 0x299   : > { %v12714_v32 = vld [vmem:[#allocation7_spill] sm:$0xff]  ;;  %v2465_v7 = vsel %vm10617_vm3, %v12704_v17, %v2461_v63  ;;  %v1574_v53 = vsub.f32 1.0, %v1573_v5  ;;  %v1581_v61 = vand.u32 2147483647, %v12712_v27  ;;  %v1583_v19 = vand.u32 2147483648, %v12712_v27  ;;  %5510 = vmatpush.bf16.msra.mxu3 %v6893_v24  ;;  %6632 = vmatmul.msk.bf16.gmra.mxu0 %vm846_vm0, %v6874_v21  ;;  %vm10658_vm7 = vmor %vm1577_vm4, %vm1578_vm5 }
 0x29a   : > { %v1742_v1 = vmul.f32 %v1345_v10, %v12714_v32  ;;  %v2470_v15 = vsel %vm10602_vm15, %v2469_v59, %v2465_v7  ;;  %7398 = vpow2.f32 %v6310_v31  ;;  %v2699_v2 = vsub.f32 1.0, %v10282_v23 }
 0x29b   : > { %v2867_v45 = vmul.f32 %v2470_v15, %v2040_v36  ;;  %v10646_v32 = vadd.f32 %v2470_v15, %v1345_v10  ;;  %v1575_v33 = vmul.f32 %v12713_v43, %v1574_v53  ;;  %vm10649_vm6 = vcmp.eq.f32.partialorder %v1581_v61, 8.507059e+37  ;;  %v3329_v15 = vpop.f32.mrf.mxu3 }
 0x29c   : > { %v1584_v52 = vor.u32 1.1754944e-38, %v1583_v19  ;;  %v2700_v59 = vmul.f32 %v10272_v4, %v2699_v2  ;;  %vm2702_vm2 = vweird.f32 %v10237_v0  ;;  %vm2703_vm8 = vweird.f32 %v10272_v4  ;;  %v2207_v19 = vpop.f32.mrf.mxu1 }
 0x29d   : > { %v10665_v63 = vadd.f32 %v2867_v45, %v1742_v1  ;;  %v1576_v5 = vadd.f32 %v12713_v43, %v1575_v33  ;;  %v2706_v10 = vand.u32 2147483647, %v10237_v0  ;;  %v2708_v36 = vand.u32 2147483648, %v10237_v0  ;;  %vm2704_vm11 = vmor %vm2702_vm2, %vm2703_vm8  ;;  %v12719_v33 = vld [vmem:[#allocation37_spill] sm:$0xff] }
 0x29e   : > { %v7397_v27 = vpop.eup %7396  ;;  %v2701_v31 = vadd.f32 %v10272_v4, %v2700_v59  ;;  %v3823_v21 = vmul.f32 %v10359_v37, %v10328_v8  ;;  %vm3827_vm9 = vweird.f32 %v10328_v8  ;;  %vm3828_vm10 = vweird.f32 %v10359_v37  ;;  %v12720_v59 = vld [vmem:[#allocation39_spill] sm:$0xff] }
 0x29f   : > { %v10675_v47 = vadd.f32 1.0, %v7397_v27  ;;  %v1580_v45 = vsel %vm10658_vm7, %v12713_v43, %v1576_v5  ;;  %vm2707_vm12 = vcmp.eq.f32.partialorder %v2706_v10, 8.507059e+37  ;;  %v2709_v24 = vor.u32 1.1754944e-38, %v2708_v36  ;;  %v12723_v27 = vld [vmem:[#allocation86_spill] sm:$0xff]  ;;  %vm3829_vm15 = vmor %vm3827_vm9, %vm3828_vm10 }
 0x2a0   : > { %v7399_v0 = vpop.eup %7398  ;;  %v1585_v1 = vsel %vm10649_vm6, %v1584_v52, %v1580_v45  ;;  %v2705_v7 = vsel %vm2704_vm11, %v10272_v4, %v2701_v31  ;;  %v3824_v53 = vsub.f32 1.0, %v3823_v21  ;;  %v3831_v61 = vand.u32 2147483647, %v10328_v8 }
 0x2a1   : > { %7400 = vrcp.f32 %v10675_v47  ;;  %v10685_v2 = vadd.f32 1.0, %v7399_v0  ;;  %v1758_v43 = vmul.f32 %v1585_v1, %v12719_v33  ;;  %v2710_v23 = vsel %vm2707_vm12, %v2709_v24, %v2705_v7  ;;  %v12724_v24 = vld [vmem:[#allocation64_spill] sm:$0xff]  ;;  %v3205_v7 = vpop.f32.mrf.mxu2 }
 0x2a2   : > { %v2883_v5 = vmul.f32 %v2710_v23, %v12720_v59  ;;  %v2947_v10 = vadd.f32 %v2710_v23, %v1585_v1  ;;  %v3825_v17 = vmul.f32 %v10359_v37, %v3824_v53  ;;  %vm10690_vm13 = vcmp.eq.f32.partialorder %v3831_v61, 8.507059e+37  ;;  %v12725_v0 = vld [vmem:[#allocation60_spill] sm:$0xff] }
 0x2a3   : > { %7402 = vrcp.f32 %v10685_v2  ;;  %v3833_v4 = vand.u32 2147483648, %v10328_v8  ;;  %v3372_v36 = vsub.f32 %v12709_v56, %v3329_v15  ;;  %v2248_v31 = vsub.f32 %v12723_v27, %v2207_v19 }
 0x2a4   : > { %v2915_v21 = vadd.f32 %v2883_v5, %v1758_v43  ;;  %v3826_v45 = vadd.f32 %v10359_v37, %v3825_v17  ;;  %v1588_v1 = vmul.f32 %v12725_v0, %v12724_v24  ;;  %vm1592_vm14 = vweird.f32 %v12724_v24  ;;  %v2209_v56 = vpop.f32.mrf.mxu1 }
 0x2a5   : > { %v3834_v53 = vor.u32 1.1754944e-38, %v3833_v4  ;;  %v6506_v61 = vmul.f32 -1.442695, %v3372_v36  ;;  %v6311_v33 = vmul.f32 -1.442695, %v2248_v31  ;;  %vm1593_vm1 = vweird.f32 %v12725_v0 }
 0x2a6   : > { %v3830_v15 = vsel %vm3829_vm15, %v10359_v37, %v3826_v45  ;;  %v1589_v19 = vsub.f32 1.0, %v1588_v1  ;;  %v1596_v43 = vand.u32 2147483647, %v12724_v24  ;;  %v1598_v23 = vand.u32 2147483648, %v12724_v24  ;;  %vm10728_vm3 = vmor %vm1592_vm14, %vm1593_vm1  ;;  %v12734_v45 = vld [vmem:[#allocation40_spill] sm:$0xff] }
 0x2a7   : > { %v10710_v59 = vpop.eup %7400  ;;  %v10714_v5 = vmul.f32 %v10593_v11, %v10547_v48  ;;  %v3835_v8 = vsel %vm10690_vm13, %v3834_v53, %v3830_v15  ;;  %7404 = vpow2.f32 %v6506_v61  ;;  %v2714_v17 = vsub.f32 1.0, %v10379_v46 }
 0x2a8   : > { %v4008_v4 = vmul.f32 %v3835_v8, %v3205_v7  ;;  %v10719_v36 = vadd.f32 %v3835_v8, %v2947_v10  ;;  %7406 = vpow2.f32 %v6311_v33  ;;  %v1590_v37 = vmul.f32 %v12725_v0, %v1589_v19  ;;  %v3332_v19 = vpop.f32.mrf.mxu3 }
 0x2a9   : > { %v10722_v31 = vpop.eup %7402  ;;  %v1599_v52 = vor.u32 1.1754944e-38, %v1598_v23  ;;  %v2715_v1 = vmul.f32 %v10364_v60, %v2714_v17  ;;  %vm2717_vm4 = vweird.f32 %v10331_v22  ;;  %vm2718_vm5 = vweird.f32 %v10364_v60  ;;  %v3208_v15 = vpop.f32.mrf.mxu2 }
 0x2aa   : > { %12726 = vst [vmem:[#allocation124_spill] sm:$0xff] %v10719_v36  ;;  %v10735_v46 = vadd.f32 %v4008_v4, %v2915_v21  ;;  %v1591_v10 = vadd.f32 %v12725_v0, %v1590_v37  ;;  %vm1597_vm6 = vcmp.eq.f32.partialorder %v1596_v43, 8.507059e+37  ;;  %v2721_v7 = vand.u32 2147483647, %v10331_v22  ;;  %vm10747_vm2 = vmor %vm2717_vm4, %vm2718_vm5 }
 0x2ab   : > { %v2716_v24 = vadd.f32 %v10364_v60, %v2715_v1  ;;  %v2723_v53 = vand.u32 2147483648, %v10331_v22  ;;  %v3838_v61 = vmul.f32 %v10474_v29, %v10433_v6  ;;  %vm3842_vm7 = vweird.f32 %v10433_v6 }
 0x2ac   : > { %12729 = vst [vmem:[#allocation78_spill] sm:$0xff] %v10735_v46  ;;  %v1595_v33 = vsel %vm10728_vm3, %v12725_v0, %v1591_v10  ;;  %vm10751_vm8 = vcmp.eq.f32.partialorder %v2721_v7, 8.507059e+37  ;;  %vm3843_vm9 = vweird.f32 %v10474_v29  ;;  %v3846_v22 = vand.u32 2147483647, %v10433_v6 }
 0x2ad   : > { %v7405_v43 = vpop.eup %7404  ;;  %v1600_v23 = vsel %vm1597_vm6, %v1599_v52, %v1595_v33  ;;  %v2720_v8 = vsel %vm10747_vm2, %v10364_v60, %v2716_v24  ;;  %v2724_v0 = vor.u32 1.1754944e-38, %v2723_v53  ;;  %v3839_v17 = vsub.f32 1.0, %v3838_v61  ;;  %v12737_v53 = vld [vmem:[#allocation42_spill] sm:$0xff]  ;;  %vm3844_vm11 = vmor %vm3842_vm7, %vm3843_vm9 }
 0x2ae   : > { %v7407_v4 = vpop.eup %7406  ;;  %v10760_v37 = vadd.f32 1.0, %v7405_v43  ;;  %v1759_v1 = vmul.f32 %v1600_v23, %v12734_v45  ;;  %vm10763_vm10 = vcmp.eq.f32.partialorder %v3846_v22, 8.507059e+37  ;;  %v3848_v7 = vand.u32 2147483648, %v10433_v6 }
 0x2af   : > { %v10768_v46 = vadd.f32 1.0, %v7407_v4  ;;  %v2725_v52 = vsel %vm10751_vm8, %v2724_v0, %v2720_v8  ;;  %v3840_v60 = vmul.f32 %v10474_v29, %v3839_v17  ;;  %v3373_v24 = vsub.f32 %v12723_v27, %v3332_v19  ;;  %v12738_v4 = vld [vmem:[#allocation92_spill] sm:$0xff]  ;;  %v12739_v19 = vld [vmem:[#allocation87_spill] sm:$0xff] }
 0x2b0   : > { %7408 = vrcp.f32 %v10760_v37  ;;  %v2884_v61 = vmul.f32 %v2725_v52, %v12737_v53  ;;  %v2948_v33 = vadd.f32 %v2725_v52, %v1600_v23  ;;  %v3849_v21 = vor.u32 1.1754944e-38, %v3848_v7  ;;  %v12740_v8 = vld [vmem:[#allocation12_spill] sm:$0xff]  ;;  %v12747_v27 = vld [vmem:[#allocation43_spill] sm:$0xff] }
 0x2b1   : > { %7410 = vrcp.f32 %v10768_v46  ;;  %v3841_v22 = vadd.f32 %v10474_v29, %v3840_v60  ;;  %v6507_v43 = vmul.f32 -1.442695, %v3373_v24  ;;  %v2249_v45 = vsub.f32 %v12738_v4, %v2209_v56 }
 0x2b2   : > { %v2916_v36 = vadd.f32 %v2884_v61, %v1759_v1  ;;  %v1603_v0 = vmul.f32 %v12740_v8, %v12739_v19  ;;  %vm1607_vm12 = vweird.f32 %v12739_v19  ;;  %vm1608_vm13 = vweird.f32 %v12740_v8  ;;  %v6875_v1 = vld [vmem:[%s12165_s1 + $0x1b0] sm:$0xff] }
 0x2b3   : > { %v3845_v23 = vsel %vm3844_vm11, %v10474_v29, %v3841_v22  ;;  %7412 = vpow2.f32 %v6507_v43  ;;  %v6312_v17 = vmul.f32 -1.442695, %v2249_v45  ;;  %v1611_v56 = vand.u32 2147483647, %v12739_v19  ;;  %6667 = vmatmul.msk.bf16.gmra.mxu1 %vm846_vm0, %v6875_v1  ;;  %6633 = vmatmul.msk.bf16.gmra.mxu0 %vm846_vm0, %v6875_v1  ;;  %vm10820_vm15 = vmor %vm1607_vm12, %vm1608_vm13  ;;  %v12748_v45 = vld [vmem:[#allocation45_spill] sm:$0xff] }
 0x2b4   : > { %v3850_v6 = vsel %vm10763_vm10, %v3849_v21, %v3845_v23  ;;  %v1604_v7 = vsub.f32 1.0, %v1603_v0  ;;  %v1613_v52 = vand.u32 2147483648, %v12739_v19  ;;  %v2729_v60 = vsub.f32 1.0, %v10492_v51 }
 0x2b5   : > { %v10798_v24 = vmul.f32 %v10722_v31, %v10685_v2  ;;  %v4009_v29 = vmul.f32 %v3850_v6, %v3208_v15  ;;  %v10800_v53 = vadd.f32 %v3850_v6, %v2948_v33  ;;  %7414 = vpow2.f32 %v6312_v17 }
 0x2b6   : > { %v10804_v61 = vpop.eup %7408  ;;  %v1605_v10 = vmul.f32 %v12740_v8, %v1604_v7  ;;  %vm10807_vm14 = vcmp.eq.f32.partialorder %v1611_v56, 8.507059e+37  ;;  %v1614_v51 = vor.u32 1.1754944e-38, %v1613_v52  ;;  %v2730_v22 = vmul.f32 %v10479_v9, %v2729_v60 }
 0x2b7   : > { %12741 = vst [vmem:[#allocation85_spill] sm:$0xff] %v10800_v53  ;;  %v10812_v43 = vpop.eup %7410  ;;  %v10814_v33 = vadd.f32 %v4009_v29, %v2916_v36  ;;  %vm2733_vm1 = vweird.f32 %v10479_v9  ;;  %v2736_v15 = vand.u32 2147483647, %v10443_v50  ;;  %v2738_v0 = vand.u32 2147483648, %v10443_v50 }
 0x2b8   : > { %v1606_v23 = vadd.f32 %v12740_v8, %v1605_v10  ;;  %v2731_v17 = vadd.f32 %v10479_v9, %v2730_v22  ;;  %vm2732_vm3 = vweird.f32 %v10443_v50  ;;  %v3853_v36 = vmul.f32 %v10587_v55, %v10542_v44 }
 0x2b9   : > { %12744 = vst [vmem:[#allocation25_spill] sm:$0xff] %v10814_v33  ;;  %v7413_v19 = vpop.eup %7412  ;;  %v10834_v56 = vmul.f32 %v10812_v43, %v10768_v46  ;;  %vm2734_vm4 = vmor %vm2732_vm3, %vm2733_vm1  ;;  %vm2737_vm5 = vcmp.eq.f32.partialorder %v2736_v15, 8.507059e+37  ;;  %v2739_v1 = vor.u32 1.1754944e-38, %v2738_v0  ;;  %vm3857_vm6 = vweird.f32 %v10542_v44  ;;  %v3334_v0 = vpop.f32.mrf.mxu3 }
 0x2ba   : > { %v10837_v6 = vadd.f32 1.0, %v7413_v19  ;;  %v1610_v7 = vsel %vm10820_vm15, %v12740_v8, %v1606_v23  ;;  %v2735_v50 = vsel %vm2734_vm4, %v10479_v9, %v2731_v17  ;;  %v3854_v52 = vsub.f32 1.0, %v3853_v36  ;;  %v2212_v33 = vpop.f32.mrf.mxu1 }
 0x2bb   : > { %v7415_v60 = vpop.eup %7414  ;;  %v1615_v29 = vsel %vm10807_vm14, %v1614_v51, %v1610_v7  ;;  %v2740_v10 = vsel %vm2737_vm5, %v2739_v1, %v2735_v50  ;;  %v3861_v22 = vand.u32 2147483647, %v10542_v44  ;;  %v3863_v15 = vand.u32 2147483648, %v10542_v44  ;;  %v12751_v1 = vld [vmem:[#allocation94_spill] sm:$0xff]  ;;  %v12752_v50 = vld [vmem:[#allocation91_spill] sm:$0xff] }
 0x2bc   : > { %v10847_v19 = vadd.f32 1.0, %v7415_v60  ;;  %v1760_v53 = vmul.f32 %v1615_v29, %v12747_v27  ;;  %v2885_v8 = vmul.f32 %v2740_v10, %v12748_v45  ;;  %vm3858_vm7 = vweird.f32 %v10587_v55  ;;  %v12753_v60 = vld [vmem:[#allocation95_spill] sm:$0xff] }
 0x2bd   : > { %7416 = vrcp.f32 %v10837_v6  ;;  %v2949_v9 = vadd.f32 %v2740_v10, %v1615_v29  ;;  %v3855_v21 = vmul.f32 %v10587_v55, %v3854_v52  ;;  %vm10854_vm2 = vcmp.eq.f32.partialorder %v3861_v22, 8.507059e+37  ;;  %v3210_v52 = vpop.f32.mrf.mxu2  ;;  %vm3859_vm9 = vmor %vm3857_vm6, %vm3858_vm7 }
 0x2be   : > { %v2917_v23 = vadd.f32 %v2885_v8, %v1760_v53  ;;  %v3864_v17 = vor.u32 1.1754944e-38, %v3863_v15  ;;  %v3374_v36 = vsub.f32 %v12738_v4, %v3334_v0  ;;  %v2250_v7 = vsub.f32 %v12751_v1, %v2212_v33 }
 0x2bf   : > { %7418 = vrcp.f32 %v10847_v19  ;;  %v3856_v27 = vadd.f32 %v10587_v55, %v3855_v21  ;;  %v1618_v45 = vmul.f32 %v12753_v60, %v12752_v50  ;;  %vm1622_vm8 = vweird.f32 %v12752_v50 }
 0x2c0   : > { %v6508_v29 = vmul.f32 -1.442695, %v3374_v36  ;;  %v6313_v53 = vmul.f32 -1.442695, %v2250_v7  ;;  %vm1623_vm10 = vweird.f32 %v12753_v60  ;;  %v1626_v10 = vand.u32 2147483647, %v12752_v50 }
 0x2c1   : > { %v3860_v33 = vsel %vm3859_vm9, %v10587_v55, %v3856_v27  ;;  %v1619_v22 = vsub.f32 1.0, %v1618_v45  ;;  %v1628_v15 = vand.u32 2147483648, %v12752_v50  ;;  %v2744_v0 = vsub.f32 1.0, %v10714_v5  ;;  %vm10885_vm13 = vmor %vm1622_vm8, %vm1623_vm10 }
 0x2c2   : > { %v3865_v8 = vsel %vm10854_vm2, %v3864_v17, %v3860_v33  ;;  %7420 = vpow2.f32 %v6508_v29  ;;  %vm2747_vm11 = vweird.f32 %v10547_v48  ;;  %vm2748_vm12 = vweird.f32 %v10593_v11  ;;  %v3337_v29 = vpop.f32.mrf.mxu3 }
 0x2c3   : > { %v10876_v44 = vpop.eup %7416  ;;  %v4010_v21 = vmul.f32 %v3865_v8, %v3210_v52  ;;  %v10878_v36 = vadd.f32 %v3865_v8, %v2949_v9  ;;  %7422 = vpow2.f32 %v6313_v53  ;;  %v1620_v55 = vmul.f32 %v12753_v60, %v1619_v22  ;;  %vm2749_vm3 = vmor %vm2747_vm11, %vm2748_vm12 }
 0x2c4   : > { %v1629_v51 = vor.u32 1.1754944e-38, %v1628_v15  ;;  %v2745_v17 = vmul.f32 %v10593_v11, %v2744_v0  ;;  %v2751_v7 = vand.u32 2147483647, %v10547_v48  ;;  %v2753_v27 = vand.u32 2147483648, %v10547_v48 }
 0x2c5   : > { %12754 = vst [vmem:[#allocation27_spill] sm:$0xff] %v10878_v36  ;;  %v10892_v9 = vpop.eup %7418  ;;  %v10894_v45 = vadd.f32 %v4010_v21, %v2917_v23  ;;  %v1621_v52 = vadd.f32 %v12753_v60, %v1620_v55  ;;  %vm1627_vm14 = vcmp.eq.f32.partialorder %v1626_v10, 8.507059e+37  ;;  %v3868_v50 = vmul.f32 %v10710_v59, %v10675_v47  ;;  %v12801_v36 = vld [vmem:[#allocation55_spill] sm:$0xff] }
 0x2c6   : > { %v2746_v53 = vadd.f32 %v10593_v11, %v2745_v17  ;;  %vm10900_vm15 = vcmp.eq.f32.partialorder %v2751_v7, 8.507059e+37  ;;  %v2754_v22 = vor.u32 1.1754944e-38, %v2753_v27  ;;  %vm3872_vm1 = vweird.f32 %v10675_v47  ;;  %v12760_v7 = vld [vmem:[#allocation46_spill] sm:$0xff] }
 0x2c7   : > { %12757 = vst [vmem:[#allocation21_spill] sm:$0xff] %v10894_v45  ;;  %v1625_v23 = vsel %vm10885_vm13, %v12753_v60, %v1621_v52  ;;  %v3869_v10 = vsub.f32 1.0, %v3868_v50  ;;  %vm3873_vm4 = vweird.f32 %v10710_v59  ;;  %v3876_v15 = vand.u32 2147483647, %v10675_v47  ;;  %v2214_v50 = vpop.f32.mrf.mxu1 }
 0x2c8   : > { %v7421_v0 = vpop.eup %7420  ;;  %v1630_v8 = vsel %vm1627_vm14, %v1629_v51, %v1625_v23  ;;  %v2750_v21 = vsel %vm2749_vm3, %v10593_v11, %v2746_v53  ;;  %v3878_v55 = vand.u32 2147483648, %v10675_v47  ;;  %v3375_v17 = vsub.f32 %v12751_v1, %v3337_v29  ;;  %v12761_v51 = vld [vmem:[#allocation48_spill] sm:$0xff]  ;;  %vm3874_vm6 = vmor %vm3872_vm1, %vm3873_vm4  ;;  %v6900_v47 = vld [vmem:[%s12171_s7 + $0x8] sm:$0xff] }
 0x2c9   : > { %v7423_v5 = vpop.eup %7422  ;;  %v10917_v60 = vadd.f32 1.0, %v7421_v0  ;;  %v1761_v27 = vmul.f32 %v1630_v8, %v12760_v7  ;;  %v2755_v48 = vsel %vm10900_vm15, %v2754_v22, %v2750_v21  ;;  %v3870_v52 = vmul.f32 %v10710_v59, %v3869_v10  ;;  %v3213_v22 = vpop.f32.mrf.mxu2  ;;  %v12764_v10 = vld [vmem:[#allocation99_spill] sm:$0xff]  ;;  %v12766_v21 = vld [vmem:[#allocation98_spill] sm:$0xff]  ;;  %5374 = vmatpush.bf16.msra.mxu2 %v6900_v47 }
 0x2ca   : > { %v10923_v4 = vadd.f32 1.0, %v7423_v5  ;;  %v2886_v23 = vmul.f32 %v2755_v48, %v12761_v51  ;;  %v2950_v11 = vadd.f32 %v2755_v48, %v1630_v8  ;;  %vm10926_vm5 = vcmp.eq.f32.partialorder %v3876_v15, 8.507059e+37  ;;  %v12765_v8 = vld [vmem:[#allocation65_spill] sm:$0xff] }
 0x2cb   : > { %7424 = vrcp.f32 %v10917_v60  ;;  %v3871_v29 = vadd.f32 %v10710_v59, %v3870_v52  ;;  %v3879_v0 = vor.u32 1.1754944e-38, %v3878_v55  ;;  %v6509_v7 = vmul.f32 -1.442695, %v3375_v17  ;;  %v6876_v55 = vld [vmem:[%s12165_s1 + $0x1b8] sm:$0xff]  ;;  %v6892_v17 = vld [vmem:[%s12170_s6 + $0x8] sm:$0xff] }
 0x2cc   : > { %7426 = vrcp.f32 %v10923_v4  ;;  %v2918_v33 = vadd.f32 %v2886_v23, %v1761_v27  ;;  %v2251_v15 = vsub.f32 %v12764_v10, %v2214_v50  ;;  %v1633_v5 = vmul.f32 %v12766_v21, %v12765_v8  ;;  %6668 = vmatmul.msk.bf16.gmra.mxu1 %vm846_vm0, %v6876_v55  ;;  %5511 = vmatpush.bf16.msra.mxu3 %v6892_v17 }
 0x2cd   : > { %v3875_v48 = vsel %vm3874_vm6, %v10710_v59, %v3871_v29  ;;  %7428 = vpow2.f32 %v6509_v7  ;;  %vm1637_vm7 = vweird.f32 %v12765_v8  ;;  %vm1638_vm2 = vweird.f32 %v12766_v21  ;;  %6634 = vmatmul.msk.bf16.gmra.mxu0 %vm846_vm0, %v6876_v55 }
 0x2ce   : > { %v3880_v59 = vsel %vm10926_vm5, %v3879_v0, %v3875_v48  ;;  %v6314_v27 = vmul.f32 -1.442695, %v2251_v15  ;;  %v1634_v52 = vsub.f32 1.0, %v1633_v5  ;;  %v1641_v50 = vand.u32 2147483647, %v12765_v8  ;;  %vm10978_vm9 = vmor %vm1637_vm7, %vm1638_vm2 }
 0x2cf   : > { %v4011_v51 = vmul.f32 %v3880_v59, %v3213_v22  ;;  %v10955_v23 = vadd.f32 %v3880_v59, %v2950_v11  ;;  %v1643_v29 = vand.u32 2147483648, %v12765_v8  ;;  %v2759_v7 = vsub.f32 1.0, %v10798_v24 }
 0x2d0   : > { %v10962_v1 = vmul.f32 %v10892_v9, %v10847_v19  ;;  %7430 = vpow2.f32 %v6314_v27  ;;  %v1635_v53 = vmul.f32 %v12766_v21, %v1634_v52  ;;  %vm10965_vm8 = vcmp.eq.f32.partialorder %v1641_v50, 8.507059e+37 }
 0x2d1   : > { %12767 = vst [vmem:[#allocation103_spill] sm:$0xff] %v10955_v23  ;;  %v10970_v11 = vpop.eup %7424  ;;  %v10972_v24 = vadd.f32 %v4011_v51, %v2918_v33  ;;  %v1644_v15 = vor.u32 1.1754944e-38, %v1643_v29  ;;  %v2760_v5 = vmul.f32 %v10722_v31, %v2759_v7  ;;  %vm2763_vm10 = vweird.f32 %v10722_v31 }
 0x2d2   : > { %v10984_v48 = vpop.eup %7426  ;;  %v1636_v55 = vadd.f32 %v12766_v21, %v1635_v53  ;;  %v2766_v33 = vand.u32 2147483647, %v10685_v2  ;;  %v2768_v47 = vand.u32 2147483648, %v10685_v2  ;;  %v3883_v8 = vmul.f32 %v10804_v61, %v10760_v37  ;;  %v3339_v53 = vpop.f32.mrf.mxu3 }
 0x2d3   : > { %12770 = vst [vmem:[#allocation80_spill] sm:$0xff] %v10972_v24  ;;  %v7429_v17 = vpop.eup %7428  ;;  %v2761_v59 = vadd.f32 %v10722_v31, %v2760_v5  ;;  %vm2762_vm11 = vweird.f32 %v10685_v2  ;;  %vm3887_vm12 = vweird.f32 %v10760_v37  ;;  %vm3888_vm13 = vweird.f32 %v10804_v61  ;;  %v2217_v5 = vpop.f32.mrf.mxu1 }
 0x2d4   : > { %v10995_v27 = vadd.f32 1.0, %v7429_v17  ;;  %v1640_v52 = vsel %vm10978_vm9, %v12766_v21, %v1636_v55  ;;  %vm2764_vm14 = vmor %vm2762_vm11, %vm2763_vm10  ;;  %vm2767_vm15 = vcmp.eq.f32.partialorder %v2766_v33, 8.507059e+37  ;;  %v2769_v50 = vor.u32 1.1754944e-38, %v2768_v47  ;;  %v12773_v17 = vld [vmem:[#allocation49_spill] sm:$0xff]  ;;  %v12774_v33 = vld [vmem:[#allocation51_spill] sm:$0xff] }
 0x2d5   : > { %v1645_v51 = vsel %vm10965_vm8, %v1644_v15, %v1640_v52  ;;  %v2765_v29 = vsel %vm2764_vm14, %v10722_v31, %v2761_v59  ;;  %v3884_v7 = vsub.f32 1.0, %v3883_v8  ;;  %v3891_v2 = vand.u32 2147483647, %v10760_v37  ;;  %v12777_v52 = vld [vmem:[#allocation105_spill] sm:$0xff]  ;;  %vm3889_vm3 = vmor %vm3887_vm12, %vm3888_vm13 }
 0x2d6   : > { %v7431_v24 = vpop.eup %7430  ;;  %7432 = vrcp.f32 %v10995_v27  ;;  %v1762_v23 = vmul.f32 %v1645_v51, %v12773_v17  ;;  %v2770_v22 = vsel %vm2767_vm15, %v2769_v50, %v2765_v29  ;;  %v3893_v21 = vand.u32 2147483648, %v10760_v37  ;;  %v12778_v29 = vld [vmem:[#allocation67_spill] sm:$0xff]  ;;  %v12779_v17 = vld [vmem:[#allocation102_spill] sm:$0xff] }
 0x2d7   : > { %v11007_v55 = vadd.f32 1.0, %v7431_v24  ;;  %v2887_v0 = vmul.f32 %v2770_v22, %v12774_v33  ;;  %v2951_v15 = vadd.f32 %v2770_v22, %v1645_v51  ;;  %v3885_v31 = vmul.f32 %v10804_v61, %v3884_v7  ;;  %v3215_v51 = vpop.f32.mrf.mxu2 }
 0x2d8   : > { %vm11011_vm1 = vcmp.eq.f32.partialorder %v3891_v2, 8.507059e+37  ;;  %v3894_v8 = vor.u32 1.1754944e-38, %v3893_v21  ;;  %v3376_v59 = vsub.f32 %v12764_v10, %v3339_v53  ;;  %v2252_v45 = vsub.f32 %v12777_v52, %v2217_v5 }
 0x2d9   : > { %7434 = vrcp.f32 %v11007_v55  ;;  %v2919_v50 = vadd.f32 %v2887_v0, %v1762_v23  ;;  %v3886_v24 = vadd.f32 %v10804_v61, %v3885_v31  ;;  %v1648_v33 = vmul.f32 %v12779_v17, %v12778_v29 }
 0x2da   : > { %v6510_v7 = vmul.f32 -1.442695, %v3376_v59  ;;  %v6315_v2 = vmul.f32 -1.442695, %v2252_v45  ;;  %vm1652_vm4 = vweird.f32 %v12778_v29  ;;  %vm1653_vm5 = vweird.f32 %v12779_v17 }
 0x2db   : > { %v3890_v53 = vsel %vm3889_vm3, %v10804_v61, %v3886_v24  ;;  %v1649_v23 = vsub.f32 1.0, %v1648_v33  ;;  %v1656_v5 = vand.u32 2147483647, %v12778_v29  ;;  %v1658_v22 = vand.u32 2147483648, %v12778_v29  ;;  %vm11044_vm6 = vmor %vm1652_vm4, %vm1653_vm5  ;;  %v2219_v24 = vpop.f32.mrf.mxu1 }
 0x2dc   : > { %v11030_v21 = vpop.eup %7432  ;;  %v11034_v0 = vmul.f32 %v10984_v48, %v10923_v4  ;;  %v3895_v37 = vsel %vm11011_vm1, %v3894_v8, %v3890_v53  ;;  %7436 = vpow2.f32 %v6510_v7  ;;  %v2774_v45 = vsub.f32 1.0, %v10834_v56 }
 0x2dd   : > { %v4012_v31 = vmul.f32 %v3895_v37, %v3215_v51  ;;  %v11039_v59 = vadd.f32 %v3895_v37, %v2951_v15  ;;  %7438 = vpow2.f32 %v6315_v2  ;;  %v1650_v61 = vmul.f32 %v12779_v17, %v1649_v23 }
 0x2de   : > { %vm11048_vm7 = vcmp.eq.f32.partialorder %v1656_v5, 8.507059e+37  ;;  %v1659_v47 = vor.u32 1.1754944e-38, %v1658_v22  ;;  %v2775_v8 = vmul.f32 %v10812_v43, %v2774_v45  ;;  %vm2778_vm2 = vweird.f32 %v10812_v43 }
 0x2df   : > { %12780 = vst [vmem:[#allocation56_spill] sm:$0xff] %v11039_v59  ;;  %v11054_v56 = vpop.eup %7434  ;;  %v11056_v15 = vadd.f32 %v4012_v31, %v2919_v50  ;;  %v1651_v51 = vadd.f32 %v12779_v17, %v1650_v61  ;;  %v2781_v29 = vand.u32 2147483647, %v10768_v46  ;;  %v2783_v7 = vand.u32 2147483648, %v10768_v46  ;;  %v3342_v61 = vpop.f32.mrf.mxu3 }
 0x2e0   : > { %v2776_v2 = vadd.f32 %v10812_v43, %v2775_v8  ;;  %vm2777_vm8 = vweird.f32 %v10768_v46  ;;  %v3898_v53 = vmul.f32 %v10876_v44, %v10837_v6  ;;  %vm3902_vm9 = vweird.f32 %v10837_v6  ;;  %v6877_v46 = vld [vmem:[%s12165_s1 + $0x1c0] sm:$0xff] }
 0x2e1   : > { %12785 = vst [vmem:[#allocation130_spill] sm:$0xff] %v11056_v15  ;;  %v1655_v50 = vsel %vm11044_vm6, %v12779_v17, %v1651_v51  ;;  %vm11069_vm10 = vmor %vm2777_vm8, %vm2778_vm2  ;;  %vm2782_vm11 = vcmp.eq.f32.partialorder %v2781_v29, 8.507059e+37  ;;  %v2784_v5 = vor.u32 1.1754944e-38, %v2783_v7  ;;  %vm3903_vm12 = vweird.f32 %v10876_v44  ;;  %v12788_v29 = vld [vmem:[#allocation52_spill] sm:$0xff]  ;;  %6669 = vmatmul.msk.bf16.gmra.mxu1 %vm846_vm0, %v6877_v46  ;;  %6635 = vmatmul.msk.bf16.gmra.mxu0 %vm846_vm0, %v6877_v46 }
 0x2e2   : > { %v7437_v22 = vpop.eup %7436  ;;  %v1660_v37 = vsel %vm11048_vm7, %v1659_v47, %v1655_v50  ;;  %v2780_v17 = vsel %vm11069_vm10, %v10812_v43, %v2776_v2  ;;  %v3899_v45 = vsub.f32 1.0, %v3898_v53  ;;  %v3906_v31 = vand.u32 2147483647, %v10837_v6  ;;  %v12789_v43 = vld [vmem:[#allocation54_spill] sm:$0xff]  ;;  %vm3904_vm14 = vmor %vm3902_vm9, %vm3903_vm12 }
 0x2e3   : > { %v7439_v8 = vpop.eup %7438  ;;  %v11083_v51 = vadd.f32 1.0, %v7437_v22  ;;  %v1763_v7 = vmul.f32 %v1660_v37, %v12788_v29  ;;  %v2785_v10 = vsel %vm2782_vm11, %v2784_v5, %v2780_v17  ;;  %v3908_v15 = vand.u32 2147483648, %v10837_v6  ;;  %v12792_v17 = vld [vmem:[#allocation113_spill] sm:$0xff]  ;;  %v3218_v29 = vpop.f32.mrf.mxu2 }
 0x2e4   : > { %v11089_v33 = vadd.f32 1.0, %v7439_v8  ;;  %v2888_v47 = vmul.f32 %v2785_v10, %v12789_v43  ;;  %v2952_v2 = vadd.f32 %v2785_v10, %v1660_v37  ;;  %v3900_v53 = vmul.f32 %v10876_v44, %v3899_v45  ;;  %v12793_v37 = vld [vmem:[#allocation66_spill] sm:$0xff] }
 0x2e5   : > { %7440 = vrcp.f32 %v11083_v51  ;;  %vm11094_vm13 = vcmp.eq.f32.partialorder %v3906_v31, 8.507059e+37  ;;  %v3909_v23 = vor.u32 1.1754944e-38, %v3908_v15  ;;  %v3377_v5 = vsub.f32 %v12777_v52, %v3342_v61  ;;  %v12794_v45 = vld [vmem:[#allocation18_spill] sm:$0xff] }
 0x2e6   : > { %7442 = vrcp.f32 %v11089_v33  ;;  %v2920_v22 = vadd.f32 %v2888_v47, %v1763_v7  ;;  %v3901_v46 = vadd.f32 %v10876_v44, %v3900_v53  ;;  %v2253_v8 = vsub.f32 %v12792_v17, %v2219_v24 }
 0x2e7   : > { %v6511_v10 = vmul.f32 -1.442695, %v3377_v5  ;;  %v1663_v31 = vmul.f32 %v12794_v45, %v12793_v37  ;;  %vm1667_vm15 = vweird.f32 %v12793_v37  ;;  %vm1668_vm1 = vweird.f32 %v12794_v45 }
 0x2e8   : > { %v3905_v15 = vsel %vm3904_vm14, %v10876_v44, %v3901_v46  ;;  %v6316_v61 = vmul.f32 -1.442695, %v2253_v8  ;;  %v1671_v7 = vand.u32 2147483647, %v12793_v37  ;;  %v1673_v24 = vand.u32 2147483648, %v12793_v37  ;;  %vm11138_vm4 = vmor %vm1667_vm15, %vm1668_vm1 }
 0x2e9   : > { %v3910_v43 = vsel %vm11094_vm13, %v3909_v23, %v3905_v15  ;;  %7444 = vpow2.f32 %v6511_v10  ;;  %v1664_v6 = vsub.f32 1.0, %v1663_v31  ;;  %v2789_v47 = vsub.f32 1.0, %v10962_v1  ;;  %v4392_v15 = vpop.f32.mrf.mxu1 }
 0x2ea   : > { %v11118_v53 = vmul.f32 %v11054_v56, %v11007_v55  ;;  %v4013_v5 = vmul.f32 %v3910_v43, %v3218_v29  ;;  %v11120_v52 = vadd.f32 %v3910_v43, %v2952_v2  ;;  %7446 = vpow2.f32 %v6316_v61 }
 0x2eb   : > { %v11122_v44 = vpop.eup %7440  ;;  %v1665_v46 = vmul.f32 %v12794_v45, %v1664_v6  ;;  %vm11125_vm3 = vcmp.eq.f32.partialorder %v1671_v7, 8.507059e+37  ;;  %v1674_v50 = vor.u32 1.1754944e-38, %v1673_v24  ;;  %v2790_v23 = vmul.f32 %v10892_v9, %v2789_v47 }
 0x2ec   : > { %12795 = vst [vmem:[#allocation28_spill] sm:$0xff] %v11120_v52  ;;  %v11130_v1 = vpop.eup %7442  ;;  %v11132_v10 = vadd.f32 %v4013_v5, %v2920_v22  ;;  %vm2793_vm5 = vweird.f32 %v10892_v9  ;;  %v2796_v29 = vand.u32 2147483647, %v10847_v19  ;;  %v2798_v31 = vand.u32 2147483648, %v10847_v19  ;;  %v3344_v52 = vpop.f32.mrf.mxu3 }
 0x2ed   : > { %v1666_v61 = vadd.f32 %v12794_v45, %v1665_v46  ;;  %v2791_v22 = vadd.f32 %v10892_v9, %v2790_v23  ;;  %vm2792_vm6 = vweird.f32 %v10847_v19  ;;  %v3913_v37 = vmul.f32 %v10970_v11, %v10917_v60 }
 0x2ee   : > { %12798 = vst [vmem:[#allocation30_spill] sm:$0xff] %v11132_v10  ;;  %v11152_v7 = vmul.f32 %v11130_v1, %v11089_v33  ;;  %vm2794_vm7 = vmor %vm2792_vm6, %vm2793_vm5  ;;  %vm2797_vm2 = vcmp.eq.f32.partialorder %v2796_v29, 8.507059e+37  ;;  %v2799_v24 = vor.u32 1.1754944e-38, %v2798_v31  ;;  %vm3917_vm8 = vweird.f32 %v10917_v60 }
 0x2ef   : > { %v7445_v43 = vpop.eup %7444  ;;  %v1670_v6 = vsel %vm11138_vm4, %v12794_v45, %v1666_v61  ;;  %v2795_v47 = vsel %vm2794_vm7, %v10892_v9, %v2791_v22  ;;  %v3914_v19 = vsub.f32 1.0, %v3913_v37  ;;  %v3921_v5 = vand.u32 2147483647, %v10917_v60  ;;  %v12802_v45 = vld [vmem:[#allocation58_spill] sm:$0xff] }
 0x2f0   : > { %v7447_v46 = vpop.eup %7446  ;;  %v11160_v23 = vadd.f32 1.0, %v7445_v43  ;;  %v1675_v10 = vsel %vm11125_vm3, %v1674_v50, %v1670_v6  ;;  %v2800_v29 = vsel %vm2797_vm2, %v2799_v24, %v2795_v47  ;;  %v3923_v31 = vand.u32 2147483648, %v10917_v60  ;;  %v12805_v6 = vld [vmem:[#allocation106_spill] sm:$0xff] }
 0x2f1   : > { %v11165_v59 = vadd.f32 1.0, %v7447_v46  ;;  %v1764_v2 = vmul.f32 %v1675_v10, %v12801_v36  ;;  %v2889_v61 = vmul.f32 %v2800_v29, %v12802_v45  ;;  %vm3918_vm9 = vweird.f32 %v10970_v11  ;;  %v12806_v47 = vld [vmem:[#allocation114_spill] sm:$0xff] }
 0x2f2   : > { %7448 = vrcp.f32 %v11160_v23  ;;  %v2953_v9 = vadd.f32 %v2800_v29, %v1675_v10  ;;  %v3915_v22 = vmul.f32 %v10970_v11, %v3914_v19  ;;  %vm11172_vm10 = vcmp.eq.f32.partialorder %v3921_v5, 8.507059e+37  ;;  %v3220_v10 = vpop.f32.mrf.mxu2  ;;  %vm3919_vm12 = vmor %vm3917_vm8, %vm3918_vm9 }
 0x2f3   : > { %7450 = vrcp.f32 %v11165_v59  ;;  %v3924_v50 = vor.u32 1.1754944e-38, %v3923_v31  ;;  %v3378_v37 = vsub.f32 %v12792_v17, %v3344_v52  ;;  %v4472_v36 = vsub.f32 %v8486_v34, %v4392_v15 }
 0x2f4   : > { %v2921_v24 = vadd.f32 %v2889_v61, %v1764_v2  ;;  %v3916_v43 = vadd.f32 %v10970_v11, %v3915_v22  ;;  %v1678_v46 = vmul.f32 %v12806_v47, %v12805_v6  ;;  %vm1682_vm11 = vweird.f32 %v12805_v6  ;;  %v4394_v2 = vpop.f32.mrf.mxu1 }
 0x2f5   : > { %v6512_v19 = vmul.f32 -1.442695, %v3378_v37  ;;  %v6677_v5 = vmul.f32 -1.442695, %v4472_v36  ;;  %vm1683_vm13 = vweird.f32 %v12806_v47  ;;  %v1686_v52 = vand.u32 2147483647, %v12805_v6 }
 0x2f6   : > { %v3920_v34 = vsel %vm3919_vm12, %v10970_v11, %v3916_v43  ;;  %v1679_v15 = vsub.f32 1.0, %v1678_v46  ;;  %v1688_v29 = vand.u32 2147483648, %v12805_v6  ;;  %v2804_v31 = vsub.f32 1.0, %v11034_v0  ;;  %vm11205_vm1 = vmor %vm1682_vm11, %vm1683_vm13  ;;  %v6878_v43 = vld [vmem:[%s12165_s1 + $0x1c8] sm:$0xff] }
 0x2f7   : > { %v3925_v45 = vsel %vm11172_vm10, %v3924_v50, %v3920_v34  ;;  %7452 = vpow2.f32 %v6512_v19  ;;  %vm2807_vm14 = vweird.f32 %v10923_v4  ;;  %vm2808_vm15 = vweird.f32 %v10984_v48  ;;  %6670 = vmatmul.msk.bf16.gmra.mxu1 %vm846_vm0, %v6878_v43  ;;  %6636 = vmatmul.msk.bf16.gmra.mxu0 %vm846_vm0, %v6878_v43  ;;  %v12812_v43 = vld [vmem:[#allocation62_spill] sm:$0xff] }
 0x2f8   : > { %v11194_v60 = vpop.eup %7448  ;;  %v4014_v61 = vmul.f32 %v3925_v45, %v3220_v10  ;;  %v11196_v22 = vadd.f32 %v3925_v45, %v2953_v9  ;;  %7454 = vpow2.f32 %v6677_v5  ;;  %v1680_v11 = vmul.f32 %v12806_v47, %v1679_v15  ;;  %vm2809_vm5 = vmor %vm2807_vm14, %vm2808_vm15 }
 0x2f9   : > { %v11199_v37 = vpop.eup %7450  ;;  %v1689_v8 = vor.u32 1.1754944e-38, %v1688_v29  ;;  %v2805_v50 = vmul.f32 %v10984_v48, %v2804_v31  ;;  %v2811_v36 = vand.u32 2147483647, %v10923_v4  ;;  %v2813_v9 = vand.u32 2147483648, %v10923_v4 }
 0x2fa   : > { %v11215_v46 = vadd.f32 %v4014_v61, %v2921_v24  ;;  %v1681_v10 = vadd.f32 %v12806_v47, %v1680_v11  ;;  %vm1687_vm3 = vcmp.eq.f32.partialorder %v1686_v52, 8.507059e+37  ;;  %v3928_v6 = vmul.f32 %v11030_v21, %v10995_v27 }
 0x2fb   : > { %v11222_v19 = vmul.f32 %v11199_v37, %v11165_v59  ;;  %v2806_v5 = vadd.f32 %v10984_v48, %v2805_v50  ;;  %vm11225_vm4 = vcmp.eq.f32.partialorder %v2811_v36, 8.507059e+37  ;;  %v2814_v15 = vor.u32 1.1754944e-38, %v2813_v9 }
 0x2fc   : > { %v1685_v24 = vsel %vm11205_vm1, %v12806_v47, %v1681_v10  ;;  %v3929_v52 = vsub.f32 1.0, %v3928_v6  ;;  %vm3932_vm6 = vweird.f32 %v10995_v27  ;;  %v3936_v29 = vand.u32 2147483647, %v10995_v27 }
 0x2fd   : > { %v7453_v31 = vpop.eup %7452  ;;  %v1690_v45 = vsel %vm1687_vm3, %v1689_v8, %v1685_v24  ;;  %v2810_v61 = vsel %vm2809_vm5, %v10984_v48, %v2806_v5  ;;  %v3938_v11 = vand.u32 2147483648, %v10995_v27  ;;  %v4473_v50 = vsub.f32 %v8490_v13, %v4394_v2  ;;  %v6899_v8 = vld [vmem:[%s12171_s7] sm:$0xff]  ;;  %v12811_v13 = vld [vmem:[#allocation59_spill] sm:$0xff] }
 0x2fe   : > { %v7455_v0 = vpop.eup %7454  ;;  %v11243_v47 = vadd.f32 1.0, %v7453_v31  ;;  %v2815_v4 = vsel %vm11225_vm4, %v2814_v15, %v2810_v61  ;;  %v3930_v36 = vmul.f32 %v11030_v21, %v3929_v52  ;;  %vm3933_vm7 = vweird.f32 %v11030_v21  ;;  %v6891_v48 = vld [vmem:[%s12170_s6] sm:$0xff]  ;;  %v11261_v15 = vpop.f32.mrf.mxu1  ;;  %5375 = vmatpush.bf16.msra.mxu2 %v6899_v8  ;;  %v12814_v61 = vld [vmem:[#allocation120_spill] sm:$0xff] }
 0x2ff   : > { %v11255_v9 = vadd.f32 1.0, %v7455_v0  ;;  %v1765_v2 = vmul.f32 %v1690_v45, %v12811_v13  ;;  %v2890_v10 = vmul.f32 %v2815_v4, %v12812_v43  ;;  %v2954_v6 = vadd.f32 %v2815_v4, %v1690_v45  ;;  %5512 = vmatpush.bf16.msra.mxu3 %v6891_v48  ;;  %v3223_v52 = vpop.f32.mrf.mxu2  ;;  %vm3934_vm8 = vmor %vm3932_vm6, %vm3933_vm7  ;;  %v12813_v45 = vld [vmem:[#allocation110_spill] sm:$0xff]  ;;  %v7658_v48 = vld [vmem:[%s7932_s24] sm:$0xff] }
 0x300   : > { %7456 = vrcp.f32 %v11243_v47  ;;  %v3931_v5 = vadd.f32 %v11030_v21, %v3930_v36  ;;  %vm3937_vm2 = vcmp.eq.f32.partialorder %v3936_v29, 8.507059e+37  ;;  %v6678_v34 = vmul.f32 -1.442695, %v4473_v50 }
 0x301   : > { %v2922_v24 = vadd.f32 %v2890_v10, %v1765_v2  ;;  %v3939_v31 = vor.u32 1.1754944e-38, %v3938_v11  ;;  %v1693_v0 = vmul.f32 %v12814_v61, %v12813_v45  ;;  %vm1697_vm9 = vweird.f32 %v12813_v45  ;;  %5376 = vmatmul.bf16.vlgmr.msra.gmra.mxu2 %v7658_v48 }
 0x302   : > { %v3935_v29 = vsel %vm3934_vm8, %v11030_v21, %v3931_v5  ;;  %7458 = vpow2.f32 %v6678_v34  ;;  %vm1698_vm10 = vweird.f32 %v12814_v61  ;;  %v1701_v50 = vand.u32 2147483647, %v12813_v45 }
 0x303   : > { %v3940_v4 = vsel %vm3937_vm2, %v3939_v31, %v3935_v29  ;;  %v1694_v36 = vsub.f32 1.0, %v1693_v0  ;;  %v1703_v8 = vand.u32 2147483648, %v12813_v45  ;;  %v2819_v27 = vsub.f32 1.0, %v11118_v53  ;;  %vm11294_vm13 = vmor %vm1697_vm9, %vm1698_vm10 }
 0x304   : > { %7460 = vrcp.f32 %v11255_v9  ;;  %v4015_v11 = vmul.f32 %v3940_v4, %v3223_v52  ;;  %v11277_v13 = vadd.f32 %v3940_v4, %v2954_v6  ;;  %vm11279_vm11 = vcmp.eq.f32.partialorder %v1701_v50, 8.507059e+37  ;;  %v12821_v6 = vld [vmem:[#allocation69_spill] sm:$0xff] }
 0x305   : > { %v1695_v2 = vmul.f32 %v12814_v61, %v1694_v36  ;;  %v1704_v43 = vor.u32 1.1754944e-38, %v1703_v8  ;;  %v2820_v10 = vmul.f32 %v11054_v56, %v2819_v27  ;;  %vm2823_vm12 = vweird.f32 %v11054_v56 }
 0x306   : > { %v11286_v5 = vpop.eup %7456  ;;  %v11288_v53 = vadd.f32 %v4015_v11, %v2922_v24  ;;  %v2826_v34 = vand.u32 2147483647, %v11007_v55  ;;  %v2828_v52 = vand.u32 2147483648, %v11007_v55  ;;  %v3943_v31 = vmul.f32 %v11122_v44, %v11083_v51 }
 0x307   : > { %v1696_v0 = vadd.f32 %v12814_v61, %v1695_v2  ;;  %v2821_v24 = vadd.f32 %v11054_v56, %v2820_v10  ;;  %vm2822_vm14 = vweird.f32 %v11007_v55  ;;  %vm3947_vm15 = vweird.f32 %v11083_v51 }
 0x308   : > { %12817 = vst [vmem:[#allocation101_spill] sm:$0xff] %v11288_v53  ;;  %v7459_v45 = vpop.eup %7458  ;;  %vm2824_vm1 = vmor %vm2822_vm14, %vm2823_vm12  ;;  %vm2827_vm3 = vcmp.eq.f32.partialorder %v2826_v34, 8.507059e+37  ;;  %v2829_v29 = vor.u32 1.1754944e-38, %v2828_v52  ;;  %v3944_v50 = vsub.f32 1.0, %v3943_v31  ;;  %v3951_v4 = vand.u32 2147483647, %v11083_v51  ;;  %v11320_v34 = vpop.f32.mrf.mxu1 }
 0x309   : > { %v11307_v36 = vadd.f32 1.0, %v7459_v45  ;;  %v1700_v8 = vsel %vm11294_vm13, %v12814_v61, %v1696_v0  ;;  %v2825_v27 = vsel %vm2824_vm1, %v11054_v56, %v2821_v24  ;;  %v3953_v48 = vand.u32 2147483648, %v11083_v51  ;;  %v11322_v52 = vpop.f32.mrf.mxu0  ;;  %v12820_v61 = vld [vmem:[#allocation63_spill] sm:$0xff]  ;;  %v12833_v51 = vld [vmem:[#allocation73_spill] sm:$0xff] }
 0x30a   : > { %v11314_v55 = vpop.eup %7460  ;;  %v1705_v11 = vsel %vm11279_vm11, %v1704_v43, %v1700_v8  ;;  %v2830_v2 = vsel %vm2827_vm3, %v2829_v29, %v2825_v27  ;;  %v3945_v10 = vmul.f32 %v11122_v44, %v3944_v50  ;;  %vm3948_vm4 = vweird.f32 %v11122_v44  ;;  %v12824_v45 = vld [vmem:[#allocation119_spill] sm:$0xff]  ;;  %v3225_v8 = vpop.f32.mrf.mxu2 }
 0x30b   : > { %7462 = vrcp.f32 %v11307_v36  ;;  %v1766_v56 = vmul.f32 %v1705_v11, %v12820_v61  ;;  %v2891_v31 = vmul.f32 %v2830_v2, %v12821_v6  ;;  %vm11327_vm5 = vcmp.eq.f32.partialorder %v3951_v4, 8.507059e+37  ;;  %v12825_v29 = vld [vmem:[#allocation127_spill] sm:$0xff]  ;;  %vm3949_vm6 = vmor %vm3947_vm15, %vm3948_vm4 }
 0x30c   : > { %v2955_v21 = vadd.f32 %v2830_v2, %v1705_v11  ;;  %v3946_v43 = vadd.f32 %v11122_v44, %v3945_v10  ;;  %v4474_v24 = vsub.f32 %v12454_v58, %v11261_v15  ;;  %v1708_v50 = vmul.f32 %v12825_v29, %v12824_v45 }
 0x30d   : > { %v3954_v27 = vor.u32 1.1754944e-38, %v3953_v48  ;;  %vm1712_vm7 = vweird.f32 %v12824_v45  ;;  %vm1713_vm2 = vweird.f32 %v12825_v29  ;;  %v1716_v4 = vand.u32 2147483647, %v12824_v45 }
 0x30e   : > { %v3950_v11 = vsel %vm3949_vm6, %v11122_v44, %v3946_v43  ;;  %v6679_v2 = vmul.f32 -1.442695, %v4474_v24  ;;  %v1709_v10 = vsub.f32 1.0, %v1708_v50  ;;  %v1718_v58 = vand.u32 2147483648, %v12824_v45  ;;  %vm11359_vm9 = vmor %vm1712_vm7, %vm1713_vm2 }
 0x30f   : > { %v2923_v15 = vadd.f32 %v2891_v31, %v1766_v56  ;;  %v3955_v61 = vsel %vm11327_vm5, %v3954_v27, %v3950_v11  ;;  %vm11345_vm8 = vcmp.eq.f32.partialorder %v1716_v4, 8.507059e+37  ;;  %v2834_v48 = vsub.f32 1.0, %v11152_v7  ;;  %v7659_v4 = vld [vmem:[%s7932_s24 + $0x8] sm:$0xff]  ;;  %v12835_v27 = vld [vmem:[#allocation96_spill] sm:$0xff] }
 0x310   : > { %v4016_v6 = vmul.f32 %v3955_v61, %v3225_v8  ;;  %v11350_v53 = vadd.f32 %v3955_v61, %v2955_v21  ;;  %7464 = vpow2.f32 %v6679_v2  ;;  %v1710_v44 = vmul.f32 %v12825_v29, %v1709_v10  ;;  %v12832_v56 = vld [vmem:[#allocation70_spill] sm:$0xff] }
 0x311   : > { %v11353_v43 = vpop.eup %7462  ;;  %v1719_v31 = vor.u32 1.1754944e-38, %v1718_v58  ;;  %v2835_v7 = vmul.f32 %v11130_v1, %v2834_v48  ;;  %vm2838_vm10 = vweird.f32 %v11130_v1  ;;  %v2841_v0 = vand.u32 2147483647, %v11089_v33  ;;  %5381 = vmatmul.bf16.gmra.mxu2 %v7659_v4 }
 0x312   : > { %v11366_v21 = vadd.f32 %v4016_v6, %v2923_v15  ;;  %v1711_v24 = vadd.f32 %v12825_v29, %v1710_v44  ;;  %v2843_v50 = vand.u32 2147483648, %v11089_v33  ;;  %v3958_v45 = vmul.f32 %v11194_v60, %v11160_v23  ;;  %v11384_v15 = vpop.f32.mrf.mxu1 }
 0x313   : > { %v2836_v8 = vadd.f32 %v11130_v1, %v2835_v7  ;;  %vm2837_vm11 = vweird.f32 %v11089_v33  ;;  %vm11374_vm12 = vcmp.eq.f32.partialorder %v2841_v0, 8.507059e+37  ;;  %vm3962_vm13 = vweird.f32 %v11160_v23  ;;  %v11386_v33 = vpop.f32.mrf.mxu0 }
 0x314   : > { %v1715_v11 = vsel %vm11359_vm9, %v12825_v29, %v1711_v24  ;;  %vm2839_vm14 = vmor %vm2837_vm11, %vm2838_vm10  ;;  %v2844_v2 = vor.u32 1.1754944e-38, %v2843_v50  ;;  %v3959_v10 = vsub.f32 1.0, %v3958_v45  ;;  %v3966_v58 = vand.u32 2147483647, %v11160_v23 }
 0x315   : > { %v1720_v61 = vsel %vm11345_vm8, %v1719_v31, %v1715_v11  ;;  %v2840_v48 = vsel %vm2839_vm14, %v11130_v1, %v2836_v8  ;;  %v3968_v6 = vand.u32 2147483648, %v11160_v23  ;;  %v4475_v44 = vsub.f32 %v12470_v42, %v11320_v34  ;;  %v12834_v42 = vld [vmem:[#allocation97_spill] sm:$0xff] }
 0x316   : > { %v7465_v29 = vpop.eup %7464  ;;  %v1767_v7 = vmul.f32 %v1720_v61, %v12832_v56  ;;  %v2845_v0 = vsel %vm11374_vm12, %v2844_v2, %v2840_v48  ;;  %v3960_v24 = vmul.f32 %v11194_v60, %v3959_v10  ;;  %vm3963_vm15 = vweird.f32 %v11194_v60  ;;  %v3228_v2 = vpop.f32.mrf.mxu2  ;;  %v12837_v56 = vld [vmem:[#allocation132_spill] sm:$0xff] }
 0x317   : > { %v11399_v50 = vadd.f32 1.0, %v7465_v29  ;;  %v2892_v31 = vmul.f32 %v2845_v0, %v12833_v51  ;;  %v2956_v1 = vadd.f32 %v2845_v0, %v1720_v61  ;;  %vm3967_vm1 = vcmp.eq.f32.partialorder %v3966_v58, 8.507059e+37  ;;  %vm3964_vm3 = vmor %vm3962_vm13, %vm3963_vm15  ;;  %v12836_v29 = vld [vmem:[#allocation125_spill] sm:$0xff] }
 0x318   : > { %v3961_v45 = vadd.f32 %v11194_v60, %v3960_v24  ;;  %v6680_v8 = vmul.f32 -1.442695, %v4475_v44  ;;  %v11405_v34 = vadd.f32 %v12834_v42, %v10089_v35  ;;  %v4051_v4 = vadd.f32 %v12835_v27, %v10074_v3 }
 0x319   : > { %7466 = vrcp.f32 %v11399_v50  ;;  %v2924_v11 = vadd.f32 %v2892_v31, %v1767_v7  ;;  %v3969_v10 = vor.u32 1.1754944e-38, %v3968_v6  ;;  %v4633_v58 = vmul.f32 %v11314_v55, %v11255_v9  ;;  %v7660_v6 = vld [vmem:[%s7932_s24 + $0x10] sm:$0xff] }
 0x31a   : > { %v3965_v61 = vsel %vm3964_vm3, %v11194_v60, %v3961_v45  ;;  %7468 = vpow2.f32 %v6680_v8  ;;  %vm4637_vm4 = vweird.f32 %v11255_v9  ;;  %v4641_v35 = vand.u32 2147483647, %v11255_v9  ;;  %v6879_v8 = vld [vmem:[%s12165_s1 + $0x1d0] sm:$0xff]  ;;  %v11438_v42 = vpop.f32.mrf.mxu1 }
 0x31b   : > { %v3970_v48 = vsel %vm3967_vm1, %v3969_v10, %v3965_v61  ;;  %v4634_v3 = vsub.f32 1.0, %v4633_v58  ;;  %v4643_v44 = vand.u32 2147483648, %v11255_v9  ;;  %v1723_v7 = vmul.f32 %v12837_v56, %v12836_v29  ;;  %v11440_v27 = vpop.f32.mrf.mxu0  ;;  %6671 = vmatmul.msk.bf16.gmra.mxu1 %vm846_vm0, %v6879_v8  ;;  %6637 = vmatmul.msk.bf16.gmra.mxu0 %vm846_vm0, %v6879_v8  ;;  %v12846_v9 = vld [vmem:[#allocation74_spill] sm:$0xff] }
 0x31c   : > { %v4017_v23 = vmul.f32 %v3970_v48, %v3228_v2  ;;  %v11420_v0 = vadd.f32 %v3970_v48, %v2956_v1  ;;  %vm4638_vm5 = vweird.f32 %v11314_v55  ;;  %vm11423_vm6 = vcmp.eq.f32.partialorder %v4641_v35, 8.507059e+37 }
 0x31d   : > { %v4635_v60 = vmul.f32 %v11314_v55, %v4634_v3  ;;  %v1724_v24 = vsub.f32 1.0, %v1723_v7  ;;  %vm1727_vm7 = vweird.f32 %v12836_v29  ;;  %vm1728_vm2 = vweird.f32 %v12837_v56  ;;  %vm11449_vm8 = vmor %vm4637_vm4, %vm4638_vm5 }
 0x31e   : > { %v11430_v51 = vadd.f32 %v4017_v23, %v2924_v11  ;;  %v1731_v31 = vand.u32 2147483647, %v12836_v29  ;;  %v1733_v1 = vand.u32 2147483648, %v12836_v29  ;;  %v2849_v45 = vsub.f32 1.0, %v11222_v19  ;;  %vm11459_vm10 = vmor %vm1727_vm7, %vm1728_vm2 }
 0x31f   : > { %v11442_v2 = vpop.eup %7466  ;;  %v4636_v10 = vadd.f32 %v11314_v55, %v4635_v60  ;;  %v4644_v19 = vor.u32 1.1754944e-38, %v4643_v44  ;;  %v1725_v58 = vmul.f32 %v12837_v56, %v1724_v24  ;;  %vm2853_vm9 = vweird.f32 %v11199_v37 }
 0x320   : > { %v7469_v61 = vpop.eup %7468  ;;  %vm11463_vm11 = vcmp.eq.f32.partialorder %v1731_v31, 8.507059e+37  ;;  %v1734_v48 = vor.u32 1.1754944e-38, %v1733_v1  ;;  %v2850_v3 = vmul.f32 %v11199_v37, %v2849_v45  ;;  %v2856_v44 = vand.u32 2147483647, %v11165_v59 }
 0x321   : > { %v11471_v7 = vadd.f32 1.0, %v7469_v61  ;;  %v4640_v29 = vsel %vm11449_vm8, %v11314_v55, %v4636_v10  ;;  %v1726_v23 = vadd.f32 %v12837_v56, %v1725_v58  ;;  %v2858_v60 = vand.u32 2147483648, %v11165_v59  ;;  %5386 = vmatmul.bf16.gmra.mxu2 %v7660_v6 }
 0x322   : > { %v4645_v24 = vsel %vm11423_vm6, %v4644_v19, %v4640_v29  ;;  %v2851_v31 = vadd.f32 %v11199_v37, %v2850_v3  ;;  %vm2852_vm12 = vweird.f32 %v11165_v59  ;;  %v3973_v1 = vmul.f32 %v11286_v5, %v11243_v47  ;;  %v11499_v61 = vpop.f32.mrf.mxu1 }
 0x323   : > { %7470 = vrcp.f32 %v11471_v7  ;;  %v5112_v45 = vmul.f32 %v4645_v24, %v11322_v52  ;;  %v5176_v8 = vadd.f32 %v4645_v24, %v4051_v4  ;;  %v1730_v55 = vsel %vm11459_vm10, %v12837_v56, %v1726_v23  ;;  %vm2854_vm13 = vmor %vm2852_vm12, %vm2853_vm9  ;;  %v11501_v35 = vpop.f32.mrf.mxu0  ;;  %v12848_v23 = vld [vmem:[#allocation15_spill] sm:$0xff]  ;;  %v12849_v24 = vld [vmem:[#allocation104_spill] sm:$0xff] }
 0x324   : > { %v1735_v59 = vsel %vm11463_vm11, %v1734_v48, %v1730_v55  ;;  %v2855_v10 = vsel %vm2854_vm13, %v11199_v37, %v2851_v31  ;;  %v2859_v11 = vor.u32 1.1754944e-38, %v2858_v60  ;;  %v3974_v19 = vsub.f32 1.0, %v3973_v1  ;;  %v12847_v37 = vld [vmem:[#allocation76_spill] sm:$0xff] }
 0x325   : > { %v5144_v58 = vadd.f32 %v5112_v45, %v11405_v34  ;;  %7472 = vrcp.f32 %v5176_v8  ;;  %vm2857_vm14 = vcmp.eq.f32.partialorder %v2856_v44, 8.507059e+37  ;;  %vm3978_vm15 = vweird.f32 %v11286_v5  ;;  %v3230_v8 = vpop.f32.mrf.mxu2 }
 0x326   : > { %v2860_v52 = vsel %vm2857_vm14, %v2859_v11, %v2855_v10  ;;  %v3975_v4 = vmul.f32 %v11286_v5, %v3974_v19  ;;  %v3981_v56 = vand.u32 2147483647, %v11243_v47  ;;  %v1768_v48 = vmul.f32 %v1735_v59, %v12846_v9 }
 0x327   : > { %v2893_v3 = vmul.f32 %v2860_v52, %v12847_v37  ;;  %v3983_v29 = vand.u32 2147483648, %v11243_v47  ;;  %v4476_v34 = vsub.f32 %v12485_v16, %v11384_v15  ;;  %vm3977_vm1 = vweird.f32 %v11243_v47 }
 0x328   : > { %v3976_v44 = vadd.f32 %v11286_v5, %v3975_v4  ;;  %v11512_v60 = vadd.f32 %v12848_v23, %v10209_v57  ;;  %v4052_v31 = vadd.f32 %v12849_v24, %v10190_v20  ;;  %v2957_v45 = vadd.f32 %v2860_v52, %v1735_v59  ;;  %vm3979_vm3 = vmor %vm3977_vm1, %vm3978_vm15 }
 0x329   : > { %v11516_v1 = vpop.eup %7470  ;;  %v3984_v55 = vor.u32 1.1754944e-38, %v3983_v29  ;;  %v6681_v16 = vmul.f32 -1.442695, %v4476_v34  ;;  %v4648_v15 = vmul.f32 %v11353_v43, %v11307_v36  ;;  %v2925_v47 = vadd.f32 %v2893_v3, %v1768_v48  ;;  %v12850_v48 = vld [vmem:[#allocation111_spill] sm:$0xff]  ;;  %v12853_v29 = vld [vmem:[#allocation109_spill] sm:$0xff] }
 0x32a   : > { %v3980_v6 = vsel %vm3979_vm3, %v11286_v5, %v3976_v44  ;;  %vm3982_vm4 = vcmp.eq.f32.partialorder %v3981_v56, 8.507059e+37  ;;  %v4656_v57 = vand.u32 2147483647, %v11307_v36  ;;  %v4658_v59 = vand.u32 2147483648, %v11307_v36  ;;  %v6880_v5 = vld [vmem:[%s12165_s1 + $0x1d8] sm:$0xff]  ;;  %v4409_v23 = vpop.f32.mrf.mxu1 }
 0x32b   : > { %v7473_v10 = vpop.eup %7472  ;;  %v3985_v20 = vsel %vm3982_vm4, %v3984_v55, %v3980_v6  ;;  %7474 = vpow2.f32 %v6681_v16  ;;  %v4649_v11 = vsub.f32 1.0, %v4648_v15  ;;  %vm4652_vm5 = vweird.f32 %v11307_v36  ;;  %v11549_v24 = vpop.f32.mrf.mxu0  ;;  %v12855_v15 = vld [vmem:[#allocation116_spill] sm:$0xff]  ;;  %6672 = vmatmul.msk.bf16.gmra.mxu1 %vm846_vm0, %v6880_v5  ;;  %6638 = vmatmul.msk.bf16.gmra.mxu0 %vm846_vm0, %v6880_v5  ;;  %v12856_v36 = vld [vmem:[#allocation115_spill] sm:$0xff] }
 0x32c   : > { %v11525_v19 = vmul.f32 %v7473_v10, %v5144_v58  ;;  %v4018_v52 = vmul.f32 %v3985_v20, %v3230_v8  ;;  %v11527_v4 = vadd.f32 %v3985_v20, %v2957_v45  ;;  %vm4653_vm6 = vweird.f32 %v11353_v43  ;;  %v7661_v5 = vld [vmem:[%s7932_s24 + $0x18] sm:$0xff] }
 0x32d   : > { %v4650_v56 = vmul.f32 %v11353_v43, %v4649_v11  ;;  %v4477_v9 = vsub.f32 %v8550_v18, %v11438_v42  ;;  %v4021_v58 = vadd.f32 %v12850_v48, %v10320_v26  ;;  %vm11541_vm7 = vcmp.eq.f32.partialorder %v4656_v57, 8.507059e+37  ;;  %vm4654_vm2 = vmor %vm4652_vm5, %vm4653_vm6 }
 0x32e   : > { %v11539_v37 = vadd.f32 %v4018_v52, %v2925_v47  ;;  %v4053_v34 = vadd.f32 %v12853_v29, %v10312_v30  ;;  %v4663_v44 = vmul.f32 %v11442_v2, %v11399_v50  ;;  %v4659_v42 = vor.u32 1.1754944e-38, %v4658_v59  ;;  %v12854_v30 = vld [vmem:[#allocation13_spill] sm:$0xff]  ;;  %v12857_v29 = vld [vmem:[#allocation16_spill] sm:$0xff] }
 0x32f   : > { %v4651_v18 = vadd.f32 %v11353_v43, %v4650_v56  ;;  %v6682_v45 = vmul.f32 -1.442695, %v4477_v9  ;;  %v4671_v26 = vand.u32 2147483647, %v11399_v50  ;;  %v4673_v55 = vand.u32 2147483648, %v11399_v50 }
 0x330   : > { %v4664_v8 = vsub.f32 1.0, %v4663_v44  ;;  %v4478_v16 = vsub.f32 %v12854_v30, %v11499_v61  ;;  %v11560_v47 = vadd.f32 %v12855_v15, %v10418_v39  ;;  %vm4667_vm8 = vweird.f32 %v11399_v50  ;;  %v12858_v50 = vld [vmem:[#allocation123_spill] sm:$0xff]  ;;  %v12859_v15 = vld [vmem:[#allocation122_spill] sm:$0xff] }
 0x331   : > { %v7475_v6 = vpop.eup %7474  ;;  %v4655_v57 = vsel %vm4654_vm2, %v11353_v43, %v4651_v18  ;;  %7476 = vpow2.f32 %v6682_v45  ;;  %v4054_v10 = vadd.f32 %v12856_v36, %v10405_v54  ;;  %vm4668_vm9 = vweird.f32 %v11442_v2  ;;  %5391 = vmatmul.bf16.gmra.mxu2 %v7661_v5 }
 0x332   : > { %v11568_v20 = vadd.f32 1.0, %v7475_v6  ;;  %v4660_v39 = vsel %vm11541_vm7, %v4659_v42, %v4655_v57  ;;  %v4665_v61 = vmul.f32 %v11442_v2, %v4664_v8  ;;  %v6683_v52 = vmul.f32 -1.442695, %v4478_v16  ;;  %vm4669_vm11 = vmor %vm4667_vm8, %vm4668_vm9  ;;  %v4412_v18 = vpop.f32.mrf.mxu1 }
 0x333   : > { %v5113_v11 = vmul.f32 %v4660_v39, %v11386_v33  ;;  %v5177_v59 = vadd.f32 %v4660_v39, %v4052_v31  ;;  %v4678_v43 = vmul.f32 %v11516_v1, %v11471_v7  ;;  %vm4672_vm10 = vcmp.eq.f32.partialorder %v4671_v26, 8.507059e+37  ;;  %v11587_v42 = vpop.f32.mrf.mxu0 }
 0x334   : > { %7478 = vrcp.f32 %v11568_v20  ;;  %v4666_v54 = vadd.f32 %v11442_v2, %v4665_v61  ;;  %v4674_v56 = vor.u32 1.1754944e-38, %v4673_v55  ;;  %v4686_v31 = vand.u32 2147483647, %v11471_v7 }
 0x335   : > { %v5145_v9 = vadd.f32 %v5113_v11, %v11512_v60  ;;  %7480 = vrcp.f32 %v5177_v59  ;;  %v4679_v33 = vsub.f32 1.0, %v4678_v43  ;;  %v4688_v3 = vand.u32 2147483648, %v11471_v7 }
 0x336   : > { %v4670_v48 = vsel %vm4669_vm11, %v11442_v2, %v4666_v54  ;;  %7482 = vpow2.f32 %v6683_v52  ;;  %v4479_v44 = vsub.f32 %v12857_v29, %v4409_v23  ;;  %vm4683_vm12 = vweird.f32 %v11516_v1 }
 0x337   : > { %v7477_v45 = vpop.eup %7476  ;;  %v4675_v26 = vsel %vm4672_vm10, %v4674_v56, %v4670_v48  ;;  %v4680_v60 = vmul.f32 %v11516_v1, %v4679_v33  ;;  %v11593_v8 = vadd.f32 %v12858_v50, %v10533_v12  ;;  %vm4682_vm13 = vweird.f32 %v11471_v7  ;;  %v12860_v56 = vld [vmem:[#allocation19_spill] sm:$0xff] }
 0x338   : > { %v11595_v55 = vadd.f32 1.0, %v7477_v45  ;;  %v5114_v2 = vmul.f32 %v4675_v26, %v11440_v27  ;;  %v5178_v30 = vadd.f32 %v4675_v26, %v4053_v34  ;;  %v6684_v16 = vmul.f32 -1.442695, %v4479_v44  ;;  %vm4684_vm14 = vmor %vm4682_vm13, %vm4683_vm12 }
 0x339   : > { %v4681_v23 = vadd.f32 %v11516_v1, %v4680_v60  ;;  %v4055_v6 = vadd.f32 %v12859_v15, %v10519_v14  ;;  %vm4687_vm15 = vcmp.eq.f32.partialorder %v4686_v31, 8.507059e+37  ;;  %v4689_v12 = vor.u32 1.1754944e-38, %v4688_v3  ;;  %v7662_v15 = vld [vmem:[%s7932_s24 + $0x20] sm:$0xff] }
 0x33a   : > { %v7479_v57 = vpop.eup %7478  ;;  %7484 = vrcp.f32 %v11595_v55  ;;  %v5146_v36 = vadd.f32 %v5114_v2, %v4021_v58  ;;  %v4701_v61 = vand.u32 2147483647, %v11568_v20  ;;  %v4703_v14 = vand.u32 2147483648, %v11568_v20  ;;  %v6881_v58 = vld [vmem:[%s12165_s1 + $0x1e0] sm:$0xff]  ;;  %v4414_v48 = vpop.f32.mrf.mxu1  ;;  %v12863_v2 = vld [vmem:[#allocation23_spill] sm:$0xff] }
 0x33b   : > { %v7481_v39 = vpop.eup %7480  ;;  %7486 = vrcp.f32 %v5178_v30  ;;  %v4685_v27 = vsel %vm4684_vm14, %v11516_v1, %v4681_v23  ;;  %v4693_v34 = vmul.f32 %v7479_v57, %v11568_v20  ;;  %vm4698_vm1 = vweird.f32 %v7479_v57  ;;  %v11619_v3 = vpop.f32.mrf.mxu0  ;;  %6673 = vmatmul.msk.bf16.gmra.mxu1 %vm846_vm0, %v6881_v58  ;;  %6639 = vmatmul.msk.bf16.gmra.mxu0 %vm846_vm0, %v6881_v58 }
 0x33c   : > { %v7483_v7 = vpop.eup %7482  ;;  %v5241_v11 = vmul.f32 %v7481_v39, %v5145_v9  ;;  %v4690_v59 = vsel %vm4687_vm15, %v4689_v12, %v4685_v27  ;;  %7488 = vpow2.f32 %v6684_v16  ;;  %v4480_v33 = vsub.f32 %v12860_v56, %v4412_v18  ;;  %v12861_v9 = vld [vmem:[#allocation129_spill] sm:$0xff]  ;;  %v12866_v56 = vld [vmem:[#allocation26_spill] sm:$0xff] }
 0x33d   : > { %v11610_v52 = vadd.f32 1.0, %v7483_v7  ;;  %v5115_v43 = vmul.f32 %v4690_v59, %v11501_v35  ;;  %v5179_v5 = vadd.f32 %v4690_v59, %v4054_v10  ;;  %v4694_v1 = vsub.f32 1.0, %v4693_v34  ;;  %v12862_v35 = vld [vmem:[#allocation128_spill] sm:$0xff] }
 0x33e   : > { %v5272_v54 = vpack.c.bf16 %v5241_v11, %v11525_v19  ;;  %v11617_v31 = vadd.f32 %v12861_v9, %v10665_v63  ;;  %v4056_v10 = vadd.f32 %v12862_v35, %v10646_v32  ;;  %v6685_v19 = vmul.f32 -1.442695, %v4480_v33 }
 0x33f   : > { %7490 = vrcp.f32 %v11610_v52  ;;  %v5147_v29 = vadd.f32 %v5115_v43, %v11560_v47  ;;  %v4695_v44 = vmul.f32 %v7479_v57, %v4694_v1  ;;  %vm4697_vm3 = vweird.f32 %v11568_v20 }
 0x340   : > { %v7485_v45 = vpop.eup %7484  ;;  %7492 = vrcp.f32 %v5179_v5  ;;  %5513 = vmatmul.bf16.vlgmr.msra.gmra.mxu3 %v5272_v54  ;;  %v4704_v26 = vor.u32 1.1754944e-38, %v4703_v14  ;;  %vm4699_vm4 = vmor %vm4697_vm3, %vm4698_vm1  ;;  %v4716_v32 = vand.u32 2147483647, %v11595_v55  ;;  %v4481_v30 = vsub.f32 %v12863_v2, %v4414_v48 }
 0x341   : > { %v7487_v18 = vpop.eup %7486  ;;  %v4696_v63 = vadd.f32 %v7479_v57, %v4695_v44  ;;  %v4708_v60 = vmul.f32 %v7485_v45, %v11595_v55  ;;  %7494 = vpow2.f32 %v6685_v19  ;;  %vm4702_vm5 = vcmp.eq.f32.partialorder %v4701_v61, 8.507059e+37  ;;  %5396 = vmatmul.bf16.gmra.mxu2 %v7662_v15 }
 0x342   : > { %v7489_v47 = vpop.eup %7488  ;;  %v11629_v50 = vmul.f32 %v7487_v18, %v5146_v36  ;;  %vm4713_vm6 = vweird.f32 %v7485_v45  ;;  %v4718_v39 = vand.u32 2147483648, %v11595_v55  ;;  %v6686_v36 = vmul.f32 -1.442695, %v4481_v30  ;;  %v4417_v14 = vpop.f32.mrf.mxu1 }
 0x343   : > { %v11634_v23 = vadd.f32 1.0, %v7489_v47  ;;  %v4700_v16 = vsel %vm4699_vm4, %v7479_v57, %v4696_v63  ;;  %v4709_v20 = vsub.f32 1.0, %v4708_v60  ;;  %vm4712_vm7 = vweird.f32 %v11595_v55  ;;  %v11646_v58 = vpop.f32.mrf.mxu0 }
 0x344   : > { %v4705_v12 = vsel %vm4702_vm5, %v4704_v26, %v4700_v16  ;;  %vm11641_vm2 = vcmp.eq.f32.partialorder %v4716_v32, 8.507059e+37  ;;  %vm4714_vm8 = vmor %vm4712_vm7, %vm4713_vm6  ;;  %v4719_v1 = vor.u32 1.1754944e-38, %v4718_v39  ;;  %v4731_v54 = vand.u32 2147483647, %v11610_v52  ;;  %v6882_v32 = vld [vmem:[%s12165_s1 + $0x1e8] sm:$0xff] }
 0x345   : > { %v7491_v27 = vpop.eup %7490  ;;  %7496 = vrcp.f32 %v11634_v23  ;;  %v5116_v34 = vmul.f32 %v4705_v12, %v11549_v24  ;;  %v5180_v7 = vadd.f32 %v4705_v12, %v4055_v6  ;;  %v4710_v11 = vmul.f32 %v7485_v45, %v4709_v20 }
 0x346   : > { %v7493_v59 = vpop.eup %7492  ;;  %7498 = vpow2.f32 %v6686_v36  ;;  %v4723_v61 = vmul.f32 %v7491_v27, %v11610_v52  ;;  %v4482_v33 = vsub.f32 %v12866_v56, %v4417_v14  ;;  %vm4728_vm9 = vweird.f32 %v7491_v27  ;;  %v7663_v56 = vld [vmem:[%s7932_s24 + $0x28] sm:$0xff] }
 0x347   : > { %v5243_v43 = vmul.f32 %v7493_v59, %v5147_v29  ;;  %v5148_v5 = vadd.f32 %v5116_v34, %v11593_v8  ;;  %7500 = vrcp.f32 %v5180_v7  ;;  %v4711_v24 = vadd.f32 %v7485_v45, %v4710_v11  ;;  %v7495_v6 = vpop.eup %7494  ;;  %v12869_v34 = vld [vmem:[#allocation29_spill] sm:$0xff] }
 0x348   : > { %v4724_v55 = vsub.f32 1.0, %v4723_v61  ;;  %v11652_v9 = vadd.f32 1.0, %v7495_v6  ;;  %v4733_v29 = vand.u32 2147483648, %v11610_v52  ;;  %v6687_v19 = vmul.f32 -1.442695, %v4482_v33  ;;  %v12870_v59 = vld [vmem:[#allocation5_spill] sm:$0xff] }
 0x349   : > { %v4715_v48 = vsel %vm4714_vm8, %v7485_v45, %v4711_v24  ;;  %v5273_v44 = vpack.c.bf16 %v5243_v43, %v11629_v50  ;;  %vm4727_vm10 = vweird.f32 %v11610_v52  ;;  %vm11661_vm11 = vcmp.eq.f32.partialorder %v4731_v54, 8.507059e+37 }
 0x34a   : > { %v4720_v8 = vsel %vm11641_vm2, %v4719_v1, %v4715_v48  ;;  %v4725_v35 = vmul.f32 %v7491_v27, %v4724_v55  ;;  %7502 = vrcp.f32 %v11652_v9  ;;  %vm4729_vm12 = vmor %vm4727_vm10, %vm4728_vm9  ;;  %v4734_v52 = vor.u32 1.1754944e-38, %v4733_v29  ;;  %v4419_v12 = vpop.f32.mrf.mxu1 }
 0x34b   : > { %v7497_v18 = vpop.eup %7496  ;;  %v5117_v63 = vmul.f32 %v4720_v8, %v11587_v42  ;;  %v5181_v26 = vadd.f32 %v4720_v8, %v4056_v10  ;;  %7504 = vpow2.f32 %v6687_v19  ;;  %v4746_v15 = vand.u32 2147483647, %v11634_v23  ;;  %v11676_v39 = vpop.f32.mrf.mxu0  ;;  %6674 = vmatmul.msk.bf16.gmra.mxu1 %vm846_vm0, %v6882_v32  ;;  %6640 = vmatmul.msk.bf16.gmra.mxu0 %vm846_vm0, %v6882_v32 }
 0x34c   : > { %v7499_v60 = vpop.eup %7498  ;;  %v4726_v45 = vadd.f32 %v7491_v27, %v4725_v35  ;;  %v4738_v50 = vmul.f32 %v7497_v18, %v11634_v23  ;;  %v4748_v36 = vand.u32 2147483648, %v11634_v23  ;;  %v4483_v7 = vsub.f32 %v12869_v34, %v4419_v12 }
 0x34d   : > { %v7501_v2 = vpop.eup %7500  ;;  %v5149_v30 = vadd.f32 %v5117_v63, %v11617_v31  ;;  %7506 = vrcp.f32 %v5181_v26  ;;  %v11670_v42 = vadd.f32 1.0, %v7499_v60  ;;  %vm4743_vm13 = vweird.f32 %v7497_v18  ;;  %v12872_v63 = vld [vmem:[#allocation6_spill] sm:$0xff] }
 0x34e   : > { %v11673_v10 = vmul.f32 %v7501_v2, %v5148_v5  ;;  %v4730_v16 = vsel %vm4729_vm12, %v7491_v27, %v4726_v45  ;;  %v4739_v20 = vsub.f32 1.0, %v4738_v50  ;;  %vm4742_vm14 = vweird.f32 %v11634_v23  ;;  %v12871_v5 = vld [vmem:[#allocation131_spill] sm:$0xff] }
 0x34f   : > { %7508 = vrcp.f32 %v11670_v42  ;;  %v4735_v31 = vsel %vm11661_vm11, %v4734_v52, %v4730_v16  ;;  %v6688_v14 = vmul.f32 -1.442695, %v4483_v7  ;;  %vm4744_vm15 = vmor %vm4742_vm14, %vm4743_vm13  ;;  %vm4747_vm1 = vcmp.eq.f32.partialorder %v4746_v15, 8.507059e+37  ;;  %v12874_v52 = vld [vmem:[#allocation71_spill] sm:$0xff] }
 0x350   : > { %5518 = vmatmul.bf16.gmra.mxu3 %v5273_v44  ;;  %v5118_v11 = vmul.f32 %v4735_v31, %v11619_v3  ;;  %v5182_v27 = vadd.f32 %v4735_v31, %v12870_v59  ;;  %v4740_v57 = vmul.f32 %v7497_v18, %v4739_v20  ;;  %v7503_v61 = vpop.eup %7502  ;;  %v4749_v54 = vor.u32 1.1754944e-38, %v4748_v36 }
 0x351   : > { %v7505_v43 = vpop.eup %7504  ;;  %v4753_v3 = vmul.f32 %v7503_v61, %v11652_v9  ;;  %5401 = vmatmul.bf16.gmra.mxu2 %v7663_v56  ;;  %v4761_v44 = vand.u32 2147483647, %v11652_v9  ;;  %vm4758_vm3 = vweird.f32 %v7503_v61  ;;  %v4763_v35 = vand.u32 2147483648, %v11652_v9 }
 0x352   : > { %v5150_v24 = vadd.f32 %v5118_v11, %v12871_v5  ;;  %7510 = vrcp.f32 %v5182_v27  ;;  %v4741_v6 = vadd.f32 %v7497_v18, %v4740_v57  ;;  %v11690_v55 = vadd.f32 1.0, %v7505_v43  ;;  %v4422_v47 = vpop.f32.mrf.mxu1  ;;  %v6883_v43 = vld [vmem:[%s12165_s1 + $0x1f0] sm:$0xff] }
 0x353   : > { %v7507_v1 = vpop.eup %7506  ;;  %7512 = vpow2.f32 %v6688_v14  ;;  %v4754_v48 = vsub.f32 1.0, %v4753_v3  ;;  %v4300_v50 = vpop.f32.mrf.mxu0  ;;  %vm4757_vm4 = vweird.f32 %v11652_v9  ;;  %vm4762_vm6 = vcmp.eq.f32.partialorder %v4761_v44, 8.507059e+37 }
 0x354   : > { %v5245_v23 = vmul.f32 %v7507_v1, %v5149_v30  ;;  %v4745_v33 = vsel %vm4744_vm15, %v7497_v18, %v4741_v6  ;;  %7514 = vrcp.f32 %v11690_v55  ;;  %v12873_v18 = vld [vmem:[#allocation32_spill] sm:$0xff]  ;;  %vm4759_vm5 = vmor %vm4757_vm4, %vm4758_vm3  ;;  %v4778_v7 = vand.u32 2147483648, %v11670_v42  ;;  %v12875_v6 = vld [vmem:[#allocation133_spill] sm:$0xff] }
 0x355   : > { %v7509_v29 = vpop.eup %7508  ;;  %v4750_v8 = vsel %vm4747_vm1, %v4749_v54, %v4745_v33  ;;  %v4755_v45 = vmul.f32 %v7503_v61, %v4754_v48  ;;  %v4484_v32 = vsub.f32 %v12873_v18, %v4422_v47  ;;  %vm4772_vm2 = vweird.f32 %v11670_v42  ;;  %v12876_v33 = vld [vmem:[#allocation35_spill] sm:$0xff] }
 0x356   : > { %v5119_v19 = vmul.f32 %v4750_v8, %v11646_v58  ;;  %v5183_v26 = vadd.f32 %v4750_v8, %v12872_v63  ;;  %v5274_v60 = vpack.c.bf16 %v5245_v23, %v11673_v10  ;;  %v4768_v2 = vmul.f32 %v7509_v29, %v11670_v42 }
 0x357   : > { %v4756_v20 = vadd.f32 %v7503_v61, %v4755_v45  ;;  %v4776_v58 = vand.u32 2147483647, %v11670_v42  ;;  %v4764_v10 = vor.u32 1.1754944e-38, %v4763_v35  ;;  %v6689_v31 = vmul.f32 -1.442695, %v4484_v32 }
 0x358   : > { %v7511_v30 = vpop.eup %7510  ;;  %v5151_v16 = vadd.f32 %v5119_v19, %v12874_v52  ;;  %7516 = vrcp.f32 %v5183_v26  ;;  %v4769_v36 = vsub.f32 1.0, %v4768_v2  ;;  %vm4773_vm7 = vweird.f32 %v7509_v29  ;;  %v12877_v26 = vld [vmem:[#allocation8_spill] sm:$0xff]  ;;  %v12878_v2 = vld [vmem:[#allocation134_spill] sm:$0xff] }
 0x359   : > { %v7513_v15 = vpop.eup %7512  ;;  %v11704_v12 = vmul.f32 %v7511_v30, %v5150_v24  ;;  %v4760_v34 = vsel %vm4759_vm5, %v7503_v61, %v4756_v20  ;;  %7518 = vpow2.f32 %v6689_v31  ;;  %vm4777_vm8 = vcmp.eq.f32.partialorder %v4776_v58, 8.507059e+37  ;;  %vm4774_vm9 = vmor %vm4772_vm2, %vm4773_vm7  ;;  %v12879_v31 = vld [vmem:[#allocation9_spill] sm:$0xff] }
 0x35a   : > { %v11707_v9 = vadd.f32 1.0, %v7513_v15  ;;  %v7515_v11 = vpop.eup %7514  ;;  %v4765_v59 = vsel %vm4762_vm6, %v4764_v10, %v4760_v34  ;;  %v4770_v27 = vmul.f32 %v7509_v29, %v4769_v36  ;;  %v4779_v1 = vor.u32 1.1754944e-38, %v4778_v7  ;;  %v4424_v54 = vpop.f32.mrf.mxu1 }
 0x35b   : > { %v5120_v57 = vmul.f32 %v4765_v59, %v11676_v39  ;;  %v5184_v14 = vadd.f32 %v4765_v59, %v9581_v38  ;;  %v4783_v61 = vmul.f32 %v7515_v11, %v11690_v55  ;;  %v4303_v39 = vpop.f32.mrf.mxu0  ;;  %v4485_v48 = vsub.f32 %v12876_v33, %v4424_v54  ;;  %6675 = vmatmul.msk.bf16.gmra.mxu1 %vm846_vm0, %v6883_v43 }
 0x35c   : > { %7520 = vrcp.f32 %v11707_v9  ;;  %v4771_v5 = vadd.f32 %v7509_v29, %v4770_v27  ;;  %v4793_v44 = vand.u32 2147483648, %v11690_v55  ;;  %vm4788_vm10 = vweird.f32 %v7515_v11  ;;  %6641 = vmatmul.msk.bf16.gmra.mxu0 %vm846_vm0, %v6883_v43  ;;  %v12880_v27 = vld [vmem:[#allocation38_spill] sm:$0xff] }
 0x35d   : > { %v5152_v3 = vadd.f32 %v5120_v57, %v12875_v6  ;;  %7522 = vrcp.f32 %v5184_v14  ;;  %v4784_v56 = vsub.f32 1.0, %v4783_v61  ;;  %v4791_v35 = vand.u32 2147483647, %v11690_v55 }
 0x35e   : > { %v7517_v24 = vpop.eup %7516  ;;  %v4775_v23 = vsel %vm4774_vm9, %v7509_v29, %v4771_v5  ;;  %v6690_v47 = vmul.f32 -1.442695, %v4485_v48  ;;  %vm4787_vm11 = vweird.f32 %v11690_v55  ;;  %v4794_v52 = vor.u32 1.1754944e-38, %v4793_v44  ;;  %v6884_v48 = vld [vmem:[%s12165_s1 + $0x1f8] sm:$0xff] }
 0x35f   : > { %v11719_v38 = vmul.f32 %v7517_v24, %v5151_v16  ;;  %v4780_v8 = vsel %vm4777_vm8, %v4779_v1, %v4775_v23  ;;  %v4785_v42 = vmul.f32 %v7515_v11, %v4784_v56  ;;  %v7519_v19 = vpop.eup %7518  ;;  %vm4789_vm12 = vmor %vm4787_vm11, %vm4788_vm10  ;;  %v7664_v16 = vld [vmem:[%s7932_s24 + $0x30] sm:$0xff]  ;;  %vm4792_vm13 = vcmp.eq.f32.partialorder %v4791_v35, 8.507059e+37 }
 0x360   : > { %5523 = vmatmul.bf16.gmra.mxu3 %v5274_v60  ;;  %v5121_v63 = vmul.f32 %v4780_v8, %v4300_v50  ;;  %v5185_v45 = vadd.f32 %v4780_v8, %v12877_v26  ;;  %v11729_v60 = vadd.f32 1.0, %v7519_v19  ;;  %v4808_v59 = vand.u32 2147483648, %v11707_v9 }
 0x361   : > { %v5275_v29 = vpack.c.bf16 %v11719_v38, %v11704_v12  ;;  %v4786_v32 = vadd.f32 %v7515_v11, %v4785_v42  ;;  %5406 = vmatmul.bf16.gmra.mxu2 %v7664_v16  ;;  %v4806_v43 = vand.u32 2147483647, %v11707_v9  ;;  %vm4802_vm15 = vweird.f32 %v11707_v9 }
 0x362   : > { %v7521_v18 = vpop.eup %7520  ;;  %v5153_v30 = vadd.f32 %v5121_v63, %v12878_v2  ;;  %7524 = vrcp.f32 %v5185_v45  ;;  %v4427_v34 = vpop.f32.mrf.mxu1  ;;  %v4809_v54 = vor.u32 1.1754944e-38, %v4808_v59  ;;  %v4823_v26 = vand.u32 2147483648, %v11729_v60  ;;  %v12884_v59 = vld [vmem:[#allocation11_spill] sm:$0xff] }
 0x363   : > { %v4798_v50 = vmul.f32 %v7521_v18, %v11707_v9  ;;  %v7523_v20 = vpop.eup %7522  ;;  %7526 = vrcp.f32 %v11729_v60  ;;  %v4790_v58 = vsel %vm4789_vm12, %v7515_v11, %v4786_v32  ;;  %v4305_v7 = vpop.f32.mrf.mxu0  ;;  %v4486_v57 = vsub.f32 %v12880_v27, %v4427_v34  ;;  %v12881_v11 = vld [vmem:[#allocation135_spill] sm:$0xff]  ;;  %v12883_v32 = vld [vmem:[#allocation41_spill] sm:$0xff] }
 0x364   : > { %v11736_v15 = vmul.f32 %v7523_v20, %v5152_v3  ;;  %7528 = vpow2.f32 %v6690_v47  ;;  %v4795_v12 = vsel %vm4792_vm13, %v4794_v52, %v4790_v58  ;;  %vm4803_vm14 = vweird.f32 %v7521_v18  ;;  %v12882_v47 = vld [vmem:[#allocation10_spill] sm:$0xff] }
 0x365   : > { %v4799_v10 = vsub.f32 1.0, %v4798_v50  ;;  %v5122_v55 = vmul.f32 %v4795_v12, %v4303_v39  ;;  %v5186_v36 = vadd.f32 %v4795_v12, %v12879_v31  ;;  %v6691_v24 = vmul.f32 -1.442695, %v4486_v57  ;;  %vm4804_vm1 = vmor %vm4802_vm15, %vm4803_vm14  ;;  %v7665_v12 = vld [vmem:[%s7932_s24 + $0x38] sm:$0xff] }
 0x366   : > { %vm4807_vm3 = vcmp.eq.f32.partialorder %v4806_v43, 8.507059e+37  ;;  %vm4817_vm5 = vweird.f32 %v11729_v60  ;;  %v4824_v58 = vor.u32 1.1754944e-38, %v4823_v26 }
 0x367   : > { %v4800_v14 = vmul.f32 %v7521_v18, %v4799_v10  ;;  %v5154_v61 = vadd.f32 %v5122_v55, %v12881_v11  ;;  %7530 = vrcp.f32 %v5186_v36 }
 0x368   : > { %v7525_v5 = vpop.eup %7524  ;;  %7532 = vpow2.f32 %v6691_v24 }
 0x369   : > { %v4801_v6 = vadd.f32 %v7521_v18, %v4800_v14  ;;  %v7527_v3 = vpop.eup %7526  ;;  %v11744_v1 = vmul.f32 %v7525_v5, %v5153_v30  ;;  %v4821_v30 = vand.u32 2147483647, %v11729_v60  ;;  %v12885_v14 = vld [vmem:[#allocation44_spill] sm:$0xff] }
 0x36a   : > { %v7529_v39 = vpop.eup %7528  ;;  %v4813_v38 = vmul.f32 %v7527_v3, %v11729_v60  ;;  %v4429_v19 = vpop.f32.mrf.mxu1  ;;  %vm4818_vm4 = vweird.f32 %v7527_v3 }
 0x36b   : > { %v4805_v56 = vsel %vm4804_vm1, %v7521_v18, %v4801_v6  ;;  %v11747_v23 = vadd.f32 1.0, %v7529_v39  ;;  %v5276_v9 = vpack.c.bf16 %v11744_v1, %v11736_v15  ;;  %v4308_v63 = vpop.f32.mrf.mxu0  ;;  %v4487_v2 = vsub.f32 %v12883_v32, %v4429_v19  ;;  %6676 = vmatmul.msk.bf16.gmra.mxu1 %vm846_vm0, %v6884_v48  ;;  %vm4819_vm6 = vmor %vm4817_vm5, %vm4818_vm4 }
 0x36c   : > { %v4810_v33 = vsel %vm4807_vm3, %v4809_v54, %v4805_v56  ;;  %v4814_v42 = vsub.f32 1.0, %v4813_v38  ;;  %6642 = vmatmul.msk.bf16.gmra.mxu0 %vm846_vm0, %v6884_v48  ;;  %vm4822_vm7 = vcmp.eq.f32.partialorder %v4821_v30, 8.507059e+37 }
 0x36d   : > { %v5123_v44 = vmul.f32 %v4810_v33, %v4305_v7  ;;  %v5187_v8 = vadd.f32 %v4810_v33, %v9776_v62  ;;  %v7531_v35 = vpop.eup %7530  ;;  %7534 = vrcp.f32 %v11747_v23  ;;  %v6692_v50 = vmul.f32 -1.442695, %v4487_v2 }
 0x36e   : > { %v11757_v45 = vmul.f32 %v7531_v35, %v5154_v61  ;;  %v4815_v62 = vmul.f32 %v7527_v3, %v4814_v42  ;;  %v7533_v52 = vpop.eup %7532  ;;  %v12886_v61 = vld [vmem:[#allocation136_spill] sm:$0xff]  ;;  %v4838_v24 = vand.u32 2147483648, %v11747_v23  ;;  %v4836_v56 = vand.u32 2147483647, %v11747_v23 }
 0x36f   : > { %v5155_v18 = vadd.f32 %v5123_v44, %v12882_v47  ;;  %7536 = vrcp.f32 %v5187_v8  ;;  %v11764_v16 = vadd.f32 1.0, %v7533_v52  ;;  %vm4832_vm2 = vweird.f32 %v11747_v23 }
 0x370   : > { %5528 = vmatmul.bf16.gmra.mxu3 %v5275_v29  ;;  %v4816_v20 = vadd.f32 %v7527_v3, %v4815_v62  ;;  %7538 = vpow2.f32 %v6692_v50  ;;  %v4839_v8 = vor.u32 1.1754944e-38, %v4838_v24  ;;  %vm4837_vm9 = vcmp.eq.f32.partialorder %v4836_v56, 8.507059e+37  ;;  %v12887_v62 = vld [vmem:[#allocation47_spill] sm:$0xff] }
 0x371   : > { %5411 = vmatmul.bf16.gmra.mxu2 %v7665_v12  ;;  %7540 = vrcp.f32 %v11764_v16  ;;  %v4851_v50 = vand.u32 2147483647, %v11764_v16  ;;  %vm4847_vm11 = vweird.f32 %v11764_v16 }
 0x372   : > { %v4820_v10 = vsel %vm4819_vm6, %v7527_v3, %v4816_v20  ;;  %v4432_v60 = vpop.f32.mrf.mxu1 }
 0x373   : > { %v7535_v29 = vpop.eup %7534  ;;  %v4825_v31 = vsel %vm4822_vm7, %v4824_v58, %v4820_v10  ;;  %v4310_v57 = vpop.f32.mrf.mxu0  ;;  %v4488_v43 = vsub.f32 %v12885_v14, %v4432_v60  ;;  %v12888_v58 = vld [vmem:[#allocation14_spill] sm:$0xff]  ;;  %vm4852_vm13 = vcmp.eq.f32.partialorder %v4851_v50, 8.507059e+37 }
 0x374   : > { %v4828_v36 = vmul.f32 %v7535_v29, %v11747_v23  ;;  %v5124_v7 = vmul.f32 %v4825_v31, %v4308_v63  ;;  %v5188_v27 = vadd.f32 %v4825_v31, %v12884_v59  ;;  %vm4833_vm0 = vweird.f32 %v7535_v29 }
 0x375   : > { %v7537_v55 = vpop.eup %7536  ;;  %v6693_v54 = vmul.f32 -1.442695, %v4488_v43  ;;  %vm4834_vm8 = vmor %vm4832_vm2, %vm4833_vm0  ;;  %v12889_v43 = vld [vmem:[#allocation50_spill] sm:$0xff] }
 0x376   : > { %v11770_v34 = vmul.f32 %v7537_v55, %v5155_v18  ;;  %v4829_v11 = vsub.f32 1.0, %v4828_v36  ;;  %v5156_v5 = vadd.f32 %v5124_v7, %v12886_v61  ;;  %7542 = vrcp.f32 %v5188_v27  ;;  %v7539_v3 = vpop.eup %7538 }
 0x377   : > { %v7541_v38 = vpop.eup %7540  ;;  %v11779_v33 = vadd.f32 1.0, %v7539_v3  ;;  %7544 = vpow2.f32 %v6693_v54  ;;  %v4853_v18 = vand.u32 2147483648, %v11764_v16  ;;  %v12890_v3 = vld [vmem:[#allocation17_spill] sm:$0xff] }
 0x378   : > { %v5277_v6 = vpack.c.bf16 %v11770_v34, %v11757_v45  ;;  %v4830_v39 = vmul.f32 %v7535_v29, %v4829_v11  ;;  %v4843_v44 = vmul.f32 %v7541_v38, %v11764_v16  ;;  %vm4848_vm10 = vweird.f32 %v7541_v38 }
 0x379   : > { %7546 = vrcp.f32 %v11779_v33  ;;  %vm4849_vm12 = vmor %vm4847_vm11, %vm4848_vm10  ;;  %v4854_v15 = vor.u32 1.1754944e-38, %v4853_v18  ;;  %v4868_v16 = vand.u32 2147483648, %v11779_v33  ;;  %vm4862_vm15 = vweird.f32 %v11779_v33 }
 0x37a   : > { %v4831_v48 = vadd.f32 %v7535_v29, %v4830_v39  ;;  %v4844_v35 = vsub.f32 1.0, %v4843_v44  ;;  %v4434_v26 = vpop.f32.mrf.mxu1 }
 0x37b   : > { %v4313_v47 = vpop.f32.mrf.mxu0  ;;  %v4489_v30 = vsub.f32 %v12887_v62, %v4434_v26  ;;  %v4869_v44 = vor.u32 1.1754944e-38, %v4868_v16  ;;  %v12891_v26 = vld [vmem:[#allocation20_spill] sm:$0xff] }
 0x37c   : > { %v4835_v42 = vsel %vm4834_vm8, %v7535_v29, %v4831_v48  ;;  %v7543_v19 = vpop.eup %7542  ;;  %v4845_v52 = vmul.f32 %v7541_v38, %v4844_v35 }
 0x37d   : > { %v4840_v63 = vsel %vm4837_vm9, %v4839_v8, %v4835_v42  ;;  %v11785_v32 = vmul.f32 %v7543_v19, %v5156_v5  ;;  %v7545_v20 = vpop.eup %7544  ;;  %v6694_v29 = vmul.f32 -1.442695, %v4489_v30  ;;  %v4866_v5 = vand.u32 2147483647, %v11779_v33 }
 0x37e   : > { %v5125_v2 = vmul.f32 %v4840_v63, %v4310_v57  ;;  %v5189_v23 = vadd.f32 %v4840_v63, %v9913_v40  ;;  %v11794_v55 = vadd.f32 1.0, %v7545_v20  ;;  %v4846_v40 = vadd.f32 %v7541_v38, %v4845_v52  ;;  %v12892_v52 = vld [vmem:[#allocation126_spill] sm:$0xff]  ;;  %v12893_v20 = vld [vmem:[#allocation53_spill] sm:$0xff] }
 0x37f   : > { %v7547_v10 = vpop.eup %7546  ;;  %vm4867_vm3 = vcmp.eq.f32.partialorder %v4866_v5, 8.507059e+37  ;;  %v12895_v5 = vld [vmem:[#allocation84_spill] sm:$0xff] }
 0x380   : > { %5533 = vmatmul.bf16.gmra.mxu3 %v5276_v9  ;;  %v5157_v12 = vadd.f32 %v5125_v2, %v12888_v58  ;;  %7548 = vrcp.f32 %v5189_v23  ;;  %v4858_v1 = vmul.f32 %v7547_v10, %v11779_v33  ;;  %v7666_v9 = vld [vmem:[%s7932_s24 + $0x40] sm:$0xff]  ;;  %v4850_v31 = vsel %vm4849_vm12, %v7541_v38, %v4846_v40 }
 0x381   : > { %7550 = vpow2.f32 %v6694_v29  ;;  %5416 = vmatmul.bf16.gmra.mxu2 %v7666_v9  ;;  %v4855_v36 = vsel %vm4852_vm13, %v4854_v15, %v4850_v31  ;;  %vm4863_vm14 = vweird.f32 %v7547_v10  ;;  %v4883_v62 = vand.u32 2147483648, %v11794_v55 }
 0x382   : > { %7552 = vrcp.f32 %v11794_v55  ;;  %v4859_v7 = vsub.f32 1.0, %v4858_v1  ;;  %v5126_v59 = vmul.f32 %v4855_v36, %v4313_v47  ;;  %v5190_v27 = vadd.f32 %v4855_v36, %v9974_v49  ;;  %v4437_v60 = vpop.f32.mrf.mxu1  ;;  %vm4864_vm1 = vmor %vm4862_vm15, %vm4863_vm14 }
 0x383   : > { %v4315_v57 = vpop.f32.mrf.mxu0  ;;  %v4490_v11 = vsub.f32 %v12889_v43, %v4437_v60  ;;  %v4881_v29 = vand.u32 2147483647, %v11794_v55  ;;  %vm4877_vm5 = vweird.f32 %v11794_v55  ;;  %v4884_v31 = vor.u32 1.1754944e-38, %v4883_v62 }
 0x384   : > { %v4860_v61 = vmul.f32 %v7547_v10, %v4859_v7  ;;  %v5158_v54 = vadd.f32 %v5126_v59, %v12890_v3  ;;  %7554 = vrcp.f32 %v5190_v27  ;;  %v7667_v7 = vld [vmem:[%s7932_s24 + $0x48] sm:$0xff]  ;;  %v11834_v43 = vpop.f32.mrf.mxu2 }
 0x385   : > { %v6695_v56 = vmul.f32 -1.442695, %v4490_v11  ;;  %vm4882_vm7 = vcmp.eq.f32.partialorder %v4881_v29, 8.507059e+37 }
 0x386   : > { %v7549_v14 = vpop.eup %7548  ;;  %v4861_v38 = vadd.f32 %v7547_v10, %v4860_v61 }
 0x387   : > { %v11804_v24 = vmul.f32 %v7549_v14, %v5157_v12  ;;  %v7551_v39 = vpop.eup %7550  ;;  %7556 = vpow2.f32 %v6695_v56 }
 0x388   : > { %v7553_v49 = vpop.eup %7552  ;;  %v11808_v48 = vadd.f32 1.0, %v7551_v39  ;;  %v4865_v42 = vsel %vm4864_vm1, %v7547_v10, %v4861_v38 }
 0x389   : > { %v5278_v8 = vpack.c.bf16 %v11804_v24, %v11785_v32  ;;  %v4873_v35 = vmul.f32 %v7553_v49, %v11794_v55  ;;  %v4870_v19 = vsel %vm4867_vm3, %v4869_v44, %v4865_v42  ;;  %vm4878_vm4 = vweird.f32 %v7553_v49 }
 0x38a   : > { %7558 = vrcp.f32 %v11808_v48  ;;  %v5127_v63 = vmul.f32 %v4870_v19, %v4315_v57  ;;  %v5191_v47 = vadd.f32 %v4870_v19, %v12891_v26  ;;  %v7555_v18 = vpop.eup %7554  ;;  %v4439_v2 = vpop.f32.mrf.mxu1  ;;  %vm4879_vm6 = vmor %vm4877_vm5, %vm4878_vm4  ;;  %v12894_v57 = vld [vmem:[#allocation77_spill] sm:$0xff]  ;;  %v4898_v14 = vand.u32 2147483648, %v11808_v48 }
 0x38b   : > { %v4874_v33 = vsub.f32 1.0, %v4873_v35  ;;  %v4318_v23 = vpop.f32.mrf.mxu0  ;;  %v11816_v30 = vmul.f32 %v7555_v18, %v5158_v54  ;;  %v4491_v58 = vsub.f32 %v12893_v20, %v4439_v2  ;;  %v4896_v61 = vand.u32 2147483647, %v11808_v48 }
 0x38c   : > { %v5159_v50 = vadd.f32 %v5127_v63, %v12892_v52  ;;  %7560 = vrcp.f32 %v5191_v47  ;;  %vm4892_vm2 = vweird.f32 %v11808_v48  ;;  %v4899_v44 = vor.u32 1.1754944e-38, %v4898_v14  ;;  %v12896_v47 = vld [vmem:[#allocation117_spill] sm:$0xff] }
 0x38d   : > { %v4875_v12 = vmul.f32 %v7553_v49, %v4874_v33  ;;  %v7557_v10 = vpop.eup %7556  ;;  %v6696_v40 = vmul.f32 -1.442695, %v4491_v58  ;;  %vm4897_vm9 = vcmp.eq.f32.partialorder %v4896_v61, 8.507059e+37  ;;  %v12898_v58 = vld [vmem:[#allocation22_spill] sm:$0xff]  ;;  %v12901_v61 = vld [vmem:[#allocation93_spill] sm:$0xff] }
 0x38e   : > { %v11824_v1 = vadd.f32 1.0, %v7557_v10 }
 0x38f   : > { %v4876_v9 = vadd.f32 %v7553_v49, %v4875_v12  ;;  %7562 = vpow2.f32 %v6696_v40  ;;  %v11855_v40 = vpop.f32.mrf.mxu2 }
 0x390   : > { %5538 = vmatmul.bf16.gmra.mxu3 %v5277_v6  ;;  %v7559_v15 = vpop.eup %7558  ;;  %7564 = vrcp.f32 %v11824_v1  ;;  %v4911_v52 = vand.u32 2147483647, %v11824_v1  ;;  %vm4907_vm11 = vweird.f32 %v11824_v1 }
 0x391   : > { %v4888_v36 = vmul.f32 %v7559_v15, %v11808_v48  ;;  %5421 = vmatmul.bf16.gmra.mxu2 %v7667_v7  ;;  %v4880_v45 = vsel %vm4879_vm6, %v7553_v49, %v4876_v9  ;;  %vm4893_vm0 = vweird.f32 %v7559_v15 }
 0x392   : > { %v7561_v34 = vpop.eup %7560  ;;  %v4885_v6 = vsel %vm4882_vm7, %v4884_v31, %v4880_v45  ;;  %vm4894_vm8 = vmor %vm4892_vm2, %vm4893_vm0  ;;  %vm4912_vm13 = vcmp.eq.f32.partialorder %v4911_v52, 8.507059e+37  ;;  %v7668_v45 = vld [vmem:[%s7932_s24 + $0x50] sm:$0xff]  ;;  %v12903_v52 = vld [vmem:[#allocation100_spill] sm:$0xff] }
 0x393   : > { %v4889_v59 = vsub.f32 1.0, %v4888_v36  ;;  %v11830_v27 = vmul.f32 %v7561_v34, %v5159_v50  ;;  %v5128_v60 = vmul.f32 %v4885_v6, %v4318_v23  ;;  %v5192_v16 = vadd.f32 %v4885_v6, %v12894_v57  ;;  %v4320_v55 = vpop.f32.mrf.mxu0  ;;  %v12897_v23 = vld [vmem:[#allocation57_spill] sm:$0xff] }
 0x394   : > { %v4913_v50 = vand.u32 2147483648, %v11824_v1 }
 0x395   : > { %v4890_v11 = vmul.f32 %v7559_v15, %v4889_v59  ;;  %v5160_v3 = vadd.f32 %v5128_v60, %v12895_v5  ;;  %7566 = vrcp.f32 %v5192_v16  ;;  %v5279_v54 = vpack.c.bf16 %v11830_v27, %v11816_v30  ;;  %v7563_v39 = vpop.eup %7562 }
 0x396   : > { %v7565_v38 = vpop.eup %7564  ;;  %v11841_v49 = vadd.f32 1.0, %v7563_v39  ;;  %v4914_v31 = vor.u32 1.1754944e-38, %v4913_v50 }
 0x397   : > { %v4891_v56 = vadd.f32 %v7559_v15, %v4890_v11  ;;  %v4903_v35 = vmul.f32 %v7565_v38, %v11824_v1  ;;  %vm4908_vm10 = vweird.f32 %v7565_v38  ;;  %v12900_v1 = vld [vmem:[#allocation61_spill] sm:$0xff] }
 0x398   : > { %7568 = vrcp.f32 %v11841_v49  ;;  %v4442_v63 = vpop.f32.mrf.mxu1  ;;  %vm4909_vm12 = vmor %vm4907_vm11, %vm4908_vm10  ;;  %v4926_v14 = vand.u32 2147483647, %v11841_v49  ;;  %v4928_v11 = vand.u32 2147483648, %v11841_v49  ;;  %vm4922_vm15 = vweird.f32 %v11841_v49 }
 0x399   : > { %v4895_v42 = vsel %vm4894_vm8, %v7559_v15, %v4891_v56  ;;  %v4904_v18 = vsub.f32 1.0, %v4903_v35  ;;  %v4492_v48 = vsub.f32 %v12897_v23, %v4442_v63 }
 0x39a   : > { %v4900_v19 = vsel %vm4897_vm9, %v4899_v44, %v4895_v42  ;;  %v4929_v35 = vor.u32 1.1754944e-38, %v4928_v11  ;;  %vm4927_vm3 = vcmp.eq.f32.partialorder %v4926_v14, 8.507059e+37 }
 0x39b   : > { %v5129_v26 = vmul.f32 %v4900_v19, %v4320_v55  ;;  %v5193_v33 = vadd.f32 %v4900_v19, %v12896_v47  ;;  %v7567_v2 = vpop.eup %7566  ;;  %v4323_v62 = vpop.f32.mrf.mxu0  ;;  %v4905_v29 = vmul.f32 %v7565_v38, %v4904_v18  ;;  %v6697_v10 = vmul.f32 -1.442695, %v4492_v48  ;;  %v12902_v48 = vld [vmem:[#allocation68_spill] sm:$0xff] }
 0x39c   : > { %v11849_v20 = vmul.f32 %v7567_v2, %v5160_v3  ;;  %v11870_v19 = vpop.f32.mrf.mxu2 }
 0x39d   : > { %v5161_v12 = vadd.f32 %v5129_v26, %v12898_v58  ;;  %7570 = vrcp.f32 %v5193_v33  ;;  %v4906_v15 = vadd.f32 %v7565_v38, %v4905_v29 }
 0x39e   : > { %v7569_v9 = vpop.eup %7568  ;;  %7572 = vpow2.f32 %v6697_v10 }
 0x39f   : > { %v4910_v36 = vsel %vm4909_vm12, %v7565_v38, %v4906_v15  ;;  %v4918_v7 = vmul.f32 %v7569_v9, %v11841_v49  ;;  %vm4923_vm14 = vweird.f32 %v7569_v9 }
 0x3a0   : > { %5543 = vmatmul.bf16.gmra.mxu3 %v5278_v8  ;;  %v4915_v34 = vsel %vm4912_vm13, %v4914_v31, %v4910_v36  ;;  %v4444_v32 = vpop.f32.mrf.mxu1  ;;  %v12899_v8 = vld [vmem:[#allocation24_spill] sm:$0xff]  ;;  %vm4924_vm1 = vmor %vm4922_vm15, %vm4923_vm14 }
 0x3a1   : > { %5426 = vmatmul.bf16.gmra.mxu2 %v7668_v45  ;;  %v5130_v24 = vmul.f32 %v4915_v34, %v4323_v62  ;;  %v5194_v59 = vadd.f32 %v4915_v34, %v12899_v8  ;;  %v4919_v60 = vsub.f32 1.0, %v4918_v7  ;;  %v4493_v16 = vsub.f32 %v12900_v1, %v4444_v32  ;;  %v12904_v32 = vld [vmem:[#allocation72_spill] sm:$0xff] }
 0x3a3   : > { %v7571_v6 = vpop.eup %7570  ;;  %v4325_v55 = vpop.f32.mrf.mxu0  ;;  %v5162_v5 = vadd.f32 %v5130_v24, %v12901_v61  ;;  %7574 = vrcp.f32 %v5194_v59  ;;  %v4920_v3 = vmul.f32 %v7569_v9, %v4919_v60  ;;  %v6698_v56 = vmul.f32 -1.442695, %v4493_v16 }
 0x3a4   : > { %v11861_v57 = vmul.f32 %v7571_v6, %v5161_v12  ;;  %v7573_v39 = vpop.eup %7572  ;;  %v11881_v31 = vpop.f32.mrf.mxu2 }
 0x3a5   : > { %v4620_v44 = vadd.f32 1.0, %v7573_v39  ;;  %v4921_v42 = vadd.f32 %v7569_v9, %v4920_v3  ;;  %7576 = vpow2.f32 %v6698_v56 }
 0x3a6   : > { %v5280_v38 = vpack.c.bf16 %v11861_v57, %v11849_v20  ;;  %v7670_v57 = vld [vmem:[%s7932_s24 + $0x60] sm:$0xff] }
 0x3a7   : > { %7578 = vrcp.f32 %v4620_v44  ;;  %v4925_v63 = vsel %vm4924_vm1, %v7569_v9, %v4921_v42  ;;  %v4941_v45 = vand.u32 2147483647, %v4620_v44  ;;  %v4943_v34 = vand.u32 2147483648, %v4620_v44 }
 0x3a8   : > { %v4930_v26 = vsel %vm4927_vm3, %v4929_v35, %v4925_v63  ;;  %v4447_v33 = vpop.f32.mrf.mxu1  ;;  %vm4937_vm5 = vweird.f32 %v4620_v44 }
 0x3a9   : > { %v7575_v47 = vpop.eup %7574  ;;  %v5131_v18 = vmul.f32 %v4930_v26, %v4325_v55  ;;  %v5195_v2 = vadd.f32 %v4930_v26, %v10476_v28  ;;  %v4494_v62 = vsub.f32 %v12902_v48, %v4447_v33  ;;  %v7669_v28 = vld [vmem:[%s7932_s24 + $0x58] sm:$0xff]  ;;  %v4944_v55 = vor.u32 1.1754944e-38, %v4943_v34  ;;  %v12905_v26 = vld [vmem:[#allocation75_spill] sm:$0xff] }
 0x3aa   : > { %v11873_v23 = vmul.f32 %v7575_v47, %v5162_v5  ;;  %vm4942_vm7 = vcmp.eq.f32.partialorder %v4941_v45, 8.507059e+37  ;;  %v12908_v34 = vld [vmem:[#allocation79_spill] sm:$0xff] }
 0x3ab   : > { %v4328_v49 = vpop.f32.mrf.mxu0  ;;  %v5163_v50 = vadd.f32 %v5131_v18, %v12903_v52  ;;  %7580 = vrcp.f32 %v5195_v2  ;;  %v7577_v58 = vpop.eup %7576  ;;  %v6699_v12 = vmul.f32 -1.442695, %v4494_v62 }
 0x3ac   : > { %v4621_v10 = vadd.f32 1.0, %v7577_v58  ;;  %v11892_v56 = vpop.f32.mrf.mxu2 }
 0x3ad   : > { %v7579_v29 = vpop.eup %7578  ;;  %7582 = vpow2.f32 %v6699_v12 }
 0x3ae   : > { %v4933_v15 = vmul.f32 %v7579_v29, %v4620_v44  ;;  %7584 = vrcp.f32 %v4621_v10  ;;  %vm4938_vm4 = vweird.f32 %v7579_v29  ;;  %v4956_v42 = vand.u32 2147483647, %v4621_v10 }
 0x3af   : > { %vm4939_vm6 = vmor %vm4937_vm5, %vm4938_vm4  ;;  %v4958_v35 = vand.u32 2147483648, %v4621_v10  ;;  %vm4952_vm2 = vweird.f32 %v4621_v10 }
 0x3b0   : > { %5548 = vmatmul.bf16.gmra.mxu3 %v5279_v54  ;;  %v4934_v9 = vsub.f32 1.0, %v4933_v15  ;;  %v4449_v7 = vpop.f32.mrf.mxu1  ;;  %vm4957_vm9 = vcmp.eq.f32.partialorder %v4956_v42, 8.507059e+37 }
 0x3b1   : > { %5431 = vmatmul.bf16.gmra.mxu2 %v7669_v28  ;;  %v7581_v36 = vpop.eup %7580  ;;  %v4495_v30 = vsub.f32 %v12904_v32, %v4449_v7  ;;  %v12907_v7 = vld [vmem:[#allocation78_spill] sm:$0xff] }
 0x3b2   : > { %v11883_v6 = vmul.f32 %v7581_v36, %v5163_v50  ;;  %v4935_v27 = vmul.f32 %v7579_v29, %v4934_v9 }
 0x3b3   : > { %v4330_v54 = vpop.f32.mrf.mxu0  ;;  %v7583_v24 = vpop.eup %7582  ;;  %v6700_v8 = vmul.f32 -1.442695, %v4495_v30 }
 0x3b4   : > { %v4936_v59 = vadd.f32 %v7579_v29, %v4935_v27  ;;  %v5281_v60 = vpack.c.bf16 %v11883_v6, %v11873_v23  ;;  %v7585_v1 = vpop.eup %7584  ;;  %v11888_v16 = vadd.f32 1.0, %v7583_v24  ;;  %v11906_v28 = vpop.f32.mrf.mxu2  ;;  %v7671_v6 = vld [vmem:[%s7932_s24 + $0x68] sm:$0xff] }
 0x3b5   : > { %7586 = vpow2.f32 %v6700_v8  ;;  %v4948_v11 = vmul.f32 %v7585_v1, %v4621_v10  ;;  %vm4953_vm0 = vweird.f32 %v7585_v1 }
 0x3b6   : > { %v4940_v14 = vsel %vm4939_vm6, %v7579_v29, %v4936_v59  ;;  %7588 = vrcp.f32 %v11888_v16  ;;  %vm4954_vm8 = vmor %vm4952_vm2, %vm4953_vm0  ;;  %v12906_v29 = vld [vmem:[#allocation124_spill] sm:$0xff]  ;;  %v4973_v30 = vand.u32 2147483648, %v11888_v16  ;;  %vm4967_vm11 = vweird.f32 %v11888_v16 }
 0x3b7   : > { %v4945_v61 = vsel %vm4942_vm7, %v4944_v55, %v4940_v14  ;;  %v4949_v39 = vsub.f32 1.0, %v4948_v11 }
 0x3b8   : > { %v5132_v5 = vmul.f32 %v4945_v61, %v4328_v49  ;;  %v5196_v3 = vadd.f32 %v4945_v61, %v10595_v25  ;;  %v4452_v44 = vpop.f32.mrf.mxu1 }
 0x3b9   : > { %v4496_v47 = vsub.f32 %v12905_v26, %v4452_v44  ;;  %v4950_v33 = vmul.f32 %v7585_v1, %v4949_v39 }
 0x3ba   : > { %v5164_v63 = vadd.f32 %v5132_v5, %v10606_v41  ;;  %7590 = vrcp.f32 %v5196_v3  ;;  %v4959_v41 = vor.u32 1.1754944e-38, %v4958_v35  ;;  %v4974_v5 = vor.u32 1.1754944e-38, %v4973_v30 }
 0x3bb   : > { %v4333_v18 = vpop.f32.mrf.mxu0  ;;  %v7587_v2 = vpop.eup %7586  ;;  %v6701_v25 = vmul.f32 -1.442695, %v4496_v47  ;;  %v4951_v48 = vadd.f32 %v7585_v1, %v4950_v33 }
 0x3bc   : > { %v7589_v62 = vpop.eup %7588  ;;  %v11899_v49 = vadd.f32 1.0, %v7587_v2  ;;  %v11931_v47 = vpop.f32.mrf.mxu2 }
 0x3bd   : > { %7592 = vpow2.f32 %v6701_v25  ;;  %v4955_v52 = vsel %vm4954_vm8, %v7585_v1, %v4951_v48  ;;  %v4963_v50 = vmul.f32 %v7589_v62, %v11888_v16  ;;  %vm4968_vm10 = vweird.f32 %v7589_v62  ;;  %v11920_v1 = vld [vmem:[%s12172_s8] ss:$0 sm:$0xff] }
 0x3be   : > { %7594 = vrcp.f32 %v11899_v49  ;;  %v4960_v20 = vsel %vm4957_vm9, %v4959_v41, %v4955_v52  ;;  %vm4969_vm12 = vmor %vm4967_vm11, %vm4968_vm10  ;;  %v4986_v44 = vand.u32 2147483647, %v11899_v49  ;;  %v12909_v25 = vld [vmem:[#allocation85_spill] sm:$0xff]  ;;  %vm4982_vm15 = vweird.f32 %v11899_v49 }
 0x3bf   : > { %v5133_v12 = vmul.f32 %v4960_v20, %v4330_v54  ;;  %v5197_v10 = vadd.f32 %v4960_v20, %v12906_v29  ;;  %v4964_v15 = vsub.f32 1.0, %v4963_v50  ;;  %v4971_v54 = vand.u32 2147483647, %v11888_v16  ;;  %v12910_v50 = vld [vmem:[#allocation86_spill] sm:$0xff] }
 0x3c0   : > { %5553 = vmatmul.bf16.gmra.mxu3 %v5280_v38  ;;  %v7591_v38 = vpop.eup %7590  ;;  %v4454_v36 = vpop.f32.mrf.mxu1  ;;  %vm4987_vm3 = vcmp.eq.f32.partialorder %v4986_v44, 8.507059e+37 }
 0x3c1   : > { %5436 = vmatmul.bf16.gmra.mxu2 %v7670_v57  ;;  %v11908_v9 = vmul.f32 %v7591_v38, %v5164_v63  ;;  %v5165_v45 = vadd.f32 %v5133_v12, %v12907_v7  ;;  %7596 = vrcp.f32 %v5197_v10  ;;  %v4497_v32 = vsub.f32 %v12908_v34, %v4454_v36 }
 0x3c2   : > { %v4965_v24 = vmul.f32 %v7589_v62, %v4964_v15  ;;  %vm4972_vm13 = vcmp.eq.f32.partialorder %v4971_v54, 8.507059e+37  ;;  %v12912_v54 = vld [vmem:[#allocation27_spill] sm:$0xff] }
 0x3c3   : > { %v5514_v58 = vpop.f32.mrf.mxu3  ;;  %v11913_v27 = vpop.f32.mrf.mxu0  ;;  %v6702_v55 = vmul.f32 -1.442695, %v4497_v32 }
 0x3c4   : > { %v7593_v8 = vpop.eup %7592  ;;  %v5515_v59 = vadd.f32 %v5514_v58, %v11834_v43  ;;  %v4966_v61 = vadd.f32 %v7589_v62, %v4965_v24 }
 0x3c5   : > { %v7595_v14 = vpop.eup %7594  ;;  %v11922_v11 = vadd.f32 1.0, %v7593_v8  ;;  %7598 = vpow2.f32 %v6702_v55  ;;  %v11958_v55 = vpop.f32.mrf.mxu2 }
 0x3c6   : > { %v4978_v3 = vmul.f32 %v7595_v14, %v11899_v49  ;;  %v4970_v43 = vsel %vm4969_vm12, %v7589_v62, %v4966_v61  ;;  %v5598_v35 = vadd.f32 %v11920_v1, %v5515_v59  ;;  %v4988_v62 = vand.u32 2147483648, %v11899_v49 }
 0x3c7   : > { %7600 = vrcp.f32 %v11922_v11  ;;  %v7597_v42 = vpop.eup %7596  ;;  %v4975_v16 = vsel %vm4972_vm13, %v4974_v5, %v4970_v43  ;;  %vm4983_vm14 = vweird.f32 %v7595_v14  ;;  %v5001_v5 = vand.u32 2147483647, %v11922_v11 }
 0x3c8   : > { %v4979_v26 = vsub.f32 1.0, %v4978_v3  ;;  %v11933_v33 = vmul.f32 %v7597_v42, %v5165_v45  ;;  %v5134_v2 = vmul.f32 %v4975_v16, %v4333_v18  ;;  %v5198_v48 = vadd.f32 %v4975_v16, %v12909_v25  ;;  %v4457_v41 = vpop.f32.mrf.mxu1  ;;  %vm4984_vm1 = vmor %vm4982_vm15, %vm4983_vm14 }
 0x3c9   : > { %v4498_v58 = vsub.f32 %v12910_v50, %v4457_v41  ;;  %v5630_v12 = vmax.f32 %v5598_v35, 0.0  ;;  %v4989_v49 = vor.u32 1.1754944e-38, %v4988_v62  ;;  %v5003_v44 = vand.u32 2147483648, %v11922_v11  ;;  %v12914_v35 = vld [vmem:[#allocation92_spill] sm:$0xff] }
 0x3ca   : > { %v4980_v20 = vmul.f32 %v7595_v14, %v4979_v26  ;;  %7602 = vrcp.f32 %v5198_v48  ;;  %v5282_v18 = vpack.c.bf16 %v11933_v33, %v11908_v9  ;;  %vm4997_vm5 = vweird.f32 %v11922_v11  ;;  %v7672_v9 = vld [vmem:[%s7932_s24 + $0x70] sm:$0xff] }
 0x3cb   : > { %v5516_v39 = vpop.f32.mrf.mxu3  ;;  %v7599_v38 = vpop.eup %7598  ;;  %v6703_v10 = vmul.f32 -1.442695, %v4498_v58  ;;  %vm5002_vm7 = vcmp.eq.f32.partialorder %v5001_v5, 8.507059e+37  ;;  %v5004_v41 = vor.u32 1.1754944e-38, %v5003_v44 }
 0x3cc   : > { %v5517_v63 = vadd.f32 %v5516_v39, %v11855_v40  ;;  %v12911_v40 = vld [vmem:[#allocation25_spill] sm:$0xff]  ;;  %v4981_v15 = vadd.f32 %v7595_v14, %v4980_v20  ;;  %v4338_v36 = vpop.f32.mrf.mxu0  ;;  %v11948_v45 = vadd.f32 1.0, %v7599_v38 }
 0x3cd   : > { %v5166_v57 = vadd.f32 %v5134_v2, %v12911_v40  ;;  %v7601_v7 = vpop.eup %7600  ;;  %7604 = vpow2.f32 %v6703_v10  ;;  %v12913_v39 = vld [vmem:[#allocation21_spill] sm:$0xff] }
 0x3ce   : > { %v5599_v52 = vadd.f32 %v11920_v1, %v5517_v63  ;;  %v4985_v32 = vsel %vm4984_vm1, %v7595_v14, %v4981_v15  ;;  %v4993_v30 = vmul.f32 %v7601_v7, %v11922_v11  ;;  %7606 = vrcp.f32 %v11948_v45  ;;  %v12915_v15 = vld [vmem:[#allocation103_spill] sm:$0xff] }
 0x3cf   : > { %v4990_v23 = vsel %vm4987_vm3, %v4989_v49, %v4985_v32  ;;  %vm4998_vm4 = vweird.f32 %v7601_v7  ;;  %v5016_v20 = vand.u32 2147483647, %v11948_v45  ;;  %v5018_v32 = vand.u32 2147483648, %v11948_v45 }
 0x3d0   : > { %v5631_v29 = vmax.f32 %v5599_v52, 0.0  ;;  %5558 = vmatmul.bf16.gmra.mxu3 %v5281_v60  ;;  %v5135_v60 = vmul.f32 %v4990_v23, %v11913_v27  ;;  %v5199_v8 = vadd.f32 %v4990_v23, %v12912_v54  ;;  %v4994_v59 = vsub.f32 1.0, %v4993_v30  ;;  %v7603_v14 = vpop.eup %7602  ;;  %v4459_v61 = vpop.f32.mrf.mxu1  ;;  %vm4999_vm6 = vmor %vm4997_vm5, %vm4998_vm4  ;;  %v12916_v30 = vld [vmem:[#allocation94_spill] sm:$0xff] }
 0x3d1   : > { %5441 = vmatmul.bf16.gmra.mxu2 %v7671_v6  ;;  %v11961_v3 = vmul.f32 %v7603_v14, %v5166_v57  ;;  %v4499_v27 = vsub.f32 %v12914_v35, %v4459_v61  ;;  %vm5012_vm2 = vweird.f32 %v11948_v45  ;;  %vm5017_vm9 = vcmp.eq.f32.partialorder %v5016_v20, 8.507059e+37  ;;  %v12920_v20 = vld [vmem:[#allocation99_spill] sm:$0xff] }
 0x3d2   : > { %v6911_v34 = vpack.c.bf16 %v5631_v29, %v5630_v12  ;;  %v5167_v43 = vadd.f32 %v5135_v60, %v12913_v39  ;;  %7608 = vrcp.f32 %v5199_v8  ;;  %v4995_v63 = vmul.f32 %v7601_v7, %v4994_v59  ;;  %v11975_v12 = vpop.f32.mrf.mxu2 }
 0x3d3   : > { %v5519_v24 = vpop.f32.mrf.mxu3  ;;  %v7605_v16 = vpop.eup %7604  ;;  %v6704_v25 = vmul.f32 -1.442695, %v4499_v27  ;;  %v5019_v61 = vor.u32 1.1754944e-38, %v5018_v32 }
 0x3d4   : > { %6912 = vst [vmem:[%s11953_s2] sm:$0xff] %v6911_v34   ;;  %v5520_v42 = vadd.f32 %v5519_v24, %v11870_v19  ;;  %v7607_v26 = vpop.eup %7606  ;;  %v11967_v2 = vadd.f32 1.0, %v7605_v16  ;;  %v4996_v48 = vadd.f32 %v7601_v7, %v4995_v63  ;;  %v4340_v62 = vpop.f32.mrf.mxu0 }
 0x3d5   : > { %v5008_v52 = vmul.f32 %v7607_v26, %v11948_v45  ;;  %vm5013_vm0 = vweird.f32 %v7607_v26 }
 0x3d6   : > { %v5600_v19 = vadd.f32 %v11920_v1, %v5520_v42  ;;  %7610 = vrcp.f32 %v11967_v2  ;;  %v5000_v58 = vsel %vm4999_vm6, %v7601_v7, %v4996_v48  ;;  %vm5014_vm8 = vmor %vm5012_vm2, %vm5013_vm0  ;;  %vm5027_vm11 = vweird.f32 %v11967_v2 }
 0x3d7   : > { %7612 = vpow2.f32 %v6704_v25  ;;  %v5005_v38 = vsel %vm5002_vm7, %v5004_v41, %v5000_v58  ;;  %v5009_v11 = vsub.f32 1.0, %v5008_v52  ;;  %v5031_v41 = vand.u32 2147483647, %v11967_v2 }
 0x3d8   : > { %v7609_v40 = vpop.eup %7608  ;;  %v5136_v10 = vmul.f32 %v5005_v38, %v4338_v36  ;;  %v5200_v49 = vadd.f32 %v5005_v38, %v12915_v15  ;;  %v4462_v34 = vpop.f32.mrf.mxu1  ;;  %v5632_v36 = vmax.f32 %v5600_v19, 0.0  ;;  %v12919_v19 = vld [vmem:[#allocation130_spill] sm:$0xff]  ;;  %v5033_v58 = vand.u32 2147483648, %v11967_v2 }
 0x3d9   : > { %v11977_v29 = vmul.f32 %v7609_v40, %v5167_v43  ;;  %v4500_v24 = vsub.f32 %v12916_v30, %v4462_v34  ;;  %v5010_v23 = vmul.f32 %v7607_v26, %v5009_v11  ;;  %vm5032_vm13 = vcmp.eq.f32.partialorder %v5031_v41, 8.507059e+37 }
 0x3da   : > { %7614 = vrcp.f32 %v5200_v49  ;;  %v11996_v25 = vpop.f32.mrf.mxu2  ;;  %v5034_v49 = vor.u32 1.1754944e-38, %v5033_v58 }
 0x3db   : > { %v5521_v50 = vpop.f32.mrf.mxu3  ;;  %v5283_v60 = vpack.c.bf16 %v11977_v29, %v11961_v3  ;;  %v6705_v8 = vmul.f32 -1.442695, %v4500_v24  ;;  %v5011_v59 = vadd.f32 %v7607_v26, %v5010_v23  ;;  %v7673_v29 = vld [vmem:[%s7932_s24 + $0x78] sm:$0xff]  ;;  %s6907_s24 = sshll.u32 %s7744_s12, 7  ;;  %s5727_s12 = scalar_lea.sflag [#allocation3], %s394_s18 }
 0x3dc   : > { %v5522_v57 = vadd.f32 %v5521_v50, %v11881_v31  ;;  %v12917_v31 = vld [vmem:[#allocation80_spill] sm:$0xff]  ;;  %v7611_v14 = vpop.eup %7610  ;;  %v4343_v63 = vpop.f32.mrf.mxu0  ;;  %s5740_s26 = scalar_lea.hbm %s12173_s9, %s6907_s24  ;;  %s7694_s24 = scalar_lea.hbm %s12173_s9, 256 }
 0x3dd   : > { %v5168_v6 = vadd.f32 %v5136_v10, %v12917_v31  ;;  %v7613_v5 = vpop.eup %7612  ;;  %7616 = vpow2.f32 %v6705_v8  ;;  %v5015_v45 = vsel %vm5014_vm8, %v7607_v26, %v5011_v59  ;;  %v5023_v43 = vmul.f32 %v7611_v14, %v11967_v2  ;;  %s5743_s28 = sshll.u32 %s5740_s26, 4  ;;  %s5744_s28 = int_to_ptr.hbm [resolvable:$true] %s5743_s28 }
 0x3de   : > { %v5601_v7 = vadd.f32 %v11920_v1, %v5522_v57  ;;  %v11991_v42 = vadd.f32 1.0, %v7613_v5  ;;  %v5020_v35 = vsel %vm5017_vm9, %v5019_v61, %v5015_v45  ;;  %vm5028_vm10 = vweird.f32 %v7611_v14  ;;  %v12922_v5 = vld [vmem:[#allocation105_spill] sm:$0xff]  ;;  %s7688_s15 = sshra.s32 %s5744_s28, 4  ;;  %s7689_s15 = int_to_ptr.hbm [resolvable:$true] %s7688_s15 }
 0x3df   : > { %v5137_v33 = vmul.f32 %v5020_v35, %v4340_v62  ;;  %v5024_v16 = vsub.f32 1.0, %v5023_v43  ;;  %vm5029_vm12 = vmor %vm5027_vm11, %vm5028_vm10  ;;  %s7690_s16 = scalar_lea.hbm %s7689_s15, 128  ;;  %p7695_p1 = scmp.lt.s32.totalorder %s7689_s15, %s12173_s9 }
 0x3e0   : > { %v5633_v54 = vmax.f32 %v5601_v7, 0.0  ;;  %5563 = vmatmul.bf16.gmra.mxu3 %v5282_v18  ;;  %v12918_v18 = vld [vmem:[#allocation56_spill] sm:$0xff]  ;;  %v7615_v48 = vpop.eup %7614  ;;  %7618 = vrcp.f32 %v11991_v42  ;;  %v4464_v26 = vpop.f32.mrf.mxu1  ;;  %v5046_v61 = vand.u32 2147483647, %v11991_v42  ;;  %v5048_v43 = vand.u32 2147483648, %v11991_v42  ;;  %p7691_p12 = scmp.ne.s32.totalorder %s7689_s15, %s7690_s16  ;;  %p7696_p2 = scmp.lt.s32.totalorder %s7694_s24, %s7690_s16 }
 0x3e1   : > { %5446 = vmatmul.bf16.gmra.mxu2 %v7672_v9  ;;  %v5201_v27 = vadd.f32 %v5020_v35, %v12918_v18  ;;  %v12000_v52 = vmul.f32 %v7615_v48, %v5168_v6  ;;  %v5169_v50 = vadd.f32 %v5137_v33, %v12919_v19  ;;  %v4501_v40 = vsub.f32 %v12920_v20, %v4464_v26  ;;  %v12923_v35 = vld [vmem:[#allocation30_spill] sm:$0xff] }
 0x3e2   : > { %v6916_v39 = vpack.c.bf16 %v5633_v54, %v5632_v36  ;;  %v5025_v57 = vmul.f32 %v7611_v14, %v5024_v16  ;;  %v12013_v6 = vpop.f32.mrf.mxu2  ;;  %v12921_v54 = vld [vmem:[#allocation28_spill] sm:$0xff]  ;;  %vm5042_vm15 = vweird.f32 %v11991_v42  ;;  %v5049_v3 = vor.u32 1.1754944e-38, %v5048_v43  ;;  %p7692_p13 = pnand %p7691_p12, %p7846_p4  ;;  %p7697_p3 = por %p7696_p2, %p7695_p1 }
 0x3e3   : > { %v5524_v44 = vpop.f32.mrf.mxu3  ;;  %7620 = vrcp.f32 %v5201_v27  ;;  %v7617_v38 = vpop.eup %7616  ;;  %v6706_v10 = vmul.f32 -1.442695, %v4501_v40  ;;  %vm5047_vm3 = vcmp.eq.f32.partialorder %v5046_v61, 8.507059e+37 }
 0x3e4   : > { %6988 = vst [vmem:[%s11953_s2 + $0x8] sm:$0xff] %v6916_v39   ;;  %v5525_v62 = vadd.f32 %v5524_v44, %v11892_v56  ;;  %v12006_v11 = vadd.f32 1.0, %v7617_v38  ;;  %v5026_v15 = vadd.f32 %v7611_v14, %v5025_v57  ;;  %v4345_v45 = vpop.f32.mrf.mxu0  ;;  %p7693_p0 = pneg %p7692_p13 }
 0x3e6   : > { %v7619_v34 = vpop.eup %7618  ;;  %v5602_v32 = vadd.f32 %v11920_v1, %v5525_v62  ;;  %7622 = vrcp.f32 %v12006_v11  ;;  %v5030_v56 = vsel %vm5029_vm12, %v7611_v14, %v5026_v15  ;;  %v5061_v15 = vand.u32 2147483647, %v12006_v11  ;;  %p7698_p5 = pnand %p7697_p3, %p7693_p0 }
 0x3e7   : > { %7624 = vpow2.f32 %v6706_v10  ;;  %v5035_v23 = vsel %vm5032_vm13, %v5034_v49, %v5030_v56  ;;  %v5038_v31 = vmul.f32 %v7619_v34, %v11991_v42  ;;  %vm5043_vm14 = vweird.f32 %v7619_v34 }
 0x3e8   : > { %v5138_v36 = vmul.f32 %v5035_v23, %v4343_v63  ;;  %v5202_v8 = vadd.f32 %v5035_v23, %v12921_v54  ;;  %v4467_v59 = vpop.f32.mrf.mxu1  ;;  %v5634_v44 = vmax.f32 %v5602_v32, 0.0  ;;  %vm5044_vm1 = vmor %vm5042_vm15, %vm5043_vm14  ;;  %v5063_v49 = vand.u32 2147483648, %v12006_v11 }
 0x3e9   : > { %v7621_v30 = vpop.eup %7620  ;;  %v4502_v39 = vsub.f32 %v12922_v5, %v4467_v59  ;;  %vm5057_vm5 = vweird.f32 %v12006_v11  ;;  %vm5062_vm7 = vcmp.eq.f32.partialorder %v5061_v15, 8.507059e+37 }
 0x3ea   : > { %v12015_v2 = vmul.f32 %v7621_v30, %v5169_v50  ;;  %v5170_v9 = vadd.f32 %v5138_v36, %v12923_v35  ;;  %7626 = vrcp.f32 %v5202_v8  ;;  %v12034_v20 = vpop.f32.mrf.mxu2  ;;  %v5064_v36 = vor.u32 1.1754944e-38, %v5063_v49 }
 0x3eb   : > { %v5526_v7 = vpop.f32.mrf.mxu3  ;;  %v6707_v27 = vmul.f32 -1.442695, %v4502_v39 }
 0x3ec   : > { %v5527_v24 = vadd.f32 %v5526_v7, %v11906_v28  ;;  %v5039_v28 = vsub.f32 1.0, %v5038_v31  ;;  %v5284_v33 = vpack.c.bf16 %v12015_v2, %v12000_v52  ;;  %v7623_v16 = vpop.eup %7622  ;;  %v4348_v30 = vpop.f32.mrf.mxu0 }
 0x3ed   : > { %v7625_v48 = vpop.eup %7624  ;;  %7628 = vpow2.f32 %v6707_v27  ;;  %v5053_v19 = vmul.f32 %v7623_v16, %v12006_v11  ;;  %vm5058_vm4 = vweird.f32 %v7623_v16 }
 0x3ee   : > { %v5603_v14 = vadd.f32 %v11920_v1, %v5527_v24  ;;  %v5040_v63 = vmul.f32 %v7619_v34, %v5039_v28  ;;  %v12030_v58 = vadd.f32 1.0, %v7625_v48  ;;  %vm5059_vm6 = vmor %vm5057_vm5, %vm5058_vm4 }
 0x3ef   : > { %v5054_v62 = vsub.f32 1.0, %v5053_v19 }
 0x3f0   : > { %v5635_v18 = vmax.f32 %v5603_v14, 0.0  ;;  %5568 = vmatmul.bf16.gmra.mxu3 %v5283_v60  ;;  %v5041_v41 = vadd.f32 %v7619_v34, %v5040_v63  ;;  %v7627_v42 = vpop.eup %7626  ;;  %7630 = vrcp.f32 %v12030_v58  ;;  %v4469_v57 = vpop.f32.mrf.mxu1  ;;  %v5076_v35 = vand.u32 2147483647, %v12030_v58 }
 0x3f1   : > { %5451 = vmatmul.bf16.gmra.mxu2 %v7673_v29  ;;  %v12037_v38 = vmul.f32 %v7627_v42, %v5170_v9  ;;  %v5055_v7 = vmul.f32 %v7623_v16, %v5054_v62  ;;  %v5078_v27 = vand.u32 2147483648, %v12030_v58  ;;  %vm5072_vm2 = vweird.f32 %v12030_v58 }
 0x3f2   : > { %v6921_v26 = vpack.c.bf16 %v5635_v18, %v5634_v44  ;;  %v5045_v60 = vsel %vm5044_vm1, %v7619_v34, %v5041_v41  ;;  %v4503_v34 = vsub.f32 %v12792_v17, %v4469_v57  ;;  %vm5077_vm9 = vcmp.eq.f32.partialorder %v5076_v35, 8.507059e+37 }
 0x3f3   : > { %v5529_v50 = vpop.f32.mrf.mxu3  ;;  %v5050_v40 = vsel %vm5047_vm3, %v5049_v3, %v5045_v60  ;;  %v7629_v56 = vpop.eup %7628  ;;  %v5079_v52 = vor.u32 1.1754944e-38, %v5078_v27 }
 0x3f4   : > { %6989 = vst [vmem:[%s11953_s2 + $0x10] sm:$0xff] %v6921_v26   ;;  %v5203_v10 = vadd.f32 %v5050_v40, %v11196_v22  ;;  %v5530_v32 = vadd.f32 %v5529_v50, %v11931_v47  ;;  %v12045_v24 = vadd.f32 1.0, %v7629_v56  ;;  %v5139_v23 = vmul.f32 %v5050_v40, %v4345_v45  ;;  %v12053_v45 = vpop.f32.mrf.mxu2  ;;  %v4350_v19 = vpop.f32.mrf.mxu0 }
 0x3f5   : > { %v6708_v31 = vmul.f32 -1.442695, %v4503_v34  ;;  %v5056_v22 = vadd.f32 %v7623_v16, %v5055_v7 }
 0x3f6   : > { %7632 = vrcp.f32 %v5203_v10  ;;  %v7631_v54 = vpop.eup %7630  ;;  %v5604_v8 = vadd.f32 %v11920_v1, %v5530_v32  ;;  %v5171_v14 = vadd.f32 %v5139_v23, %v11215_v46  ;;  %v5091_v10 = vand.u32 2147483647, %v12045_v24 }
 0x3f7   : > { %7634 = vrcp.f32 %v12045_v24  ;;  %v5060_v17 = vsel %vm5059_vm6, %v7623_v16, %v5056_v22  ;;  %v5068_v11 = vmul.f32 %v7631_v54, %v12030_v58  ;;  %vm5073_vm0 = vweird.f32 %v7631_v54 }
 0x3f8   : > { %7636 = vpow2.f32 %v6708_v31  ;;  %v5065_v61 = vsel %vm5062_vm7, %v5064_v36, %v5060_v17  ;;  %v5636_v63 = vmax.f32 %v5604_v8, 0.0  ;;  %vm5074_vm8 = vmor %vm5072_vm2, %vm5073_vm0  ;;  %vm5087_vm11 = vweird.f32 %v12045_v24 }
 0x3f9   : > { %v5140_v5 = vmul.f32 %v5065_v61, %v4348_v30  ;;  %v5204_v39 = vadd.f32 %v5065_v61, %v11277_v13  ;;  %v5069_v44 = vsub.f32 1.0, %v5068_v11  ;;  %vm5092_vm13 = vcmp.eq.f32.partialorder %v5091_v10, 8.507059e+37 }
 0x3fb   : > { %v5531_v47 = vpop.f32.mrf.mxu3  ;;  %7638 = vrcp.f32 %v5204_v39  ;;  %v5070_v13 = vmul.f32 %v7631_v54, %v5069_v44 }
 0x3fc   : > { %v5532_v59 = vadd.f32 %v5531_v47, %v11958_v55  ;;  %v7633_v28 = vpop.eup %7632  ;;  %v12924_v55 = vld [vmem:[#allocation101_spill] sm:$0xff]  ;;  %v12074_v15 = vpop.f32.mrf.mxu2 }
 0x3fd   : > { %v12057_v9 = vmul.f32 %v7633_v28, %v5171_v14  ;;  %v5172_v18 = vadd.f32 %v5140_v5, %v12924_v55  ;;  %v7635_v16 = vpop.eup %7634  ;;  %v5071_v50 = vadd.f32 %v7631_v54, %v5070_v13  ;;  %v4353_v22 = vpop.f32.mrf.mxu0 }
 0x3fe   : > { %v5605_v43 = vadd.f32 %v11920_v1, %v5532_v59  ;;  %v7637_v26 = vpop.eup %7636  ;;  %v5083_v3 = vmul.f32 %v7635_v16, %v12045_v24  ;;  %vm5088_vm10 = vweird.f32 %v7635_v16 }
 0x3ff   : > { %v5285_v48 = vpack.c.bf16 %v12057_v9, %v12037_v38  ;;  %v4631_v60 = vadd.f32 1.0, %v7637_v26  ;;  %v5075_v2 = vsel %vm5074_vm8, %v7631_v54, %v5071_v50  ;;  %v5093_v38 = vand.u32 2147483648, %v12045_v24  ;;  %vm5089_vm12 = vmor %vm5087_vm11, %vm5088_vm10 }
 0x400   : > { %v5637_v46 = vmax.f32 %v5605_v43, 0.0  ;;  %5573 = vmatmul.bf16.gmra.mxu3 %v5284_v33  ;;  %v5084_v33 = vsub.f32 1.0, %v5083_v3  ;;  %v5080_v42 = vsel %vm5077_vm9, %v5079_v52, %v5075_v2 }
 0x401   : > { %v7639_v62 = vpop.eup %7638  ;;  %7640 = vrcp.f32 %v4631_v60  ;;  %v5205_v57 = vadd.f32 %v5080_v42, %v11350_v53  ;;  %v5141_v32 = vmul.f32 %v5080_v42, %v4350_v19  ;;  %v5094_v7 = vor.u32 1.1754944e-38, %v5093_v38 }
 0x402   : > { %v6926_v41 = vpack.c.bf16 %v5637_v46, %v5636_v63  ;;  %v12069_v40 = vmul.f32 %v7639_v62, %v5172_v18  ;;  %v5085_v58 = vmul.f32 %v7635_v16, %v5084_v33  ;;  %v5106_v61 = vand.u32 2147483647, %v4631_v60 }
 0x403   : > { %v5534_v29 = vpop.f32.mrf.mxu3  ;;  %7642 = vrcp.f32 %v5205_v57  ;;  %v5108_v5 = vand.u32 2147483648, %v4631_v60  ;;  %vm5102_vm15 = vweird.f32 %v4631_v60 }
 0x404   : > { %6990 = vst [vmem:[%s11953_s2 + $0x18] sm:$0xff] %v6926_v41   ;;  %v5535_v49 = vadd.f32 %v5534_v29, %v11975_v12  ;;  %v5086_v34 = vadd.f32 %v7635_v16, %v5085_v58  ;;  %v5173_v12 = vadd.f32 %v5141_v32, %v11366_v21  ;;  %v5412_v43 = vpop.f32.mrf.mxu2  ;;  %vm5107_vm3 = vcmp.eq.f32.partialorder %v5106_v61, 8.507059e+37 }
 0x405   : > { %v5109_v9 = vor.u32 1.1754944e-38, %v5108_v5  ;;  %v4355_v13 = vpop.f32.mrf.mxu0 }
 0x406   : > { %v5090_v53 = vsel %vm5089_vm12, %v7635_v16, %v5086_v34  ;;  %v5606_v23 = vadd.f32 %v11920_v1, %v5535_v49 }
 0x407   : > { %v7641_v56 = vpop.eup %7640  ;;  %v5095_v36 = vsel %vm5092_vm13, %v5094_v7, %v5090_v53 }
 0x408   : > { %v5098_v54 = vmul.f32 %v7641_v56, %v4631_v60  ;;  %v5142_v8 = vmul.f32 %v5095_v36, %v4353_v22  ;;  %v5206_v47 = vadd.f32 %v5095_v36, %v11420_v0  ;;  %vm5103_vm14 = vweird.f32 %v7641_v56 }
 0x409   : > { %v7643_v17 = vpop.eup %7642  ;;  %vm5104_vm1 = vmor %vm5102_vm15, %vm5103_vm14 }
 0x40a   : > { %v5099_v59 = vsub.f32 1.0, %v5098_v54  ;;  %v5269_v11 = vmul.f32 %v7643_v17, %v5173_v12  ;;  %v5174_v14 = vadd.f32 %v5142_v8, %v11430_v51  ;;  %7644 = vrcp.f32 %v5206_v47 }
 0x40b   : > { %v5536_v30 = vpop.f32.mrf.mxu3 }
 0x40c   : > { %v5537_v31 = vadd.f32 %v5536_v30, %v11996_v25  ;;  %v5638_v25 = vmax.f32 %v5606_v23, 0.0  ;;  %v5100_v28 = vmul.f32 %v7641_v56, %v5099_v59  ;;  %v5286_v21 = vpack.c.bf16 %v5269_v11, %v12069_v40  ;;  %v5414_v26 = vpop.f32.mrf.mxu2 }
 0x40e   : > { %v5607_v24 = vadd.f32 %v11920_v1, %v5537_v31  ;;  %v5101_v44 = vadd.f32 %v7641_v56, %v5100_v28 }
 0x410   : > { %v5639_v39 = vmax.f32 %v5607_v24, 0.0  ;;  %5578 = vmatmul.bf16.gmra.mxu3 %v5285_v48  ;;  %v5105_v55 = vsel %vm5104_vm1, %v7641_v56, %v5101_v44  ;;  %v7645_v51 = vpop.eup %7644 }
 0x411   : > { %v5110_v18 = vsel %vm5107_vm3, %v5109_v9, %v5105_v55  ;;  %v5270_v27 = vmul.f32 %v7645_v51, %v5174_v14 }
 0x412   : > { %v6931_v0 = vpack.c.bf16 %v5639_v39, %v5638_v25  ;;  %v5207_v63 = vadd.f32 %v5110_v18, %v11527_v4  ;;  %v5143_v16 = vmul.f32 %v5110_v18, %v4355_v13 }
 0x413   : > { %v5539_v35 = vpop.f32.mrf.mxu3 }
 0x414   : > { %6991 = vst [vmem:[%s11953_s2 + $0x20] sm:$0xff] %v6931_v0   ;;  %v5540_v46 = vadd.f32 %v5539_v35, %v12013_v6  ;;  %7646 = vrcp.f32 %v5207_v63  ;;  %v5175_v50 = vadd.f32 %v5143_v16, %v11539_v37  ;;  %v5417_v62 = vpop.f32.mrf.mxu2 }
 0x416   : > { %v5608_v41 = vadd.f32 %v11920_v1, %v5540_v46 }
 0x418   : > { %v5640_v52 = vmax.f32 %v5608_v41, 0.0 }
 0x41a   : > { %v7647_v3 = vpop.eup %7646 }
 0x41b   : > { %v5541_v48 = vpop.f32.mrf.mxu3  ;;  %v5271_v60 = vmul.f32 %v7647_v3, %v5175_v50 }
 0x41c   : > { %v5542_v19 = vadd.f32 %v5541_v48, %v12034_v20  ;;  %v5419_v38 = vpop.f32.mrf.mxu2 }
 0x41d   : > { %v5287_v6 = vpack.c.bf16 %v5271_v60, %v5270_v27 }
 0x41e   : > { %v5609_v29 = vadd.f32 %v11920_v1, %v5542_v19 }
 0x420   : > { %v5641_v4 = vmax.f32 %v5609_v29, 0.0  ;;  %5583 = vmatmul.bf16.gmra.mxu3 %v5286_v21 }
 0x422   : > { %v6936_v2 = vpack.c.bf16 %v5641_v4, %v5640_v52 }
 0x423   : > { %v5544_v33 = vpop.f32.mrf.mxu3 }
 0x424   : > { %6992 = vst [vmem:[%s11953_s2 + $0x28] sm:$0xff] %v6936_v2   ;;  %v5545_v42 = vadd.f32 %v5544_v33, %v12053_v45  ;;  %v5422_v7 = vpop.f32.mrf.mxu2 }
 0x426   : > { %v5610_v20 = vadd.f32 %v11920_v1, %v5545_v42 }
 0x428   : > { %v5642_v58 = vmax.f32 %v5610_v20, 0.0 }
 0x42b   : > { %v5546_v40 = vpop.f32.mrf.mxu3 }
 0x42c   : > { %v5547_v37 = vadd.f32 %v5546_v40, %v12074_v15  ;;  %v5424_v36 = vpop.f32.mrf.mxu2 }
 0x42e   : > { %v5611_v57 = vadd.f32 %v11920_v1, %v5547_v37 }
 0x430   : > { %v5643_v10 = vmax.f32 %v5611_v57, 0.0  ;;  %5588 = vmatmul.bf16.gmra.mxu3 %v5287_v6 }
 0x432   : > { %v6941_v49 = vpack.c.bf16 %v5643_v10, %v5642_v58 }
 0x433   : > { %v5549_v32 = vpop.f32.mrf.mxu3 }
 0x434   : > { %6993 = vst [vmem:[%s11953_s2 + $0x30] sm:$0xff] %v6941_v49   ;;  %v5550_v34 = vadd.f32 %v5549_v32, %v5412_v43  ;;  %v5427_v17 = vpop.f32.mrf.mxu2 }
 0x436   : > { %v5612_v45 = vadd.f32 %v11920_v1, %v5550_v34 }
 0x438   : > { %v5644_v23 = vmax.f32 %v5612_v45, 0.0 }
 0x43b   : > { %v5551_v56 = vpop.f32.mrf.mxu3 }
 0x43c   : > { %v5552_v30 = vadd.f32 %v5551_v56, %v5414_v26  ;;  %v5429_v5 = vpop.f32.mrf.mxu2 }
 0x43e   : > { %v5613_v53 = vadd.f32 %v11920_v1, %v5552_v30 }
 0x440   : > { %v5645_v15 = vmax.f32 %v5613_v53, 0.0 }
 0x442   : > { %v6946_v31 = vpack.c.bf16 %v5645_v15, %v5644_v23 }
 0x443   : > { %v5554_v22 = vpop.f32.mrf.mxu3 }
 0x444   : > { %6994 = vst [vmem:[%s11953_s2 + $0x38] sm:$0xff] %v6946_v31   ;;  %v5555_v54 = vadd.f32 %v5554_v22, %v5417_v62  ;;  %v5432_v35 = vpop.f32.mrf.mxu2 }
 0x446   : > { %v5614_v8 = vadd.f32 %v11920_v1, %v5555_v54 }
 0x448   : > { %v5646_v59 = vmax.f32 %v5614_v8, 0.0 }
 0x44b   : > { %v5556_v12 = vpop.f32.mrf.mxu3 }
 0x44c   : > { %v5557_v47 = vadd.f32 %v5556_v12, %v5419_v38  ;;  %v5434_v27 = vpop.f32.mrf.mxu2 }
 0x44e   : > { %v5615_v24 = vadd.f32 %v11920_v1, %v5557_v47 }
 0x450   : > { %v5647_v61 = vmax.f32 %v5615_v24, 0.0 }
 0x452   : > { %v6951_v11 = vpack.c.bf16 %v5647_v61, %v5646_v59 }
 0x453   : > { %v5559_v14 = vpop.f32.mrf.mxu3 }
 0x454   : > { %6995 = vst [vmem:[%s11953_s2 + $0x40] sm:$0xff] %v6951_v11   ;;  %v5560_v25 = vadd.f32 %v5559_v14, %v5422_v7  ;;  %v5437_v19 = vpop.f32.mrf.mxu2 }
 0x456   : > { %v5616_v28 = vadd.f32 %v11920_v1, %v5560_v25 }
 0x458   : > { %v5648_v0 = vmax.f32 %v5616_v28, 0.0 }
 0x45b   : > { %v5561_v39 = vpop.f32.mrf.mxu3 }
 0x45c   : > { %v5562_v21 = vadd.f32 %v5561_v39, %v5424_v36  ;;  %v5439_v4 = vpop.f32.mrf.mxu2 }
 0x45e   : > { %v5617_v43 = vadd.f32 %v11920_v1, %v5562_v21 }
 0x460   : > { %v5649_v44 = vmax.f32 %v5617_v43, 0.0 }
 0x462   : > { %v6956_v9 = vpack.c.bf16 %v5649_v44, %v5648_v0 }
 0x463   : > { %v5564_v55 = vpop.f32.mrf.mxu3 }
 0x464   : > { %6996 = vst [vmem:[%s11953_s2 + $0x48] sm:$0xff] %v6956_v9   ;;  %v5565_v51 = vadd.f32 %v5564_v55, %v5427_v17  ;;  %v5442_v40 = vpop.f32.mrf.mxu2 }
 0x466   : > { %v5618_v63 = vadd.f32 %v11920_v1, %v5565_v51 }
 0x468   : > { %v5650_v16 = vmax.f32 %v5618_v63, 0.0 }
 0x46b   : > { %v5566_v18 = vpop.f32.mrf.mxu3 }
 0x46c   : > { %v5567_v46 = vadd.f32 %v5566_v18, %v5429_v5  ;;  %v5444_v32 = vpop.f32.mrf.mxu2 }
 0x46e   : > { %v5619_v13 = vadd.f32 %v11920_v1, %v5567_v46 }
 0x470   : > { %v5651_v48 = vmax.f32 %v5619_v13, 0.0 }
 0x472   : > { %v6961_v26 = vpack.c.bf16 %v5651_v48, %v5650_v16 }
 0x473   : > { %v5569_v41 = vpop.f32.mrf.mxu3 }
 0x474   : > { %6997 = vst [vmem:[%s11953_s2 + $0x50] sm:$0xff] %v6961_v26   ;;  %v5570_v50 = vadd.f32 %v5569_v41, %v5432_v35  ;;  %v5447_v53 = vpop.f32.mrf.mxu2 }
 0x476   : > { %v5620_v29 = vadd.f32 %v11920_v1, %v5570_v50 }
 0x478   : > { %v5652_v6 = vmax.f32 %v5620_v29, 0.0 }
 0x47b   : > { %v5571_v3 = vpop.f32.mrf.mxu3 }
 0x47c   : > { %v5572_v60 = vadd.f32 %v5571_v3, %v5434_v27  ;;  %v5449_v54 = vpop.f32.mrf.mxu2 }
 0x47e   : > { %v5621_v52 = vadd.f32 %v11920_v1, %v5572_v60 }
 0x480   : > { %v5653_v2 = vmax.f32 %v5621_v52, 0.0 }
 0x482   : > { %v6966_v33 = vpack.c.bf16 %v5653_v2, %v5652_v6 }
 0x483   : > { %v5574_v62 = vpop.f32.mrf.mxu3 }
 0x484   : > { %6998 = vst [vmem:[%s11953_s2 + $0x58] sm:$0xff] %v6966_v33   ;;  %v5575_v42 = vadd.f32 %v5574_v62, %v5437_v19  ;;  %v5452_v11 = vpop.f32.mrf.mxu2 }
 0x486   : > { %v5622_v37 = vadd.f32 %v11920_v1, %v5575_v42 }
 0x488   : > { %v5654_v58 = vmax.f32 %v5622_v37, 0.0 }
 0x48b   : > { %v5576_v20 = vpop.f32.mrf.mxu3 }
 0x48c   : > { %v5577_v57 = vadd.f32 %v5576_v20, %v5439_v4  ;;  %v5454_v39 = vpop.f32.mrf.mxu2 }
 0x48e   : > { %v5623_v38 = vadd.f32 %v11920_v1, %v5577_v57 }
 0x490   : > { %v5655_v10 = vmax.f32 %v5623_v38, 0.0 }
 0x492   : > { %v6971_v49 = vpack.c.bf16 %v5655_v10, %v5654_v58 }
 0x493   : > { %v5579_v34 = vpop.f32.mrf.mxu3 }
 0x494   : > { %6999 = vst [vmem:[%s11953_s2 + $0x60] sm:$0xff] %v6971_v49   ;;  %v5580_v7 = vadd.f32 %v5579_v34, %v5442_v40 }
 0x496   : > { %v5624_v45 = vadd.f32 %v11920_v1, %v5580_v7 }
 0x498   : > { %v5656_v15 = vmax.f32 %v5624_v45, 0.0 }
 0x49b   : > { %v5581_v56 = vpop.f32.mrf.mxu3 }
 0x49c   : > { %v5582_v30 = vadd.f32 %v5581_v56, %v5444_v32 }
 0x49e   : > { %v5625_v23 = vadd.f32 %v11920_v1, %v5582_v30 }
 0x4a0   : > { %v5657_v31 = vmax.f32 %v5625_v23, 0.0 }
 0x4a2   : > { %v6976_v22 = vpack.c.bf16 %v5657_v31, %v5656_v15 }
 0x4a3   : > { %v5584_v36 = vpop.f32.mrf.mxu3 }
 0x4a4   : > { %7000 = vst [vmem:[%s11953_s2 + $0x68] sm:$0xff] %v6976_v22   ;;  %v5585_v12 = vadd.f32 %v5584_v36, %v5447_v53 }
 0x4a6   : > { %v5626_v47 = vadd.f32 %v11920_v1, %v5585_v12 }
 0x4a8   : > { %v5658_v59 = vmax.f32 %v5626_v47, 0.0 }
 0x4ab   : > { %v5586_v8 = vpop.f32.mrf.mxu3 }
 0x4ac   : > { %v5587_v17 = vadd.f32 %v5586_v8, %v5449_v54 }
 0x4ae   : > { %v5627_v24 = vadd.f32 %v11920_v1, %v5587_v17 }
 0x4b0   : > { %v5659_v61 = vmax.f32 %v5627_v24, 0.0 }
 0x4b2   : > { %v6981_v14 = vpack.c.bf16 %v5659_v61, %v5658_v59 }
 0x4b3   : > { %v5589_v5 = vpop.f32.mrf.mxu3 }
 0x4b4   : > { %7001 = vst [vmem:[%s11953_s2 + $0x70] sm:$0xff] %v6981_v14   ;;  %v5590_v25 = vadd.f32 %v5589_v5, %v5452_v11 }
 0x4b6   : > { %v5628_v21 = vadd.f32 %v11920_v1, %v5590_v25 }
 0x4b8   : > { %v5660_v44 = vmax.f32 %v5628_v21, 0.0 }
 0x4bb   : > { %v5591_v28 = vpop.f32.mrf.mxu3 }
 0x4bc   : > { %v5592_v43 = vadd.f32 %v5591_v28, %v5454_v39 }
 0x4be   : > { %v5629_v0 = vadd.f32 %v11920_v1, %v5592_v43 }
 0x4c0   : > { %v5661_v35 = vmax.f32 %v5629_v0, 0.0 }
 0x4c2   : > { %v6986_v9 = vpack.c.bf16 %v5661_v35, %v5660_v44 }
 0x4c4   : > { %7002 = vst [vmem:[%s11953_s2 + $0x78] sm:$0xff] %v6986_v9  }
 0x4c5   : > { %7701 = shalt.err (!%p7698_p5)
}
 0x4c6   : > { %s7754_s18 = smov 64   ;;  %s7755_s2 = smov 4  }
 0x4c7   : > { %7013 = dma.vmem_to_hbm [thread:$0]  (%p7846_p4), %s5742_s29, 2048, %s5744_s28, %s5727_s12, %s7754_s18, %s7754_s18, %s7755_s2  }
 0x4c8 PF: > { %p7019_p6 = scmp.ge.s32.totalorder %s7752_s14, 2  ;;  %s5758_s26 = sand.u32 1, %s7732_s30  }
 0x4c9   : > { %s5759_s27 = scalar_lea.sflag [#allocation3], %s5758_s26 }
 0x4ca   : > { %p7016_p7 = pnand %p7019_p6, %p7853_p8 }
 0x4cc   : > { %p7017_p9 = pneg %p7016_p7 }
 0x4ce   : > { %7727 = dma.done.wait (%p7017_p9), %s5759_s27, 2048  }
 0x4cf   : > { %7729 = vsyncadd (%p7017_p9), %s5759_s27, 4294965248  ;;  %s22_s14 = sadd.s32 1, %s7752_s14   ;;  %s12925_s30 = smov %s7736_s10 }
 0x4d0   : > { %p19_p10 = scmp.ge.s32.totalorder %s22_s14, 4   ;;  %s12926_s10 = smov %s7740_s11 }
 0x4d1   : > { %s12927_s11 = smov %s7859_s22  ;;  %s12928_s12 = smov %s7748_s13 }
 0x4d2   : > { %s12929_s13 = smov %s12931_s17  ;;  %21 = sbr.rel (!%p19_p10) target bundleno = 6 (0x6), region = 109 }
 0x4d7   :  { %5765 = vsyncpa [#allocation3], 1 }
 0x4d8   :  { %5767 = vsyncpa [#allocation3 + $0x1], 1 }

</bundles_post_ra>
